<compile_context>
chip_gen: v6e
topology: v6e:2x2x1
jax: 0.10.0
libtpu: 0.0.40
codegen_flags: <defaults>
</compile_context>

<pallas_src>
import functools

import numpy as np
import jax
import jax.numpy as jnp
from jax.experimental import pallas as pl
from jax.experimental.pallas import tpu as pltpu

N_FEATURES = 3
N_WIRES = 3606
N_WIRES_PAD = 3712            # 29 * 128 : lane-aligned wire axis
N512 = 512
BN_EPS = 1e-5
NEG_BIG = -1e30               # "minus infinity" for padded wire-logit lanes
MM_DTYPE = jnp.bfloat16       # matmul operand dtype (f32 accumulation)


def _round_up(x, m):
    return (x + m - 1) // m * m


def _vmem_limit_bytes():
    """~3/4 of physical VMEM, clamped to [32 MiB, 96 MiB] (v7x-safe)."""
    cap = 64 * 1024 * 1024
    fn = getattr(pltpu, "get_tpu_info", None)
    if fn is not None:
        try:
            cap = int(getattr(fn(), "vmem_capacity_bytes", cap) or cap)
        except Exception:
            pass
    return int(min(max(cap * 3 // 4, 32 * 1024 * 1024), 96 * 1024 * 1024))


VMEM_LIMIT = _vmem_limit_bytes()


def _pick_tm(m):
    return 256 if m >= 256 else _round_up(max(m, 1), 8)


def _pick_tn(n):
    if n % 256 == 0:
        return 256
    if n % 128 == 0:
        return 128
    return n                  # full-dim block (allowed for any size)


def _pick_tk(k):
    if k <= 512:
        return k, k           # single full-K block
    for cand in (512, 256, 128):
        if k % cand == 0:
            return cand, k
    return 512, _round_up(k, 512)


# ---------------------------------------------------------------------------
# Generic tiled matmul:  y = act(x @ w + b)
# ---------------------------------------------------------------------------
def _mm_kernel(x_ref, w_ref, b_ref, o_ref, acc_ref, *, act, k_steps):
    k = pl.program_id(2)

    @pl.when(k == 0)
    def _():
        acc_ref[...] = jnp.zeros_like(acc_ref)

    acc_ref[...] += jnp.dot(x_ref[...], w_ref[...],
                            preferred_element_type=jnp.float32)

    @pl.when(k == k_steps - 1)
    def _():
        acc = acc_ref[...] + b_ref[...]
        if act == "relu":
            acc = jnp.maximum(acc, 0.0)
        elif act == "tanh":
            acc = jnp.tanh(acc)
        o_ref[...] = acc.astype(o_ref.dtype)


def matmul_bias_act(x, w, b=None, act="none"):
    M, K = x.shape
    _, N = w.shape
    if b is None:
        b = jnp.zeros((N,), jnp.float32)

    tm = _pick_tm(M)
    Mp = _round_up(M, tm)
    tk, Kp = _pick_tk(K)
    tn = _pick_tn(N)

    xc = x.astype(MM_DTYPE)
    wc = w.astype(MM_DTYPE)
    if (Mp, Kp) != (M, K):
        xc = jnp.pad(xc, ((0, Mp - M), (0, Kp - K)))
    if Kp != K:
        wc = jnp.pad(wc, ((0, Kp - K), (0, 0)))
    b2 = b.reshape(1, N).astype(jnp.float32)

    grid = (Mp // tm, N // tn, Kp // tk)
    out = pl.pallas_call(
        functools.partial(_mm_kernel, act=act, k_steps=grid[2]),
        out_shape=jax.ShapeDtypeStruct((Mp, N), jnp.float32),
        grid_spec=pltpu.PrefetchScalarGridSpec(
            num_scalar_prefetch=0,
            grid=grid,
            in_specs=[
                pl.BlockSpec((tm, tk), lambda i, j, k: (i, k)),
                pl.BlockSpec((tk, tn), lambda i, j, k: (k, j)),
                pl.BlockSpec((1, tn), lambda i, j, k: (0, j)),
            ],
            out_specs=pl.BlockSpec((tm, tn), lambda i, j, k: (i, j)),
            scratch_shapes=[pltpu.VMEM((tm, tn), jnp.float32)],
        ),
        compiler_params=pltpu.CompilerParams(
            dimension_semantics=("parallel", "parallel", "arbitrary"),
            vmem_limit_bytes=VMEM_LIMIT,
        ),
    )(xc, wc, b2)
    if Mp != M:
        out = out[:M]
    return out


# ---------------------------------------------------------------------------
# Two-input matmul (avoids materializing concat): y = act(x1@w1 + x2@w2 + b)
# ---------------------------------------------------------------------------
def _mm2_kernel(x1_ref, w1_ref, x2_ref, w2_ref, b_ref, o_ref, *, act):
    acc = jnp.dot(x1_ref[...], w1_ref[...], preferred_element_type=jnp.float32)
    acc = acc + jnp.dot(x2_ref[...], w2_ref[...], preferred_element_type=jnp.float32)
    acc = acc + b_ref[...]
    if act == "relu":
        acc = jnp.maximum(acc, 0.0)
    elif act == "tanh":
        acc = jnp.tanh(acc)
    o_ref[...] = acc.astype(o_ref.dtype)


def matmul2_bias_act(x1, w1, x2, w2, b, act="none"):
    M, K1 = x1.shape
    _, K2 = x2.shape
    N = w1.shape[1]

    tm = _pick_tm(M)
    Mp = _round_up(M, tm)
    tn = _pick_tn(N)

    x1c = x1.astype(MM_DTYPE)
    x2c = x2.astype(MM_DTYPE)
    if Mp != M:
        x1c = jnp.pad(x1c, ((0, Mp - M), (0, 0)))
        x2c = jnp.pad(x2c, ((0, Mp - M), (0, 0)))
    w1c = w1.astype(MM_DTYPE)
    w2c = w2.astype(MM_DTYPE)
    b2 = b.reshape(1, N).astype(jnp.float32)

    grid = (Mp // tm, N // tn)
    out = pl.pallas_call(
        functools.partial(_mm2_kernel, act=act),
        out_shape=jax.ShapeDtypeStruct((Mp, N), jnp.float32),
        grid_spec=pltpu.PrefetchScalarGridSpec(
            num_scalar_prefetch=0,
            grid=grid,
            in_specs=[
                pl.BlockSpec((tm, K1), lambda i, j: (i, 0)),
                pl.BlockSpec((K1, tn), lambda i, j: (0, j)),
                pl.BlockSpec((tm, K2), lambda i, j: (i, 0)),
                pl.BlockSpec((K2, tn), lambda i, j: (0, j)),
                pl.BlockSpec((1, tn), lambda i, j: (0, j)),
            ],
            out_specs=pl.BlockSpec((tm, tn), lambda i, j: (i, j)),
        ),
        compiler_params=pltpu.CompilerParams(
            dimension_semantics=("parallel", "parallel"),
            vmem_limit_bytes=VMEM_LIMIT,
        ),
    )(x1c, w1c, x2c, w2c, b2)
    if Mp != M:
        out = out[:M]
    return out


# ---------------------------------------------------------------------------
# Fused linw2 + gumbel(hard): per-row argmax of (x@w2 + b2 + gumbel)
# ---------------------------------------------------------------------------
def _wire_argmax_kernel(x_ref, w_ref, b_ref, g_ref, idx_ref, m_sc, i_sc,
                        *, n_steps, tn):
    j = pl.program_id(1)

    @pl.when(j == 0)
    def _():
        m_sc[...] = jnp.full_like(m_sc, -jnp.inf)
        i_sc[...] = jnp.zeros_like(i_sc)

    logits = jnp.dot(x_ref[...], w_ref[...], preferred_element_type=jnp.float32)
    logits = logits + b_ref[...] + g_ref[...]
    # tau == 1.0; the argmax of a hard gumbel-softmax is invariant to tau > 0.
    tile_max = jnp.max(logits, axis=-1, keepdims=True)
    lane = jax.lax.broadcasted_iota(jnp.int32, logits.shape, 1)
    tile_arg = jnp.min(jnp.where(logits == tile_max, lane, tn),
                       axis=-1, keepdims=True) + j * tn
    better = tile_max > m_sc[...]
    i_sc[...] = jnp.where(better, tile_arg, i_sc[...])
    m_sc[...] = jnp.maximum(tile_max, m_sc[...])

    @pl.when(j == n_steps - 1)
    def _():
        idx_ref[...] = i_sc[...]


def wire_logits_argmax(x, w2p, b2p, gumbel):
    """x:(M,512); w2p:(512,Np) zero-padded; b2p:(Np,) pad=-1e30 -> idx (M,1) int32."""
    M, K = x.shape
    Np = w2p.shape[1]
    tn = 128
    tm = _pick_tm(M)
    Mp = _round_up(M, tm)

    xc = x.astype(MM_DTYPE)
    if Mp != M:
        xc = jnp.pad(xc, ((0, Mp - M), (0, 0)))
    pad_r, pad_c = Mp - M, Np - gumbel.shape[1]
    g = jnp.pad(gumbel, ((0, pad_r), (0, pad_c))) if (pad_r or pad_c) else gumbel
    wc = w2p.astype(MM_DTYPE)
    b2 = b2p.reshape(1, Np).astype(jnp.float32)

    n_steps = Np // tn
    out = pl.pallas_call(
        functools.partial(_wire_argmax_kernel, n_steps=n_steps, tn=tn),
        out_shape=jax.ShapeDtypeStruct((Mp, 1), jnp.int32),
        grid_spec=pltpu.PrefetchScalarGridSpec(
            num_scalar_prefetch=0,
            grid=(Mp // tm, n_steps),
            in_specs=[
                pl.BlockSpec((tm, K), lambda i, j: (i, 0)),
                pl.BlockSpec((K, tn), lambda i, j: (0, j)),
                pl.BlockSpec((1, tn), lambda i, j: (0, j)),
                pl.BlockSpec((tm, tn), lambda i, j: (i, j)),
            ],
            out_specs=pl.BlockSpec((tm, 1), lambda i, j: (i, 0)),
            scratch_shapes=[pltpu.VMEM((tm, 1), jnp.float32),
                            pltpu.VMEM((tm, 1), jnp.int32)],
        ),
        compiler_params=pltpu.CompilerParams(
            dimension_semantics=("parallel", "arbitrary"),
            vmem_limit_bytes=VMEM_LIMIT,
        ),
    )(xc, wc, b2, g)
    if Mp != M:
        out = out[:M]
    return out


# ---------------------------------------------------------------------------
# One-hot writer: wg[b, n, s] = (n == idx[b, s]) directly in (B, n_wires, seq)
# ---------------------------------------------------------------------------
def _one_hot_kernel(idx_ref, o_ref):
    wire = jax.lax.broadcasted_iota(jnp.int32, o_ref.shape, 1)
    o_ref[...] = (wire == idx_ref[...]).astype(o_ref.dtype)


def one_hot_wires(idx_b1s, n_wires):
    B, _, S = idx_b1s.shape
    ts = S
    for cand in (512, 256, 128):
        if S % cand == 0:
            ts = cand
            break
    return pl.pallas_call(
        _one_hot_kernel,
        out_shape=jax.ShapeDtypeStruct((B, n_wires, S), jnp.float32),
        grid_spec=pltpu.PrefetchScalarGridSpec(
            num_scalar_prefetch=0,
            grid=(B, S // ts),
            in_specs=[pl.BlockSpec((1, 1, ts), lambda b, s: (b, 0, s))],
            out_specs=pl.BlockSpec((1, n_wires, ts), lambda b, s: (b, 0, s)),
        ),
        compiler_params=pltpu.CompilerParams(
            dimension_semantics=("parallel", "parallel"),
            vmem_limit_bytes=VMEM_LIMIT,
        ),
    )(idx_b1s)


# ---------------------------------------------------------------------------
# GBlock helpers (BN folding, ConvT phase decomposition, 2-tap interpolation)
# ---------------------------------------------------------------------------
def bn_fold(bn):
    scale = bn["gamma"] / jnp.sqrt(bn["var"] + BN_EPS)
    shift = bn["beta"] - bn["mean"] * scale
    return scale, shift


def conv_t_wbig(wt, stride):
    """ConvTranspose1d(k=3*stride, pad=stride) as one matmul on 3 neighbours.

    output block j (stride positions, phi-major, then channel) =
        [x[j-1], x[j], x[j+1]] @ w_big ,  w_big : (3*cin, stride*cout)
    """
    cin, cout, k = wt.shape
    assert k == 3 * stride
    rows = []
    for r in range(3):                                   # r=0 -> x[j-1], 1 -> x[j], 2 -> x[j+1]
        taps = wt[:, :, (2 - r) * stride:(3 - r) * stride]   # (cin, cout, stride)
        rows.append(jnp.transpose(taps, (0, 2, 1)).reshape(cin, stride * cout))
    return jnp.concatenate(rows, axis=0)


def _shift_cat(xb):
    """(B, L, C) -> (B, L, 3C) = [x[j-1], x[j], x[j+1]] with zero boundary rows."""
    B, L, C = xb.shape
    zero = jnp.zeros((B, 1, C), xb.dtype)
    xm1 = jnp.concatenate([zero, xb[:, :-1]], axis=1)
    xp1 = jnp.concatenate([xb[:, 1:], zero], axis=1)
    return jnp.concatenate([xm1, xb, xp1], axis=-1)


def _interp_taps(lin, lout):
    """Taps for F.interpolate(mode='linear', align_corners=False)."""
    src = (np.arange(lout, dtype=np.float64) + 0.5) * lin / lout - 0.5
    src = np.clip(src, 0.0, lin - 1)
    i0 = np.floor(src).astype(np.int32)
    i1 = np.minimum(i0 + 1, lin - 1).astype(np.int32)
    frac = (src - i0).astype(np.float32)
    return i0, i1, frac


def gblock_apply(p, x_cl):
    """GBlock forward; x_cl: (B, L, Cin) channels-last -> (B, L*stride, Cout)."""
    B, L, Cin = x_cl.shape
    Cout = p["w1y"].shape[0]
    stride = p["w_big"].shape[1] // Cout
    Lout = L * stride

    # bn0 folded as channels-last affine on the SMALL pre-upsample input (glue).
    xb = x_cl * p["s0"] + p["t0"]
    # relu(ConvTranspose1d(bn0(x))) as ONE matmul (no overlap-add needed).
    xc = _shift_cat(xb).reshape(B * L, 3 * Cin)
    y = matmul_bias_act(xc, p["w_big"], p["b_big"], act="relu")   # (B*L, stride*Cout)
    y = y.reshape(B, Lout, Cout)

    # x0 = F.interpolate(x, Lout, 'linear'): 2-tap channels-last lerp (identity for stride 1).
    if stride == 1:
        x0 = x_cl
    else:
        i0, i1, frac = _interp_taps(L, Lout)
        x0 = (x_cl[:, i0, :] * (1.0 - frac)[None, :, None] +
              x_cl[:, i1, :] * frac[None, :, None])

    # relu(conv1(cat([x0, bn(relu(convT))]))) with bn folded into w1y/b1.
    out = matmul2_bias_act(x0.reshape(B * Lout, Cin), p["w1x"],
                           y.reshape(B * Lout, Cout), p["w1y"],
                           p["b1"], act="relu")
    return out.reshape(B, Lout, Cout)


# ---------------------------------------------------------------------------
# Forward pass
# ---------------------------------------------------------------------------
def gen_forward(P, z, wire_to_xy, gumbel_noise, seq_len):
    # wire_to_xy is part of the reference signature but unused by forward.
    del wire_to_xy
    B = z.shape[0]
    L = seq_len // 16

    # x = relu(lin0(z)).reshape(-1, 512, L)
    x_flat = matmul_bias_act(z, P["lin0_w"], P["lin0_b"], act="relu")         # (B, 512*L)
    x_cl = jnp.transpose(x_flat.reshape(B, N512, L), (0, 2, 1))               # (B, L, 512)

    # ------------------------------ wire branch ------------------------------
    w = matmul_bias_act(x_flat.reshape(B * N512, L), P["linws_w"], P["linws_b"],
                        act="relu")                                           # (B*512, seq)
    w = jnp.transpose(w.reshape(B, N512, seq_len), (0, 2, 1)).reshape(B * seq_len, N512)
    # Dropout(0.1) is an identity in inference mode.
    w = matmul_bias_act(w, P["linw1_w"], P["linw1_b"], act="relu")            # (B*seq, 512)
    # tau = 1/(1/temp_min)**(gen_it/max_its) == 1.0 ; hard gumbel-softmax forward
    # == one-hot(argmax(logits + gumbel)).  linw2 + argmax fused in one kernel.
    idx = wire_logits_argmax(w, P["linw2_w"], P["linw2_b"], gumbel_noise)     # (B*seq, 1)
    wg = one_hot_wires(idx.reshape(B, 1, seq_len), N_WIRES)                   # (B, n_wires, seq)

    # ------------------------------ point branch -----------------------------
    p = gblock_apply(P["convp4"], x_cl)                                       # (B, 4L, 256)
    p = gblock_apply(P["convp3"], p)                                          # (B, 16L, 128)
    p = gblock_apply(P["convp2"], p)                                          # (B, 16L, 64)
    Bp, Lp, C = p.shape
    pf = matmul_bias_act(p.reshape(Bp * Lp, C), P["convp1_w"], P["convp1_b"],
                         act="tanh")                                          # (B*seq, 128) padded
    p_out = jnp.transpose(pf[:, :N_FEATURES].reshape(Bp, Lp, N_FEATURES), (0, 2, 1))
    return p_out, wg


# ---------------------------------------------------------------------------
# Parameter init (synthetic, module-shaped) and one-time folding/padding
# ---------------------------------------------------------------------------
def init_params(key, latent_dims, seq_len):
    L = seq_len // 16
    keys = iter(jax.random.split(key, 64))

    def nrm(shape, scale=0.05):
        return scale * jax.random.normal(next(keys), shape, jnp.float32)

    def bn(c):
        return dict(gamma=1.0 + nrm((c,), 0.1), beta=nrm((c,), 0.1),
                    mean=nrm((c,), 0.1), var=1.0 + jnp.abs(nrm((c,), 0.1)))

    def gblock(cin, cout, k):
        return dict(bn0=bn(cin),
                    conv_w=nrm((cin, cout, k)), conv_b=nrm((cout,)),
                    bn=bn(cout),
                    conv1_w=nrm((cin + cout, cout)), conv1_b=nrm((cout,)))

    return dict(
        lin0_w=nrm((latent_dims, L * N512)), lin0_b=nrm((L * N512,)),
        linws_w=nrm((L, seq_len)), linws_b=nrm((seq_len,)),
        linw1_w=nrm((N512, N512)), linw1_b=nrm((N512,)),
        linw2_w=nrm((N512, N_WIRES)), linw2_b=nrm((N_WIRES,)),
        convp4=gblock(N512, 256, 12),
        convp3=gblock(256, 128, 12),
        convp2=gblock(128, 64, 3),
        convp1_w=nrm((64, N_FEATURES)), convp1_b=nrm((N_FEATURES,)),
    )


def prepare_gblock(g, stride):
    cin = g["conv_w"].shape[0]
    s0, t0 = bn_fold(g["bn0"])
    s1, t1 = bn_fold(g["bn"])
    w1x = g["conv1_w"][:cin]
    w1y = g["conv1_w"][cin:]
    return dict(
        s0=s0, t0=t0,
        w_big=conv_t_wbig(g["conv_w"], stride),
        b_big=jnp.tile(g["conv_b"], stride),
        w1x=w1x,
        w1y=s1[:, None] * w1y,                 # fold bn(relu(.)) scale
        b1=g["conv1_b"] + t1 @ w1y,            # fold bn(relu(.)) shift
    )


def prepare_params(raw):
    pad_w = N_WIRES_PAD - N_WIRES
    return dict(
        lin0_w=raw["lin0_w"], lin0_b=raw["lin0_b"],
        linws_w=raw["linws_w"], linws_b=raw["linws_b"],
        linw1_w=raw["linw1_w"], linw1_b=raw["linw1_b"],
        # wire head padded to 3712 lanes; pad bias = -1e30 so pad lanes never win argmax
        linw2_w=jnp.pad(raw["linw2_w"], ((0, 0), (0, pad_w))),
        linw2_b=jnp.pad(raw["linw2_b"], ((0, pad_w),), constant_values=NEG_BIG),
        convp4=prepare_gblock(raw["convp4"], 4),
        convp3=prepare_gblock(raw["convp3"], 4),
        convp2=prepare_gblock(raw["convp2"], 1),
        # convp1 padded to a lane-dense 128-wide projection; slice [:, :3] in glue
        convp1_w=jnp.pad(raw["convp1_w"], ((0, 0), (0, 128 - N_FEATURES))),
        convp1_b=jnp.pad(raw["convp1_b"], ((0, 128 - N_FEATURES),)),
    )


# ---------------------------------------------------------------------------
if __name__ == "__main__":
    B, latent_dims, seq_len = 2, 8, 32          # seq_len must be divisible by 16
    key = jax.random.PRNGKey(0)
    kz, kw, kg, kp = jax.random.split(key, 4)
    z = jax.random.normal(kz, (B, latent_dims), jnp.float32)
    wire_to_xy = jax.random.normal(kw, (2, N_WIRES), jnp.float32)   # unused by forward
    # TODO(synk): Gumbel noise drawn with JAX RNG; the torch RNG stream is not reproducible here.
    gumbel_noise = jax.random.gumbel(kg, (B * seq_len, N_WIRES), jnp.float32)

    raw = init_params(kp, latent_dims, seq_len)
    params = prepare_params(raw)                 # one-time BN folding / padding

    fwd = jax.jit(functools.partial(gen_forward, seq_len=seq_len))
    p_out, wg = fwd(params, z, wire_to_xy, gumbel_noise)
    jax.block_until_ready((p_out, wg))

    assert p_out.shape == (B, N_FEATURES, seq_len), p_out.shape
    assert wg.shape == (B, N_WIRES, seq_len), wg.shape
    # each (batch, position) column of wg is one-hot over the wire axis
    assert bool(jnp.all(jnp.sum(wg, axis=1) == 1.0))
    assert bool(jnp.all(jnp.abs(p_out) <= 1.0))
    print("KERNEL_OK")
</pallas_src>

<mosaic_0001>
module attributes {stable_mosaic.version = 11 : i64} {
  func.func @_mm_kernel(%arg0: i32, %arg1: i32, %arg2: i32, %arg3: memref<8x8xbf16, #tpu.memory_space<vmem>>, %arg4: memref<8x256xbf16, #tpu.memory_space<vmem>>, %arg5: memref<1x256xf32, #tpu.memory_space<vmem>>, %arg6: memref<8x256xf32, #tpu.memory_space<vmem>>, %arg7: memref<8x256xf32, #tpu.memory_space<vmem>>) attributes {dimension_semantics = [#tpu.dimension_semantics<parallel>, #tpu.dimension_semantics<parallel>, #tpu.dimension_semantics<arbitrary>], iteration_bounds = array<i64: 1, 4, 1>, scalar_prefetch = 0 : i64, scratch_operands = 1 : i64, tpu.core_type = #tpu.core_type<tc>, window_params = [{transform_indices = @transform_0, window_bounds = array<i64: 8, 8>}, {transform_indices = @transform_1, window_bounds = array<i64: 8, 256>}, {transform_indices = @transform_2, window_bounds = array<i64: 1, 256>}, {transform_indices = @transform_3, window_bounds = array<i64: 8, 256>}]} {
    %c0_i32 = arith.constant 0 : i32
    %0 = arith.cmpi eq, %arg2, %c0_i32 : i32
    %1 = arith.extui %0 : i1 to i32
    %c0_i32_0 = arith.constant 0 : i32
    %2 = arith.cmpi ne, %1, %c0_i32_0 : i32
    scf.if %2 {
      %cst_10 = arith.constant 0.000000e+00 : f32
      %12 = vector.broadcast %cst_10 : f32 to vector<8x256xf32>
      %c0_11 = arith.constant 0 : index
      %c0_12 = arith.constant 0 : index
      %13 = vector.load %arg7[%c0_11, %c0_12] : memref<8x256xf32, #tpu.memory_space<vmem>>, vector<8x256xf32>
      tpu.vector_store %arg7[%c0_11, %c0_12], %12 {strides = array<i32>} : memref<8x256xf32, #tpu.memory_space<vmem>>, vector<8x256xf32>,
    } else {
    }
    %c0 = arith.constant 0 : index
    %c0_1 = arith.constant 0 : index
    %3 = vector.load %arg7[%c0, %c0_1] : memref<8x256xf32, #tpu.memory_space<vmem>>, vector<8x256xf32>
    %c0_2 = arith.constant 0 : index
    %c0_3 = arith.constant 0 : index
    %4 = vector.load %arg3[%c0_2, %c0_3] : memref<8x8xbf16, #tpu.memory_space<vmem>>, vector<8x8xbf16>
    %c0_4 = arith.constant 0 : index
    %c0_5 = arith.constant 0 : index
    %5 = vector.load %arg4[%c0_4, %c0_5] : memref<8x256xbf16, #tpu.memory_space<vmem>>, vector<8x256xbf16>
    %cst = arith.constant dense<0.000000e+00> : vector<8x256xf32>
    %6 = tpu.matmul %4, %5, %cst {dimension_numbers = #tpu.dot_dimension_numbers<[1], [0], [0], [1], [0, 0, 1, 1], [], []>} : vector<8x8xbf16>, vector<8x256xbf16>, vector<8x256xf32> -> vector<8x256xf32>
    %7 = arith.addf %3, %6 : vector<8x256xf32>
    %c0_6 = arith.constant 0 : index
    %c0_7 = arith.constant 0 : index
    %8 = vector.load %arg7[%c0_6, %c0_7] : memref<8x256xf32, #tpu.memory_space<vmem>>, vector<8x256xf32>
    tpu.vector_store %arg7[%c0_6, %c0_7], %7 {strides = array<i32>} : memref<8x256xf32, #tpu.memory_space<vmem>>, vector<8x256xf32>,
    %c0_i32_8 = arith.constant 0 : i32
    %9 = arith.cmpi eq, %arg2, %c0_i32_8 : i32
    %10 = arith.extui %9 : i1 to i32
    %c0_i32_9 = arith.constant 0 : i32
    %11 = arith.cmpi ne, %10, %c0_i32_9 : i32
    scf.if %11 {
      %c0_10 = arith.constant 0 : index
      %c0_11 = arith.constant 0 : index
      %12 = vector.load %arg7[%c0_10, %c0_11] : memref<8x256xf32, #tpu.memory_space<vmem>>, vector<8x256xf32>
      %c0_12 = arith.constant 0 : index
      %c0_13 = arith.constant 0 : index
      %13 = vector.load %arg5[%c0_12, %c0_13] : memref<1x256xf32, #tpu.memory_space<vmem>>, vector<1x256xf32>
      %14 = vector.broadcast %13 : vector<1x256xf32> to vector<8x256xf32>
      %15 = arith.addf %12, %14 : vector<8x256xf32>
      %cst_14 = arith.constant 0.000000e+00 : f32
      %16 = vector.broadcast %cst_14 : f32 to vector<8x256xf32>
      %17 = arith.maximumf %15, %16 : vector<8x256xf32>
      %c0_15 = arith.constant 0 : index
      %c0_16 = arith.constant 0 : index
      %18 = vector.load %arg6[%c0_15, %c0_16] : memref<8x256xf32, #tpu.memory_space<vmem>>, vector<8x256xf32>
      tpu.vector_store %arg6[%c0_15, %c0_16], %17 {strides = array<i32>} : memref<8x256xf32, #tpu.memory_space<vmem>>, vector<8x256xf32>,
    } else {
    }
    return
  }
  func.func @transform_0(%arg0: i32, %arg1: i32, %arg2: i32) -> (i32, i32) {
    %c0_i32 = arith.constant 0 : i32
    return %arg0, %arg2 : i32, i32
  }
  func.func @transform_1(%arg0: i32, %arg1: i32, %arg2: i32) -> (i32, i32) {
    %c0_i32 = arith.constant 0 : i32
    return %arg2, %arg1 : i32, i32
  }
  func.func @transform_2(%arg0: i32, %arg1: i32, %arg2: i32) -> (i32, i32) {
    %c0_i32 = arith.constant 0 : i32
    %c0_i32_0 = arith.constant 0 : i32
    return %c0_i32, %arg1 : i32, i32
  }
  func.func @transform_3(%arg0: i32, %arg1: i32, %arg2: i32) -> (i32, i32) {
    %c0_i32 = arith.constant 0 : i32
    return %arg0, %arg1 : i32, i32
  }
}

module attributes {stable_mosaic.version = 11 : i64} {
  func.func @_mm_kernel(%arg0: i32, %arg1: i32, %arg2: i32, %arg3: memref<8x512xbf16, #tpu.memory_space<vmem>>, %arg4: memref<512x256xbf16, #tpu.memory_space<vmem>>, %arg5: memref<1x256xf32, #tpu.memory_space<vmem>>, %arg6: memref<8x256xf32, #tpu.memory_space<vmem>>, %arg7: memref<8x256xf32, #tpu.memory_space<vmem>>) attributes {dimension_semantics = [#tpu.dimension_semantics<parallel>, #tpu.dimension_semantics<parallel>, #tpu.dimension_semantics<arbitrary>], iteration_bounds = array<i64: 1, 4, 3>, scalar_prefetch = 0 : i64, scratch_operands = 1 : i64, tpu.core_type = #tpu.core_type<tc>, window_params = [{transform_indices = @transform_0, window_bounds = array<i64: 8, 512>}, {transform_indices = @transform_1, window_bounds = array<i64: 512, 256>}, {transform_indices = @transform_2, window_bounds = array<i64: 1, 256>}, {transform_indices = @transform_3, window_bounds = array<i64: 8, 256>}]} {
    %c0_i32 = arith.constant 0 : i32
    %0 = arith.cmpi eq, %arg2, %c0_i32 : i32
    %1 = arith.extui %0 : i1 to i32
    %c0_i32_0 = arith.constant 0 : i32
    %2 = arith.cmpi ne, %1, %c0_i32_0 : i32
    scf.if %2 {
      %cst_9 = arith.constant 0.000000e+00 : f32
      %12 = vector.broadcast %cst_9 : f32 to vector<8x256xf32>
      %c0_10 = arith.constant 0 : index
      %c0_11 = arith.constant 0 : index
      %13 = vector.load %arg7[%c0_10, %c0_11] : memref<8x256xf32, #tpu.memory_space<vmem>>, vector<8x256xf32>
      tpu.vector_store %arg7[%c0_10, %c0_11], %12 {strides = array<i32>} : memref<8x256xf32, #tpu.memory_space<vmem>>, vector<8x256xf32>,
    } else {
    }
    %c0 = arith.constant 0 : index
    %c0_1 = arith.constant 0 : index
    %3 = vector.load %arg7[%c0, %c0_1] : memref<8x256xf32, #tpu.memory_space<vmem>>, vector<8x256xf32>
    %c0_2 = arith.constant 0 : index
    %c0_3 = arith.constant 0 : index
    %4 = vector.load %arg3[%c0_2, %c0_3] : memref<8x512xbf16, #tpu.memory_space<vmem>>, vector<8x512xbf16>
    %c0_4 = arith.constant 0 : index
    %c0_5 = arith.constant 0 : index
    %5 = vector.load %arg4[%c0_4, %c0_5] : memref<512x256xbf16, #tpu.memory_space<vmem>>, vector<512x256xbf16>
    %cst = arith.constant dense<0.000000e+00> : vector<8x256xf32>
    %6 = tpu.matmul %4, %5, %cst {dimension_numbers = #tpu.dot_dimension_numbers<[1], [0], [0], [1], [0, 0, 1, 1], [], []>} : vector<8x512xbf16>, vector<512x256xbf16>, vector<8x256xf32> -> vector<8x256xf32>
    %7 = arith.addf %3, %6 : vector<8x256xf32>
    %c0_6 = arith.constant 0 : index
    %c0_7 = arith.constant 0 : index
    %8 = vector.load %arg7[%c0_6, %c0_7] : memref<8x256xf32, #tpu.memory_space<vmem>>, vector<8x256xf32>
    tpu.vector_store %arg7[%c0_6, %c0_7], %7 {strides = array<i32>} : memref<8x256xf32, #tpu.memory_space<vmem>>, vector<8x256xf32>,
    %c2_i32 = arith.constant 2 : i32
    %9 = arith.cmpi eq, %arg2, %c2_i32 : i32
    %10 = arith.extui %9 : i1 to i32
    %c0_i32_8 = arith.constant 0 : i32
    %11 = arith.cmpi ne, %10, %c0_i32_8 : i32
    scf.if %11 {
      %c0_9 = arith.constant 0 : index
      %c0_10 = arith.constant 0 : index
      %12 = vector.load %arg7[%c0_9, %c0_10] : memref<8x256xf32, #tpu.memory_space<vmem>>, vector<8x256xf32>
      %c0_11 = arith.constant 0 : index
      %c0_12 = arith.constant 0 : index
      %13 = vector.load %arg5[%c0_11, %c0_12] : memref<1x256xf32, #tpu.memory_space<vmem>>, vector<1x256xf32>
      %14 = vector.broadcast %13 : vector<1x256xf32> to vector<8x256xf32>
      %15 = arith.addf %12, %14 : vector<8x256xf32>
      %cst_13 = arith.constant 0.000000e+00 : f32
      %16 = vector.broadcast %cst_13 : f32 to vector<8x256xf32>
      %17 = arith.maximumf %15, %16 : vector<8x256xf32>
      %c0_14 = arith.constant 0 : index
      %c0_15 = arith.constant 0 : index
      %18 = vector.load %arg6[%c0_14, %c0_15] : memref<8x256xf32, #tpu.memory_space<vmem>>, vector<8x256xf32>
      tpu.vector_store %arg6[%c0_14, %c0_15], %17 {strides = array<i32>} : memref<8x256xf32, #tpu.memory_space<vmem>>, vector<8x256xf32>,
    } else {
    }
    return
  }
  func.func @transform_0(%arg0: i32, %arg1: i32, %arg2: i32) -> (i32, i32) {
    %c0_i32 = arith.constant 0 : i32
    return %arg0, %arg2 : i32, i32
  }
  func.func @transform_1(%arg0: i32, %arg1: i32, %arg2: i32) -> (i32, i32) {
    %c0_i32 = arith.constant 0 : i32
    return %arg2, %arg1 : i32, i32
  }
  func.func @transform_2(%arg0: i32, %arg1: i32, %arg2: i32) -> (i32, i32) {
    %c0_i32 = arith.constant 0 : i32
    %c0_i32_0 = arith.constant 0 : i32
    return %c0_i32, %arg1 : i32, i32
  }
  func.func @transform_3(%arg0: i32, %arg1: i32, %arg2: i32) -> (i32, i32) {
    %c0_i32 = arith.constant 0 : i32
    return %arg0, %arg1 : i32, i32
  }
}

module attributes {stable_mosaic.version = 11 : i64} {
  func.func @_mm2_kernel(%arg0: i32, %arg1: i32, %arg2: memref<16x512xbf16, #tpu.memory_space<vmem>>, %arg3: memref<512x256xbf16, #tpu.memory_space<vmem>>, %arg4: memref<16x256xbf16, #tpu.memory_space<vmem>>, %arg5: memref<256x256xbf16, #tpu.memory_space<vmem>>, %arg6: memref<1x256xf32, #tpu.memory_space<vmem>>, %arg7: memref<16x256xf32, #tpu.memory_space<vmem>>) attributes {dimension_semantics = [#tpu.dimension_semantics<parallel>, #tpu.dimension_semantics<parallel>], iteration_bounds = array<i64: 1, 1>, scalar_prefetch = 0 : i64, scratch_operands = 0 : i64, tpu.core_type = #tpu.core_type<tc>, window_params = [{transform_indices = @transform_0, window_bounds = array<i64: 16, 512>}, {transform_indices = @transform_1, window_bounds = array<i64: 512, 256>}, {transform_indices = @transform_2, window_bounds = array<i64: 16, 256>}, {transform_indices = @transform_3, window_bounds = array<i64: 256, 256>}, {transform_indices = @transform_4, window_bounds = array<i64: 1, 256>}, {transform_indices = @transform_5, window_bounds = array<i64: 16, 256>}]} {
    %c0 = arith.constant 0 : index
    %c0_0 = arith.constant 0 : index
    %0 = vector.load %arg2[%c0, %c0_0] : memref<16x512xbf16, #tpu.memory_space<vmem>>, vector<16x512xbf16>
    %c0_1 = arith.constant 0 : index
    %c0_2 = arith.constant 0 : index
    %1 = vector.load %arg3[%c0_1, %c0_2] : memref<512x256xbf16, #tpu.memory_space<vmem>>, vector<512x256xbf16>
    %cst = arith.constant dense<0.000000e+00> : vector<16x256xf32>
    %2 = tpu.matmul %0, %1, %cst {dimension_numbers = #tpu.dot_dimension_numbers<[1], [0], [0], [1], [0, 0, 1, 1], [], []>} : vector<16x512xbf16>, vector<512x256xbf16>, vector<16x256xf32> -> vector<16x256xf32>
    %c0_3 = arith.constant 0 : index
    %c0_4 = arith.constant 0 : index
    %3 = vector.load %arg4[%c0_3, %c0_4] : memref<16x256xbf16, #tpu.memory_space<vmem>>, vector<16x256xbf16>
    %c0_5 = arith.constant 0 : index
    %c0_6 = arith.constant 0 : index
    %4 = vector.load %arg5[%c0_5, %c0_6] : memref<256x256xbf16, #tpu.memory_space<vmem>>, vector<256x256xbf16>
    %cst_7 = arith.constant dense<0.000000e+00> : vector<16x256xf32>
    %5 = tpu.matmul %3, %4, %cst_7 {dimension_numbers = #tpu.dot_dimension_numbers<[1], [0], [0], [1], [0, 0, 1, 1], [], []>} : vector<16x256xbf16>, vector<256x256xbf16>, vector<16x256xf32> -> vector<16x256xf32>
    %6 = arith.addf %2, %5 : vector<16x256xf32>
    %c0_8 = arith.constant 0 : index
    %c0_9 = arith.constant 0 : index
    %7 = vector.load %arg6[%c0_8, %c0_9] : memref<1x256xf32, #tpu.memory_space<vmem>>, vector<1x256xf32>
    %8 = vector.broadcast %7 : vector<1x256xf32> to vector<16x256xf32>
    %9 = arith.addf %6, %8 : vector<16x256xf32>
    %cst_10 = arith.constant 0.000000e+00 : f32
    %10 = vector.broadcast %cst_10 : f32 to vector<16x256xf32>
    %11 = arith.maximumf %9, %10 : vector<16x256xf32>
    %c0_11 = arith.constant 0 : index
    %c0_12 = arith.constant 0 : index
    %12 = vector.load %arg7[%c0_11, %c0_12] : memref<16x256xf32, #tpu.memory_space<vmem>>, vector<16x256xf32>
    tpu.vector_store %arg7[%c0_11, %c0_12], %11 {strides = array<i32>} : memref<16x256xf32, #tpu.memory_space<vmem>>, vector<16x256xf32>,
    return
  }
  func.func @transform_0(%arg0: i32, %arg1: i32) -> (i32, i32) {
    %c0_i32 = arith.constant 0 : i32
    %c0_i32_0 = arith.constant 0 : i32
    return %arg0, %c0_i32 : i32, i32
  }
  func.func @transform_1(%arg0: i32, %arg1: i32) -> (i32, i32) {
    %c0_i32 = arith.constant 0 : i32
    %c0_i32_0 = arith.constant 0 : i32
    return %c0_i32, %arg1 : i32, i32
  }
  func.func @transform_2(%arg0: i32, %arg1: i32) -> (i32, i32) {
    %c0_i32 = arith.constant 0 : i32
    %c0_i32_0 = arith.constant 0 : i32
    return %arg0, %c0_i32 : i32, i32
  }
  func.func @transform_3(%arg0: i32, %arg1: i32) -> (i32, i32) {
    %c0_i32 = arith.constant 0 : i32
    %c0_i32_0 = arith.constant 0 : i32
    return %c0_i32, %arg1 : i32, i32
  }
  func.func @transform_4(%arg0: i32, %arg1: i32) -> (i32, i32) {
    %c0_i32 = arith.constant 0 : i32
    %c0_i32_0 = arith.constant 0 : i32
    return %c0_i32, %arg1 : i32, i32
  }
  func.func @transform_5(%arg0: i32, %arg1: i32) -> (i32, i32) {
    %c0_i32 = arith.constant 0 : i32
    return %arg0, %arg1 : i32, i32
  }
}

module attributes {stable_mosaic.version = 11 : i64} {
  func.func @_mm_kernel(%arg0: i32, %arg1: i32, %arg2: i32, %arg3: memref<16x256xbf16, #tpu.memory_space<vmem>>, %arg4: memref<256x256xbf16, #tpu.memory_space<vmem>>, %arg5: memref<1x256xf32, #tpu.memory_space<vmem>>, %arg6: memref<16x256xf32, #tpu.memory_space<vmem>>, %arg7: memref<16x256xf32, #tpu.memory_space<vmem>>) attributes {dimension_semantics = [#tpu.dimension_semantics<parallel>, #tpu.dimension_semantics<parallel>, #tpu.dimension_semantics<arbitrary>], iteration_bounds = array<i64: 1, 2, 3>, scalar_prefetch = 0 : i64, scratch_operands = 1 : i64, tpu.core_type = #tpu.core_type<tc>, window_params = [{transform_indices = @transform_0, window_bounds = array<i64: 16, 256>}, {transform_indices = @transform_1, window_bounds = array<i64: 256, 256>}, {transform_indices = @transform_2, window_bounds = array<i64: 1, 256>}, {transform_indices = @transform_3, window_bounds = array<i64: 16, 256>}]} {
    %c0_i32 = arith.constant 0 : i32
    %0 = arith.cmpi eq, %arg2, %c0_i32 : i32
    %1 = arith.extui %0 : i1 to i32
    %c0_i32_0 = arith.constant 0 : i32
    %2 = arith.cmpi ne, %1, %c0_i32_0 : i32
    scf.if %2 {
      %cst_9 = arith.constant 0.000000e+00 : f32
      %12 = vector.broadcast %cst_9 : f32 to vector<16x256xf32>
      %c0_10 = arith.constant 0 : index
      %c0_11 = arith.constant 0 : index
      %13 = vector.load %arg7[%c0_10, %c0_11] : memref<16x256xf32, #tpu.memory_space<vmem>>, vector<16x256xf32>
      tpu.vector_store %arg7[%c0_10, %c0_11], %12 {strides = array<i32>} : memref<16x256xf32, #tpu.memory_space<vmem>>, vector<16x256xf32>,
    } else {
    }
    %c0 = arith.constant 0 : index
    %c0_1 = arith.constant 0 : index
    %3 = vector.load %arg7[%c0, %c0_1] : memref<16x256xf32, #tpu.memory_space<vmem>>, vector<16x256xf32>
    %c0_2 = arith.constant 0 : index
    %c0_3 = arith.constant 0 : index
    %4 = vector.load %arg3[%c0_2, %c0_3] : memref<16x256xbf16, #tpu.memory_space<vmem>>, vector<16x256xbf16>
    %c0_4 = arith.constant 0 : index
    %c0_5 = arith.constant 0 : index
    %5 = vector.load %arg4[%c0_4, %c0_5] : memref<256x256xbf16, #tpu.memory_space<vmem>>, vector<256x256xbf16>
    %cst = arith.constant dense<0.000000e+00> : vector<16x256xf32>
    %6 = tpu.matmul %4, %5, %cst {dimension_numbers = #tpu.dot_dimension_numbers<[1], [0], [0], [1], [0, 0, 1, 1], [], []>} : vector<16x256xbf16>, vector<256x256xbf16>, vector<16x256xf32> -> vector<16x256xf32>
    %7 = arith.addf %3, %6 : vector<16x256xf32>
    %c0_6 = arith.constant 0 : index
    %c0_7 = arith.constant 0 : index
    %8 = vector.load %arg7[%c0_6, %c0_7] : memref<16x256xf32, #tpu.memory_space<vmem>>, vector<16x256xf32>
    tpu.vector_store %arg7[%c0_6, %c0_7], %7 {strides = array<i32>} : memref<16x256xf32, #tpu.memory_space<vmem>>, vector<16x256xf32>,
    %c2_i32 = arith.constant 2 : i32
    %9 = arith.cmpi eq, %arg2, %c2_i32 : i32
    %10 = arith.extui %9 : i1 to i32
    %c0_i32_8 = arith.constant 0 : i32
    %11 = arith.cmpi ne, %10, %c0_i32_8 : i32
    scf.if %11 {
      %c0_9 = arith.constant 0 : index
      %c0_10 = arith.constant 0 : index
      %12 = vector.load %arg7[%c0_9, %c0_10] : memref<16x256xf32, #tpu.memory_space<vmem>>, vector<16x256xf32>
      %c0_11 = arith.constant 0 : index
      %c0_12 = arith.constant 0 : index
      %13 = vector.load %arg5[%c0_11, %c0_12] : memref<1x256xf32, #tpu.memory_space<vmem>>, vector<1x256xf32>
      %14 = vector.broadcast %13 : vector<1x256xf32> to vector<16x256xf32>
      %15 = arith.addf %12, %14 : vector<16x256xf32>
      %cst_13 = arith.constant 0.000000e+00 : f32
      %16 = vector.broadcast %cst_13 : f32 to vector<16x256xf32>
      %17 = arith.maximumf %15, %16 : vector<16x256xf32>
      %c0_14 = arith.constant 0 : index
      %c0_15 = arith.constant 0 : index
      %18 = vector.load %arg6[%c0_14, %c0_15] : memref<16x256xf32, #tpu.memory_space<vmem>>, vector<16x256xf32>
      tpu.vector_store %arg6[%c0_14, %c0_15], %17 {strides = array<i32>} : memref<16x256xf32, #tpu.memory_space<vmem>>, vector<16x256xf32>,
    } else {
    }
    return
  }
  func.func @transform_0(%arg0: i32, %arg1: i32, %arg2: i32) -> (i32, i32) {
    %c0_i32 = arith.constant 0 : i32
    return %arg0, %arg2 : i32, i32
  }
  func.func @transform_1(%arg0: i32, %arg1: i32, %arg2: i32) -> (i32, i32) {
    %c0_i32 = arith.constant 0 : i32
    return %arg2, %arg1 : i32, i32
  }
  func.func @transform_2(%arg0: i32, %arg1: i32, %arg2: i32) -> (i32, i32) {
    %c0_i32 = arith.constant 0 : i32
    %c0_i32_0 = arith.constant 0 : i32
    return %c0_i32, %arg1 : i32, i32
  }
  func.func @transform_3(%arg0: i32, %arg1: i32, %arg2: i32) -> (i32, i32) {
    %c0_i32 = arith.constant 0 : i32
    return %arg0, %arg1 : i32, i32
  }
}

module attributes {stable_mosaic.version = 11 : i64} {
  func.func @_mm2_kernel(%arg0: i32, %arg1: i32, %arg2: memref<64x256xbf16, #tpu.memory_space<vmem>>, %arg3: memref<256x128xbf16, #tpu.memory_space<vmem>>, %arg4: memref<64x128xbf16, #tpu.memory_space<vmem>>, %arg5: memref<128x128xbf16, #tpu.memory_space<vmem>>, %arg6: memref<1x128xf32, #tpu.memory_space<vmem>>, %arg7: memref<64x128xf32, #tpu.memory_space<vmem>>) attributes {dimension_semantics = [#tpu.dimension_semantics<parallel>, #tpu.dimension_semantics<parallel>], iteration_bounds = array<i64: 1, 1>, scalar_prefetch = 0 : i64, scratch_operands = 0 : i64, tpu.core_type = #tpu.core_type<tc>, window_params = [{transform_indices = @transform_0, window_bounds = array<i64: 64, 256>}, {transform_indices = @transform_1, window_bounds = array<i64: 256, 128>}, {transform_indices = @transform_2, window_bounds = array<i64: 64, 128>}, {transform_indices = @transform_3, window_bounds = array<i64: 128, 128>}, {transform_indices = @transform_4, window_bounds = array<i64: 1, 128>}, {transform_indices = @transform_5, window_bounds = array<i64: 64, 128>}]} {
    %c0 = arith.constant 0 : index
    %c0_0 = arith.constant 0 : index
    %0 = vector.load %arg2[%c0, %c0_0] : memref<64x256xbf16, #tpu.memory_space<vmem>>, vector<64x256xbf16>
    %c0_1 = arith.constant 0 : index
    %c0_2 = arith.constant 0 : index
    %1 = vector.load %arg3[%c0_1, %c0_2] : memref<256x128xbf16, #tpu.memory_space<vmem>>, vector<256x128xbf16>
    %cst = arith.constant dense<0.000000e+00> : vector<64x128xf32>
    %2 = tpu.matmul %0, %1, %cst {dimension_numbers = #tpu.dot_dimension_numbers<[1], [0], [0], [1], [0, 0, 1, 1], [], []>} : vector<64x256xbf16>, vector<256x128xbf16>, vector<64x128xf32> -> vector<64x128xf32>
    %c0_3 = arith.constant 0 : index
    %c0_4 = arith.constant 0 : index
    %3 = vector.load %arg4[%c0_3, %c0_4] : memref<64x128xbf16, #tpu.memory_space<vmem>>, vector<64x128xbf16>
    %c0_5 = arith.constant 0 : index
    %c0_6 = arith.constant 0 : index
    %4 = vector.load %arg5[%c0_5, %c0_6] : memref<128x128xbf16, #tpu.memory_space<vmem>>, vector<128x128xbf16>
    %cst_7 = arith.constant dense<0.000000e+00> : vector<64x128xf32>
    %5 = tpu.matmul %3, %4, %cst_7 {dimension_numbers = #tpu.dot_dimension_numbers<[1], [0], [0], [1], [0, 0, 1, 1], [], []>} : vector<64x128xbf16>, vector<128x128xbf16>, vector<64x128xf32> -> vector<64x128xf32>
    %6 = arith.addf %2, %5 : vector<64x128xf32>
    %c0_8 = arith.constant 0 : index
    %c0_9 = arith.constant 0 : index
    %7 = vector.load %arg6[%c0_8, %c0_9] : memref<1x128xf32, #tpu.memory_space<vmem>>, vector<1x128xf32>
    %8 = vector.broadcast %7 : vector<1x128xf32> to vector<64x128xf32>
    %9 = arith.addf %6, %8 : vector<64x128xf32>
    %cst_10 = arith.constant 0.000000e+00 : f32
    %10 = vector.broadcast %cst_10 : f32 to vector<64x128xf32>
    %11 = arith.maximumf %9, %10 : vector<64x128xf32>
    %c0_11 = arith.constant 0 : index
    %c0_12 = arith.constant 0 : index
    %12 = vector.load %arg7[%c0_11, %c0_12] : memref<64x128xf32, #tpu.memory_space<vmem>>, vector<64x128xf32>
    tpu.vector_store %arg7[%c0_11, %c0_12], %11 {strides = array<i32>} : memref<64x128xf32, #tpu.memory_space<vmem>>, vector<64x128xf32>,
    return
  }
  func.func @transform_0(%arg0: i32, %arg1: i32) -> (i32, i32) {
    %c0_i32 = arith.constant 0 : i32
    %c0_i32_0 = arith.constant 0 : i32
    return %arg0, %c0_i32 : i32, i32
  }
  func.func @transform_1(%arg0: i32, %arg1: i32) -> (i32, i32) {
    %c0_i32 = arith.constant 0 : i32
    %c0_i32_0 = arith.constant 0 : i32
    return %c0_i32, %arg1 : i32, i32
  }
  func.func @transform_2(%arg0: i32, %arg1: i32) -> (i32, i32) {
    %c0_i32 = arith.constant 0 : i32
    %c0_i32_0 = arith.constant 0 : i32
    return %arg0, %c0_i32 : i32, i32
  }
  func.func @transform_3(%arg0: i32, %arg1: i32) -> (i32, i32) {
    %c0_i32 = arith.constant 0 : i32
    %c0_i32_0 = arith.constant 0 : i32
    return %c0_i32, %arg1 : i32, i32
  }
  func.func @transform_4(%arg0: i32, %arg1: i32) -> (i32, i32) {
    %c0_i32 = arith.constant 0 : i32
    %c0_i32_0 = arith.constant 0 : i32
    return %c0_i32, %arg1 : i32, i32
  }
  func.func @transform_5(%arg0: i32, %arg1: i32) -> (i32, i32) {
    %c0_i32 = arith.constant 0 : i32
    return %arg0, %arg1 : i32, i32
  }
}

module attributes {stable_mosaic.version = 11 : i64} {
  func.func @_mm_kernel(%arg0: i32, %arg1: i32, %arg2: i32, %arg3: memref<64x384xbf16, #tpu.memory_space<vmem>>, %arg4: memref<384x64xbf16, #tpu.memory_space<vmem>>, %arg5: memref<1x64xf32, #tpu.memory_space<vmem>>, %arg6: memref<64x64xf32, #tpu.memory_space<vmem>>, %arg7: memref<64x64xf32, #tpu.memory_space<vmem>>) attributes {dimension_semantics = [#tpu.dimension_semantics<parallel>, #tpu.dimension_semantics<parallel>, #tpu.dimension_semantics<arbitrary>], iteration_bounds = array<i64: 1, 1, 1>, scalar_prefetch = 0 : i64, scratch_operands = 1 : i64, tpu.core_type = #tpu.core_type<tc>, window_params = [{transform_indices = @transform_0, window_bounds = array<i64: 64, 384>}, {transform_indices = @transform_1, window_bounds = array<i64: 384, 64>}, {transform_indices = @transform_2, window_bounds = array<i64: 1, 64>}, {transform_indices = @transform_3, window_bounds = array<i64: 64, 64>}]} {
    %c0_i32 = arith.constant 0 : i32
    %0 = arith.cmpi eq, %arg2, %c0_i32 : i32
    %1 = arith.extui %0 : i1 to i32
    %c0_i32_0 = arith.constant 0 : i32
    %2 = arith.cmpi ne, %1, %c0_i32_0 : i32
    scf.if %2 {
      %cst_10 = arith.constant 0.000000e+00 : f32
      %12 = vector.broadcast %cst_10 : f32 to vector<64x64xf32>
      %c0_11 = arith.constant 0 : index
      %c0_12 = arith.constant 0 : index
      %13 = vector.load %arg7[%c0_11, %c0_12] : memref<64x64xf32, #tpu.memory_space<vmem>>, vector<64x64xf32>
      tpu.vector_store %arg7[%c0_11, %c0_12], %12 {strides = array<i32>} : memref<64x64xf32, #tpu.memory_space<vmem>>, vector<64x64xf32>,
    } else {
    }
    %c0 = arith.constant 0 : index
    %c0_1 = arith.constant 0 : index
    %3 = vector.load %arg7[%c0, %c0_1] : memref<64x64xf32, #tpu.memory_space<vmem>>, vector<64x64xf32>
    %c0_2 = arith.constant 0 : index
    %c0_3 = arith.constant 0 : index
    %4 = vector.load %arg3[%c0_2, %c0_3] : memref<64x384xbf16, #tpu.memory_space<vmem>>, vector<64x384xbf16>
    %c0_4 = arith.constant 0 : index
    %c0_5 = arith.constant 0 : index
    %5 = vector.load %arg4[%c0_4, %c0_5] : memref<384x64xbf16, #tpu.memory_space<vmem>>, vector<384x64xbf16>
    %cst = arith.constant dense<0.000000e+00> : vector<64x64xf32>
    %6 = tpu.matmul %4, %5, %cst {dimension_numbers = #tpu.dot_dimension_numbers<[1], [0], [0], [1], [0, 0, 1, 1], [], []>} : vector<64x384xbf16>, vector<384x64xbf16>, vector<64x64xf32> -> vector<64x64xf32>
    %7 = arith.addf %3, %6 : vector<64x64xf32>
    %c0_6 = arith.constant 0 : index
    %c0_7 = arith.constant 0 : index
    %8 = vector.load %arg7[%c0_6, %c0_7] : memref<64x64xf32, #tpu.memory_space<vmem>>, vector<64x64xf32>
    tpu.vector_store %arg7[%c0_6, %c0_7], %7 {strides = array<i32>} : memref<64x64xf32, #tpu.memory_space<vmem>>, vector<64x64xf32>,
    %c0_i32_8 = arith.constant 0 : i32
    %9 = arith.cmpi eq, %arg2, %c0_i32_8 : i32
    %10 = arith.extui %9 : i1 to i32
    %c0_i32_9 = arith.constant 0 : i32
    %11 = arith.cmpi ne, %10, %c0_i32_9 : i32
    scf.if %11 {
      %c0_10 = arith.constant 0 : index
      %c0_11 = arith.constant 0 : index
      %12 = vector.load %arg7[%c0_10, %c0_11] : memref<64x64xf32, #tpu.memory_space<vmem>>, vector<64x64xf32>
      %c0_12 = arith.constant 0 : index
      %c0_13 = arith.constant 0 : index
      %13 = vector.load %arg5[%c0_12, %c0_13] : memref<1x64xf32, #tpu.memory_space<vmem>>, vector<1x64xf32>
      %14 = vector.broadcast %13 : vector<1x64xf32> to vector<64x64xf32>
      %15 = arith.addf %12, %14 : vector<64x64xf32>
      %cst_14 = arith.constant 0.000000e+00 : f32
      %16 = vector.broadcast %cst_14 : f32 to vector<64x64xf32>
      %17 = arith.maximumf %15, %16 : vector<64x64xf32>
      %c0_15 = arith.constant 0 : index
      %c0_16 = arith.constant 0 : index
      %18 = vector.load %arg6[%c0_15, %c0_16] : memref<64x64xf32, #tpu.memory_space<vmem>>, vector<64x64xf32>
      tpu.vector_store %arg6[%c0_15, %c0_16], %17 {strides = array<i32>} : memref<64x64xf32, #tpu.memory_space<vmem>>, vector<64x64xf32>,
    } else {
    }
    return
  }
  func.func @transform_0(%arg0: i32, %arg1: i32, %arg2: i32) -> (i32, i32) {
    %c0_i32 = arith.constant 0 : i32
    return %arg0, %arg2 : i32, i32
  }
  func.func @transform_1(%arg0: i32, %arg1: i32, %arg2: i32) -> (i32, i32) {
    %c0_i32 = arith.constant 0 : i32
    return %arg2, %arg1 : i32, i32
  }
  func.func @transform_2(%arg0: i32, %arg1: i32, %arg2: i32) -> (i32, i32) {
    %c0_i32 = arith.constant 0 : i32
    %c0_i32_0 = arith.constant 0 : i32
    return %c0_i32, %arg1 : i32, i32
  }
  func.func @transform_3(%arg0: i32, %arg1: i32, %arg2: i32) -> (i32, i32) {
    %c0_i32 = arith.constant 0 : i32
    return %arg0, %arg1 : i32, i32
  }
}

module attributes {stable_mosaic.version = 11 : i64} {
  func.func @_mm2_kernel(%arg0: i32, %arg1: i32, %arg2: memref<64x128xbf16, #tpu.memory_space<vmem>>, %arg3: memref<128x64xbf16, #tpu.memory_space<vmem>>, %arg4: memref<64x64xbf16, #tpu.memory_space<vmem>>, %arg5: memref<64x64xbf16, #tpu.memory_space<vmem>>, %arg6: memref<1x64xf32, #tpu.memory_space<vmem>>, %arg7: memref<64x64xf32, #tpu.memory_space<vmem>>) attributes {dimension_semantics = [#tpu.dimension_semantics<parallel>, #tpu.dimension_semantics<parallel>], iteration_bounds = array<i64: 1, 1>, scalar_prefetch = 0 : i64, scratch_operands = 0 : i64, tpu.core_type = #tpu.core_type<tc>, window_params = [{transform_indices = @transform_0, window_bounds = array<i64: 64, 128>}, {transform_indices = @transform_1, window_bounds = array<i64: 128, 64>}, {transform_indices = @transform_2, window_bounds = array<i64: 64, 64>}, {transform_indices = @transform_3, window_bounds = array<i64: 64, 64>}, {transform_indices = @transform_4, window_bounds = array<i64: 1, 64>}, {transform_indices = @transform_5, window_bounds = array<i64: 64, 64>}]} {
    %c0 = arith.constant 0 : index
    %c0_0 = arith.constant 0 : index
    %0 = vector.load %arg2[%c0, %c0_0] : memref<64x128xbf16, #tpu.memory_space<vmem>>, vector<64x128xbf16>
    %c0_1 = arith.constant 0 : index
    %c0_2 = arith.constant 0 : index
    %1 = vector.load %arg3[%c0_1, %c0_2] : memref<128x64xbf16, #tpu.memory_space<vmem>>, vector<128x64xbf16>
    %cst = arith.constant dense<0.000000e+00> : vector<64x64xf32>
    %2 = tpu.matmul %0, %1, %cst {dimension_numbers = #tpu.dot_dimension_numbers<[1], [0], [0], [1], [0, 0, 1, 1], [], []>} : vector<64x128xbf16>, vector<128x64xbf16>, vector<64x64xf32> -> vector<64x64xf32>
    %c0_3 = arith.constant 0 : index
    %c0_4 = arith.constant 0 : index
    %3 = vector.load %arg4[%c0_3, %c0_4] : memref<64x64xbf16, #tpu.memory_space<vmem>>, vector<64x64xbf16>
    %c0_5 = arith.constant 0 : index
    %c0_6 = arith.constant 0 : index
    %4 = vector.load %arg5[%c0_5, %c0_6] : memref<64x64xbf16, #tpu.memory_space<vmem>>, vector<64x64xbf16>
    %cst_7 = arith.constant dense<0.000000e+00> : vector<64x64xf32>
    %5 = tpu.matmul %3, %4, %cst_7 {dimension_numbers = #tpu.dot_dimension_numbers<[1], [0], [0], [1], [0, 0, 1, 1], [], []>} : vector<64x64xbf16>, vector<64x64xbf16>, vector<64x64xf32> -> vector<64x64xf32>
    %6 = arith.addf %2, %5 : vector<64x64xf32>
    %c0_8 = arith.constant 0 : index
    %c0_9 = arith.constant 0 : index
    %7 = vector.load %arg6[%c0_8, %c0_9] : memref<1x64xf32, #tpu.memory_space<vmem>>, vector<1x64xf32>
    %8 = vector.broadcast %7 : vector<1x64xf32> to vector<64x64xf32>
    %9 = arith.addf %6, %8 : vector<64x64xf32>
    %cst_10 = arith.constant 0.000000e+00 : f32
    %10 = vector.broadcast %cst_10 : f32 to vector<64x64xf32>
    %11 = arith.maximumf %9, %10 : vector<64x64xf32>
    %c0_11 = arith.constant 0 : index
    %c0_12 = arith.constant 0 : index
    %12 = vector.load %arg7[%c0_11, %c0_12] : memref<64x64xf32, #tpu.memory_space<vmem>>, vector<64x64xf32>
    tpu.vector_store %arg7[%c0_11, %c0_12], %11 {strides = array<i32>} : memref<64x64xf32, #tpu.memory_space<vmem>>, vector<64x64xf32>,
    return
  }
  func.func @transform_0(%arg0: i32, %arg1: i32) -> (i32, i32) {
    %c0_i32 = arith.constant 0 : i32
    %c0_i32_0 = arith.constant 0 : i32
    return %arg0, %c0_i32 : i32, i32
  }
  func.func @transform_1(%arg0: i32, %arg1: i32) -> (i32, i32) {
    %c0_i32 = arith.constant 0 : i32
    %c0_i32_0 = arith.constant 0 : i32
    return %c0_i32, %arg1 : i32, i32
  }
  func.func @transform_2(%arg0: i32, %arg1: i32) -> (i32, i32) {
    %c0_i32 = arith.constant 0 : i32
    %c0_i32_0 = arith.constant 0 : i32
    return %arg0, %c0_i32 : i32, i32
  }
  func.func @transform_3(%arg0: i32, %arg1: i32) -> (i32, i32) {
    %c0_i32 = arith.constant 0 : i32
    %c0_i32_0 = arith.constant 0 : i32
    return %c0_i32, %arg1 : i32, i32
  }
  func.func @transform_4(%arg0: i32, %arg1: i32) -> (i32, i32) {
    %c0_i32 = arith.constant 0 : i32
    %c0_i32_0 = arith.constant 0 : i32
    return %c0_i32, %arg1 : i32, i32
  }
  func.func @transform_5(%arg0: i32, %arg1: i32) -> (i32, i32) {
    %c0_i32 = arith.constant 0 : i32
    return %arg0, %arg1 : i32, i32
  }
}

module attributes {stable_mosaic.version = 11 : i64} {
  func.func @_mm_kernel(%arg0: i32, %arg1: i32, %arg2: i32, %arg3: memref<64x64xbf16, #tpu.memory_space<vmem>>, %arg4: memref<64x128xbf16, #tpu.memory_space<vmem>>, %arg5: memref<1x128xf32, #tpu.memory_space<vmem>>, %arg6: memref<64x128xf32, #tpu.memory_space<vmem>>, %arg7: memref<64x128xf32, #tpu.memory_space<vmem>>) attributes {dimension_semantics = [#tpu.dimension_semantics<parallel>, #tpu.dimension_semantics<parallel>, #tpu.dimension_semantics<arbitrary>], iteration_bounds = array<i64: 1, 1, 1>, scalar_prefetch = 0 : i64, scratch_operands = 1 : i64, tpu.core_type = #tpu.core_type<tc>, window_params = [{transform_indices = @transform_0, window_bounds = array<i64: 64, 64>}, {transform_indices = @transform_1, window_bounds = array<i64: 64, 128>}, {transform_indices = @transform_2, window_bounds = array<i64: 1, 128>}, {transform_indices = @transform_3, window_bounds = array<i64: 64, 128>}]} {
    %c0_i32 = arith.constant 0 : i32
    %0 = arith.cmpi eq, %arg2, %c0_i32 : i32
    %1 = arith.extui %0 : i1 to i32
    %c0_i32_0 = arith.constant 0 : i32
    %2 = arith.cmpi ne, %1, %c0_i32_0 : i32
    scf.if %2 {
      %cst_10 = arith.constant 0.000000e+00 : f32
      %12 = vector.broadcast %cst_10 : f32 to vector<64x128xf32>
      %c0_11 = arith.constant 0 : index
      %c0_12 = arith.constant 0 : index
      %13 = vector.load %arg7[%c0_11, %c0_12] : memref<64x128xf32, #tpu.memory_space<vmem>>, vector<64x128xf32>
      tpu.vector_store %arg7[%c0_11, %c0_12], %12 {strides = array<i32>} : memref<64x128xf32, #tpu.memory_space<vmem>>, vector<64x128xf32>,
    } else {
    }
    %c0 = arith.constant 0 : index
    %c0_1 = arith.constant 0 : index
    %3 = vector.load %arg7[%c0, %c0_1] : memref<64x128xf32, #tpu.memory_space<vmem>>, vector<64x128xf32>
    %c0_2 = arith.constant 0 : index
    %c0_3 = arith.constant 0 : index
    %4 = vector.load %arg3[%c0_2, %c0_3] : memref<64x64xbf16, #tpu.memory_space<vmem>>, vector<64x64xbf16>
    %c0_4 = arith.constant 0 : index
    %c0_5 = arith.constant 0 : index
    %5 = vector.load %arg4[%c0_4, %c0_5] : memref<64x128xbf16, #tpu.memory_space<vmem>>, vector<64x128xbf16>
    %cst = arith.constant dense<0.000000e+00> : vector<64x128xf32>
    %6 = tpu.matmul %4, %5, %cst {dimension_numbers = #tpu.dot_dimension_numbers<[1], [0], [0], [1], [0, 0, 1, 1], [], []>} : vector<64x64xbf16>, vector<64x128xbf16>, vector<64x128xf32> -> vector<64x128xf32>
    %7 = arith.addf %3, %6 : vector<64x128xf32>
    %c0_6 = arith.constant 0 : index
    %c0_7 = arith.constant 0 : index
    %8 = vector.load %arg7[%c0_6, %c0_7] : memref<64x128xf32, #tpu.memory_space<vmem>>, vector<64x128xf32>
    tpu.vector_store %arg7[%c0_6, %c0_7], %7 {strides = array<i32>} : memref<64x128xf32, #tpu.memory_space<vmem>>, vector<64x128xf32>,
    %c0_i32_8 = arith.constant 0 : i32
    %9 = arith.cmpi eq, %arg2, %c0_i32_8 : i32
    %10 = arith.extui %9 : i1 to i32
    %c0_i32_9 = arith.constant 0 : i32
    %11 = arith.cmpi ne, %10, %c0_i32_9 : i32
    scf.if %11 {
      %c0_10 = arith.constant 0 : index
      %c0_11 = arith.constant 0 : index
      %12 = vector.load %arg7[%c0_10, %c0_11] : memref<64x128xf32, #tpu.memory_space<vmem>>, vector<64x128xf32>
      %c0_12 = arith.constant 0 : index
      %c0_13 = arith.constant 0 : index
      %13 = vector.load %arg5[%c0_12, %c0_13] : memref<1x128xf32, #tpu.memory_space<vmem>>, vector<1x128xf32>
      %14 = vector.broadcast %13 : vector<1x128xf32> to vector<64x128xf32>
      %15 = arith.addf %12, %14 : vector<64x128xf32>
      %16 = math.tanh %15 : vector<64x128xf32>
      %c0_14 = arith.constant 0 : index
      %c0_15 = arith.constant 0 : index
      %17 = vector.load %arg6[%c0_14, %c0_15] : memref<64x128xf32, #tpu.memory_space<vmem>>, vector<64x128xf32>
      tpu.vector_store %arg6[%c0_14, %c0_15], %16 {strides = array<i32>} : memref<64x128xf32, #tpu.memory_space<vmem>>, vector<64x128xf32>,
    } else {
    }
    return
  }
  func.func @transform_0(%arg0: i32, %arg1: i32, %arg2: i32) -> (i32, i32) {
    %c0_i32 = arith.constant 0 : i32
    return %arg0, %arg2 : i32, i32
  }
  func.func @transform_1(%arg0: i32, %arg1: i32, %arg2: i32) -> (i32, i32) {
    %c0_i32 = arith.constant 0 : i32
    return %arg2, %arg1 : i32, i32
  }
  func.func @transform_2(%arg0: i32, %arg1: i32, %arg2: i32) -> (i32, i32) {
    %c0_i32 = arith.constant 0 : i32
    %c0_i32_0 = arith.constant 0 : i32
    return %c0_i32, %arg1 : i32, i32
  }
  func.func @transform_3(%arg0: i32, %arg1: i32, %arg2: i32) -> (i32, i32) {
    %c0_i32 = arith.constant 0 : i32
    return %arg0, %arg1 : i32, i32
  }
}

module attributes {stable_mosaic.version = 11 : i64} {
  func.func @_mm_kernel(%arg0: i32, %arg1: i32, %arg2: i32, %arg3: memref<256x2xbf16, #tpu.memory_space<vmem>>, %arg4: memref<2x32xbf16, #tpu.memory_space<vmem>>, %arg5: memref<1x32xf32, #tpu.memory_space<vmem>>, %arg6: memref<256x32xf32, #tpu.memory_space<vmem>>, %arg7: memref<256x32xf32, #tpu.memory_space<vmem>>) attributes {dimension_semantics = [#tpu.dimension_semantics<parallel>, #tpu.dimension_semantics<parallel>, #tpu.dimension_semantics<arbitrary>], iteration_bounds = array<i64: 4, 1, 1>, scalar_prefetch = 0 : i64, scratch_operands = 1 : i64, tpu.core_type = #tpu.core_type<tc>, window_params = [{transform_indices = @transform_0, window_bounds = array<i64: 256, 2>}, {transform_indices = @transform_1, window_bounds = array<i64: 2, 32>}, {transform_indices = @transform_2, window_bounds = array<i64: 1, 32>}, {transform_indices = @transform_3, window_bounds = array<i64: 256, 32>}]} {
    %c0_i32 = arith.constant 0 : i32
    %0 = arith.cmpi eq, %arg2, %c0_i32 : i32
    %1 = arith.extui %0 : i1 to i32
    %c0_i32_0 = arith.constant 0 : i32
    %2 = arith.cmpi ne, %1, %c0_i32_0 : i32
    scf.if %2 {
      %cst_10 = arith.constant 0.000000e+00 : f32
      %12 = vector.broadcast %cst_10 : f32 to vector<256x32xf32>
      %c0_11 = arith.constant 0 : index
      %c0_12 = arith.constant 0 : index
      %13 = vector.load %arg7[%c0_11, %c0_12] : memref<256x32xf32, #tpu.memory_space<vmem>>, vector<256x32xf32>
      tpu.vector_store %arg7[%c0_11, %c0_12], %12 {strides = array<i32>} : memref<256x32xf32, #tpu.memory_space<vmem>>, vector<256x32xf32>,
    } else {
    }
    %c0 = arith.constant 0 : index
    %c0_1 = arith.constant 0 : index
    %3 = vector.load %arg7[%c0, %c0_1] : memref<256x32xf32, #tpu.memory_space<vmem>>, vector<256x32xf32>
    %c0_2 = arith.constant 0 : index
    %c0_3 = arith.constant 0 : index
    %4 = vector.load %arg3[%c0_2, %c0_3] : memref<256x2xbf16, #tpu.memory_space<vmem>>, vector<256x2xbf16>
    %c0_4 = arith.constant 0 : index
    %c0_5 = arith.constant 0 : index
    %5 = vector.load %arg4[%c0_4, %c0_5] : memref<2x32xbf16, #tpu.memory_space<vmem>>, vector<2x32xbf16>
    %cst = arith.constant dense<0.000000e+00> : vector<256x32xf32>
    %6 = tpu.matmul %4, %5, %cst {dimension_numbers = #tpu.dot_dimension_numbers<[1], [0], [0], [1], [0, 0, 1, 1], [], []>} : vector<256x2xbf16>, vector<2x32xbf16>, vector<256x32xf32> -> vector<256x32xf32>
    %7 = arith.addf %3, %6 : vector<256x32xf32>
    %c0_6 = arith.constant 0 : index
    %c0_7 = arith.constant 0 : index
    %8 = vector.load %arg7[%c0_6, %c0_7] : memref<256x32xf32, #tpu.memory_space<vmem>>, vector<256x32xf32>
    tpu.vector_store %arg7[%c0_6, %c0_7], %7 {strides = array<i32>} : memref<256x32xf32, #tpu.memory_space<vmem>>, vector<256x32xf32>,
    %c0_i32_8 = arith.constant 0 : i32
    %9 = arith.cmpi eq, %arg2, %c0_i32_8 : i32
    %10 = arith.extui %9 : i1 to i32
    %c0_i32_9 = arith.constant 0 : i32
    %11 = arith.cmpi ne, %10, %c0_i32_9 : i32
    scf.if %11 {
      %c0_10 = arith.constant 0 : index
      %c0_11 = arith.constant 0 : index
      %12 = vector.load %arg7[%c0_10, %c0_11] : memref<256x32xf32, #tpu.memory_space<vmem>>, vector<256x32xf32>
      %c0_12 = arith.constant 0 : index
      %c0_13 = arith.constant 0 : index
      %13 = vector.load %arg5[%c0_12, %c0_13] : memref<1x32xf32, #tpu.memory_space<vmem>>, vector<1x32xf32>
      %14 = vector.broadcast %13 : vector<1x32xf32> to vector<256x32xf32>
      %15 = arith.addf %12, %14 : vector<256x32xf32>
      %cst_14 = arith.constant 0.000000e+00 : f32
      %16 = vector.broadcast %cst_14 : f32 to vector<256x32xf32>
      %17 = arith.maximumf %15, %16 : vector<256x32xf32>
      %c0_15 = arith.constant 0 : index
      %c0_16 = arith.constant 0 : index
      %18 = vector.load %arg6[%c0_15, %c0_16] : memref<256x32xf32, #tpu.memory_space<vmem>>, vector<256x32xf32>
      tpu.vector_store %arg6[%c0_15, %c0_16], %17 {strides = array<i32>} : memref<256x32xf32, #tpu.memory_space<vmem>>, vector<256x32xf32>,
    } else {
    }
    return
  }
  func.func @transform_0(%arg0: i32, %arg1: i32, %arg2: i32) -> (i32, i32) {
    %c0_i32 = arith.constant 0 : i32
    return %arg0, %arg2 : i32, i32
  }
  func.func @transform_1(%arg0: i32, %arg1: i32, %arg2: i32) -> (i32, i32) {
    %c0_i32 = arith.constant 0 : i32
    return %arg2, %arg1 : i32, i32
  }
  func.func @transform_2(%arg0: i32, %arg1: i32, %arg2: i32) -> (i32, i32) {
    %c0_i32 = arith.constant 0 : i32
    %c0_i32_0 = arith.constant 0 : i32
    return %c0_i32, %arg1 : i32, i32
  }
  func.func @transform_3(%arg0: i32, %arg1: i32, %arg2: i32) -> (i32, i32) {
    %c0_i32 = arith.constant 0 : i32
    return %arg0, %arg1 : i32, i32
  }
}

module attributes {stable_mosaic.version = 11 : i64} {
  func.func @_mm_kernel(%arg0: i32, %arg1: i32, %arg2: i32, %arg3: memref<64x512xbf16, #tpu.memory_space<vmem>>, %arg4: memref<512x256xbf16, #tpu.memory_space<vmem>>, %arg5: memref<1x256xf32, #tpu.memory_space<vmem>>, %arg6: memref<64x256xf32, #tpu.memory_space<vmem>>, %arg7: memref<64x256xf32, #tpu.memory_space<vmem>>) attributes {dimension_semantics = [#tpu.dimension_semantics<parallel>, #tpu.dimension_semantics<parallel>, #tpu.dimension_semantics<arbitrary>], iteration_bounds = array<i64: 1, 2, 1>, scalar_prefetch = 0 : i64, scratch_operands = 1 : i64, tpu.core_type = #tpu.core_type<tc>, window_params = [{transform_indices = @transform_0, window_bounds = array<i64: 64, 512>}, {transform_indices = @transform_1, window_bounds = array<i64: 512, 256>}, {transform_indices = @transform_2, window_bounds = array<i64: 1, 256>}, {transform_indices = @transform_3, window_bounds = array<i64: 64, 256>}]} {
    %c0_i32 = arith.constant 0 : i32
    %0 = arith.cmpi eq, %arg2, %c0_i32 : i32
    %1 = arith.extui %0 : i1 to i32
    %c0_i32_0 = arith.constant 0 : i32
    %2 = arith.cmpi ne, %1, %c0_i32_0 : i32
    scf.if %2 {
      %cst_10 = arith.constant 0.000000e+00 : f32
      %12 = vector.broadcast %cst_10 : f32 to vector<64x256xf32>
      %c0_11 = arith.constant 0 : index
      %c0_12 = arith.constant 0 : index
      %13 = vector.load %arg7[%c0_11, %c0_12] : memref<64x256xf32, #tpu.memory_space<vmem>>, vector<64x256xf32>
      tpu.vector_store %arg7[%c0_11, %c0_12], %12 {strides = array<i32>} : memref<64x256xf32, #tpu.memory_space<vmem>>, vector<64x256xf32>,
    } else {
    }
    %c0 = arith.constant 0 : index
    %c0_1 = arith.constant 0 : index
    %3 = vector.load %arg7[%c0, %c0_1] : memref<64x256xf32, #tpu.memory_space<vmem>>, vector<64x256xf32>
    %c0_2 = arith.constant 0 : index
    %c0_3 = arith.constant 0 : index
    %4 = vector.load %arg3[%c0_2, %c0_3] : memref<64x512xbf16, #tpu.memory_space<vmem>>, vector<64x512xbf16>
    %c0_4 = arith.constant 0 : index
    %c0_5 = arith.constant 0 : index
    %5 = vector.load %arg4[%c0_4, %c0_5] : memref<512x256xbf16, #tpu.memory_space<vmem>>, vector<512x256xbf16>
    %cst = arith.constant dense<0.000000e+00> : vector<64x256xf32>
    %6 = tpu.matmul %4, %5, %cst {dimension_numbers = #tpu.dot_dimension_numbers<[1], [0], [0], [1], [0, 0, 1, 1], [], []>} : vector<64x512xbf16>, vector<512x256xbf16>, vector<64x256xf32> -> vector<64x256xf32>
    %7 = arith.addf %3, %6 : vector<64x256xf32>
    %c0_6 = arith.constant 0 : index
    %c0_7 = arith.constant 0 : index
    %8 = vector.load %arg7[%c0_6, %c0_7] : memref<64x256xf32, #tpu.memory_space<vmem>>, vector<64x256xf32>
    tpu.vector_store %arg7[%c0_6, %c0_7], %7 {strides = array<i32>} : memref<64x256xf32, #tpu.memory_space<vmem>>, vector<64x256xf32>,
    %c0_i32_8 = arith.constant 0 : i32
    %9 = arith.cmpi eq, %arg2, %c0_i32_8 : i32
    %10 = arith.extui %9 : i1 to i32
    %c0_i32_9 = arith.constant 0 : i32
    %11 = arith.cmpi ne, %10, %c0_i32_9 : i32
    scf.if %11 {
      %c0_10 = arith.constant 0 : index
      %c0_11 = arith.constant 0 : index
      %12 = vector.load %arg7[%c0_10, %c0_11] : memref<64x256xf32, #tpu.memory_space<vmem>>, vector<64x256xf32>
      %c0_12 = arith.constant 0 : index
      %c0_13 = arith.constant 0 : index
      %13 = vector.load %arg5[%c0_12, %c0_13] : memref<1x256xf32, #tpu.memory_space<vmem>>, vector<1x256xf32>
      %14 = vector.broadcast %13 : vector<1x256xf32> to vector<64x256xf32>
      %15 = arith.addf %12, %14 : vector<64x256xf32>
      %cst_14 = arith.constant 0.000000e+00 : f32
      %16 = vector.broadcast %cst_14 : f32 to vector<64x256xf32>
      %17 = arith.maximumf %15, %16 : vector<64x256xf32>
      %c0_15 = arith.constant 0 : index
      %c0_16 = arith.constant 0 : index
      %18 = vector.load %arg6[%c0_15, %c0_16] : memref<64x256xf32, #tpu.memory_space<vmem>>, vector<64x256xf32>
      tpu.vector_store %arg6[%c0_15, %c0_16], %17 {strides = array<i32>} : memref<64x256xf32, #tpu.memory_space<vmem>>, vector<64x256xf32>,
    } else {
    }
    return
  }
  func.func @transform_0(%arg0: i32, %arg1: i32, %arg2: i32) -> (i32, i32) {
    %c0_i32 = arith.constant 0 : i32
    return %arg0, %arg2 : i32, i32
  }
  func.func @transform_1(%arg0: i32, %arg1: i32, %arg2: i32) -> (i32, i32) {
    %c0_i32 = arith.constant 0 : i32
    return %arg2, %arg1 : i32, i32
  }
  func.func @transform_2(%arg0: i32, %arg1: i32, %arg2: i32) -> (i32, i32) {
    %c0_i32 = arith.constant 0 : i32
    %c0_i32_0 = arith.constant 0 : i32
    return %c0_i32, %arg1 : i32, i32
  }
  func.func @transform_3(%arg0: i32, %arg1: i32, %arg2: i32) -> (i32, i32) {
    %c0_i32 = arith.constant 0 : i32
    return %arg0, %arg1 : i32, i32
  }
}

module attributes {stable_mosaic.version = 11 : i64} {
  func.func @_wire_argmax_kernel(%arg0: i32, %arg1: i32, %arg2: memref<64x512xbf16, #tpu.memory_space<vmem>>, %arg3: memref<512x128xbf16, #tpu.memory_space<vmem>>, %arg4: memref<1x128xf32, #tpu.memory_space<vmem>>, %arg5: memref<64x128xf32, #tpu.memory_space<vmem>>, %arg6: memref<64x1xi32, #tpu.memory_space<vmem>>, %arg7: memref<64x1xf32, #tpu.memory_space<vmem>>, %arg8: memref<64x1xi32, #tpu.memory_space<vmem>>) attributes {dimension_semantics = [#tpu.dimension_semantics<parallel>, #tpu.dimension_semantics<arbitrary>], iteration_bounds = array<i64: 1, 29>, scalar_prefetch = 0 : i64, scratch_operands = 2 : i64, tpu.core_type = #tpu.core_type<tc>, window_params = [{transform_indices = @transform_0, window_bounds = array<i64: 64, 512>}, {transform_indices = @transform_1, window_bounds = array<i64: 512, 128>}, {transform_indices = @transform_2, window_bounds = array<i64: 1, 128>}, {transform_indices = @transform_3, window_bounds = array<i64: 64, 128>}, {transform_indices = @transform_4, window_bounds = array<i64: 64, 1>}]} {
    %c0_i32 = arith.constant 0 : i32
    %0 = arith.cmpi eq, %arg1, %c0_i32 : i32
    %1 = arith.extui %0 : i1 to i32
    %c0_i32_0 = arith.constant 0 : i32
    %2 = arith.cmpi ne, %1, %c0_i32_0 : i32
    scf.if %2 {
      %cst_22 = arith.constant 0xFF800000 : f32
      %34 = vector.broadcast %cst_22 : f32 to vector<64x1xf32>
      %c0_23 = arith.constant 0 : index
      %c0_24 = arith.constant 0 : index
      %35 = vector.load %arg7[%c0_23, %c0_24] : memref<64x1xf32, #tpu.memory_space<vmem>>, vector<64x1xf32>
      tpu.vector_store %arg7[%c0_23, %c0_24], %34 {strides = array<i32>} : memref<64x1xf32, #tpu.memory_space<vmem>>, vector<64x1xf32>,
      %c0_i32_25 = arith.constant 0 : i32
      %36 = vector.broadcast %c0_i32_25 : i32 to vector<64x1xi32>
      %c0_26 = arith.constant 0 : index
      %c0_27 = arith.constant 0 : index
      %37 = vector.load %arg8[%c0_26, %c0_27] : memref<64x1xi32, #tpu.memory_space<vmem>>, vector<64x1xi32>
      tpu.vector_store %arg8[%c0_26, %c0_27], %36 {strides = array<i32>} : memref<64x1xi32, #tpu.memory_space<vmem>>, vector<64x1xi32>,
    } else {
    }
    %c0 = arith.constant 0 : index
    %c0_1 = arith.constant 0 : index
    %3 = vector.load %arg2[%c0, %c0_1] : memref<64x512xbf16, #tpu.memory_space<vmem>>, vector<64x512xbf16>
    %c0_2 = arith.constant 0 : index
    %c0_3 = arith.constant 0 : index
    %4 = vector.load %arg3[%c0_2, %c0_3] : memref<512x128xbf16, #tpu.memory_space<vmem>>, vector<512x128xbf16>
    %cst = arith.constant dense<0.000000e+00> : vector<64x128xf32>
    %5 = tpu.matmul %3, %4, %cst {dimension_numbers = #tpu.dot_dimension_numbers<[1], [0], [0], [1], [0, 0, 1, 1], [], []>} : vector<64x512xbf16>, vector<512x128xbf16>, vector<64x128xf32> -> vector<64x128xf32>
    %c0_4 = arith.constant 0 : index
    %c0_5 = arith.constant 0 : index
    %6 = vector.load %arg4[%c0_4, %c0_5] : memref<1x128xf32, #tpu.memory_space<vmem>>, vector<1x128xf32>
    %7 = vector.broadcast %6 : vector<1x128xf32> to vector<64x128xf32>
    %8 = arith.addf %5, %7 : vector<64x128xf32>
    %c0_6 = arith.constant 0 : index
    %c0_7 = arith.constant 0 : index
    %9 = vector.load %arg5[%c0_6, %c0_7] : memref<64x128xf32, #tpu.memory_space<vmem>>, vector<64x128xf32>
    %10 = arith.addf %8, %9 : vector<64x128xf32>
    %cst_8 = arith.constant dense<0xFF800000> : vector<64xf32>
    %11 = vector.multi_reduction <maximumf>, %10, %cst_8 [1] : vector<64x128xf32> to vector<64xf32>
    %12 = vector.shape_cast %11 : vector<64xf32> to vector<64x1xf32>
    %13 = tpu.iota {dimensions = array<i32: 1>} : vector<64x128xi32>
    %14 = vector.broadcast %12 : vector<64x1xf32> to vector<64x128xf32>
    %15 = arith.cmpf oeq, %10, %14 : vector<64x128xf32>
    %c128_i32 = arith.constant 128 : i32
    %16 = vector.broadcast %c128_i32 : i32 to vector<64x128xi32>
    %17 = arith.select %15, %13, %16 : vector<64x128xi1>, vector<64x128xi32>
    %cst_9 = arith.constant dense<2147483647> : vector<64xi32>
    %18 = vector.multi_reduction <minsi>, %17, %cst_9 [1] : vector<64x128xi32> to vector<64xi32>
    %19 = vector.shape_cast %18 : vector<64xi32> to vector<64x1xi32>
    %c128_i32_10 = arith.constant 128 : i32
    %20 = arith.muli %arg1, %c128_i32_10 : i32
    %21 = vector.broadcast %20 : i32 to vector<64x1xi32>
    %22 = arith.addi %19, %21 : vector<64x1xi32>
    %c0_11 = arith.constant 0 : index
    %c0_12 = arith.constant 0 : index
    %23 = vector.load %arg7[%c0_11, %c0_12] : memref<64x1xf32, #tpu.memory_space<vmem>>, vector<64x1xf32>
    %24 = arith.cmpf ogt, %12, %23 : vector<64x1xf32>
    %c0_13 = arith.constant 0 : index
    %c0_14 = arith.constant 0 : index
    %25 = vector.load %arg8[%c0_13, %c0_14] : memref<64x1xi32, #tpu.memory_space<vmem>>, vector<64x1xi32>
    %26 = arith.select %24, %22, %25 : vector<64x1xi1>, vector<64x1xi32>
    %c0_15 = arith.constant 0 : index
    %c0_16 = arith.constant 0 : index
    %27 = vector.load %arg8[%c0_15, %c0_16] : memref<64x1xi32, #tpu.memory_space<vmem>>, vector<64x1xi32>
    tpu.vector_store %arg8[%c0_15, %c0_16], %26 {strides = array<i32>} : memref<64x1xi32, #tpu.memory_space<vmem>>, vector<64x1xi32>,
    %c0_17 = arith.constant 0 : index
    %c0_18 = arith.constant 0 : index
    %28 = vector.load %arg7[%c0_17, %c0_18] : memref<64x1xf32, #tpu.memory_space<vmem>>, vector<64x1xf32>
    %29 = arith.maximumf %12, %28 : vector<64x1xf32>
    %c0_19 = arith.constant 0 : index
    %c0_20 = arith.constant 0 : index
    %30 = vector.load %arg7[%c0_19, %c0_20] : memref<64x1xf32, #tpu.memory_space<vmem>>, vector<64x1xf32>
    tpu.vector_store %arg7[%c0_19, %c0_20], %29 {strides = array<i32>} : memref<64x1xf32, #tpu.memory_space<vmem>>, vector<64x1xf32>,
    %c28_i32 = arith.constant 28 : i32
    %31 = arith.cmpi eq, %arg1, %c28_i32 : i32
    %32 = arith.extui %31 : i1 to i32
    %c0_i32_21 = arith.constant 0 : i32
    %33 = arith.cmpi ne, %32, %c0_i32_21 : i32
    scf.if %33 {
      %c0_22 = arith.constant 0 : index
      %c0_23 = arith.constant 0 : index
      %34 = vector.load %arg8[%c0_22, %c0_23] : memref<64x1xi32, #tpu.memory_space<vmem>>, vector<64x1xi32>
      %c0_24 = arith.constant 0 : index
      %c0_25 = arith.constant 0 : index
      %35 = vector.load %arg6[%c0_24, %c0_25] : memref<64x1xi32, #tpu.memory_space<vmem>>, vector<64x1xi32>
      tpu.vector_store %arg6[%c0_24, %c0_25], %34 {strides = array<i32>} : memref<64x1xi32, #tpu.memory_space<vmem>>, vector<64x1xi32>,
    } else {
    }
    return
  }
  func.func @transform_0(%arg0: i32, %arg1: i32) -> (i32, i32) {
    %c0_i32 = arith.constant 0 : i32
    %c0_i32_0 = arith.constant 0 : i32
    return %arg0, %c0_i32 : i32, i32
  }
  func.func @transform_1(%arg0: i32, %arg1: i32) -> (i32, i32) {
    %c0_i32 = arith.constant 0 : i32
    %c0_i32_0 = arith.constant 0 : i32
    return %c0_i32, %arg1 : i32, i32
  }
  func.func @transform_2(%arg0: i32, %arg1: i32) -> (i32, i32) {
    %c0_i32 = arith.constant 0 : i32
    %c0_i32_0 = arith.constant 0 : i32
    return %c0_i32, %arg1 : i32, i32
  }
  func.func @transform_3(%arg0: i32, %arg1: i32) -> (i32, i32) {
    %c0_i32 = arith.constant 0 : i32
    return %arg0, %arg1 : i32, i32
  }
  func.func @transform_4(%arg0: i32, %arg1: i32) -> (i32, i32) {
    %c0_i32 = arith.constant 0 : i32
    %c0_i32_0 = arith.constant 0 : i32
    return %arg0, %c0_i32 : i32, i32
  }
}

module attributes {stable_mosaic.version = 11 : i64} {
  func.func @_one_hot_kernel(%arg0: i32, %arg1: i32, %arg2: memref<1x1x32xi32, #tpu.memory_space<vmem>>, %arg3: memref<1x3606x32xf32, #tpu.memory_space<vmem>>) attributes {dimension_semantics = [#tpu.dimension_semantics<parallel>, #tpu.dimension_semantics<parallel>], iteration_bounds = array<i64: 2, 1>, scalar_prefetch = 0 : i64, scratch_operands = 0 : i64, tpu.core_type = #tpu.core_type<tc>, window_params = [{transform_indices = @transform_0, window_bounds = array<i64: 1, 1, 32>}, {transform_indices = @transform_1, window_bounds = array<i64: 1, 3606, 32>}]} {
    %0 = tpu.iota {dimensions = array<i32: 1>} : vector<1x3606x32xi32>
    %c0 = arith.constant 0 : index
    %c0_0 = arith.constant 0 : index
    %c0_1 = arith.constant 0 : index
    %1 = vector.load %arg2[%c0, %c0_0, %c0_1] : memref<1x1x32xi32, #tpu.memory_space<vmem>>, vector<1x1x32xi32>
    %2 = vector.broadcast %1 : vector<1x1x32xi32> to vector<1x3606x32xi32>
    %3 = arith.cmpi eq, %0, %2 : vector<1x3606x32xi32>
    %4 = arith.extui %3 : vector<1x3606x32xi1> to vector<1x3606x32xi32>
    %5 = arith.sitofp %4 : vector<1x3606x32xi32> to vector<1x3606x32xf32>
    %c0_2 = arith.constant 0 : index
    %c0_3 = arith.constant 0 : index
    %c0_4 = arith.constant 0 : index
    %6 = vector.load %arg3[%c0_2, %c0_3, %c0_4] : memref<1x3606x32xf32, #tpu.memory_space<vmem>>, vector<1x3606x32xf32>
    tpu.vector_store %arg3[%c0_2, %c0_3, %c0_4], %5 {strides = array<i32>} : memref<1x3606x32xf32, #tpu.memory_space<vmem>>, vector<1x3606x32xf32>,
    return
  }
  func.func @transform_0(%arg0: i32, %arg1: i32) -> (i32, i32, i32) {
    %c0_i32 = arith.constant 0 : i32
    %c0_i32_0 = arith.constant 0 : i32
    return %arg0, %c0_i32, %arg1 : i32, i32, i32
  }
  func.func @transform_1(%arg0: i32, %arg1: i32) -> (i32, i32, i32) {
    %c0_i32 = arith.constant 0 : i32
    %c0_i32_0 = arith.constant 0 : i32
    return %arg0, %c0_i32, %arg1 : i32, i32, i32
  }
}

</mosaic_0001>

<bundles_post_ra>
// kernel: gen_forward.12
= control target key start
LH: loop header
LB: loop body
LE: loop exit
PB: predicated region body
PF: predicated region fallthrough
CT: control target
= control target key end

     0   :  { %8 = vsyncpa [#allocation4], 0  ;;  %s796_s0 = inlined_call_operand.vmem [shape: bf16[8,8], index: 0, kind: input, shape index: {}]   ;;  %s797_s1 = inlined_call_operand.vmem [shape: bf16[8,1024], index: 1, kind: input, shape index: {}]   ;;  %s798_s2 = inlined_call_operand.hbm [shape: f32[1,1024], index: 2, kind: input, shape index: {}]   ;;  %s799_s3 = inlined_call_operand.vmem [shape: f32[8,1024], index: 3, kind: output, shape index: {}]  }
   0x1   :  { %10 = vsyncpa [#allocation4 + $0x1], 0  ;;  %s691_s12 = smov 0   ;;  %s693_s13 = smov 0  }
   0x2   :  { %s695_s14 = smov 0   ;;  %s697_s15 = smov 0  }
   0x3   :  { %s699_s16 = smov 0   ;;  %s701_s17 = smov 0  }
   0x4 LB: > { %s510_s18 = sadd.s32 4294967295, %s667_s17   ;;  %s31_s19 = sadd.s32 1, %s663_s16  ;;  %s667_s17 = sphi %s701_s17, %s16_s17   ;;  %s663_s16 = sphi %s699_s16, %s807_s16   ;;  %s659_s15 = sphi %s697_s15, %s806_s15   ;;  %s655_s14 = sphi %s695_s14, %s805_s14   ;;  %s651_s13 = sphi %s693_s13, %s804_s13   ;;  %s647_s12 = sphi %s691_s12, %s803_s12  }
   0x5   : > { %p33_p0 = scmp.ge.s32.totalorder %s31_s19, 4  ;;  %s98_s20 = sadd.s32 1, %s655_s14 }
   0x6   : > { %p105_p1 = scmp.ne.s32.totalorder %s655_s14, %s651_s13  ;;  %p106_p2 = scmp.eq.s32.totalorder %s667_s17, 0 }
   0x7   : > { %s809_s19 = smov (%p33_p0, %s31_s19), 0  ;;  %p111_p4 = scmp.ne.s32.totalorder %s651_s13, %s647_s12 }
   0x8   : > { %p727_p3 = por %p106_p2, %p105_p1  ;;  %s95_s22 = ssub.s32 %s663_s16, %s809_s19 }
   0x9   : > { %p112_p5 = scmp.eq.s32.totalorder %s510_s18, 0  ;;  %p96_p6 = scmp.eq.s32.totalorder %s95_s22, 0 }
   0xa   : > { %p537_p8 = scmp.lt.s32.totalorder %s667_s17, 4  ;;  %s186_s25 = sand.u32 1, %s655_s14  }
   0xb   : > { %p734_p7 = por %p112_p5, %p111_p4  ;;  %s530_s26 = sshll.u32 %s663_s16, 5 }
   0xc   : > { %s740_s24 = scalar_select %p96_p6, %s655_s14, %s98_s20  }
   0xd   : > { %s515_s27 = sshll.u32 %s186_s25, 1  ;;  %s196_s30 = scalar_lea.hbm %s798_s2, %s530_s26 }
   0xe   : > { %s190_s4 = scalar_lea.vmem [#allocation3], %s515_s27  ;;  %p749_p9 = pnand %p537_p8, %p727_p3 }
   0xf   : > { %s198_s5 = sshll.u32 %s190_s4, 4  ;;  %p518_p10 = scmp.ge.s32.totalorder %s667_s17, 1  ;;  %s199_s5 = int_to_ptr.vmem [resolvable:$true] %s198_s5 }
  0x10   : > { %p203_p11 = scmp.lt.s32.totalorder %s667_s17, 5  ;;  %s187_s7 = scalar_lea.sflag [#allocation4], %s186_s25 }
  0x11   : > { %p591_p12 = pneg %p749_p9  ;;  %s602_s8 = scalar_lea.vmem %s199_s5, 32 }
  0x12   : > { %p603_p13 = scmp.ne.s32.totalorder %s199_s5, %s602_s8  ;;  %s669_s9 = smov [#allocation3]  }
  0x13   : > { %s607_s10 = sshll.u32 %s669_s9, 4  ;;  %s608_s10 = int_to_ptr.vmem [resolvable:$false] %s607_s10 }
  0x14   : > { %p605_p0 = pnand %p603_p13, %p591_p12  ;;  %s609_s11 = scalar_lea.vmem %s608_s10, 64 }
  0x15   : > { %p610_p2 = scmp.lt.s32.totalorder %s199_s5, %s608_s10  ;;  %p611_p3 = scmp.lt.s32.totalorder %s609_s11, %s602_s8 }
  0x16   : > { %p606_p1 = pneg %p605_p0 }
  0x17   : > { %p612_p4 = por %p611_p3, %p610_p2 }
  0x19   : > { %p613_p5 = pnand %p612_p4, %p606_p1 }
  0x1b   : > { %616 = shalt.err (!%p613_p5)
}
  0x1c   : > { %536 = dma.hbm_to_vmem [thread:$0]  (!%p749_p9), %s196_s30, 32, %s199_s5, %s187_s7  }
  0x1d   : > { %p204_p6 = pnand %p518_p10, %p203_p11 }
  0x1e   : > { %s209_s12 = sand.u32 (!%p204_p6), 1, %s651_s13  }
  0x1f   : > { %207 = sbr.rel (%p204_p6) target bundleno = 250 (0xfa), region = 32  ;;  %s519_s18 = sshll.u32 (!%p204_p6), %s209_s12, 1 }
  0x20   : > { %s210_s20 = scalar_lea.sflag (!%p204_p6), [#allocation4], %s209_s12  ;;  %s213_s21 = scalar_lea.vmem (!%p204_p6), [#allocation3], %s519_s18 }
  0x24   : > { %642 = dma.done.wait (%p734_p7), %s210_s20, 32  }
  0x25   : > { %644 = vsyncadd (%p734_p7), %s210_s20, 4294967264  ;;  %s520_s22 = sshll.u32 %s659_s15, 1  ;;  %v670_v0 = vmov 0   ;;  %vm304_vm0 = vcmask 1043456   ;;  %v293_v5 = vld [vmem:[%s796_s0] sm:$0xf]  ;;  %v363_v6 = vlaneseq }
  0x26   : > { %p266_p8 = scmp.lt.s32.totalorder %s520_s22, 7  ;;  %343 = vmatprep.mubr.bf16.mxu0 %v670_v0  ;;  %vm300_vm1 = vcmask 64512   ;;  %v361_v9 = vld [vmem:[%s213_s21] sm:$0x3] }
  0x27   : > { %v364_v7 = vshrl.u32 %v363_v6, 7 }
  0x28   : > { %s811_s22 = smov (!%p266_p8, %s520_s22), 7 }
  0x29   : > { %s521_s25 = sshll.u32 %s811_s22, 2  ;;  %v365_v8 = vsub.s32 0, %v364_v7  ;;  %v369_v10 = vsub.s32 1, %v364_v7  ;;  %s523_s15 = sshll.u32 %s811_s22, 3 }
  0x2a   : > { %s271_s28 = scalar_lea.vmem %s797_s1, %s521_s25  ;;  %s282_s5 = scalar_lea.vmem %s799_s3, %s523_s15 }
  0x2b   : > { %v294_v1 = vld [vmem:[%s271_s28] sm:$0xff]  ;;  %v366_v11 = vrot.slane %v361_v9, %v365_v8  ;;  %v370_v12 = vrot.slane %v361_v9, %v369_v10 }
  0x2c   : > { %v525_v2 = vcombine.high %v294_v1, %v294_v1  ;;  %v524_v3 = vcombine.low %v294_v1, %v294_v1 }
  0x2e   : > { %526 = vmatprep.subr.msk.bf16.mxu0 %vm304_vm0, %v525_v2  ;;  %v306_v4 = vsel %vm304_vm0, %v524_v3, 0 }
  0x2f   : > { %326 = vmatpush1.bf16.msra.mxu0 %v306_v4 }
  0x32   : > { %527 = vmatmul.mubr.msk.bf16.vlgmr.msra.gmra.mxu0 %vm300_vm1, %v293_v5 }
  0xf2   : > { %v345_v13 = vpop.f32.mrf.mxu0 }
  0xf3   : > { %v373_v14 = vadd.f32 %v366_v11, %v345_v13 }
  0xf4   : > { %v347_v15 = vpop.f32.mrf.mxu0 }
  0xf5   : > { %v375_v16 = vmax.f32 %v373_v14, 0.0  ;;  %v374_v17 = vadd.f32 %v370_v12, %v347_v15 }
  0xf6   : > { %v349_v18 = vpop.f32.mrf.mxu0 }
  0xf7   : > { %377 = vst [vmem:[%s282_s5] sm:$0xff] %v375_v16  ;;  %v376_v19 = vmax.f32 %v374_v17, 0.0 }
  0xf8   : > { %v350_v20 = vpop.f32.mrf.mxu0 }
  0xf9   : > { %378 = vst [vmem:[%s282_s5 + $0x8] sm:$0xff] %v376_v19 }
  0xfa PF: > { %s16_s17 = sadd.s32 1, %s667_s17   ;;  %s803_s12 = smov %s651_s13 }
  0xfb   : > { %p13_p7 = scmp.ge.s32.totalorder %s16_s17, 6   ;;  %s804_s13 = smov %s655_s14 }
  0xfc   : > { %s805_s14 = smov %s740_s24  ;;  %s806_s15 = smov %s663_s16 }
  0xfd   : > { %s807_s16 = smov %s809_s19  ;;  %15 = sbr.rel (!%p13_p7) target bundleno = 4 (0x4), region = 86 }
 0x102   :  { %409 = vsyncpa [#allocation4], 1 }
 0x103   :  { %411 = vsyncpa [#allocation4 + $0x1], 1 }

// kernel: gen_forward.17
= control target key start
LH: loop header
LB: loop body
LE: loop exit
PB: predicated region body
PF: predicated region fallthrough
CT: control target
= control target key end

     0   :  { %s1515_s12 = smov 0   ;;  %s1517_s13 = smov 0   ;;  %s1827_s0 = inlined_call_operand.vmem [shape: bf16[8,1536], index: 0, kind: input, shape index: {}]   ;;  %s1828_s1 = inlined_call_operand.vmem [shape: bf16[1536,1024], index: 1, kind: input, shape index: {}]   ;;  %s1829_s2 = inlined_call_operand.vmem [shape: f32[1,1024], index: 2, kind: input, shape index: {}]   ;;  %s1830_s3 = inlined_call_operand.vmem [shape: f32[8,1024], index: 3, kind: output, shape index: {}]  }
   0x1   :  { %s1519_s14 = smov 0   ;;  %s1521_s15 = smov 0  }
   0x2   :  { %s1523_s16 = smov 0   ;;  %s1525_s17 = smov 0  }
   0x3   :  { %s1527_s18 = smov 0  }
   0x4 LB: > { %s25_s19 = sadd.s32 1, %s1484_s16  ;;  %s28_s20 = sadd.s32 1, %s1488_s17  ;;  %s1492_s18 = sphi %s1527_s18, %s13_s18   ;;  %s1488_s17 = sphi %s1525_s17, %s1836_s17   ;;  %s1484_s16 = sphi %s1523_s16, %s1835_s16   ;;  %s1480_s15 = sphi %s1521_s15, %s1834_s15   ;;  %s1476_s14 = sphi %s1519_s14, %s1833_s14   ;;  %s1472_s13 = sphi %s1517_s13, %s1832_s13   ;;  %s1468_s12 = sphi %s1515_s12, %s1831_s12  }
   0x5   : > { %p26_p0 = scmp.ge.s32.totalorder %s25_s19, 3  ;;  %p76_p1 = scmp.ne.s32.totalorder %s1472_s13, %s1468_s12 }
   0x6   : > { %p77_p2 = scmp.eq.s32.totalorder %s1492_s18, 0  ;;  %s69_s24 = sadd.s32 1, %s1472_s13 }
   0x7   : > { %s1838_s19 = smov (%p26_p0, %s25_s19), 0  ;;  %s1840_s20 = smov (!%p26_p0, %s28_s20), %s1488_s17 }
   0x8   : > { %p78_p3 = por %p77_p2, %p76_p1  ;;  %p30_p4 = scmp.ge.s32.totalorder %s1840_s20, 4 }
   0x9   : > { %s64_s21 = ssub.s32 %s1484_s16, %s1838_s19  ;;  %p1195_p6 = scmp.ge.s32.totalorder %s1492_s18, 12 }
   0xa   : > { %s1842_s20 = smov (%p30_p4, %s1840_s20), 0 }
   0xb   : > { %s65_s22 = ssub.s32 %s1488_s17, %s1842_s20  ;;  %156 = sbr.rel (%p1195_p6) target bundleno = 87 (0x57), region = 16 }
   0xc   : > { %s66_s23 = sor.u32 %s65_s22, %s64_s21 }
   0xd   : > { %p67_p5 = scmp.eq.s32.totalorder %s66_s23, 0 }
   0xf   : > { %s1566_s25 = scalar_select %p67_p5, %s1472_s13, %s69_s24  }
  0x10   : > { %172 = sbr.rel (!%p78_p3) target bundleno = 87 (0x57), region = 24  ;;  %s174_s26 = sand.u32 (%p78_p3), 1, %s1472_s13  }
  0x11   : > { %s1198_s27 = sshll.u32 (%p78_p3), %s1488_s17, 1  ;;  %s1196_s28 = sshll.u32 (%p78_p3), %s174_s26, 9 }
  0x12   : > { %s1280_s29 = sshll.u32 (%p78_p3), %s1484_s16, 9  ;;  %s1580_s8 = scalar_lea.vmem (%p78_p3), [#allocation3], %s1196_s28 }
  0x13   : > { %s180_s30 = sadd.s32 (%p78_p3), %s1280_s29, %s1198_s27 }
  0x14   : > { %s1200_s4 = sshll.u32 (%p78_p3), %s180_s30, 2 }
  0x15   : > { %s1575_s7 = scalar_lea.vmem %s1828_s1, %s1200_s4 }
  0x16   : > { %v337_v0 = vld [vmem:[%s1575_s7] sm:$0xff] }
  0x17   : > { %v339_v1 = vld [vmem:[%s1575_s7 + $0x20] sm:$0xff]  ;;  %338 = vst [vmem:[%s1580_s8] sm:$0xff] %v337_v0 }
  0x18   : > { %v341_v2 = vld [vmem:[%s1575_s7 + $0x40] sm:$0xff]  ;;  %340 = vst [vmem:[%s1580_s8 + $0x8] sm:$0xff] %v339_v1 }
  0x19   : > { %342 = vst [vmem:[%s1580_s8 + $0x10] sm:$0xff] %v341_v2  ;;  %v343_v3 = vld [vmem:[%s1575_s7 + $0x60] sm:$0xff] }
  0x1a   : > { %v345_v4 = vld [vmem:[%s1575_s7 + $0x80] sm:$0xff]  ;;  %344 = vst [vmem:[%s1580_s8 + $0x18] sm:$0xff] %v343_v3 }
  0x1b   : > { %v347_v5 = vld [vmem:[%s1575_s7 + $0xa0] sm:$0xff]  ;;  %346 = vst [vmem:[%s1580_s8 + $0x20] sm:$0xff] %v345_v4 }
  0x1c   : > { %348 = vst [vmem:[%s1580_s8 + $0x28] sm:$0xff] %v347_v5  ;;  %v349_v6 = vld [vmem:[%s1575_s7 + $0xc0] sm:$0xff] }
  0x1d   : > { %v351_v7 = vld [vmem:[%s1575_s7 + $0xe0] sm:$0xff]  ;;  %350 = vst [vmem:[%s1580_s8 + $0x30] sm:$0xff] %v349_v6 }
  0x1e   : > { %v353_v8 = vld [vmem:[%s1575_s7 + $0x100] sm:$0xff]  ;;  %352 = vst [vmem:[%s1580_s8 + $0x38] sm:$0xff] %v351_v7 }
  0x1f   : > { %354 = vst [vmem:[%s1580_s8 + $0x40] sm:$0xff] %v353_v8  ;;  %v355_v9 = vld [vmem:[%s1575_s7 + $0x120] sm:$0xff] }
  0x20   : > { %v357_v10 = vld [vmem:[%s1575_s7 + $0x140] sm:$0xff]  ;;  %356 = vst [vmem:[%s1580_s8 + $0x48] sm:$0xff] %v355_v9 }
  0x21   : > { %v359_v11 = vld [vmem:[%s1575_s7 + $0x160] sm:$0xff]  ;;  %358 = vst [vmem:[%s1580_s8 + $0x50] sm:$0xff] %v357_v10 }
  0x22   : > { %360 = vst [vmem:[%s1580_s8 + $0x58] sm:$0xff] %v359_v11  ;;  %v361_v12 = vld [vmem:[%s1575_s7 + $0x180] sm:$0xff] }
  0x23   : > { %v363_v13 = vld [vmem:[%s1575_s7 + $0x1a0] sm:$0xff]  ;;  %362 = vst [vmem:[%s1580_s8 + $0x60] sm:$0xff] %v361_v12 }
  0x24   : > { %v365_v14 = vld [vmem:[%s1575_s7 + $0x1c0] sm:$0xff]  ;;  %364 = vst [vmem:[%s1580_s8 + $0x68] sm:$0xff] %v363_v13 }
  0x25   : > { %366 = vst [vmem:[%s1580_s8 + $0x70] sm:$0xff] %v365_v14  ;;  %v367_v15 = vld [vmem:[%s1575_s7 + $0x1e0] sm:$0xff] }
  0x26   : > { %v369_v16 = vld [vmem:[%s1575_s7 + $0x200] sm:$0xff]  ;;  %368 = vst [vmem:[%s1580_s8 + $0x78] sm:$0xff] %v367_v15 }
  0x27   : > { %v371_v17 = vld [vmem:[%s1575_s7 + $0x220] sm:$0xff]  ;;  %370 = vst [vmem:[%s1580_s8 + $0x80] sm:$0xff] %v369_v16 }
  0x28   : > { %372 = vst [vmem:[%s1580_s8 + $0x88] sm:$0xff] %v371_v17  ;;  %v373_v18 = vld [vmem:[%s1575_s7 + $0x240] sm:$0xff] }
  0x29   : > { %v375_v19 = vld [vmem:[%s1575_s7 + $0x260] sm:$0xff]  ;;  %374 = vst [vmem:[%s1580_s8 + $0x90] sm:$0xff] %v373_v18 }
  0x2a   : > { %v377_v20 = vld [vmem:[%s1575_s7 + $0x280] sm:$0xff]  ;;  %376 = vst [vmem:[%s1580_s8 + $0x98] sm:$0xff] %v375_v19 }
  0x2b   : > { %378 = vst [vmem:[%s1580_s8 + $0xa0] sm:$0xff] %v377_v20  ;;  %v379_v21 = vld [vmem:[%s1575_s7 + $0x2a0] sm:$0xff] }
  0x2c   : > { %v381_v22 = vld [vmem:[%s1575_s7 + $0x2c0] sm:$0xff]  ;;  %380 = vst [vmem:[%s1580_s8 + $0xa8] sm:$0xff] %v379_v21 }
  0x2d   : > { %v383_v23 = vld [vmem:[%s1575_s7 + $0x2e0] sm:$0xff]  ;;  %382 = vst [vmem:[%s1580_s8 + $0xb0] sm:$0xff] %v381_v22 }
  0x2e   : > { %384 = vst [vmem:[%s1580_s8 + $0xb8] sm:$0xff] %v383_v23  ;;  %v385_v24 = vld [vmem:[%s1575_s7 + $0x300] sm:$0xff] }
  0x2f   : > { %v387_v25 = vld [vmem:[%s1575_s7 + $0x320] sm:$0xff]  ;;  %386 = vst [vmem:[%s1580_s8 + $0xc0] sm:$0xff] %v385_v24 }
  0x30   : > { %v389_v26 = vld [vmem:[%s1575_s7 + $0x340] sm:$0xff]  ;;  %388 = vst [vmem:[%s1580_s8 + $0xc8] sm:$0xff] %v387_v25 }
  0x31   : > { %390 = vst [vmem:[%s1580_s8 + $0xd0] sm:$0xff] %v389_v26  ;;  %v391_v27 = vld [vmem:[%s1575_s7 + $0x360] sm:$0xff] }
  0x32   : > { %v393_v28 = vld [vmem:[%s1575_s7 + $0x380] sm:$0xff]  ;;  %392 = vst [vmem:[%s1580_s8 + $0xd8] sm:$0xff] %v391_v27 }
  0x33   : > { %v395_v29 = vld [vmem:[%s1575_s7 + $0x3a0] sm:$0xff]  ;;  %394 = vst [vmem:[%s1580_s8 + $0xe0] sm:$0xff] %v393_v28 }
  0x34   : > { %396 = vst [vmem:[%s1580_s8 + $0xe8] sm:$0xff] %v395_v29  ;;  %v397_v30 = vld [vmem:[%s1575_s7 + $0x3c0] sm:$0xff] }
  0x35   : > { %v399_v31 = vld [vmem:[%s1575_s7 + $0x3e0] sm:$0xff]  ;;  %398 = vst [vmem:[%s1580_s8 + $0xf0] sm:$0xff] %v397_v30 }
  0x36   : > { %v401_v32 = vld [vmem:[%s1575_s7 + $0x400] sm:$0xff]  ;;  %400 = vst [vmem:[%s1580_s8 + $0xf8] sm:$0xff] %v399_v31 }
  0x37   : > { %402 = vst [vmem:[%s1580_s8 + $0x100] sm:$0xff] %v401_v32  ;;  %v403_v33 = vld [vmem:[%s1575_s7 + $0x420] sm:$0xff] }
  0x38   : > { %v405_v34 = vld [vmem:[%s1575_s7 + $0x440] sm:$0xff]  ;;  %404 = vst [vmem:[%s1580_s8 + $0x108] sm:$0xff] %v403_v33 }
  0x39   : > { %v407_v35 = vld [vmem:[%s1575_s7 + $0x460] sm:$0xff]  ;;  %406 = vst [vmem:[%s1580_s8 + $0x110] sm:$0xff] %v405_v34 }
  0x3a   : > { %408 = vst [vmem:[%s1580_s8 + $0x118] sm:$0xff] %v407_v35  ;;  %v409_v36 = vld [vmem:[%s1575_s7 + $0x480] sm:$0xff] }
  0x3b   : > { %v411_v37 = vld [vmem:[%s1575_s7 + $0x4a0] sm:$0xff]  ;;  %410 = vst [vmem:[%s1580_s8 + $0x120] sm:$0xff] %v409_v36 }
  0x3c   : > { %v413_v38 = vld [vmem:[%s1575_s7 + $0x4c0] sm:$0xff]  ;;  %412 = vst [vmem:[%s1580_s8 + $0x128] sm:$0xff] %v411_v37 }
  0x3d   : > { %414 = vst [vmem:[%s1580_s8 + $0x130] sm:$0xff] %v413_v38  ;;  %v415_v39 = vld [vmem:[%s1575_s7 + $0x4e0] sm:$0xff] }
  0x3e   : > { %v417_v40 = vld [vmem:[%s1575_s7 + $0x500] sm:$0xff]  ;;  %416 = vst [vmem:[%s1580_s8 + $0x138] sm:$0xff] %v415_v39 }
  0x3f   : > { %v419_v41 = vld [vmem:[%s1575_s7 + $0x520] sm:$0xff]  ;;  %418 = vst [vmem:[%s1580_s8 + $0x140] sm:$0xff] %v417_v40 }
  0x40   : > { %420 = vst [vmem:[%s1580_s8 + $0x148] sm:$0xff] %v419_v41  ;;  %v421_v42 = vld [vmem:[%s1575_s7 + $0x540] sm:$0xff] }
  0x41   : > { %v423_v43 = vld [vmem:[%s1575_s7 + $0x560] sm:$0xff]  ;;  %422 = vst [vmem:[%s1580_s8 + $0x150] sm:$0xff] %v421_v42 }
  0x42   : > { %v425_v44 = vld [vmem:[%s1575_s7 + $0x580] sm:$0xff]  ;;  %424 = vst [vmem:[%s1580_s8 + $0x158] sm:$0xff] %v423_v43 }
  0x43   : > { %426 = vst [vmem:[%s1580_s8 + $0x160] sm:$0xff] %v425_v44  ;;  %v427_v45 = vld [vmem:[%s1575_s7 + $0x5a0] sm:$0xff] }
  0x44   : > { %v429_v46 = vld [vmem:[%s1575_s7 + $0x5c0] sm:$0xff]  ;;  %428 = vst [vmem:[%s1580_s8 + $0x168] sm:$0xff] %v427_v45 }
  0x45   : > { %v431_v47 = vld [vmem:[%s1575_s7 + $0x5e0] sm:$0xff]  ;;  %430 = vst [vmem:[%s1580_s8 + $0x170] sm:$0xff] %v429_v46 }
  0x46   : > { %432 = vst [vmem:[%s1580_s8 + $0x178] sm:$0xff] %v431_v47  ;;  %v433_v48 = vld [vmem:[%s1575_s7 + $0x600] sm:$0xff] }
  0x47   : > { %v435_v49 = vld [vmem:[%s1575_s7 + $0x620] sm:$0xff]  ;;  %434 = vst [vmem:[%s1580_s8 + $0x180] sm:$0xff] %v433_v48 }
  0x48   : > { %v437_v50 = vld [vmem:[%s1575_s7 + $0x640] sm:$0xff]  ;;  %436 = vst [vmem:[%s1580_s8 + $0x188] sm:$0xff] %v435_v49 }
  0x49   : > { %438 = vst [vmem:[%s1580_s8 + $0x190] sm:$0xff] %v437_v50  ;;  %v439_v51 = vld [vmem:[%s1575_s7 + $0x660] sm:$0xff] }
  0x4a   : > { %v441_v52 = vld [vmem:[%s1575_s7 + $0x680] sm:$0xff]  ;;  %440 = vst [vmem:[%s1580_s8 + $0x198] sm:$0xff] %v439_v51 }
  0x4b   : > { %v443_v53 = vld [vmem:[%s1575_s7 + $0x6a0] sm:$0xff]  ;;  %442 = vst [vmem:[%s1580_s8 + $0x1a0] sm:$0xff] %v441_v52 }
  0x4c   : > { %444 = vst [vmem:[%s1580_s8 + $0x1a8] sm:$0xff] %v443_v53  ;;  %v445_v54 = vld [vmem:[%s1575_s7 + $0x6c0] sm:$0xff] }
  0x4d   : > { %v447_v55 = vld [vmem:[%s1575_s7 + $0x6e0] sm:$0xff]  ;;  %446 = vst [vmem:[%s1580_s8 + $0x1b0] sm:$0xff] %v445_v54 }
  0x4e   : > { %v449_v56 = vld [vmem:[%s1575_s7 + $0x700] sm:$0xff]  ;;  %448 = vst [vmem:[%s1580_s8 + $0x1b8] sm:$0xff] %v447_v55 }
  0x4f   : > { %450 = vst [vmem:[%s1580_s8 + $0x1c0] sm:$0xff] %v449_v56  ;;  %v451_v57 = vld [vmem:[%s1575_s7 + $0x720] sm:$0xff] }
  0x50   : > { %v453_v58 = vld [vmem:[%s1575_s7 + $0x740] sm:$0xff]  ;;  %452 = vst [vmem:[%s1580_s8 + $0x1c8] sm:$0xff] %v451_v57 }
  0x51   : > { %v455_v59 = vld [vmem:[%s1575_s7 + $0x760] sm:$0xff]  ;;  %454 = vst [vmem:[%s1580_s8 + $0x1d0] sm:$0xff] %v453_v58 }
  0x52   : > { %456 = vst [vmem:[%s1580_s8 + $0x1d8] sm:$0xff] %v455_v59  ;;  %v457_v60 = vld [vmem:[%s1575_s7 + $0x780] sm:$0xff] }
  0x53   : > { %v459_v61 = vld [vmem:[%s1575_s7 + $0x7a0] sm:$0xff]  ;;  %458 = vst [vmem:[%s1580_s8 + $0x1e0] sm:$0xff] %v457_v60 }
  0x54   : > { %v461_v62 = vld [vmem:[%s1575_s7 + $0x7c0] sm:$0xff]  ;;  %460 = vst [vmem:[%s1580_s8 + $0x1e8] sm:$0xff] %v459_v61 }
  0x55   : > { %462 = vst [vmem:[%s1580_s8 + $0x1f0] sm:$0xff] %v461_v62  ;;  %v463_v63 = vld [vmem:[%s1575_s7 + $0x7e0] sm:$0xff] }
  0x56   : > { %464 = vst [vmem:[%s1580_s8 + $0x1f8] sm:$0xff] %v463_v63 }
  0x57 PF: > { %p1201_p7 = scmp.ge.s32.totalorder %s1492_s18, 1  ;;  %p477_p8 = scmp.lt.s32.totalorder %s1492_s18, 13 }
  0x59   : > { %p478_p9 = pnand %p1201_p7, %p477_p8 }
  0x5a   : > { %s484_s9 = sand.u32 (!%p478_p9), 1, %s1468_s12   ;;  %s1203_s10 = sshll.u32 (!%p478_p9), %s1476_s14, 2 }
  0x5b   : > { %481 = sbr.rel (%p478_p9) target bundleno = 385 (0x181), region = 66  ;;  %s1202_s11 = sshll.u32 (!%p478_p9), %s484_s9, 9 }
  0x5c   : > { %p527_p10 = scmp.lt.s32.totalorder (!%p478_p9), %s1203_s10, 11  ;;  %s1205_s21 = sshll.u32 (!%p478_p9), %s1480_s15, 1 }
  0x5d   : > { %p537_p11 = scmp.lt.s32.totalorder (!%p478_p9), %s1205_s21, 7  ;;  %s1729_s5 = scalar_lea.vmem (!%p478_p9), [#allocation3], %s1202_s11 }
  0x5e   : > { %p1208_p12 = scmp.ne.s32.totalorder (!%p478_p9), %s1476_s14, 0 }
  0x60   : > { %s1844_s10 = smov (!%p527_p10, %s1203_s10), 11  ;;  %s1846_s21 = smov (!%p537_p11, %s1205_s21), 7 }
  0x61   : > { %s1204_s22 = sshll.u32 %s1844_s10, 2  ;;  %s539_s12 = scalar_lea.vmem %s1829_s2, %s1846_s21 }
  0x62   : > { %s1715_s26 = scalar_lea.vmem %s1827_s0, %s1204_s22  ;;  %s1207_s29 = sshll.u32 %s1846_s21, 3 }
  0x63   : > { %s1727_s15 = scalar_lea.vmem %s1830_s3, %s1207_s29  ;;  %554 = sbr.rel (%p1208_p12) target bundleno = 106 (0x6a), region = 74 }
  0x68   : > { %v1494_v0 = vmov 0.0  }
  0x69   : > { %555 = vst [vmem:[#allocation2] sm:$0xff] %v1494_v0  ;;  %556 = vst [vmem:[#allocation2 + $0x8] sm:$0xff] %v1494_v0 }
  0x6a PF: > { %v1338_v1 = vld [vmem:[%s1729_s5 + $0x74] ss:$8 sps:$4 sm:$0xff]   ;;  %v1342_v3 = vld [vmem:[%s1729_s5 + $0x70] ss:$8 sps:$4 sm:$0xff]   ;;  %v1344_v5 = vld [vmem:[%s1729_s5 + $0x64] ss:$8 sps:$4 sm:$0xff]  }
  0x6b   : > { %v1340_v2 = vld [vmem:[%s1729_s5 + $0x174] ss:$8 sps:$4 sm:$0xff]   ;;  %959 = vmatprep.subr.bf16.mxu0 %v1338_v1  ;;  %v1343_v4 = vld [vmem:[%s1729_s5 + $0x170] ss:$8 sps:$4 sm:$0xff]   ;;  %v1346_v6 = vld [vmem:[%s1729_s5 + $0x164] ss:$8 sps:$4 sm:$0xff]  }
  0x6c   : > { %1000 = vmatprep.subr.bf16.mxu1 %v1340_v2  ;;  %960 = vmatpush1.bf16.msra.mxu0 %v1342_v3  ;;  %v1348_v7 = vld [vmem:[%s1729_s5 + $0x60] ss:$8 sps:$4 sm:$0xff]   ;;  %v1350_v9 = vld [vmem:[%s1729_s5 + $0x54] ss:$8 sps:$4 sm:$0xff]   ;;  %v1354_v11 = vld [vmem:[%s1729_s5 + $0x50] ss:$8 sps:$4 sm:$0xff]  }
  0x6d   : > { %1001 = vmatpush1.bf16.msra.mxu1 %v1343_v4  ;;  %961 = vmatprep.subr.bf16.mxu0 %v1344_v5  ;;  %v1349_v8 = vld [vmem:[%s1729_s5 + $0x160] ss:$8 sps:$4 sm:$0xff]   ;;  %v1352_v10 = vld [vmem:[%s1729_s5 + $0x154] ss:$8 sps:$4 sm:$0xff]   ;;  %v1355_v12 = vld [vmem:[%s1729_s5 + $0x150] ss:$8 sps:$4 sm:$0xff]  }
  0x6e   : > { %1002 = vmatprep.subr.bf16.mxu1 %v1346_v6  ;;  %v1356_v13 = vld [vmem:[%s1729_s5 + $0x44] ss:$8 sps:$4 sm:$0xff]   ;;  %v1360_v15 = vld [vmem:[%s1729_s5 + $0x40] ss:$8 sps:$4 sm:$0xff]   ;;  %v1362_v17 = vld [vmem:[%s1729_s5 + $0x34] ss:$8 sps:$4 sm:$0xff]  }
  0x6f   : > { %v1358_v14 = vld [vmem:[%s1729_s5 + $0x144] ss:$8 sps:$4 sm:$0xff]   ;;  %v1361_v16 = vld [vmem:[%s1729_s5 + $0x140] ss:$8 sps:$4 sm:$0xff]   ;;  %v1364_v18 = vld [vmem:[%s1729_s5 + $0x134] ss:$8 sps:$4 sm:$0xff]  }
  0x70   : > { %962 = vmatpush1.bf16.msra.mxu0 %v1348_v7  ;;  %v1366_v19 = vld [vmem:[%s1729_s5 + $0x30] ss:$8 sps:$4 sm:$0xff]   ;;  %v1368_v21 = vld [vmem:[%s1729_s5 + $0x24] ss:$8 sps:$4 sm:$0xff]   ;;  %v1372_v23 = vld [vmem:[%s1729_s5 + $0x20] ss:$8 sps:$4 sm:$0xff]  }
  0x71   : > { %1003 = vmatpush1.bf16.msra.mxu1 %v1349_v8  ;;  %963 = vmatprep.subr.bf16.mxu0 %v1350_v9  ;;  %v1367_v20 = vld [vmem:[%s1729_s5 + $0x130] ss:$8 sps:$4 sm:$0xff]   ;;  %v1370_v22 = vld [vmem:[%s1729_s5 + $0x124] ss:$8 sps:$4 sm:$0xff]   ;;  %v1373_v24 = vld [vmem:[%s1729_s5 + $0x120] ss:$8 sps:$4 sm:$0xff]  }
  0x72   : > { %1004 = vmatprep.subr.bf16.mxu1 %v1352_v10  ;;  %v1374_v25 = vld [vmem:[%s1729_s5 + $0x14] ss:$8 sps:$4 sm:$0xff]   ;;  %v1378_v27 = vld [vmem:[%s1729_s5 + $0x10] ss:$8 sps:$4 sm:$0xff]   ;;  %v1380_v29 = vld [vmem:[%s1729_s5 + $0x4] ss:$8 sps:$4 sm:$0xff]  }
  0x73   : > { %v1376_v26 = vld [vmem:[%s1729_s5 + $0x114] ss:$8 sps:$4 sm:$0xff]   ;;  %v1379_v28 = vld [vmem:[%s1729_s5 + $0x110] ss:$8 sps:$4 sm:$0xff]   ;;  %v1382_v30 = vld [vmem:[%s1729_s5 + $0x104] ss:$8 sps:$4 sm:$0xff]  }
  0x74   : > { %964 = vmatpush1.bf16.msra.mxu0 %v1354_v11  ;;  %v1384_v31 = vld [vmem:[%s1729_s5] ss:$8 sps:$4 sm:$0xff]   ;;  %v1386_v33 = vld [vmem:[%s1729_s5 + $0xf4] ss:$8 sps:$4 sm:$0xff]   ;;  %v1390_v35 = vld [vmem:[%s1729_s5 + $0xf0] ss:$8 sps:$4 sm:$0xff]  }
  0x75   : > { %1005 = vmatpush1.bf16.msra.mxu1 %v1355_v12  ;;  %965 = vmatprep.subr.bf16.mxu0 %v1356_v13  ;;  %v1385_v32 = vld [vmem:[%s1729_s5 + $0x100] ss:$8 sps:$4 sm:$0xff]   ;;  %v1388_v34 = vld [vmem:[%s1729_s5 + $0x1f4] ss:$8 sps:$4 sm:$0xff]   ;;  %v1391_v36 = vld [vmem:[%s1729_s5 + $0x1f0] ss:$8 sps:$4 sm:$0xff]  }
  0x76   : > { %1006 = vmatprep.subr.bf16.mxu1 %v1358_v14  ;;  %v1392_v37 = vld [vmem:[%s1729_s5 + $0xe4] ss:$8 sps:$4 sm:$0xff]   ;;  %v1396_v39 = vld [vmem:[%s1729_s5 + $0xe0] ss:$8 sps:$4 sm:$0xff]   ;;  %v1398_v41 = vld [vmem:[%s1729_s5 + $0xd4] ss:$8 sps:$4 sm:$0xff]  }
  0x77   : > { %v1394_v38 = vld [vmem:[%s1729_s5 + $0x1e4] ss:$8 sps:$4 sm:$0xff]   ;;  %v1397_v40 = vld [vmem:[%s1729_s5 + $0x1e0] ss:$8 sps:$4 sm:$0xff]   ;;  %v1400_v42 = vld [vmem:[%s1729_s5 + $0x1d4] ss:$8 sps:$4 sm:$0xff]  }
  0x78   : > { %966 = vmatpush1.bf16.msra.mxu0 %v1360_v15  ;;  %v1402_v43 = vld [vmem:[%s1729_s5 + $0xd0] ss:$8 sps:$4 sm:$0xff]   ;;  %v1404_v45 = vld [vmem:[%s1729_s5 + $0xc4] ss:$8 sps:$4 sm:$0xff]   ;;  %v1408_v50 = vld [vmem:[%s1729_s5 + $0xc0] ss:$8 sps:$4 sm:$0xff]  }
  0x79   : > { %1007 = vmatpush1.bf16.msra.mxu1 %v1361_v16  ;;  %967 = vmatprep.subr.bf16.mxu0 %v1362_v17  ;;  %v1403_v44 = vld [vmem:[%s1729_s5 + $0x1d0] ss:$8 sps:$4 sm:$0xff]   ;;  %v1406_v46 = vld [vmem:[%s1729_s5 + $0x1c4] ss:$8 sps:$4 sm:$0xff]   ;;  %v1409_v51 = vld [vmem:[%s1729_s5 + $0x1c0] ss:$8 sps:$4 sm:$0xff]  }
  0x7a   : > { %1008 = vmatprep.subr.bf16.mxu1 %v1364_v18  ;;  %v559_v47 = vld [vmem:[%s1715_s26] sm:$0xff]  ;;  %v560_v49 = vld [vmem:[%s1715_s26 + $0x8] sm:$0xff]  ;;  %v1416_v57 = vld [vmem:[%s1729_s5 + $0xa4] ss:$8 sps:$4 sm:$0xff]   ;;  %p1277_p13 = scmp.ne.s32.totalorder %s1476_s14, 2 }
  0x7b   : > { %v1210_v48 = vcombine.high %v559_v47, %v559_v47  ;;  %v1212_v52 = vcombine.high %v560_v49, %v560_v49  ;;  %v1410_v53 = vld [vmem:[%s1729_s5 + $0xb4] ss:$8 sps:$4 sm:$0xff]   ;;  %v1414_v55 = vld [vmem:[%s1729_s5 + $0xb0] ss:$8 sps:$4 sm:$0xff]   ;;  %v1418_v58 = vld [vmem:[%s1729_s5 + $0x1a4] ss:$8 sps:$4 sm:$0xff]   ;;  %v1209_v5 = vcombine.low %v559_v47, %v559_v47  ;;  %v1211_v6 = vcombine.low %v560_v49, %v560_v49 }
  0x7c   : > { %968 = vmatpush1.bf16.msra.mxu0 %v1366_v19  ;;  %v1412_v54 = vld [vmem:[%s1729_s5 + $0x1b4] ss:$8 sps:$4 sm:$0xff]   ;;  %v1415_v56 = vld [vmem:[%s1729_s5 + $0x1b0] ss:$8 sps:$4 sm:$0xff]   ;;  %v1420_v59 = vld [vmem:[%s1729_s5 + $0xa0] ss:$8 sps:$4 sm:$0xff]  }
  0x7d   : > { %1009 = vmatpush1.bf16.msra.mxu1 %v1367_v20  ;;  %969 = vmatprep.subr.bf16.mxu0 %v1368_v21  ;;  %v1421_v60 = vld [vmem:[%s1729_s5 + $0x1a0] ss:$8 sps:$4 sm:$0xff]   ;;  %v1422_v61 = vld [vmem:[%s1729_s5 + $0x94] ss:$8 sps:$4 sm:$0xff]   ;;  %v1426_v63 = vld [vmem:[%s1729_s5 + $0x90] ss:$8 sps:$4 sm:$0xff]  }
  0x7e   : > { %1010 = vmatprep.subr.bf16.mxu1 %v1370_v22  ;;  %991 = vmatprep.mubr.bf16.mxu0 %v1210_v48  ;;  %v1424_v62 = vld [vmem:[%s1729_s5 + $0x194] ss:$8 sps:$4 sm:$0xff]   ;;  %v1427_v0 = vld [vmem:[%s1729_s5 + $0x190] ss:$8 sps:$4 sm:$0xff]   ;;  %v1428_v1 = vld [vmem:[%s1729_s5 + $0x84] ss:$8 sps:$4 sm:$0xff]  }
  0x7f   : > { %1032 = vmatprep.mubr.bf16.mxu1 %v1212_v52  ;;  %v1430_v2 = vld [vmem:[%s1729_s5 + $0x184] ss:$8 sps:$4 sm:$0xff]   ;;  %v1432_v3 = vld [vmem:[%s1729_s5 + $0x80] ss:$8 sps:$4 sm:$0xff]   ;;  %v557_v8 = vld [vmem:[#allocation2] sm:$0xff] }
  0x80   : > { %970 = vmatpush1.bf16.msra.mxu0 %v1372_v23  ;;  %v1433_v4 = vld [vmem:[%s1729_s5 + $0x180] ss:$8 sps:$4 sm:$0xff]   ;;  %v558_v12 = vld [vmem:[#allocation2 + $0x8] sm:$0xff] }
  0x81   : > { %1011 = vmatpush1.bf16.msra.mxu1 %v1373_v24  ;;  %971 = vmatprep.subr.bf16.mxu0 %v1374_v25 }
  0x82   : > { %1012 = vmatprep.subr.bf16.mxu1 %v1376_v26 }
  0x84   : > { %972 = vmatpush1.bf16.msra.mxu0 %v1378_v27 }
  0x85   : > { %1013 = vmatpush1.bf16.msra.mxu1 %v1379_v28  ;;  %973 = vmatprep.subr.bf16.mxu0 %v1380_v29 }
  0x86   : > { %1014 = vmatprep.subr.bf16.mxu1 %v1382_v30 }
  0x88   : > { %974 = vmatpush1.bf16.msra.mxu0 %v1384_v31 }
  0x89   : > { %1015 = vmatpush1.bf16.msra.mxu1 %v1385_v32  ;;  %975 = vmatprep.subr.bf16.mxu0 %v1386_v33 }
  0x8a   : > { %1016 = vmatprep.subr.bf16.mxu1 %v1388_v34 }
  0x8c   : > { %976 = vmatpush2.bf16.msra.mxu0 %v1390_v35 }
  0x8d   : > { %1017 = vmatpush2.bf16.msra.mxu1 %v1391_v36  ;;  %977 = vmatprep.subr.bf16.mxu0 %v1392_v37 }
  0x8e   : > { %1018 = vmatprep.subr.bf16.mxu1 %v1394_v38 }
  0x90   : > { %978 = vmatpush2.bf16.msra.mxu0 %v1396_v39 }
  0x91   : > { %1019 = vmatpush2.bf16.msra.mxu1 %v1397_v40  ;;  %979 = vmatprep.subr.bf16.mxu0 %v1398_v41 }
  0x92   : > { %1020 = vmatprep.subr.bf16.mxu1 %v1400_v42 }
  0x94   : > { %980 = vmatpush2.bf16.msra.mxu0 %v1402_v43 }
  0x95   : > { %1021 = vmatpush2.bf16.msra.mxu1 %v1403_v44  ;;  %981 = vmatprep.subr.bf16.mxu0 %v1404_v45 }
  0x96   : > { %1022 = vmatprep.subr.bf16.mxu1 %v1406_v46 }
  0x98   : > { %982 = vmatpush2.bf16.msra.mxu0 %v1408_v50 }
  0x99   : > { %1023 = vmatpush2.bf16.msra.mxu1 %v1409_v51  ;;  %983 = vmatprep.subr.bf16.mxu0 %v1410_v53 }
  0x9a   : > { %1024 = vmatprep.subr.bf16.mxu1 %v1412_v54 }
  0x9c   : > { %984 = vmatpush2.bf16.msra.mxu0 %v1414_v55 }
  0x9d   : > { %1025 = vmatpush2.bf16.msra.mxu1 %v1415_v56  ;;  %985 = vmatprep.subr.bf16.mxu0 %v1416_v57 }
  0x9e   : > { %1026 = vmatprep.subr.bf16.mxu1 %v1418_v58 }
  0xa0   : > { %986 = vmatpush2.bf16.msra.mxu0 %v1420_v59 }
  0xa1   : > { %1027 = vmatpush2.bf16.msra.mxu1 %v1421_v60  ;;  %987 = vmatprep.subr.bf16.mxu0 %v1422_v61 }
  0xa2   : > { %1028 = vmatprep.subr.bf16.mxu1 %v1424_v62 }
  0xa4   : > { %988 = vmatpush2.bf16.msra.mxu0 %v1426_v63 }
  0xa5   : > { %1029 = vmatpush2.bf16.msra.mxu1 %v1427_v0  ;;  %989 = vmatprep.subr.bf16.mxu0 %v1428_v1 }
  0xa6   : > { %1030 = vmatprep.subr.bf16.mxu1 %v1430_v2 }
  0xa8   : > { %990 = vmatpush2.bf16.msra.mxu0 %v1432_v3 }
  0xa9   : > { %1031 = vmatpush2.bf16.msra.mxu1 %v1433_v4 }
  0xab   : > { %992 = vmatmul.mubr.bf16.vlgmr.msra.gmra.mxu0 %v1209_v5 }
  0xac   : > { %1033 = vmatmul.mubr.bf16.vlgmr.msra.gmra.mxu1 %v1211_v6 }
 0x16b   : > { %v993_v7 = vpop.f32.mrf.mxu0 }
 0x16c   : > { %v1034_v9 = vpop.f32.mrf.mxu1 }
 0x16d   : > { %v1035_v10 = vadd.f32 %v1034_v9, %v993_v7  ;;  %v995_v11 = vpop.f32.mrf.mxu0 }
 0x16e   : > { %v1036_v13 = vpop.f32.mrf.mxu1 }
 0x16f   : > { %v1041_v14 = vadd.f32 %v1035_v10, %v557_v8  ;;  %v1037_v15 = vadd.f32 %v1036_v13, %v995_v11  ;;  %v997_v16 = vpop.f32.mrf.mxu0  ;;  %1048 = sbr.rel (%p1277_p13) target bundleno = 385 (0x181), region = 78 }
 0x170   : > { %v1038_v17 = vpop.f32.mrf.mxu1 }
 0x171   : > { %1043 = vst [vmem:[#allocation2] sm:$0xff] %v1041_v14  ;;  %v1042_v18 = vadd.f32 %v1037_v15, %v558_v12  ;;  %v998_v19 = vpop.f32.mrf.mxu0 }
 0x172   : > { %v1039_v20 = vpop.f32.mrf.mxu1 }
 0x173   : > { %1044 = vst [vmem:[#allocation2 + $0x8] sm:$0xff] %v1042_v18 }
 0x174   : > { %v1053_v21 = vlaneseq  ;;  %v1051_v23 = vld [vmem:[%s539_s12] sm:$0x3] }
 0x176   : > { %v1054_v22 = vshrl.u32 %v1053_v21, 7 }
 0x178   : > { %v1055_v24 = vsub.s32 0, %v1054_v22  ;;  %v1059_v25 = vsub.s32 1, %v1054_v22  ;;  %v1049_v26 = vld [vmem:[#allocation2] sm:$0xff] }
 0x17a   : > { %v1050_v27 = vld [vmem:[#allocation2 + $0x8] sm:$0xff]  ;;  %v1056_v28 = vrot.slane %v1051_v23, %v1055_v24  ;;  %v1060_v29 = vrot.slane %v1051_v23, %v1059_v25 }
 0x17c   : > { %v1063_v30 = vadd.f32 %v1056_v28, %v1049_v26  ;;  %v1064_v31 = vadd.f32 %v1060_v29, %v1050_v27 }
 0x17e   : > { %v1065_v32 = vmax.f32 %v1063_v30, 0.0  ;;  %v1066_v33 = vmax.f32 %v1064_v31, 0.0 }
 0x180   : > { %1067 = vst [vmem:[%s1727_s15] sm:$0xff] %v1065_v32  ;;  %1068 = vst [vmem:[%s1727_s15 + $0x8] sm:$0xff] %v1066_v33 }
 0x181 PF: > { %s13_s18 = sadd.s32 1, %s1492_s18   ;;  %s1831_s12 = smov %s1472_s13 }
 0x182   : > { %p10_p0 = scmp.ge.s32.totalorder %s13_s18, 14   ;;  %s1832_s13 = smov %s1566_s25 }
 0x183   : > { %s1833_s14 = smov %s1484_s16  ;;  %s1834_s15 = smov %s1488_s17 }
 0x184   : > { %s1835_s16 = smov %s1838_s19  ;;  %s1836_s17 = smov %s1842_s20 }
 0x185   :  { %12 = sbr.rel (!%p10_p0) target bundleno = 4 (0x4), region = 119 }

// kernel: gen_forward.18
= control target key start
LH: loop header
LB: loop body
LE: loop exit
PB: predicated region body
PF: predicated region fallthrough
CT: control target
= control target key end

     0   :  { %s1395_s3 = inlined_call_operand.vmem [shape: bf16[256,256], index: 3, kind: input, shape index: {}]   ;;  %s1396_s1 = inlined_call_operand.vmem [shape: bf16[512,256], index: 1, kind: input, shape index: {}]   ;;  %s1397_s2 = inlined_call_operand.vmem [shape: bf16[16,256], index: 2, kind: input, shape index: {}]   ;;  %s1398_s0 = inlined_call_operand.vmem [shape: bf16[16,512], index: 0, kind: input, shape index: {}]   ;;  %s1399_s4 = inlined_call_operand.vmem [shape: f32[1,256], index: 4, kind: input, shape index: {}]   ;;  %s1400_s5 = inlined_call_operand.vmem [shape: f32[16,256], index: 5, kind: output, shape index: {}]  }
   0x1   :  { %v891_v0 = vld [vmem:[%s1395_s3 + $0x74] ss:$8 sps:$4 sm:$0xff]   ;;  %v895_v2 = vld [vmem:[%s1395_s3 + $0x70] ss:$8 sps:$4 sm:$0xff]   ;;  %v897_v4 = vld [vmem:[%s1395_s3 + $0x64] ss:$8 sps:$4 sm:$0xff]  }
   0x2   :  { %v893_v1 = vld [vmem:[%s1396_s1 + $0x74] ss:$8 sps:$4 sm:$0xff]   ;;  %292 = vmatprep.subr.bf16.mxu0 %v891_v0  ;;  %v896_v3 = vld [vmem:[%s1396_s1 + $0x70] ss:$8 sps:$4 sm:$0xff]   ;;  %v899_v5 = vld [vmem:[%s1396_s1 + $0x64] ss:$8 sps:$4 sm:$0xff]  }
   0x3   :  { %675 = vmatprep.subr.bf16.mxu1 %v893_v1  ;;  %293 = vmatpush1.bf16.msra.mxu0 %v895_v2  ;;  %v901_v6 = vld [vmem:[%s1395_s3 + $0x60] ss:$8 sps:$4 sm:$0xff]   ;;  %v903_v8 = vld [vmem:[%s1395_s3 + $0x54] ss:$8 sps:$4 sm:$0xff]   ;;  %v907_v10 = vld [vmem:[%s1395_s3 + $0x50] ss:$8 sps:$4 sm:$0xff]  }
   0x4   :  { %676 = vmatpush1.bf16.msra.mxu1 %v896_v3  ;;  %294 = vmatprep.subr.bf16.mxu0 %v897_v4  ;;  %v902_v7 = vld [vmem:[%s1396_s1 + $0x60] ss:$8 sps:$4 sm:$0xff]   ;;  %v905_v9 = vld [vmem:[%s1396_s1 + $0x54] ss:$8 sps:$4 sm:$0xff]   ;;  %v908_v11 = vld [vmem:[%s1396_s1 + $0x50] ss:$8 sps:$4 sm:$0xff]  }
   0x5   :  { %677 = vmatprep.subr.bf16.mxu1 %v899_v5  ;;  %v909_v12 = vld [vmem:[%s1395_s3 + $0x44] ss:$8 sps:$4 sm:$0xff]   ;;  %v913_v14 = vld [vmem:[%s1395_s3 + $0x40] ss:$8 sps:$4 sm:$0xff]   ;;  %v915_v16 = vld [vmem:[%s1395_s3 + $0x34] ss:$8 sps:$4 sm:$0xff]  }
   0x6   :  { %v911_v13 = vld [vmem:[%s1396_s1 + $0x44] ss:$8 sps:$4 sm:$0xff]   ;;  %v914_v15 = vld [vmem:[%s1396_s1 + $0x40] ss:$8 sps:$4 sm:$0xff]   ;;  %v917_v17 = vld [vmem:[%s1396_s1 + $0x34] ss:$8 sps:$4 sm:$0xff]  }
   0x7   :  { %295 = vmatpush1.bf16.msra.mxu0 %v901_v6  ;;  %v919_v18 = vld [vmem:[%s1395_s3 + $0x30] ss:$8 sps:$4 sm:$0xff]   ;;  %v921_v20 = vld [vmem:[%s1395_s3 + $0x24] ss:$8 sps:$4 sm:$0xff]   ;;  %v925_v22 = vld [vmem:[%s1395_s3 + $0x20] ss:$8 sps:$4 sm:$0xff]  }
   0x8   :  { %678 = vmatpush1.bf16.msra.mxu1 %v902_v7  ;;  %296 = vmatprep.subr.bf16.mxu0 %v903_v8  ;;  %v920_v19 = vld [vmem:[%s1396_s1 + $0x30] ss:$8 sps:$4 sm:$0xff]   ;;  %v923_v21 = vld [vmem:[%s1396_s1 + $0x24] ss:$8 sps:$4 sm:$0xff]   ;;  %v926_v23 = vld [vmem:[%s1396_s1 + $0x20] ss:$8 sps:$4 sm:$0xff]  }
   0x9   :  { %679 = vmatprep.subr.bf16.mxu1 %v905_v9  ;;  %v927_v24 = vld [vmem:[%s1395_s3 + $0x14] ss:$8 sps:$4 sm:$0xff]   ;;  %v931_v26 = vld [vmem:[%s1395_s3 + $0x10] ss:$8 sps:$4 sm:$0xff]   ;;  %v933_v28 = vld [vmem:[%s1395_s3 + $0x4] ss:$8 sps:$4 sm:$0xff]  }
   0xa   :  { %v929_v25 = vld [vmem:[%s1396_s1 + $0x14] ss:$8 sps:$4 sm:$0xff]   ;;  %v932_v27 = vld [vmem:[%s1396_s1 + $0x10] ss:$8 sps:$4 sm:$0xff]   ;;  %v935_v29 = vld [vmem:[%s1396_s1 + $0x4] ss:$8 sps:$4 sm:$0xff]  }
   0xb   :  { %297 = vmatpush1.bf16.msra.mxu0 %v907_v10  ;;  %v937_v30 = vld [vmem:[%s1395_s3] ss:$8 sps:$4 sm:$0xff]   ;;  %v939_v32 = vld [vmem:[%s1395_s3 + $0xf4] ss:$8 sps:$4 sm:$0xff]   ;;  %v943_v34 = vld [vmem:[%s1395_s3 + $0xf0] ss:$8 sps:$4 sm:$0xff]  }
   0xc   :  { %680 = vmatpush1.bf16.msra.mxu1 %v908_v11  ;;  %298 = vmatprep.subr.bf16.mxu0 %v909_v12  ;;  %v938_v31 = vld [vmem:[%s1396_s1] ss:$8 sps:$4 sm:$0xff]   ;;  %v941_v33 = vld [vmem:[%s1396_s1 + $0xf4] ss:$8 sps:$4 sm:$0xff]   ;;  %v944_v35 = vld [vmem:[%s1396_s1 + $0xf0] ss:$8 sps:$4 sm:$0xff]  }
   0xd   :  { %681 = vmatprep.subr.bf16.mxu1 %v911_v13  ;;  %v945_v36 = vld [vmem:[%s1395_s3 + $0xe4] ss:$8 sps:$4 sm:$0xff]   ;;  %v949_v38 = vld [vmem:[%s1395_s3 + $0xe0] ss:$8 sps:$4 sm:$0xff]   ;;  %v951_v40 = vld [vmem:[%s1395_s3 + $0xd4] ss:$8 sps:$4 sm:$0xff]  }
   0xe   :  { %v947_v37 = vld [vmem:[%s1396_s1 + $0xe4] ss:$8 sps:$4 sm:$0xff]   ;;  %v950_v39 = vld [vmem:[%s1396_s1 + $0xe0] ss:$8 sps:$4 sm:$0xff]   ;;  %v953_v41 = vld [vmem:[%s1396_s1 + $0xd4] ss:$8 sps:$4 sm:$0xff]  }
   0xf   :  { %299 = vmatpush1.bf16.msra.mxu0 %v913_v14  ;;  %v955_v42 = vld [vmem:[%s1395_s3 + $0xd0] ss:$8 sps:$4 sm:$0xff]   ;;  %v957_v44 = vld [vmem:[%s1395_s3 + $0xc4] ss:$8 sps:$4 sm:$0xff]   ;;  %v961_v46 = vld [vmem:[%s1395_s3 + $0xc0] ss:$8 sps:$4 sm:$0xff]  }
  0x10   :  { %682 = vmatpush1.bf16.msra.mxu1 %v914_v15  ;;  %300 = vmatprep.subr.bf16.mxu0 %v915_v16  ;;  %v956_v43 = vld [vmem:[%s1396_s1 + $0xd0] ss:$8 sps:$4 sm:$0xff]   ;;  %v959_v45 = vld [vmem:[%s1396_s1 + $0xc4] ss:$8 sps:$4 sm:$0xff]   ;;  %v962_v47 = vld [vmem:[%s1396_s1 + $0xc0] ss:$8 sps:$4 sm:$0xff]  }
  0x11   :  { %683 = vmatprep.subr.bf16.mxu1 %v917_v17  ;;  %v963_v48 = vld [vmem:[%s1395_s3 + $0xb4] ss:$8 sps:$4 sm:$0xff]   ;;  %v989_v49 = vld [vmem:[%s1397_s2 + $0x4] ss:$8 sps:$4 sm:$0xff]   ;;  %v967_v52 = vld [vmem:[%s1395_s3 + $0xb0] ss:$8 sps:$4 sm:$0xff]  }
  0x12   :  { %v965_v50 = vld [vmem:[%s1396_s1 + $0xb4] ss:$8 sps:$4 sm:$0xff]   ;;  %324 = vmatprep.mubr.bf16.mxu0 %v989_v49  ;;  %v968_v53 = vld [vmem:[%s1396_s1 + $0xb0] ss:$8 sps:$4 sm:$0xff]   ;;  %v969_v54 = vld [vmem:[%s1395_s3 + $0xa4] ss:$8 sps:$4 sm:$0xff]  }
  0x13   :  { %301 = vmatpush1.bf16.msra.mxu0 %v919_v18  ;;  %v992_v51 = vld [vmem:[%s1398_s0 + $0x4] ss:$16 sps:$4 sm:$0xff]   ;;  %v973_v56 = vld [vmem:[%s1395_s3 + $0xa0] ss:$8 sps:$4 sm:$0xff]   ;;  %v979_v60 = vld [vmem:[%s1395_s3 + $0x90] ss:$8 sps:$4 sm:$0xff]  }
  0x14   :  { %684 = vmatpush1.bf16.msra.mxu1 %v920_v19  ;;  %302 = vmatprep.subr.bf16.mxu0 %v921_v20  ;;  %v971_v55 = vld [vmem:[%s1396_s1 + $0xa4] ss:$8 sps:$4 sm:$0xff]   ;;  %v974_v57 = vld [vmem:[%s1396_s1 + $0xa0] ss:$8 sps:$4 sm:$0xff]   ;;  %v975_v58 = vld [vmem:[%s1395_s3 + $0x94] ss:$8 sps:$4 sm:$0xff]  }
  0x15   :  { %685 = vmatprep.subr.bf16.mxu1 %v923_v21  ;;  %707 = vmatprep.mubr.bf16.mxu1 %v992_v51  ;;  %v977_v59 = vld [vmem:[%s1396_s1 + $0x94] ss:$8 sps:$4 sm:$0xff]   ;;  %v980_v61 = vld [vmem:[%s1396_s1 + $0x90] ss:$8 sps:$4 sm:$0xff]   ;;  %v981_v62 = vld [vmem:[%s1395_s3 + $0x84] ss:$8 sps:$4 sm:$0xff]  }
  0x16   :  { %v983_v63 = vld [vmem:[%s1396_s1 + $0x84] ss:$8 sps:$4 sm:$0xff]   ;;  %v985_v0 = vld [vmem:[%s1395_s3 + $0x80] ss:$8 sps:$4 sm:$0xff]   ;;  %v995_v2 = vld [vmem:[%s1396_s1 + $0x174] ss:$8 sps:$4 sm:$0xff]  }
  0x17   :  { %303 = vmatpush1.bf16.msra.mxu0 %v925_v22  ;;  %v986_v1 = vld [vmem:[%s1396_s1 + $0x80] ss:$8 sps:$4 sm:$0xff]   ;;  %v993_v5 = vld [vmem:[%s1396_s1 + $0x170] ss:$8 sps:$4 sm:$0xff]   ;;  %v998_v6 = vld [vmem:[%s1396_s1 + $0x164] ss:$8 sps:$4 sm:$0xff]  }
  0x18   :  { %686 = vmatpush1.bf16.msra.mxu1 %v926_v23  ;;  %304 = vmatprep.subr.bf16.mxu0 %v927_v24  ;;  %v987_v3 = vld [vmem:[%s1397_s2] ss:$8 sps:$4 sm:$0xff]   ;;  %v1043_v7 = vld [vmem:[%s1398_s0 + $0xc] ss:$16 sps:$4 sm:$0xff]   ;;  %v999_v10 = vld [vmem:[%s1396_s1 + $0x150] ss:$8 sps:$4 sm:$0xff]  }
  0x19   :  { %687 = vmatprep.subr.bf16.mxu1 %v929_v25  ;;  %v990_v4 = vld [vmem:[%s1398_s0] ss:$16 sps:$4 sm:$0xff]   ;;  %v1001_v9 = vld [vmem:[%s1396_s1 + $0x154] ss:$8 sps:$4 sm:$0xff]   ;;  %v1004_v11 = vld [vmem:[%s1396_s1 + $0x144] ss:$8 sps:$4 sm:$0xff]  }
  0x1a   :  { %v996_v8 = vld [vmem:[%s1396_s1 + $0x160] ss:$8 sps:$4 sm:$0xff]   ;;  %v1007_v13 = vld [vmem:[%s1396_s1 + $0x134] ss:$8 sps:$4 sm:$0xff]   ;;  %v1005_v14 = vld [vmem:[%s1396_s1 + $0x130] ss:$8 sps:$4 sm:$0xff]  }
  0x1b   :  { %305 = vmatpush1.bf16.msra.mxu0 %v931_v26  ;;  %v1002_v12 = vld [vmem:[%s1396_s1 + $0x140] ss:$8 sps:$4 sm:$0xff]   ;;  %v1010_v15 = vld [vmem:[%s1396_s1 + $0x124] ss:$8 sps:$4 sm:$0xff]   ;;  %v1013_v17 = vld [vmem:[%s1396_s1 + $0x114] ss:$8 sps:$4 sm:$0xff]  }
  0x1c   :  { %688 = vmatpush1.bf16.msra.mxu1 %v932_v27  ;;  %306 = vmatprep.subr.bf16.mxu0 %v933_v28  ;;  %v1008_v16 = vld [vmem:[%s1396_s1 + $0x120] ss:$8 sps:$4 sm:$0xff]   ;;  %v1011_v18 = vld [vmem:[%s1396_s1 + $0x110] ss:$8 sps:$4 sm:$0xff]   ;;  %v1016_v19 = vld [vmem:[%s1396_s1 + $0x104] ss:$8 sps:$4 sm:$0xff]  }
  0x1d   :  { %689 = vmatprep.subr.bf16.mxu1 %v935_v29  ;;  %v1014_v20 = vld [vmem:[%s1396_s1 + $0x100] ss:$8 sps:$4 sm:$0xff]   ;;  %v1019_v21 = vld [vmem:[%s1396_s1 + $0x1f4] ss:$8 sps:$4 sm:$0xff]   ;;  %v1017_v22 = vld [vmem:[%s1396_s1 + $0x1f0] ss:$8 sps:$4 sm:$0xff]  }
  0x1e   :  { %v1022_v23 = vld [vmem:[%s1396_s1 + $0x1e4] ss:$8 sps:$4 sm:$0xff]   ;;  %v1020_v24 = vld [vmem:[%s1396_s1 + $0x1e0] ss:$8 sps:$4 sm:$0xff]   ;;  %v1025_v25 = vld [vmem:[%s1396_s1 + $0x1d4] ss:$8 sps:$4 sm:$0xff]  }
  0x1f   :  { %307 = vmatpush1.bf16.msra.mxu0 %v937_v30  ;;  %v1023_v26 = vld [vmem:[%s1396_s1 + $0x1d0] ss:$8 sps:$4 sm:$0xff]   ;;  %v1028_v27 = vld [vmem:[%s1396_s1 + $0x1c4] ss:$8 sps:$4 sm:$0xff]   ;;  %v1026_v28 = vld [vmem:[%s1396_s1 + $0x1c0] ss:$8 sps:$4 sm:$0xff]  }
  0x20   :  { %690 = vmatpush1.bf16.msra.mxu1 %v938_v31  ;;  %308 = vmatprep.subr.bf16.mxu0 %v939_v32  ;;  %v1031_v29 = vld [vmem:[%s1396_s1 + $0x1b4] ss:$8 sps:$4 sm:$0xff]   ;;  %v1029_v30 = vld [vmem:[%s1396_s1 + $0x1b0] ss:$8 sps:$4 sm:$0xff]   ;;  %v1034_v31 = vld [vmem:[%s1396_s1 + $0x1a4] ss:$8 sps:$4 sm:$0xff]  }
  0x21   :  { %691 = vmatprep.subr.bf16.mxu1 %v941_v33  ;;  %v1032_v32 = vld [vmem:[%s1396_s1 + $0x1a0] ss:$8 sps:$4 sm:$0xff]   ;;  %v1037_v33 = vld [vmem:[%s1396_s1 + $0x194] ss:$8 sps:$4 sm:$0xff]  }
  0x23   :  { %309 = vmatpush2.bf16.msra.mxu0 %v943_v34  ;;  %v1035_v34 = vld [vmem:[%s1396_s1 + $0x190] ss:$8 sps:$4 sm:$0xff]  }
  0x24   :  { %692 = vmatpush2.bf16.msra.mxu1 %v944_v35  ;;  %310 = vmatprep.subr.bf16.mxu0 %v945_v36  ;;  %v1040_v35 = vld [vmem:[%s1396_s1 + $0x184] ss:$8 sps:$4 sm:$0xff]   ;;  %v1038_v36 = vld [vmem:[%s1396_s1 + $0x180] ss:$8 sps:$4 sm:$0xff]  }
  0x25   :  { %693 = vmatprep.subr.bf16.mxu1 %v947_v37  ;;  %v1041_v37 = vld [vmem:[%s1398_s0 + $0x8] ss:$16 sps:$4 sm:$0xff]  }
  0x27   :  { %311 = vmatpush2.bf16.msra.mxu0 %v949_v38 }
  0x28   :  { %694 = vmatpush2.bf16.msra.mxu1 %v950_v39  ;;  %312 = vmatprep.subr.bf16.mxu0 %v951_v40  ;;  %v763_v39 = vlaneseq }
  0x29   :  { %695 = vmatprep.subr.bf16.mxu1 %v953_v41 }
  0x2b   :  { %313 = vmatpush2.bf16.msra.mxu0 %v955_v42  ;;  %v764_v42 = vshrl.u32 %v763_v39, 7 }
  0x2c   :  { %696 = vmatpush2.bf16.msra.mxu1 %v956_v43  ;;  %314 = vmatprep.subr.bf16.mxu0 %v957_v44 }
  0x2d   :  { %697 = vmatprep.subr.bf16.mxu1 %v959_v45  ;;  %v765_v45 = vsub.s32 0, %v764_v42 }
  0x2f   :  { %315 = vmatpush2.bf16.msra.mxu0 %v961_v46  ;;  %v761_v46 = vld [vmem:[%s1399_s4] sm:$0x3] }
  0x30   :  { %698 = vmatpush2.bf16.msra.mxu1 %v962_v47  ;;  %316 = vmatprep.subr.bf16.mxu0 %v963_v48  ;;  %v769_v47 = vsub.s32 1, %v764_v42  ;;  %v766_v51 = vrot.slane %v761_v46, %v765_v45 }
  0x31   :  { %699 = vmatprep.subr.bf16.mxu1 %v965_v50 }
  0x33   :  { %317 = vmatpush2.bf16.msra.mxu0 %v967_v52 }
  0x34   :  { %700 = vmatpush2.bf16.msra.mxu1 %v968_v53  ;;  %318 = vmatprep.subr.bf16.mxu0 %v969_v54 }
  0x35   :  { %701 = vmatprep.subr.bf16.mxu1 %v971_v55  ;;  %v770_v55 = vrot.slane %v761_v46, %v769_v47 }
  0x37   :  { %319 = vmatpush2.bf16.msra.mxu0 %v973_v56 }
  0x38   :  { %702 = vmatpush2.bf16.msra.mxu1 %v974_v57  ;;  %320 = vmatprep.subr.bf16.mxu0 %v975_v58 }
  0x39   :  { %703 = vmatprep.subr.bf16.mxu1 %v977_v59 }
  0x3b   :  { %321 = vmatpush2.bf16.msra.mxu0 %v979_v60 }
  0x3c   :  { %704 = vmatpush2.bf16.msra.mxu1 %v980_v61  ;;  %322 = vmatprep.subr.bf16.mxu0 %v981_v62 }
  0x3d   :  { %705 = vmatprep.subr.bf16.mxu1 %v983_v63 }
  0x3f   :  { %323 = vmatpush2.bf16.msra.mxu0 %v985_v0 }
  0x40   :  { %706 = vmatpush2.bf16.msra.mxu1 %v986_v1  ;;  %718 = vmatprep.subr.bf16.mxu0 %v995_v2 }
  0x42   :  { %325 = vmatmul.mubr.bf16.vlgmr.msra.gmra.mxu0 %v987_v3 }
  0x43   :  { %708 = vmatmul.mubr.bf16.vlgmr.msra.gmra.mxu1 %v990_v4  ;;  %719 = vmatpush1.bf16.msra.mxu0 %v993_v5 }
  0x44   :  { %720 = vmatprep.subr.bf16.mxu0 %v998_v6  ;;  %750 = vmatprep.mubr.bf16.mxu0 %v1043_v7 }
  0x47   :  { %721 = vmatpush1.bf16.msra.mxu0 %v996_v8 }
  0x48   :  { %722 = vmatprep.subr.bf16.mxu0 %v1001_v9 }
  0x4b   :  { %723 = vmatpush1.bf16.msra.mxu0 %v999_v10 }
  0x4c   :  { %724 = vmatprep.subr.bf16.mxu0 %v1004_v11 }
  0x4f   :  { %725 = vmatpush1.bf16.msra.mxu0 %v1002_v12 }
  0x50   :  { %726 = vmatprep.subr.bf16.mxu0 %v1007_v13 }
  0x53   :  { %727 = vmatpush1.bf16.msra.mxu0 %v1005_v14 }
  0x54   :  { %728 = vmatprep.subr.bf16.mxu0 %v1010_v15 }
  0x57   :  { %729 = vmatpush1.bf16.msra.mxu0 %v1008_v16 }
  0x58   :  { %730 = vmatprep.subr.bf16.mxu0 %v1013_v17 }
  0x5b   :  { %731 = vmatpush1.bf16.msra.mxu0 %v1011_v18 }
  0x5c   :  { %732 = vmatprep.subr.bf16.mxu0 %v1016_v19 }
  0x5f   :  { %733 = vmatpush1.bf16.msra.mxu0 %v1014_v20 }
  0x60   :  { %734 = vmatprep.subr.bf16.mxu0 %v1019_v21 }
  0x63   :  { %735 = vmatpush2.bf16.msra.mxu0 %v1017_v22 }
  0x64   :  { %736 = vmatprep.subr.bf16.mxu0 %v1022_v23 }
  0x67   :  { %737 = vmatpush2.bf16.msra.mxu0 %v1020_v24 }
  0x68   :  { %738 = vmatprep.subr.bf16.mxu0 %v1025_v25 }
  0x6b   :  { %739 = vmatpush2.bf16.msra.mxu0 %v1023_v26 }
  0x6c   :  { %740 = vmatprep.subr.bf16.mxu0 %v1028_v27 }
  0x6f   :  { %741 = vmatpush2.bf16.msra.mxu0 %v1026_v28 }
  0x70   :  { %742 = vmatprep.subr.bf16.mxu0 %v1031_v29 }
  0x73   :  { %743 = vmatpush2.bf16.msra.mxu0 %v1029_v30 }
  0x74   :  { %744 = vmatprep.subr.bf16.mxu0 %v1034_v31 }
  0x77   :  { %745 = vmatpush2.bf16.msra.mxu0 %v1032_v32 }
  0x78   :  { %746 = vmatprep.subr.bf16.mxu0 %v1037_v33 }
  0x7b   :  { %747 = vmatpush2.bf16.msra.mxu0 %v1035_v34 }
  0x7c   :  { %748 = vmatprep.subr.bf16.mxu0 %v1040_v35 }
  0x7f   :  { %749 = vmatpush2.bf16.msra.mxu0 %v1038_v36 }
  0x82   :  { %751 = vmatmul.mubr.bf16.vlgmr.msra.gmra.mxu0 %v1041_v37 }
 0x102   :  { %v326_v38 = vpop.f32.mrf.mxu0 }
 0x103   :  { %v709_v40 = vpop.f32.mrf.mxu1 }
 0x104   :  { %v328_v41 = vpop.f32.mrf.mxu0  ;;  %v710_v50 = vadd.f32 %v709_v40, %v326_v38 }
 0x105   :  { %v711_v43 = vpop.f32.mrf.mxu1 }
 0x106   :  { %v330_v44 = vpop.f32.mrf.mxu0  ;;  %v712_v53 = vadd.f32 %v711_v43, %v328_v41 }
 0x107   :  { %v713_v48 = vpop.f32.mrf.mxu1 }
 0x108   :  { %v332_v49 = vpop.f32.mrf.mxu0  ;;  %v714_v58 = vadd.f32 %v713_v48, %v330_v44 }
 0x109   :  { %v715_v56 = vpop.f32.mrf.mxu1 }
 0x10a   :  { %v716_v62 = vadd.f32 %v715_v56, %v332_v49 }
 0x142   :  { %v752_v52 = vpop.f32.mrf.mxu0 }
 0x143   :  { %v753_v54 = vadd.f32 %v752_v52, %v710_v50 }
 0x144   :  { %v754_v57 = vpop.f32.mrf.mxu0 }
 0x145   :  { %v773_v59 = vadd.f32 %v766_v51, %v753_v54  ;;  %v755_v60 = vadd.f32 %v754_v57, %v712_v53 }
 0x146   :  { %v756_v61 = vpop.f32.mrf.mxu0 }
 0x147   :  { %v777_v63 = vmax.f32 %v773_v59, 0.0  ;;  %v774_v0 = vadd.f32 %v770_v55, %v755_v60  ;;  %v757_v1 = vadd.f32 %v756_v61, %v714_v58 }
 0x148   :  { %v758_v2 = vpop.f32.mrf.mxu0 }
 0x149   :  { %781 = vst [vmem:[%s1400_s5] sm:$0xff] %v777_v63  ;;  %v778_v3 = vmax.f32 %v774_v0, 0.0  ;;  %v775_v4 = vadd.f32 %v766_v51, %v757_v1  ;;  %v759_v5 = vadd.f32 %v758_v2, %v716_v62 }
 0x14b   :  { %782 = vst [vmem:[%s1400_s5 + $0x8] sm:$0xff] %v778_v3  ;;  %v779_v6 = vmax.f32 %v775_v4, 0.0  ;;  %v776_v7 = vadd.f32 %v770_v55, %v759_v5 }
 0x14d   :  { %783 = vst [vmem:[%s1400_s5 + $0x10] sm:$0xff] %v779_v6  ;;  %v780_v8 = vmax.f32 %v776_v7, 0.0 }
 0x14f   :  { %784 = vst [vmem:[%s1400_s5 + $0x18] sm:$0xff] %v780_v8 }

// kernel: gen_forward.19
= control target key start
LH: loop header
LB: loop body
LE: loop exit
PB: predicated region body
PF: predicated region fallthrough
CT: control target
= control target key end

     0   :  { %s1193_s12 = smov 0   ;;  %s1195_s13 = smov 0   ;;  %s1484_s0 = inlined_call_operand.vmem [shape: bf16[16,768], index: 0, kind: input, shape index: {}]   ;;  %s1485_s1 = inlined_call_operand.vmem [shape: bf16[768,512], index: 1, kind: input, shape index: {}]   ;;  %s1486_s2 = inlined_call_operand.vmem [shape: f32[1,512], index: 2, kind: input, shape index: {}]   ;;  %s1487_s3 = inlined_call_operand.vmem [shape: f32[16,512], index: 3, kind: output, shape index: {}]  }
   0x1   :  { %s1197_s14 = smov 0   ;;  %s1199_s15 = smov 0  }
   0x2   :  { %s1201_s16 = smov 0   ;;  %s1203_s17 = smov 0  }
   0x3   :  { %s1205_s18 = smov 0   ;;  %s1207_s19 = smov 0  }
   0x4   :  { %s1209_s20 = smov 0   ;;  %s1211_s21 = smov 0  }
   0x5   :  { %s1213_s22 = smov 0  }
   0x6 LB: > { %s883_s23 = sadd.s32 4294967295, %s1170_s22   ;;  %s25_s24 = sadd.s32 1, %s1162_s20  ;;  %s1170_s22 = sphi %s1213_s22, %s13_s22   ;;  %s1166_s21 = sphi %s1211_s21, %s1508_s21   ;;  %s1162_s20 = sphi %s1209_s20, %s1507_s20   ;;  %s1158_s19 = sphi %s1207_s19, %s1506_s19   ;;  %s1154_s18 = sphi %s1205_s18, %s1505_s18   ;;  %s1150_s17 = sphi %s1203_s17, %s1504_s17   ;;  %s1146_s16 = sphi %s1201_s16, %s1503_s16   ;;  %s1142_s15 = sphi %s1199_s15, %s1502_s15   ;;  %s1138_s14 = sphi %s1197_s14, %s1501_s14   ;;  %s1134_s13 = sphi %s1195_s13, %s1500_s13   ;;  %s1130_s12 = sphi %s1193_s12, %s1499_s12  }
   0x7   : > { %p26_p0 = scmp.ge.s32.totalorder %s25_s24, 3  ;;  %s28_s25 = sadd.s32 1, %s1166_s21 }
   0x8   : > { %s41_s26 = sadd.s32 1, %s1150_s17  ;;  %p48_p1 = scmp.ne.s32.totalorder %s1150_s17, %s1146_s16 }
   0x9   : > { %s1510_s24 = smov (%p26_p0, %s25_s24), 0  ;;  %s1512_s25 = smov (!%p26_p0, %s28_s25), %s1166_s21 }
   0xa   : > { %1490 = sst [smem:[#allocation6_spill]] %s1510_s24  ;;  %s37_s27 = ssub.s32 %s1162_s20, %s1510_s24 }
   0xb   : > { %p49_p2 = scmp.eq.s32.totalorder %s1170_s22, 0  ;;  %p30_p3 = scmp.ge.s32.totalorder %s1512_s25, 2 }
   0xc   : > { %p39_p4 = scmp.eq.s32.totalorder %s37_s27, 0  ;;  %s69_s29 = sadd.s32 1, %s1142_s15 }
   0xd   : > { %p1260_p5 = por %p49_p2, %p48_p1  ;;  %s1514_s25 = smov (%p30_p3, %s1512_s25), 0 }
   0xe   : > { %1492 = sst [smem:[#allocation7_spill]] %s1514_s25  ;;  %s65_s4 = ssub.s32 %s1166_s21, %s1514_s25 }
   0xf   : > { %s1268_s30 = scalar_select %p39_p4, %s1150_s17, %s41_s26  }
  0x10   : > { %p76_p6 = scmp.ne.s32.totalorder %s1142_s15, %s1138_s14  ;;  %s66_s5 = sor.u32 %s65_s4, %s37_s27 }
  0x11   : > { %1493 = sst [smem:[#allocation8_spill]] %s1268_s30  ;;  %p121_p7 = scmp.eq.s32.totalorder %s65_s4, 0 }
  0x12   : > { %p67_p8 = scmp.eq.s32.totalorder %s66_s5, 0  ;;  %p1274_p9 = por %p76_p6, %p49_p2 }
  0x13   : > { %s123_s7 = sadd.s32 1, %s1134_s13  ;;  %p133_p10 = scmp.ne.s32.totalorder %s1134_s13, %s1130_s12 }
  0x14   : > { %s1282_s8 = scalar_select %p67_p8, %s1142_s15, %s69_s29  }
  0x15   : > { %s1285_s9 = scalar_select %p121_p7, %s1134_s13, %s123_s7  }
  0x16   : > { %p134_p11 = scmp.eq.s32.totalorder %s883_s23, 5  ;;  %p886_p13 = scmp.ge.s32.totalorder %s1170_s22, 6 }
  0x18   : > { %p1287_p12 = por %p134_p11, %p133_p10  ;;  %156 = sbr.rel (%p886_p13) target bundleno = 57 (0x39), region = 16 }
  0x1d   : > { %159 = sbr.rel (!%p1260_p5) target bundleno = 34 (0x22), region = 20  ;;  %s161_s11 = sand.u32 (%p1260_p5), 1, %s1150_s17  }
  0x1e   : > { %s941_s26 = sshll.u32 (%p1260_p5), %s1162_s20, 3  ;;  %s887_s27 = sshll.u32 (%p1260_p5), %s161_s11, 4 }
  0x1f   : > { %s169_s5 = scalar_lea.vmem (%p1260_p5), %s1484_s0, %s941_s26  ;;  %s163_s23 = scalar_lea.vmem (%p1260_p5), [#allocation3], %s887_s27 }
  0x20   : > { %v200_v0 = vld [vmem:[%s169_s5] sm:$0xff] (%p1260_p5)  ;;  %v202_v1 = vld [vmem:[%s169_s5 + $0x18] sm:$0xff] (%p1260_p5) }
  0x21   : > { %201 = vst [vmem:[%s163_s23] sm:$0xff] (%p1260_p5), %v200_v0  ;;  %203 = vst [vmem:[%s163_s23 + $0x8] sm:$0xff] (%p1260_p5), %v202_v1 }
  0x22 PF: > { %209 = sbr.rel (!%p1274_p9) target bundleno = 57 (0x39), region = 58  ;;  %s211_s28 = sand.u32 (%p1274_p9), 1, %s1142_s15  }
  0x23   : > { %s892_s7 = sshll.u32 (%p1274_p9), %s1166_s21, 1  ;;  %s890_s25 = sshll.u32 (%p1274_p9), %s211_s28, 8 }
  0x24   : > { %s942_s11 = sshll.u32 (%p1274_p9), %s1162_s20, 7  ;;  %s1312_s6 = scalar_lea.vmem (%p1274_p9), [#allocation4], %s890_s25 }
  0x25   : > { %s217_s24 = sadd.s32 (%p1274_p9), %s942_s11, %s892_s7 }
  0x26   : > { %s894_s30 = sshll.u32 (%p1274_p9), %s217_s24, 2 }
  0x27   : > { %s1307_s4 = scalar_lea.vmem %s1485_s1, %s894_s30 }
  0x28   : > { %v310_v2 = vld [vmem:[%s1307_s4] sm:$0xff]  ;;  %v312_v3 = vld [vmem:[%s1307_s4 + $0x10] sm:$0xff] }
  0x29   : > { %v314_v4 = vld [vmem:[%s1307_s4 + $0x20] sm:$0xff]  ;;  %311 = vst [vmem:[%s1312_s6] sm:$0xff] %v310_v2  ;;  %313 = vst [vmem:[%s1312_s6 + $0x8] sm:$0xff] %v312_v3  ;;  %v316_v5 = vld [vmem:[%s1307_s4 + $0x30] sm:$0xff] }
  0x2a   : > { %315 = vst [vmem:[%s1312_s6 + $0x10] sm:$0xff] %v314_v4  ;;  %v318_v6 = vld [vmem:[%s1307_s4 + $0x40] sm:$0xff]  ;;  %v320_v7 = vld [vmem:[%s1307_s4 + $0x50] sm:$0xff]  ;;  %317 = vst [vmem:[%s1312_s6 + $0x18] sm:$0xff] %v316_v5 }
  0x2b   : > { %319 = vst [vmem:[%s1312_s6 + $0x20] sm:$0xff] %v318_v6  ;;  %321 = vst [vmem:[%s1312_s6 + $0x28] sm:$0xff] %v320_v7  ;;  %v322_v8 = vld [vmem:[%s1307_s4 + $0x60] sm:$0xff]  ;;  %v324_v9 = vld [vmem:[%s1307_s4 + $0x70] sm:$0xff] }
  0x2c   : > { %v326_v10 = vld [vmem:[%s1307_s4 + $0x80] sm:$0xff]  ;;  %323 = vst [vmem:[%s1312_s6 + $0x30] sm:$0xff] %v322_v8  ;;  %325 = vst [vmem:[%s1312_s6 + $0x38] sm:$0xff] %v324_v9  ;;  %v328_v11 = vld [vmem:[%s1307_s4 + $0x90] sm:$0xff] }
  0x2d   : > { %327 = vst [vmem:[%s1312_s6 + $0x40] sm:$0xff] %v326_v10  ;;  %v330_v12 = vld [vmem:[%s1307_s4 + $0xa0] sm:$0xff]  ;;  %v332_v13 = vld [vmem:[%s1307_s4 + $0xb0] sm:$0xff]  ;;  %329 = vst [vmem:[%s1312_s6 + $0x48] sm:$0xff] %v328_v11 }
  0x2e   : > { %331 = vst [vmem:[%s1312_s6 + $0x50] sm:$0xff] %v330_v12  ;;  %333 = vst [vmem:[%s1312_s6 + $0x58] sm:$0xff] %v332_v13  ;;  %v334_v14 = vld [vmem:[%s1307_s4 + $0xc0] sm:$0xff]  ;;  %v336_v15 = vld [vmem:[%s1307_s4 + $0xd0] sm:$0xff] }
  0x2f   : > { %v338_v16 = vld [vmem:[%s1307_s4 + $0xe0] sm:$0xff]  ;;  %335 = vst [vmem:[%s1312_s6 + $0x60] sm:$0xff] %v334_v14  ;;  %337 = vst [vmem:[%s1312_s6 + $0x68] sm:$0xff] %v336_v15  ;;  %v340_v17 = vld [vmem:[%s1307_s4 + $0xf0] sm:$0xff] }
  0x30   : > { %339 = vst [vmem:[%s1312_s6 + $0x70] sm:$0xff] %v338_v16  ;;  %v342_v18 = vld [vmem:[%s1307_s4 + $0x100] sm:$0xff]  ;;  %v344_v19 = vld [vmem:[%s1307_s4 + $0x110] sm:$0xff]  ;;  %341 = vst [vmem:[%s1312_s6 + $0x78] sm:$0xff] %v340_v17 }
  0x31   : > { %343 = vst [vmem:[%s1312_s6 + $0x80] sm:$0xff] %v342_v18  ;;  %345 = vst [vmem:[%s1312_s6 + $0x88] sm:$0xff] %v344_v19  ;;  %v346_v20 = vld [vmem:[%s1307_s4 + $0x120] sm:$0xff]  ;;  %v348_v21 = vld [vmem:[%s1307_s4 + $0x130] sm:$0xff] }
  0x32   : > { %v350_v22 = vld [vmem:[%s1307_s4 + $0x140] sm:$0xff]  ;;  %347 = vst [vmem:[%s1312_s6 + $0x90] sm:$0xff] %v346_v20  ;;  %349 = vst [vmem:[%s1312_s6 + $0x98] sm:$0xff] %v348_v21  ;;  %v352_v23 = vld [vmem:[%s1307_s4 + $0x150] sm:$0xff] }
  0x33   : > { %351 = vst [vmem:[%s1312_s6 + $0xa0] sm:$0xff] %v350_v22  ;;  %v354_v24 = vld [vmem:[%s1307_s4 + $0x160] sm:$0xff]  ;;  %v356_v25 = vld [vmem:[%s1307_s4 + $0x170] sm:$0xff]  ;;  %353 = vst [vmem:[%s1312_s6 + $0xa8] sm:$0xff] %v352_v23 }
  0x34   : > { %355 = vst [vmem:[%s1312_s6 + $0xb0] sm:$0xff] %v354_v24  ;;  %357 = vst [vmem:[%s1312_s6 + $0xb8] sm:$0xff] %v356_v25  ;;  %v358_v26 = vld [vmem:[%s1307_s4 + $0x180] sm:$0xff]  ;;  %v360_v27 = vld [vmem:[%s1307_s4 + $0x190] sm:$0xff] }
  0x35   : > { %v362_v28 = vld [vmem:[%s1307_s4 + $0x1a0] sm:$0xff]  ;;  %359 = vst [vmem:[%s1312_s6 + $0xc0] sm:$0xff] %v358_v26  ;;  %361 = vst [vmem:[%s1312_s6 + $0xc8] sm:$0xff] %v360_v27  ;;  %v364_v29 = vld [vmem:[%s1307_s4 + $0x1b0] sm:$0xff] }
  0x36   : > { %363 = vst [vmem:[%s1312_s6 + $0xd0] sm:$0xff] %v362_v28  ;;  %v366_v30 = vld [vmem:[%s1307_s4 + $0x1c0] sm:$0xff]  ;;  %v368_v31 = vld [vmem:[%s1307_s4 + $0x1d0] sm:$0xff]  ;;  %365 = vst [vmem:[%s1312_s6 + $0xd8] sm:$0xff] %v364_v29 }
  0x37   : > { %367 = vst [vmem:[%s1312_s6 + $0xe0] sm:$0xff] %v366_v30  ;;  %369 = vst [vmem:[%s1312_s6 + $0xe8] sm:$0xff] %v368_v31  ;;  %v370_v32 = vld [vmem:[%s1307_s4 + $0x1e0] sm:$0xff]  ;;  %v372_v33 = vld [vmem:[%s1307_s4 + $0x1f0] sm:$0xff] }
  0x38   : > { %371 = vst [vmem:[%s1312_s6 + $0xf0] sm:$0xff] %v370_v32  ;;  %373 = vst [vmem:[%s1312_s6 + $0xf8] sm:$0xff] %v372_v33 }
  0x39 PF: > { %p895_p0 = scmp.ge.s32.totalorder %s1170_s22, 1  ;;  %p386_p1 = scmp.lt.s32.totalorder %s1170_s22, 7 }
  0x3b   : > { %p387_p2 = pnand %p895_p0, %p386_p1 }
  0x3c   : > { %s393_s24 = sand.u32 (!%p387_p2), 1, %s1146_s16   ;;  %s400_s25 = sand.u32 (!%p387_p2), 1, %s1138_s14  }
  0x3d   : > { %390 = sbr.rel (%p387_p2) target bundleno = 365 (0x16d), region = 100  ;;  %s1379_s30 = sshll.u32 (!%p387_p2), %s393_s24, 4 }
  0x3e   : > { %s897_s27 = sshll.u32 (!%p387_p2), %s400_s25, 8  ;;  %s427_s5 = sand.u32 (!%p387_p2), 1, %s1130_s12  }
  0x3f   : > { %s899_s23 = sshll.u32 (!%p387_p2), %s1158_s19, 1  ;;  %s898_s28 = sshll.u32 (!%p387_p2), %s427_s5, 5 }
  0x40   : > { %p435_p3 = scmp.lt.s32.totalorder (!%p387_p2), %s899_s23, 3  ;;  %s395_s26 = scalar_lea.vmem (!%p387_p2), [#allocation3], %s1379_s30 }
  0x41   : > { %s1390_s4 = scalar_lea.vmem (!%p387_p2), [#allocation4], %s897_s27  ;;  %s1392_s16 = scalar_lea.vmem (!%p387_p2), [#allocation5], %s898_s28 }
  0x42   : > { %s1516_s23 = smov (!%p435_p3, %s899_s23), 3  ;;  %p900_p4 = scmp.ne.s32.totalorder %s1154_s18, 0 }
  0x43   : > { %s437_s29 = scalar_lea.vmem %s1486_s2, %s1516_s23 }
  0x44   : > { %444 = sbr.rel (%p900_p4) target bundleno = 76 (0x4c), region = 112 }
  0x49   : > { %v1172_v34 = vmov 0.0  }
  0x4a   : > { %445 = vst [vmem:[#allocation2 + $0x10] sm:$0xff] %v1172_v34  ;;  %446 = vst [vmem:[#allocation2] sm:$0xff] %v1172_v34 }
  0x4b   : > { %447 = vst [vmem:[#allocation2 + $0x18] sm:$0xff] %v1172_v34  ;;  %448 = vst [vmem:[#allocation2 + $0x8] sm:$0xff] %v1172_v34 }
  0x4c PF: > { %v1033_v35 = vld [vmem:[%s1390_s4 + $0x74] ss:$8 sps:$4 sm:$0xff]   ;;  %v1035_v36 = vld [vmem:[%s1390_s4 + $0x70] ss:$8 sps:$4 sm:$0xff]   ;;  %v1036_v37 = vld [vmem:[%s1390_s4 + $0x64] ss:$8 sps:$4 sm:$0xff]  }
  0x4d   : > { %657 = vmatprep.subr.bf16.mxu0 %v1033_v35  ;;  %v1038_v38 = vld [vmem:[%s1390_s4 + $0x60] ss:$8 sps:$4 sm:$0xff]   ;;  %v1039_v39 = vld [vmem:[%s1390_s4 + $0x54] ss:$8 sps:$4 sm:$0xff]   ;;  %v1041_v40 = vld [vmem:[%s1390_s4 + $0x50] ss:$8 sps:$4 sm:$0xff]  }
  0x4e   : > { %658 = vmatpush1.bf16.msra.mxu0 %v1035_v36  ;;  %v1042_v41 = vld [vmem:[%s1390_s4 + $0x44] ss:$8 sps:$4 sm:$0xff]   ;;  %v1044_v42 = vld [vmem:[%s1390_s4 + $0x40] ss:$8 sps:$4 sm:$0xff]   ;;  %v1045_v43 = vld [vmem:[%s1390_s4 + $0x34] ss:$8 sps:$4 sm:$0xff]  }
  0x4f   : > { %659 = vmatprep.subr.bf16.mxu0 %v1036_v37  ;;  %v1047_v44 = vld [vmem:[%s1390_s4 + $0x30] ss:$8 sps:$4 sm:$0xff]   ;;  %v1048_v45 = vld [vmem:[%s1390_s4 + $0x24] ss:$8 sps:$4 sm:$0xff]   ;;  %v1050_v46 = vld [vmem:[%s1390_s4 + $0x20] ss:$8 sps:$4 sm:$0xff]  }
  0x50   : > { %v1051_v47 = vld [vmem:[%s1390_s4 + $0x14] ss:$8 sps:$4 sm:$0xff]   ;;  %v1053_v49 = vld [vmem:[%s1390_s4 + $0x10] ss:$8 sps:$4 sm:$0xff]   ;;  %v1054_v50 = vld [vmem:[%s1390_s4 + $0x4] ss:$8 sps:$4 sm:$0xff]  }
  0x51   : > { %v1083_v48 = vld [vmem:[%s395_s26 + $0x4] ss:$8 sps:$4 sm:$0xff]   ;;  %v1056_v51 = vld [vmem:[%s1390_s4] ss:$8 sps:$4 sm:$0xff]   ;;  %v1059_v53 = vld [vmem:[%s1390_s4 + $0xf0] ss:$8 sps:$4 sm:$0xff]  }
  0x52   : > { %660 = vmatpush1.bf16.msra.mxu0 %v1038_v38  ;;  %689 = vmatprep.mubr.bf16.mxu0 %v1083_v48  ;;  %v1057_v52 = vld [vmem:[%s1390_s4 + $0xf4] ss:$8 sps:$4 sm:$0xff]   ;;  %v1060_v54 = vld [vmem:[%s1390_s4 + $0xe4] ss:$8 sps:$4 sm:$0xff]   ;;  %v1062_v55 = vld [vmem:[%s1390_s4 + $0xe0] ss:$8 sps:$4 sm:$0xff]  }
  0x53   : > { %661 = vmatprep.subr.bf16.mxu0 %v1039_v39  ;;  %v1063_v56 = vld [vmem:[%s1390_s4 + $0xd4] ss:$8 sps:$4 sm:$0xff]   ;;  %v1065_v57 = vld [vmem:[%s1390_s4 + $0xd0] ss:$8 sps:$4 sm:$0xff]   ;;  %v1066_v58 = vld [vmem:[%s1390_s4 + $0xc4] ss:$8 sps:$4 sm:$0xff]  }
  0x54   : > { %v1068_v59 = vld [vmem:[%s1390_s4 + $0xc0] ss:$8 sps:$4 sm:$0xff]   ;;  %v1069_v60 = vld [vmem:[%s1390_s4 + $0xb4] ss:$8 sps:$4 sm:$0xff]   ;;  %v1071_v61 = vld [vmem:[%s1390_s4 + $0xb0] ss:$8 sps:$4 sm:$0xff]  }
  0x55   : > { %v1072_v62 = vld [vmem:[%s1390_s4 + $0xa4] ss:$8 sps:$4 sm:$0xff]   ;;  %v1074_v63 = vld [vmem:[%s1390_s4 + $0xa0] ss:$8 sps:$4 sm:$0xff]   ;;  %v1075_v0 = vld [vmem:[%s1390_s4 + $0x94] ss:$8 sps:$4 sm:$0xff]  }
  0x56   : > { %662 = vmatpush1.bf16.msra.mxu0 %v1041_v40  ;;  %v1077_v1 = vld [vmem:[%s1390_s4 + $0x90] ss:$8 sps:$4 sm:$0xff]   ;;  %v1078_v2 = vld [vmem:[%s1390_s4 + $0x84] ss:$8 sps:$4 sm:$0xff]   ;;  %v1080_v3 = vld [vmem:[%s1390_s4 + $0x80] ss:$8 sps:$4 sm:$0xff]  }
  0x57   : > { %663 = vmatprep.subr.bf16.mxu0 %v1042_v41  ;;  %v1081_v4 = vld [vmem:[%s395_s26] ss:$8 sps:$4 sm:$0xff]   ;;  %p935_p5 = scmp.ne.s32.totalorder %s1154_s18, 2 }
  0x58   : > { %v449_v5 = vld [vmem:[#allocation2 + $0x10] sm:$0xff]  ;;  %v450_v7 = vld [vmem:[#allocation2] sm:$0xff]  ;;  %v451_v10 = vld [vmem:[#allocation2 + $0x18] sm:$0xff] }
  0x59   : > { %v452_v13 = vld [vmem:[#allocation2 + $0x8] sm:$0xff] }
  0x5a   : > { %664 = vmatpush1.bf16.msra.mxu0 %v1044_v42 }
  0x5b   : > { %665 = vmatprep.subr.bf16.mxu0 %v1045_v43 }
  0x5e   : > { %666 = vmatpush1.bf16.msra.mxu0 %v1047_v44 }
  0x5f   : > { %667 = vmatprep.subr.bf16.mxu0 %v1048_v45 }
  0x62   : > { %668 = vmatpush1.bf16.msra.mxu0 %v1050_v46 }
  0x63   : > { %669 = vmatprep.subr.bf16.mxu0 %v1051_v47 }
  0x66   : > { %670 = vmatpush1.bf16.msra.mxu0 %v1053_v49 }
  0x67   : > { %671 = vmatprep.subr.bf16.mxu0 %v1054_v50 }
  0x6a   : > { %672 = vmatpush1.bf16.msra.mxu0 %v1056_v51 }
  0x6b   : > { %673 = vmatprep.subr.bf16.mxu0 %v1057_v52 }
  0x6e   : > { %674 = vmatpush2.bf16.msra.mxu0 %v1059_v53 }
  0x6f   : > { %675 = vmatprep.subr.bf16.mxu0 %v1060_v54 }
  0x72   : > { %676 = vmatpush2.bf16.msra.mxu0 %v1062_v55 }
  0x73   : > { %677 = vmatprep.subr.bf16.mxu0 %v1063_v56 }
  0x76   : > { %678 = vmatpush2.bf16.msra.mxu0 %v1065_v57 }
  0x77   : > { %679 = vmatprep.subr.bf16.mxu0 %v1066_v58 }
  0x7a   : > { %680 = vmatpush2.bf16.msra.mxu0 %v1068_v59 }
  0x7b   : > { %681 = vmatprep.subr.bf16.mxu0 %v1069_v60 }
  0x7e   : > { %682 = vmatpush2.bf16.msra.mxu0 %v1071_v61 }
  0x7f   : > { %683 = vmatprep.subr.bf16.mxu0 %v1072_v62 }
  0x82   : > { %684 = vmatpush2.bf16.msra.mxu0 %v1074_v63 }
  0x83   : > { %685 = vmatprep.subr.bf16.mxu0 %v1075_v0 }
  0x86   : > { %686 = vmatpush2.bf16.msra.mxu0 %v1077_v1 }
  0x87   : > { %687 = vmatprep.subr.bf16.mxu0 %v1078_v2 }
  0x8a   : > { %688 = vmatpush2.bf16.msra.mxu0 %v1080_v3 }
  0x8d   : > { %690 = vmatmul.mubr.bf16.vlgmr.msra.gmra.mxu0 %v1081_v4 }
 0x14d   : > { %v691_v6 = vpop.f32.mrf.mxu0 }
 0x14e   : > { %v700_v8 = vadd.f32 %v691_v6, %v449_v5 }
 0x14f   : > { %v693_v9 = vpop.f32.mrf.mxu0 }
 0x150   : > { %704 = vst [vmem:[#allocation2 + $0x10] sm:$0xff] %v700_v8  ;;  %v701_v11 = vadd.f32 %v693_v9, %v450_v7 }
 0x151   : > { %v695_v12 = vpop.f32.mrf.mxu0 }
 0x152   : > { %705 = vst [vmem:[#allocation2] sm:$0xff] %v701_v11  ;;  %v702_v14 = vadd.f32 %v695_v12, %v451_v10  ;;  %711 = sbr.rel (%p935_p5) target bundleno = 357 (0x165), region = 116 }
 0x153   : > { %v697_v15 = vpop.f32.mrf.mxu0 }
 0x154   : > { %706 = vst [vmem:[#allocation2 + $0x18] sm:$0xff] %v702_v14  ;;  %v703_v16 = vadd.f32 %v697_v15, %v452_v13 }
 0x156   : > { %707 = vst [vmem:[#allocation2 + $0x8] sm:$0xff] %v703_v16 }
 0x157   : > { %v718_v17 = vlaneseq  ;;  %v716_v19 = vld [vmem:[%s437_s29] sm:$0x3]  ;;  %v712_v20 = vld [vmem:[#allocation2 + $0x10] sm:$0xff] }
 0x159   : > { %v719_v18 = vshrl.u32 %v718_v17, 7  ;;  %v713_v23 = vld [vmem:[#allocation2] sm:$0xff] }
 0x15b   : > { %v720_v21 = vsub.s32 0, %v719_v18  ;;  %v724_v22 = vsub.s32 1, %v719_v18  ;;  %v714_v24 = vld [vmem:[#allocation2 + $0x18] sm:$0xff] }
 0x15d   : > { %v715_v25 = vld [vmem:[#allocation2 + $0x8] sm:$0xff]  ;;  %v721_v26 = vrot.slane %v716_v19, %v720_v21  ;;  %v725_v27 = vrot.slane %v716_v19, %v724_v22 }
 0x15f   : > { %v728_v28 = vadd.f32 %v721_v26, %v712_v20  ;;  %v729_v29 = vadd.f32 %v725_v27, %v713_v23  ;;  %v730_v30 = vadd.f32 %v721_v26, %v714_v24  ;;  %v731_v31 = vadd.f32 %v725_v27, %v715_v25 }
 0x161   : > { %v732_v32 = vmax.f32 %v728_v28, 0.0  ;;  %v733_v33 = vmax.f32 %v729_v29, 0.0  ;;  %v734_v34 = vmax.f32 %v730_v30, 0.0  ;;  %v735_v35 = vmax.f32 %v731_v31, 0.0 }
 0x163   : > { %736 = vst [vmem:[%s1392_s16] sm:$0xff] %v732_v32  ;;  %737 = vst [vmem:[%s1392_s16 + $0x8] sm:$0xff] %v733_v33 }
 0x164   : > { %738 = vst [vmem:[%s1392_s16 + $0x10] sm:$0xff] %v734_v34  ;;  %739 = vst [vmem:[%s1392_s16 + $0x18] sm:$0xff] %v735_v35 }
 0x165 PF: > { %746 = sbr.rel (!%p1287_p12) target bundleno = 365 (0x16d), region = 120  ;;  %s943_s18 = sshll.u32 (%p1287_p12), %s1158_s19, 4 }
 0x166   : > { %s752_s25 = scalar_lea.vmem (%p1287_p12), %s1487_s3, %s943_s18 }
 0x16a   : > { %v765_v36 = vld [vmem:[%s1392_s16] sm:$0xff]  ;;  %v767_v37 = vld [vmem:[%s1392_s16 + $0x8] sm:$0xff] }
 0x16b   : > { %v769_v38 = vld [vmem:[%s1392_s16 + $0x10] sm:$0xff]  ;;  %v771_v39 = vld [vmem:[%s1392_s16 + $0x18] sm:$0xff]  ;;  %766 = vst [vmem:[%s752_s25] sm:$0xff] %v765_v36  ;;  %768 = vst [vmem:[%s752_s25 + $0x8] sm:$0xff] %v767_v37 }
 0x16c   : > { %770 = vst [vmem:[%s752_s25 + $0x20] sm:$0xff] %v769_v38  ;;  %772 = vst [vmem:[%s752_s25 + $0x28] sm:$0xff] %v771_v39 }
 0x16d PF: > { %s13_s22 = sadd.s32 1, %s1170_s22   ;;  %s1496_s19 = sld [smem:[#allocation8_spill]] }
 0x16e   : > { %p10_p6 = scmp.ge.s32.totalorder %s13_s22, 8   ;;  %s1497_s10 = sld [smem:[#allocation6_spill]] }
 0x16f   : > { %s1498_s30 = sld [smem:[#allocation7_spill]]  ;;  %s1499_s12 = smov %s1134_s13 }
 0x170   : > { %s1500_s13 = smov %s1285_s9  ;;  %s1501_s14 = smov %s1142_s15 }
 0x171   : > { %s1502_s15 = smov %s1282_s8  ;;  %s1503_s16 = smov %s1150_s17 }
 0x172   : > { %s1505_s18 = smov %s1162_s20  ;;  %12 = sbr.rel (!%p10_p6) target bundleno = 6 (0x6), region = 185 }
 0x173   : > { %s1504_s17 = smov %s1496_s19  ;;  %s1506_s19 = smov %s1166_s21 }
 0x174   : > { %s1507_s20 = smov %s1497_s10 }
 0x175   : > { %s1508_s21 = smov %s1498_s30 }

// kernel: gen_forward.20
= control target key start
LH: loop header
LB: loop body
LE: loop exit
PB: predicated region body
PF: predicated region fallthrough
CT: control target
= control target key end

     0   :  { %s776_s1 = inlined_call_operand.vmem [shape: bf16[256,128], index: 1, kind: input, shape index: {}]   ;;  %s777_s3 = inlined_call_operand.vmem [shape: bf16[128,128], index: 3, kind: input, shape index: {}]   ;;  %s778_s0 = inlined_call_operand.vmem [shape: bf16[64,256], index: 0, kind: input, shape index: {}]   ;;  %s779_s2 = inlined_call_operand.vmem [shape: bf16[64,128], index: 2, kind: input, shape index: {}]   ;;  %s780_s4 = inlined_call_operand.vmem [shape: f32[1,128], index: 4, kind: input, shape index: {}]   ;;  %s781_s5 = inlined_call_operand.vmem [shape: f32[64,128], index: 5, kind: output, shape index: {}]  }
   0x1   :  { %v571_v0 = vld [vmem:[%s776_s1 + $0x78] sm:$0xff]   ;;  %v574_v3 = vld [vmem:[%s776_s1 + $0x70] sm:$0xff]   ;;  %v577_v6 = vld [vmem:[%s776_s1 + $0x68] sm:$0xff]  }
   0x2   :  { %v572_v1 = vld [vmem:[%s776_s1 + $0x38] sm:$0xff]   ;;  %507 = vmatprep.subr.bf16.mxu1 %v571_v0  ;;  %v575_v4 = vld [vmem:[%s776_s1 + $0x30] sm:$0xff]   ;;  %v578_v7 = vld [vmem:[%s776_s1 + $0x28] sm:$0xff]  }
   0x3   :  { %v573_v2 = vld [vmem:[%s777_s3 + $0x38] sm:$0xff]   ;;  %508 = vmatpush3.bf16.msra.mxu1 %v572_v1  ;;  %v576_v5 = vld [vmem:[%s777_s3 + $0x30] sm:$0xff]   ;;  %v579_v8 = vld [vmem:[%s777_s3 + $0x28] sm:$0xff]  }
   0x4   :  { %547 = vmatprep.subr.bf16.mxu0 %v573_v2  ;;  %509 = vmatprep.subr.bf16.mxu1 %v574_v3  ;;  %v580_v9 = vld [vmem:[%s776_s1 + $0x60] sm:$0xff]   ;;  %v583_v12 = vld [vmem:[%s776_s1 + $0x58] sm:$0xff]   ;;  %v586_v15 = vld [vmem:[%s776_s1 + $0x50] sm:$0xff]  }
   0x5   :  { %548 = vmatpush3.bf16.msra.mxu0 %v573_v2  ;;  %v581_v10 = vld [vmem:[%s776_s1 + $0x20] sm:$0xff]   ;;  %v585_v13 = vld [vmem:[%s777_s3 + $0x18] sm:$0xff]   ;;  %v588_v16 = vld [vmem:[%s777_s3 + $0x10] sm:$0xff]  }
   0x6   :  { %549 = vmatprep.subr.bf16.mxu0 %v576_v5  ;;  %v582_v11 = vld [vmem:[%s777_s3 + $0x20] sm:$0xff]   ;;  %v584_v14 = vld [vmem:[%s776_s1 + $0x18] sm:$0xff]   ;;  %v587_v17 = vld [vmem:[%s776_s1 + $0x10] sm:$0xff]  }
   0x7   :  { %510 = vmatpush3.bf16.msra.mxu1 %v575_v4  ;;  %v589_v18 = vld [vmem:[%s776_s1 + $0x48] sm:$0xff]   ;;  %v592_v21 = vld [vmem:[%s776_s1 + $0x40] sm:$0xff]   ;;  %v600_v27 = vld [vmem:[%s778_s0 + $0x14] ss:$8 sps:$4 sm:$0xff]  }
   0x8   :  { %511 = vmatprep.subr.bf16.mxu1 %v577_v6  ;;  %v590_v19 = vld [vmem:[%s776_s1 + $0x8] sm:$0xff]   ;;  %v594_v22 = vld [vmem:[%s777_s3] sm:$0xff]   ;;  %v606_v29 = vld [vmem:[%s779_s2 + $0x10] sm:$0xff]  }
   0x9   :  { %550 = vmatpush3.bf16.msra.mxu0 %v576_v5  ;;  %v591_v20 = vld [vmem:[%s777_s3 + $0x8] sm:$0xff]   ;;  %v598_v24 = vld [vmem:[%s779_s2] sm:$0xff]   ;;  %v602_v30 = vld [vmem:[%s778_s0 + $0x10] ss:$8 sps:$4 sm:$0xff]  }
   0xa   :  { %551 = vmatprep.subr.bf16.mxu0 %v579_v8  ;;  %v597_v23 = vld [vmem:[%s778_s0 + $0x4] ss:$8 sps:$4 sm:$0xff]   ;;  %563 = vmatprep.mubr.bf16.mxu0 %v598_v24  ;;  %v595_v26 = vld [vmem:[%s778_s0] ss:$8 sps:$4 sm:$0xff]   ;;  %v607_v32 = vld [vmem:[%s779_s2 + $0x18] sm:$0xff]  }
   0xb   :  { %512 = vmatpush3.bf16.msra.mxu1 %v578_v7  ;;  %v593_v25 = vld [vmem:[%s776_s1] sm:$0xff]   ;;  %390 = vmatprep.mubr.bf16.mxu1 %v597_v23  ;;  %v599_v28 = vld [vmem:[%s779_s2 + $0x8] sm:$0xff]   ;;  %v608_v34 = vld [vmem:[%s778_s0 + $0x34] ss:$8 sps:$4 sm:$0xff]  }
   0xc   :  { %513 = vmatprep.subr.bf16.mxu1 %v580_v9  ;;  %v603_v31 = vld [vmem:[%s778_s0 + $0x24] ss:$8 sps:$4 sm:$0xff]   ;;  %v605_v33 = vld [vmem:[%s778_s0 + $0x20] ss:$8 sps:$4 sm:$0xff]   ;;  %v610_v35 = vld [vmem:[%s778_s0 + $0x30] ss:$8 sps:$4 sm:$0xff]  }
   0xd   :  { %552 = vmatpush3.bf16.msra.mxu0 %v579_v8  ;;  %v494_v41 = vld [vmem:[%s780_s4] ss:$0 sm:$0xff] }
   0xe   :  { %553 = vmatprep.subr.bf16.mxu0 %v582_v11 }
   0xf   :  { %514 = vmatpush3.bf16.msra.mxu1 %v581_v10 }
  0x10   :  { %515 = vmatprep.subr.bf16.mxu1 %v583_v12 }
  0x11   :  { %554 = vmatpush3.bf16.msra.mxu0 %v582_v11 }
  0x12   :  { %555 = vmatprep.subr.bf16.mxu0 %v585_v13 }
  0x13   :  { %516 = vmatpush3.bf16.msra.mxu1 %v584_v14 }
  0x14   :  { %517 = vmatprep.subr.bf16.mxu1 %v586_v15 }
  0x15   :  { %556 = vmatpush3.bf16.msra.mxu0 %v585_v13 }
  0x16   :  { %557 = vmatprep.subr.bf16.mxu0 %v588_v16 }
  0x17   :  { %518 = vmatpush3.bf16.msra.mxu1 %v587_v17 }
  0x18   :  { %519 = vmatprep.subr.bf16.mxu1 %v589_v18 }
  0x19   :  { %558 = vmatpush3.bf16.msra.mxu0 %v588_v16 }
  0x1a   :  { %559 = vmatprep.subr.bf16.mxu0 %v591_v20 }
  0x1b   :  { %520 = vmatpush3.bf16.msra.mxu1 %v590_v19 }
  0x1c   :  { %521 = vmatprep.subr.bf16.mxu1 %v592_v21 }
  0x1d   :  { %560 = vmatpush3.bf16.msra.mxu0 %v591_v20 }
  0x1e   :  { %561 = vmatprep.subr.bf16.mxu0 %v594_v22 }
  0x1f   :  { %522 = vmatpush3.bf16.msra.mxu1 %v593_v25 }
  0x21   :  { %562 = vmatpush3.bf16.msra.mxu0 %v594_v22 }
  0x22   :  { %391 = vmatmul.mubr.bf16.vlgmr.msra.gmra.mxu1 %v595_v26 }
  0x23   :  { %398 = vmatprep.mubr.bf16.mxu1 %v600_v27 }
  0x24   :  { %564 = vmatmul.mubr.bf16.vlgmr.msra.gmra.mxu0 %v599_v28 }
  0x25   :  { %567 = vmatprep.mubr.bf16.mxu0 %v606_v29 }
  0x2a   :  { %399 = vmatmul.mubr.bf16.gmra.mxu1 %v602_v30 }
  0x2b   :  { %406 = vmatprep.mubr.bf16.mxu1 %v603_v31 }
  0x2c   :  { %568 = vmatmul.mubr.bf16.gmra.mxu0 %v607_v32 }
  0x32   :  { %407 = vmatmul.mubr.bf16.gmra.mxu1 %v605_v33 }
  0x33   :  { %414 = vmatprep.mubr.bf16.mxu1 %v608_v34 }
  0x3a   :  { %415 = vmatmul.mubr.bf16.gmra.mxu1 %v610_v35 }
  0xe2   :  { %v523_v36 = vpop.f32.mrf.mxu1 }
  0xe4   :  { %v565_v37 = vpop.f32.mrf.mxu0  ;;  %v524_v38 = vpop.f32.mrf.mxu1 }
  0xe5   :  { %v525_v39 = vadd.f32 %v524_v38, %v523_v36 }
  0xe6   :  { %v191_v40 = vpop.f32.mrf.mxu0  ;;  %v526_v42 = vpop.f32.mrf.mxu1 }
  0xe7   :  { %v393_v43 = vadd.f32 %v525_v39, %v191_v40 }
  0xe8   :  { %v566_v44 = vpop.f32.mrf.mxu0  ;;  %v527_v45 = vpop.f32.mrf.mxu1 }
  0xe9   :  { %v430_v46 = vadd.f32 %v494_v41, %v393_v43  ;;  %v528_v47 = vadd.f32 %v527_v45, %v526_v42 }
  0xea   :  { %v194_v48 = vpop.f32.mrf.mxu0  ;;  %v529_v49 = vpop.f32.mrf.mxu1 }
  0xeb   :  { %v438_v50 = vmax.f32 %v430_v46, 0.0  ;;  %v396_v51 = vadd.f32 %v528_v47, %v194_v48 }
  0xec   :  { %v530_v52 = vpop.f32.mrf.mxu1  ;;  %v569_v53 = vpop.f32.mrf.mxu0 }
  0xed   :  { %446 = vst [vmem:[%s781_s5] sm:$0xff] %v438_v50  ;;  %v431_v54 = vadd.f32 %v494_v41, %v396_v51  ;;  %v531_v55 = vadd.f32 %v530_v52, %v529_v49 }
  0xee   :  { %v532_v56 = vpop.f32.mrf.mxu1  ;;  %v207_v60 = vpop.f32.mrf.mxu0 }
  0xef   :  { %v439_v57 = vmax.f32 %v431_v54, 0.0  ;;  %v401_v58 = vadd.f32 %v565_v37, %v531_v55 }
  0xf0   :  { %v533_v59 = vpop.f32.mrf.mxu1  ;;  %v570_v3 = vpop.f32.mrf.mxu0 }
  0xf1   :  { %447 = vst [vmem:[%s781_s5 + $0x8] sm:$0xff] %v439_v57  ;;  %v432_v61 = vadd.f32 %v494_v41, %v401_v58  ;;  %v534_v62 = vadd.f32 %v533_v59, %v532_v56 }
  0xf2   :  { %v535_v63 = vpop.f32.mrf.mxu1  ;;  %v210_v10 = vpop.f32.mrf.mxu0 }
  0xf3   :  { %v440_v0 = vmax.f32 %v432_v61, 0.0  ;;  %v404_v1 = vadd.f32 %v566_v44, %v534_v62 }
  0xf4   :  { %v536_v2 = vpop.f32.mrf.mxu1 }
  0xf5   :  { %448 = vst [vmem:[%s781_s5 + $0x10] sm:$0xff] %v440_v0  ;;  %v433_v4 = vadd.f32 %v494_v41, %v404_v1  ;;  %v537_v5 = vadd.f32 %v536_v2, %v535_v63 }
  0xf6   :  { %v538_v6 = vpop.f32.mrf.mxu1 }
  0xf7   :  { %v441_v7 = vmax.f32 %v433_v4, 0.0  ;;  %v409_v8 = vadd.f32 %v537_v5, %v207_v60 }
  0xf8   :  { %v539_v9 = vpop.f32.mrf.mxu1 }
  0xf9   :  { %449 = vst [vmem:[%s781_s5 + $0x18] sm:$0xff] %v441_v7  ;;  %v434_v11 = vadd.f32 %v494_v41, %v409_v8  ;;  %v540_v12 = vadd.f32 %v539_v9, %v538_v6 }
  0xfa   :  { %v541_v13 = vpop.f32.mrf.mxu1 }
  0xfb   :  { %v442_v14 = vmax.f32 %v434_v11, 0.0  ;;  %v412_v15 = vadd.f32 %v540_v12, %v210_v10 }
  0xfc   :  { %v542_v16 = vpop.f32.mrf.mxu1 }
  0xfd   :  { %450 = vst [vmem:[%s781_s5 + $0x20] sm:$0xff] %v442_v14  ;;  %v435_v17 = vadd.f32 %v494_v41, %v412_v15  ;;  %v543_v18 = vadd.f32 %v542_v16, %v541_v13 }
  0xfe   :  { %v544_v19 = vpop.f32.mrf.mxu1 }
  0xff   :  { %v443_v20 = vmax.f32 %v435_v17, 0.0  ;;  %v417_v21 = vadd.f32 %v569_v53, %v543_v18 }
 0x100   :  { %v545_v22 = vpop.f32.mrf.mxu1 }
 0x101   :  { %451 = vst [vmem:[%s781_s5 + $0x28] sm:$0xff] %v443_v20  ;;  %v436_v23 = vadd.f32 %v494_v41, %v417_v21  ;;  %v546_v24 = vadd.f32 %v545_v22, %v544_v19 }
 0x103   :  { %v444_v25 = vmax.f32 %v436_v23, 0.0  ;;  %v420_v26 = vadd.f32 %v570_v3, %v546_v24 }
 0x105   :  { %452 = vst [vmem:[%s781_s5 + $0x30] sm:$0xff] %v444_v25  ;;  %v437_v27 = vadd.f32 %v494_v41, %v420_v26 }
 0x107   :  { %v445_v28 = vmax.f32 %v437_v27, 0.0 }
 0x109   :  { %453 = vst [vmem:[%s781_s5 + $0x38] sm:$0xff] %v445_v28 }

// kernel: gen_forward.22
= control target key start
LH: loop header
LB: loop body
LE: loop exit
PB: predicated region body
PF: predicated region fallthrough
CT: control target
= control target key end

     0   :  { %vm105_vm0 = vcmask 523264   ;;  %s589_s1 = inlined_call_operand.vmem [shape: bf16[128,64], index: 1, kind: input, shape index: {}]   ;;  %s590_s3 = inlined_call_operand.vmem [shape: bf16[64,64], index: 3, kind: input, shape index: {}]   ;;  %s591_s2 = inlined_call_operand.vmem [shape: bf16[64,64], index: 2, kind: input, shape index: {}]   ;;  %s592_s0 = inlined_call_operand.vmem [shape: bf16[64,128], index: 0, kind: input, shape index: {}]   ;;  %s593_s4 = inlined_call_operand.vmem [shape: f32[1,64], index: 4, kind: input, shape index: {}]   ;;  %s594_s5 = inlined_call_operand.vmem [shape: f32[64,64], index: 5, kind: output, shape index: {}]  }
   0x1   :  { %v440_v0 = vld [vmem:[%s589_s1 + $0x38] sm:$0xff]   ;;  %v441_v1 = vld [vmem:[%s589_s1 + $0x30] sm:$0xff]   ;;  %v442_v3 = vld [vmem:[%s589_s1 + $0x28] sm:$0xff]  }
   0x2   :  { %416 = vmatprep.subr.bf16.mxu1 %v440_v0  ;;  %v443_v2 = vld [vmem:[%s590_s3 + $0x18] sm:$0xff]   ;;  %v445_v4 = vld [vmem:[%s590_s3 + $0x10] sm:$0xff]   ;;  %v447_v5 = vld [vmem:[%s590_s3 + $0x8] sm:$0xff]  }
   0x3   :  { %417 = vmatpush3.bf16.msra.mxu1 %v440_v0  ;;  %400 = vmatprep.subr.bf16.mxu0 %v443_v2  ;;  %v444_v6 = vld [vmem:[%s589_s1 + $0x20] sm:$0xff]   ;;  %v446_v9 = vld [vmem:[%s589_s1 + $0x18] sm:$0xff]   ;;  %v448_v11 = vld [vmem:[%s589_s1 + $0x10] sm:$0xff]  }
   0x4   :  { %418 = vmatprep.subr.bf16.mxu1 %v441_v1  ;;  %401 = vmatpush3.bf16.msra.mxu0 %v443_v2  ;;  %v449_v7 = vld [vmem:[%s590_s3] sm:$0xff]   ;;  %v452_v12 = vld [vmem:[%s591_s2 + $0x8] sm:$0xff]   ;;  %v456_v13 = vld [vmem:[%s591_s2 + $0x10] sm:$0xff]  }
   0x5   :  { %402 = vmatprep.subr.bf16.mxu0 %v445_v4  ;;  %v451_v8 = vld [vmem:[%s591_s2] sm:$0xff]   ;;  %v450_v14 = vld [vmem:[%s589_s1 + $0x8] sm:$0xff]   ;;  %v457_v16 = vld [vmem:[%s591_s2 + $0x18] sm:$0xff]  }
   0x6   :  { %408 = vmatprep.mubr.msk.bf16.mxu0 %vm105_vm0, %v451_v8  ;;  %v454_v10 = vld [vmem:[%s592_s0] sm:$0xff]   ;;  %v455_v17 = vld [vmem:[%s592_s0 + $0x8] sm:$0xff]   ;;  %v458_v18 = vld [vmem:[%s592_s0 + $0x10] sm:$0xff]  }
   0x7   :  { %419 = vmatpush3.bf16.msra.mxu1 %v441_v1  ;;  %432 = vmatprep.mubr.bf16.mxu1 %v454_v10  ;;  %v453_v15 = vld [vmem:[%s589_s1] sm:$0xff]   ;;  %v459_v19 = vld [vmem:[%s592_s0 + $0x18] sm:$0xff]  }
   0x8   :  { %420 = vmatprep.subr.bf16.mxu1 %v442_v3  ;;  %403 = vmatpush3.bf16.msra.mxu0 %v445_v4  ;;  %v379_v25 = vld [vmem:[%s593_s4] ss:$0 sm:$0xff] }
   0x9   :  { %404 = vmatprep.subr.bf16.mxu0 %v447_v5 }
   0xb   :  { %421 = vmatpush3.bf16.msra.mxu1 %v442_v3 }
   0xc   :  { %422 = vmatprep.subr.bf16.mxu1 %v444_v6  ;;  %405 = vmatpush3.bf16.msra.mxu0 %v447_v5 }
   0xd   :  { %406 = vmatprep.subr.bf16.mxu0 %v449_v7 }
   0xf   :  { %423 = vmatpush3.bf16.msra.mxu1 %v444_v6 }
  0x10   :  { %424 = vmatprep.subr.bf16.mxu1 %v446_v9  ;;  %407 = vmatpush3.bf16.msra.mxu0 %v449_v7 }
  0x13   :  { %425 = vmatpush3.bf16.msra.mxu1 %v446_v9  ;;  %409 = vmatmul.mubr.msk.bf16.vlgmr.msra.gmra.mxu0 %vm105_vm0, %v452_v12 }
  0x14   :  { %426 = vmatprep.subr.bf16.mxu1 %v448_v11  ;;  %412 = vmatprep.mubr.msk.bf16.mxu0 %vm105_vm0, %v456_v13 }
  0x17   :  { %427 = vmatpush3.bf16.msra.mxu1 %v448_v11 }
  0x18   :  { %428 = vmatprep.subr.bf16.mxu1 %v450_v14 }
  0x1b   :  { %429 = vmatpush3.bf16.msra.mxu1 %v450_v14  ;;  %413 = vmatmul.mubr.msk.bf16.gmra.mxu0 %vm105_vm0, %v457_v16 }
  0x1c   :  { %430 = vmatprep.subr.bf16.mxu1 %v453_v15 }
  0x1f   :  { %431 = vmatpush3.bf16.msra.mxu1 %v453_v15 }
  0x22   :  { %433 = vmatmul.mubr.bf16.vlgmr.msra.gmra.mxu1 %v455_v17 }
  0x23   :  { %436 = vmatprep.mubr.bf16.mxu1 %v458_v18 }
  0x2a   :  { %437 = vmatmul.mubr.bf16.gmra.mxu1 %v459_v19 }
  0xd3   :  { %v410_v20 = vpop.f32.mrf.mxu0 }
  0xd5   :  { %v152_v21 = vpop.f32.mrf.mxu0 }
  0xd7   :  { %v411_v22 = vpop.f32.mrf.mxu0 }
  0xd9   :  { %v155_v23 = vpop.f32.mrf.mxu0 }
  0xdb   :  { %v414_v27 = vpop.f32.mrf.mxu0 }
  0xdd   :  { %v168_v35 = vpop.f32.mrf.mxu0 }
  0xdf   :  { %v415_v44 = vpop.f32.mrf.mxu0 }
  0xe1   :  { %v171_v53 = vpop.f32.mrf.mxu0 }
  0xe2   :  { %v434_v24 = vpop.f32.mrf.mxu1 }
  0xe3   :  { %v298_v26 = vadd.f32 %v434_v24, %v410_v20 }
  0xe4   :  { %v289_v28 = vpop.f32.mrf.mxu1 }
  0xe5   :  { %v329_v29 = vadd.f32 %v379_v25, %v298_v26  ;;  %v290_v30 = vadd.f32 %v289_v28, %v152_v21 }
  0xe6   :  { %v435_v31 = vpop.f32.mrf.mxu1 }
  0xe7   :  { %v337_v32 = vmax.f32 %v329_v29, 0.0  ;;  %v327_v33 = vadd.f32 %v379_v25, %v290_v30  ;;  %v301_v34 = vadd.f32 %v435_v31, %v411_v22 }
  0xe8   :  { %v292_v36 = vpop.f32.mrf.mxu1 }
  0xe9   :  { %345 = vst.msk [vmem:[%s594_s5 + $0x10] sm:$0xff] %vm105_vm0, %v337_v32  ;;  %v335_v37 = vmax.f32 %v327_v33, 0.0  ;;  %v330_v38 = vadd.f32 %v379_v25, %v301_v34  ;;  %v293_v39 = vadd.f32 %v292_v36, %v155_v23 }
  0xea   :  { %v438_v40 = vpop.f32.mrf.mxu1 }
  0xeb   :  { %343 = vst.msk [vmem:[%s594_s5] sm:$0xff] %vm105_vm0, %v335_v37  ;;  %v338_v41 = vmax.f32 %v330_v38, 0.0  ;;  %v328_v42 = vadd.f32 %v379_v25, %v293_v39  ;;  %v314_v43 = vadd.f32 %v438_v40, %v414_v27 }
  0xec   :  { %v305_v45 = vpop.f32.mrf.mxu1 }
  0xed   :  { %346 = vst.msk [vmem:[%s594_s5 + $0x18] sm:$0xff] %vm105_vm0, %v338_v41  ;;  %v336_v46 = vmax.f32 %v328_v42, 0.0  ;;  %v333_v47 = vadd.f32 %v379_v25, %v314_v43  ;;  %v306_v48 = vadd.f32 %v305_v45, %v168_v35 }
  0xee   :  { %v439_v49 = vpop.f32.mrf.mxu1 }
  0xef   :  { %344 = vst.msk [vmem:[%s594_s5 + $0x8] sm:$0xff] %vm105_vm0, %v336_v46  ;;  %v341_v50 = vmax.f32 %v333_v47, 0.0  ;;  %v331_v51 = vadd.f32 %v379_v25, %v306_v48  ;;  %v317_v52 = vadd.f32 %v439_v49, %v415_v44 }
  0xf0   :  { %v308_v54 = vpop.f32.mrf.mxu1 }
  0xf1   :  { %349 = vst.msk [vmem:[%s594_s5 + $0x30] sm:$0xff] %vm105_vm0, %v341_v50  ;;  %v339_v55 = vmax.f32 %v331_v51, 0.0  ;;  %v334_v56 = vadd.f32 %v379_v25, %v317_v52  ;;  %v309_v57 = vadd.f32 %v308_v54, %v171_v53 }
  0xf3   :  { %347 = vst.msk [vmem:[%s594_s5 + $0x20] sm:$0xff] %vm105_vm0, %v339_v55  ;;  %v342_v58 = vmax.f32 %v334_v56, 0.0  ;;  %v332_v59 = vadd.f32 %v379_v25, %v309_v57 }
  0xf5   :  { %350 = vst.msk [vmem:[%s594_s5 + $0x38] sm:$0xff] %vm105_vm0, %v342_v58  ;;  %v340_v60 = vmax.f32 %v332_v59, 0.0 }
  0xf7   :  { %348 = vst.msk [vmem:[%s594_s5 + $0x28] sm:$0xff] %vm105_vm0, %v340_v60 }

// kernel: gen_forward.21
= control target key start
LH: loop header
LB: loop body
LE: loop exit
PB: predicated region body
PF: predicated region fallthrough
CT: control target
= control target key end

     0   :  { %vm19_vm0 = vcmask 523264   ;;  %v655_v36 = vmov 0.0   ;;  %s845_s1 = inlined_call_operand.vmem [shape: bf16[384,64], index: 1, kind: input, shape index: {}]   ;;  %s846_s0 = inlined_call_operand.vmem [shape: bf16[64,384], index: 0, kind: input, shape index: {}]   ;;  %s847_s2 = inlined_call_operand.vmem [shape: f32[1,64], index: 2, kind: input, shape index: {}]   ;;  %s848_s3 = inlined_call_operand.vmem [shape: f32[64,64], index: 3, kind: output, shape index: {}]  }
   0x1   :  { %v615_v0 = vld [vmem:[%s845_s1 + $0x78] sm:$0xff]   ;;  %v618_v3 = vld [vmem:[%s845_s1 + $0x70] sm:$0xff]   ;;  %v621_v6 = vld [vmem:[%s845_s1 + $0x68] sm:$0xff]   ;;  %20 = vst.msk [vmem:[#allocation2] sm:$0xff] %vm19_vm0, %v655_v36 }
   0x2   :  { %v616_v1 = vld [vmem:[%s845_s1 + $0x38] sm:$0xff]   ;;  %538 = vmatprep.subr.bf16.mxu0 %v615_v0  ;;  %v619_v4 = vld [vmem:[%s845_s1 + $0x30] sm:$0xff]   ;;  %v622_v7 = vld [vmem:[%s845_s1 + $0x28] sm:$0xff]   ;;  %21 = vst.msk [vmem:[#allocation2 + $0x8] sm:$0xff] %vm19_vm0, %v655_v36 }
   0x3   :  { %v617_v2 = vld [vmem:[%s845_s1 + $0xb8] sm:$0xff]   ;;  %539 = vmatpush3.bf16.msra.mxu0 %v616_v1  ;;  %v620_v5 = vld [vmem:[%s845_s1 + $0xb0] sm:$0xff]   ;;  %v623_v8 = vld [vmem:[%s845_s1 + $0xa8] sm:$0xff]   ;;  %22 = vst.msk [vmem:[#allocation2 + $0x10] sm:$0xff] %vm19_vm0, %v655_v36 }
   0x4   :  { %590 = vmatprep.subr.bf16.mxu1 %v617_v2  ;;  %540 = vmatprep.subr.bf16.mxu0 %v618_v3  ;;  %v624_v9 = vld [vmem:[%s845_s1 + $0x60] sm:$0xff]   ;;  %v627_v12 = vld [vmem:[%s845_s1 + $0x58] sm:$0xff]   ;;  %v630_v15 = vld [vmem:[%s845_s1 + $0x50] sm:$0xff]   ;;  %23 = vst.msk [vmem:[#allocation2 + $0x18] sm:$0xff] %vm19_vm0, %v655_v36 }
   0x5   :  { %591 = vmatpush3.bf16.msra.mxu1 %v617_v2  ;;  %v625_v10 = vld [vmem:[%s845_s1 + $0x20] sm:$0xff]   ;;  %v629_v13 = vld [vmem:[%s845_s1 + $0x98] sm:$0xff]   ;;  %v632_v16 = vld [vmem:[%s845_s1 + $0x90] sm:$0xff]   ;;  %24 = vst.msk [vmem:[#allocation2 + $0x20] sm:$0xff] %vm19_vm0, %v655_v36 }
   0x6   :  { %592 = vmatprep.subr.bf16.mxu1 %v620_v5  ;;  %v626_v11 = vld [vmem:[%s845_s1 + $0xa0] sm:$0xff]   ;;  %v628_v14 = vld [vmem:[%s845_s1 + $0x18] sm:$0xff]   ;;  %v631_v17 = vld [vmem:[%s845_s1 + $0x10] sm:$0xff]   ;;  %25 = vst.msk [vmem:[#allocation2 + $0x28] sm:$0xff] %vm19_vm0, %v655_v36 }
   0x7   :  { %541 = vmatpush3.bf16.msra.mxu0 %v619_v4  ;;  %v633_v18 = vld [vmem:[%s845_s1 + $0x48] sm:$0xff]   ;;  %v636_v21 = vld [vmem:[%s845_s1 + $0x40] sm:$0xff]   ;;  %v651_v32 = vld [vmem:[%s846_s0 + $0x50] ss:$12 sps:$4 sm:$0xff]   ;;  %26 = vst.msk [vmem:[#allocation2 + $0x30] sm:$0xff] %vm19_vm0, %v655_v36 }
   0x8   :  { %542 = vmatprep.subr.bf16.mxu0 %v621_v6  ;;  %v634_v19 = vld [vmem:[%s845_s1 + $0x8] sm:$0xff]   ;;  %v638_v22 = vld [vmem:[%s845_s1 + $0x80] sm:$0xff]   ;;  %v649_v33 = vld [vmem:[%s846_s0 + $0x30] ss:$12 sps:$4 sm:$0xff]   ;;  %27 = vst.msk [vmem:[#allocation2 + $0x38] sm:$0xff] %vm19_vm0, %v655_v36 }
   0x9   :  { %593 = vmatpush3.bf16.msra.mxu1 %v620_v5  ;;  %v635_v20 = vld [vmem:[%s845_s1 + $0x88] sm:$0xff]   ;;  %v641_v23 = vld [vmem:[%s846_s0 + $0x4] ss:$12 sps:$4 sm:$0xff]   ;;  %v647_v31 = vld [vmem:[%s846_s0 + $0x34] ss:$12 sps:$4 sm:$0xff]  }
   0xa   :  { %594 = vmatprep.subr.bf16.mxu1 %v623_v8  ;;  %v642_v24 = vld [vmem:[%s846_s0 + $0x8] ss:$12 sps:$4 sm:$0xff]   ;;  %v637_v25 = vld [vmem:[%s845_s1] sm:$0xff]   ;;  %340 = vmatprep.mubr.bf16.mxu0 %v641_v23  ;;  %v652_v34 = vld [vmem:[%s846_s0 + $0x4c] ss:$12 sps:$4 sm:$0xff]  }
   0xb   :  { %543 = vmatpush3.bf16.msra.mxu0 %v622_v7  ;;  %606 = vmatprep.mubr.bf16.mxu1 %v642_v24  ;;  %v639_v26 = vld [vmem:[%s846_s0] ss:$12 sps:$4 sm:$0xff]   ;;  %v644_v27 = vld [vmem:[%s846_s0 + $0x1c] ss:$12 sps:$4 sm:$0xff]   ;;  %v650_v29 = vld [vmem:[%s846_s0 + $0x38] ss:$12 sps:$4 sm:$0xff]  }
   0xc   :  { %544 = vmatprep.subr.bf16.mxu0 %v624_v9  ;;  %v643_v28 = vld [vmem:[%s846_s0 + $0x20] ss:$12 sps:$4 sm:$0xff]   ;;  %v646_v30 = vld [vmem:[%s846_s0 + $0x18] ss:$12 sps:$4 sm:$0xff]   ;;  %v654_v35 = vld [vmem:[%s846_s0 + $0x48] ss:$12 sps:$4 sm:$0xff]  }
   0xd   :  { %595 = vmatpush3.bf16.msra.mxu1 %v623_v8  ;;  %v28_v42 = vld [vmem:[#allocation2] sm:$0xff]  ;;  %v29_v50 = vld [vmem:[#allocation2 + $0x8] sm:$0xff]  ;;  %v30_v57 = vld [vmem:[#allocation2 + $0x10] sm:$0xff] }
   0xe   :  { %596 = vmatprep.subr.bf16.mxu1 %v626_v11  ;;  %v797_v60 = vld [vmem:[%s847_s2] ss:$0 sm:$0xff]  ;;  %v31_v2 = vld [vmem:[#allocation2 + $0x18] sm:$0xff]  ;;  %v33_v23 = vld [vmem:[#allocation2 + $0x28] sm:$0xff] }
   0xf   :  { %545 = vmatpush3.bf16.msra.mxu0 %v625_v10 }
  0x10   :  { %546 = vmatprep.subr.bf16.mxu0 %v627_v12 }
  0x11   :  { %597 = vmatpush3.bf16.msra.mxu1 %v626_v11 }
  0x12   :  { %598 = vmatprep.subr.bf16.mxu1 %v629_v13 }
  0x13   :  { %547 = vmatpush3.bf16.msra.mxu0 %v628_v14 }
  0x14   :  { %548 = vmatprep.subr.bf16.mxu0 %v630_v15 }
  0x15   :  { %599 = vmatpush3.bf16.msra.mxu1 %v629_v13  ;;  %v32_v13 = vld [vmem:[#allocation2 + $0x20] sm:$0xff] }
  0x16   :  { %600 = vmatprep.subr.bf16.mxu1 %v632_v16 }
  0x17   :  { %549 = vmatpush3.bf16.msra.mxu0 %v631_v17 }
  0x18   :  { %550 = vmatprep.subr.bf16.mxu0 %v633_v18 }
  0x19   :  { %601 = vmatpush3.bf16.msra.mxu1 %v632_v16 }
  0x1a   :  { %602 = vmatprep.subr.bf16.mxu1 %v635_v20 }
  0x1b   :  { %551 = vmatpush3.bf16.msra.mxu0 %v634_v19 }
  0x1c   :  { %552 = vmatprep.subr.bf16.mxu0 %v636_v21 }
  0x1d   :  { %603 = vmatpush3.bf16.msra.mxu1 %v635_v20 }
  0x1e   :  { %604 = vmatprep.subr.bf16.mxu1 %v638_v22 }
  0x1f   :  { %553 = vmatpush3.bf16.msra.mxu0 %v637_v25 }
  0x21   :  { %605 = vmatpush3.bf16.msra.mxu1 %v638_v22 }
  0x22   :  { %341 = vmatmul.mubr.bf16.vlgmr.msra.gmra.mxu0 %v639_v26 }
  0x23   :  { %348 = vmatprep.mubr.bf16.mxu0 %v644_v27 }
  0x24   :  { %607 = vmatmul.mubr.bf16.vlgmr.msra.gmra.mxu1 %v643_v28 }
  0x25   :  { %610 = vmatprep.mubr.bf16.mxu1 %v650_v29 }
  0x2a   :  { %349 = vmatmul.mubr.bf16.gmra.mxu0 %v646_v30 }
  0x2b   :  { %356 = vmatprep.mubr.bf16.mxu0 %v647_v31  ;;  %v34_v31 = vld [vmem:[#allocation2 + $0x30] sm:$0xff] }
  0x2c   :  { %611 = vmatmul.mubr.bf16.gmra.mxu1 %v651_v32 }
  0x32   :  { %357 = vmatmul.mubr.bf16.gmra.mxu0 %v649_v33 }
  0x33   :  { %364 = vmatprep.mubr.bf16.mxu0 %v652_v34 }
  0x3a   :  { %365 = vmatmul.mubr.bf16.gmra.mxu0 %v654_v35 }
  0xe2   :  { %v554_v37 = vpop.f32.mrf.mxu0 }
  0xe4   :  { %v555_v38 = vpop.f32.mrf.mxu0  ;;  %v608_v39 = vpop.f32.mrf.mxu1 }
  0xe5   :  { %v556_v40 = vadd.f32 %v555_v38, %v554_v37 }
  0xe6   :  { %v557_v41 = vpop.f32.mrf.mxu0  ;;  %v407_v43 = vpop.f32.mrf.mxu1 }
  0xe7   :  { %v408_v44 = vadd.f32 %v556_v40, %v407_v43  ;;  %v35_v40 = vld [vmem:[#allocation2 + $0x38] sm:$0xff] }
  0xe8   :  { %v558_v45 = vpop.f32.mrf.mxu0  ;;  %v609_v46 = vpop.f32.mrf.mxu1 }
  0xe9   :  { %v438_v47 = vadd.f32 %v408_v44, %v28_v42  ;;  %v559_v48 = vadd.f32 %v558_v45, %v557_v41 }
  0xea   :  { %v560_v49 = vpop.f32.mrf.mxu0  ;;  %v410_v51 = vpop.f32.mrf.mxu1 }
  0xeb   :  { %447 = vst.msk [vmem:[#allocation2] sm:$0xff] %vm19_vm0, %v438_v47  ;;  %v411_v52 = vadd.f32 %v559_v48, %v410_v51 }
  0xec   :  { %v561_v53 = vpop.f32.mrf.mxu0  ;;  %v612_v54 = vpop.f32.mrf.mxu1 }
  0xed   :  { %v439_v55 = vadd.f32 %v411_v52, %v29_v50  ;;  %v562_v56 = vadd.f32 %v561_v53, %v560_v49 }
  0xee   :  { %v563_v58 = vpop.f32.mrf.mxu0  ;;  %v423_v62 = vpop.f32.mrf.mxu1 }
  0xef   :  { %448 = vst.msk [vmem:[#allocation2 + $0x8] sm:$0xff] %vm19_vm0, %v439_v55  ;;  %v416_v59 = vadd.f32 %v608_v39, %v562_v56 }
  0xf0   :  { %v564_v61 = vpop.f32.mrf.mxu0  ;;  %v613_v7 = vpop.f32.mrf.mxu1 }
  0xf1   :  { %v440_v63 = vadd.f32 %v416_v59, %v30_v57  ;;  %v565_v0 = vadd.f32 %v564_v61, %v563_v58 }
  0xf2   :  { %v458_v1 = vld [vmem:[#allocation2] sm:$0xff]  ;;  %v566_v3 = vpop.f32.mrf.mxu0  ;;  %v426_v17 = vpop.f32.mrf.mxu1 }
  0xf3   :  { %v473_v4 = vadd.f32 %v797_v60, %v458_v1  ;;  %449 = vst.msk [vmem:[#allocation2 + $0x10] sm:$0xff] %vm19_vm0, %v440_v63  ;;  %v419_v5 = vadd.f32 %v609_v46, %v565_v0 }
  0xf4   :  { %v567_v6 = vpop.f32.mrf.mxu0 }
  0xf5   :  { %v481_v8 = vmax.f32 %v473_v4, 0.0  ;;  %v441_v9 = vadd.f32 %v419_v5, %v31_v2  ;;  %v568_v10 = vadd.f32 %v567_v6, %v566_v3 }
  0xf6   :  { %v459_v11 = vld [vmem:[#allocation2 + $0x8] sm:$0xff]  ;;  %v569_v12 = vpop.f32.mrf.mxu0 }
  0xf7   :  { %489 = vst.msk [vmem:[%s848_s3] sm:$0xff] %vm19_vm0, %v481_v8  ;;  %v474_v14 = vadd.f32 %v797_v60, %v459_v11  ;;  %450 = vst.msk [vmem:[#allocation2 + $0x18] sm:$0xff] %vm19_vm0, %v441_v9  ;;  %v424_v15 = vadd.f32 %v568_v10, %v423_v62 }
  0xf8   :  { %v570_v16 = vpop.f32.mrf.mxu0 }
  0xf9   :  { %v482_v18 = vmax.f32 %v474_v14, 0.0  ;;  %v442_v19 = vadd.f32 %v424_v15, %v32_v13  ;;  %v571_v20 = vadd.f32 %v570_v16, %v569_v12 }
  0xfa   :  { %v460_v21 = vld [vmem:[#allocation2 + $0x10] sm:$0xff]  ;;  %v572_v22 = vpop.f32.mrf.mxu0 }
  0xfb   :  { %490 = vst.msk [vmem:[%s848_s3 + $0x8] sm:$0xff] %vm19_vm0, %v482_v18  ;;  %v475_v24 = vadd.f32 %v797_v60, %v460_v21  ;;  %451 = vst.msk [vmem:[#allocation2 + $0x20] sm:$0xff] %vm19_vm0, %v442_v19  ;;  %v427_v25 = vadd.f32 %v571_v20, %v426_v17 }
  0xfc   :  { %v573_v26 = vpop.f32.mrf.mxu0 }
  0xfd   :  { %v483_v27 = vmax.f32 %v475_v24, 0.0  ;;  %v443_v28 = vadd.f32 %v427_v25, %v33_v23  ;;  %v574_v29 = vadd.f32 %v573_v26, %v572_v22 }
  0xfe   :  { %v461_v30 = vld [vmem:[#allocation2 + $0x18] sm:$0xff]  ;;  %v575_v32 = vpop.f32.mrf.mxu0 }
  0xff   :  { %491 = vst.msk [vmem:[%s848_s3 + $0x10] sm:$0xff] %vm19_vm0, %v483_v27  ;;  %v476_v33 = vadd.f32 %v797_v60, %v461_v30  ;;  %452 = vst.msk [vmem:[#allocation2 + $0x28] sm:$0xff] %vm19_vm0, %v443_v28  ;;  %v432_v34 = vadd.f32 %v612_v54, %v574_v29 }
 0x100   :  { %v576_v35 = vpop.f32.mrf.mxu0 }
 0x101   :  { %v484_v36 = vmax.f32 %v476_v33, 0.0  ;;  %v444_v37 = vadd.f32 %v432_v34, %v34_v31  ;;  %v577_v38 = vadd.f32 %v576_v35, %v575_v32 }
 0x102   :  { %v462_v39 = vld [vmem:[#allocation2 + $0x20] sm:$0xff] }
 0x103   :  { %492 = vst.msk [vmem:[%s848_s3 + $0x18] sm:$0xff] %vm19_vm0, %v484_v36  ;;  %v477_v41 = vadd.f32 %v797_v60, %v462_v39  ;;  %453 = vst.msk [vmem:[#allocation2 + $0x30] sm:$0xff] %vm19_vm0, %v444_v37  ;;  %v435_v42 = vadd.f32 %v613_v7, %v577_v38 }
 0x105   :  { %v485_v43 = vmax.f32 %v477_v41, 0.0  ;;  %v445_v44 = vadd.f32 %v435_v42, %v35_v40 }
 0x106   :  { %v463_v45 = vld [vmem:[#allocation2 + $0x28] sm:$0xff] }
 0x107   :  { %493 = vst.msk [vmem:[%s848_s3 + $0x20] sm:$0xff] %vm19_vm0, %v485_v43  ;;  %v478_v46 = vadd.f32 %v797_v60, %v463_v45  ;;  %454 = vst.msk [vmem:[#allocation2 + $0x38] sm:$0xff] %vm19_vm0, %v445_v44 }
 0x109   :  { %v486_v47 = vmax.f32 %v478_v46, 0.0 }
 0x10a   :  { %v464_v48 = vld [vmem:[#allocation2 + $0x30] sm:$0xff] }
 0x10b   :  { %494 = vst.msk [vmem:[%s848_s3 + $0x28] sm:$0xff] %vm19_vm0, %v486_v47  ;;  %v479_v49 = vadd.f32 %v797_v60, %v464_v48 }
 0x10d   :  { %v487_v50 = vmax.f32 %v479_v49, 0.0 }
 0x10e   :  { %v465_v51 = vld [vmem:[#allocation2 + $0x38] sm:$0xff] }
 0x10f   :  { %495 = vst.msk [vmem:[%s848_s3 + $0x30] sm:$0xff] %vm19_vm0, %v487_v50  ;;  %v480_v52 = vadd.f32 %v797_v60, %v465_v51 }
 0x111   :  { %v488_v53 = vmax.f32 %v480_v52, 0.0 }
 0x113   :  { %496 = vst.msk [vmem:[%s848_s3 + $0x38] sm:$0xff] %vm19_vm0, %v488_v53 }

// kernel: gen_forward.23
= control target key start
LH: loop header
LB: loop body
LE: loop exit
PB: predicated region body
PF: predicated region fallthrough
CT: control target
= control target key end

     0   :  { %vm95_vm0 = vcmask 523264   ;;  %s379_s1 = inlined_call_operand.vmem [shape: bf16[64,128], index: 1, kind: input, shape index: {}]   ;;  %s380_s0 = inlined_call_operand.vmem [shape: bf16[64,64], index: 0, kind: input, shape index: {}]   ;;  %s381_s2 = inlined_call_operand.vmem [shape: f32[1,128], index: 2, kind: input, shape index: {}]   ;;  %s382_s3 = inlined_call_operand.vmem [shape: f32[64,128], index: 3, kind: output, shape index: {}]  }
   0x1   :  { %v280_v0 = vld [vmem:[%s379_s1 + $0x18] sm:$0xff]   ;;  %v281_v1 = vld [vmem:[%s379_s1 + $0x10] sm:$0xff]   ;;  %v282_v2 = vld [vmem:[%s379_s1 + $0x8] sm:$0xff]  }
   0x2   :  { %256 = vmatprep.subr.bf16.mxu0 %v280_v0  ;;  %272 = vmatprep.subr.bf16.mxu1 %v280_v0  ;;  %v284_v3 = vld [vmem:[%s380_s0] sm:$0xff]   ;;  %v285_v4 = vld [vmem:[%s380_s0 + $0x10] sm:$0xff]   ;;  %v286_v6 = vld [vmem:[%s380_s0 + $0x8] sm:$0xff]  }
   0x3   :  { %257 = vmatpush3.bf16.msra.mxu0 %v280_v0  ;;  %276 = vmatpush3.bf16.msra.mxu1 %v280_v0  ;;  %v283_v5 = vld [vmem:[%s379_s1] sm:$0xff]   ;;  %v287_v7 = vld [vmem:[%s380_s0 + $0x18] sm:$0xff]  }
   0x4   :  { %258 = vmatprep.subr.bf16.mxu0 %v281_v1  ;;  %273 = vmatprep.subr.bf16.mxu1 %v281_v1  ;;  %v247_v8 = vld [vmem:[%s381_s2] ss:$0 sm:$0xff] }
   0x5   :  { %264 = vmatprep.mubr.msk.bf16.mxu0 %vm95_vm0, %v284_v3  ;;  %268 = vmatprep.mubr.msk.bf16.mxu1 %vm95_vm0, %v285_v4 }
   0x7   :  { %259 = vmatpush3.bf16.msra.mxu0 %v281_v1  ;;  %277 = vmatpush3.bf16.msra.mxu1 %v281_v1 }
   0x8   :  { %260 = vmatprep.subr.bf16.mxu0 %v282_v2  ;;  %274 = vmatprep.subr.bf16.mxu1 %v282_v2 }
   0xb   :  { %261 = vmatpush3.bf16.msra.mxu0 %v282_v2  ;;  %278 = vmatpush3.bf16.msra.mxu1 %v282_v2 }
   0xc   :  { %262 = vmatprep.subr.bf16.mxu0 %v283_v5  ;;  %275 = vmatprep.subr.bf16.mxu1 %v283_v5 }
   0xf   :  { %263 = vmatpush3.bf16.msra.mxu0 %v283_v5  ;;  %279 = vmatpush3.bf16.msra.mxu1 %v283_v5 }
  0x12   :  { %265 = vmatmul.mubr.msk.bf16.vlgmr.msra.gmra.mxu0 %vm95_vm0, %v286_v6  ;;  %269 = vmatmul.mubr.msk.bf16.vlgmr.msra.gmra.mxu1 %vm95_vm0, %v287_v7 }
  0xd2   :  { %v266_v9 = vpop.f32.mrf.mxu0  ;;  %v270_v10 = vpop.f32.mrf.mxu1 }
  0xd3   :  { %v209_v11 = vadd.f32 %v266_v9, %v247_v8  ;;  %v213_v12 = vadd.f32 %v270_v10, %v247_v8 }
  0xd4   :  { %v142_v13 = vpop.f32.mrf.mxu0  ;;  %v158_v14 = vpop.f32.mrf.mxu1 }
  0xd5   :  { %288 = vtanh.f32 %v209_v11  ;;  %v207_v15 = vadd.f32 %v247_v8, %v142_v13  ;;  %v211_v16 = vadd.f32 %v247_v8, %v158_v14 }
  0xd6   :  { %290 = vtanh.f32 %v213_v12  ;;  %v267_v17 = vpop.f32.mrf.mxu0  ;;  %v271_v18 = vpop.f32.mrf.mxu1 }
  0xd7   :  { %292 = vtanh.f32 %v207_v15  ;;  %v210_v19 = vadd.f32 %v267_v17, %v247_v8  ;;  %v214_v20 = vadd.f32 %v271_v18, %v247_v8 }
  0xd8   :  { %294 = vtanh.f32 %v211_v16  ;;  %v145_v21 = vpop.f32.mrf.mxu0  ;;  %v161_v22 = vpop.f32.mrf.mxu1 }
  0xd9   :  { %296 = vtanh.f32 %v210_v19  ;;  %v208_v23 = vadd.f32 %v247_v8, %v145_v21  ;;  %v212_v24 = vadd.f32 %v247_v8, %v161_v22 }
  0xda   :  { %298 = vtanh.f32 %v214_v20 }
  0xdb   :  { %300 = vtanh.f32 %v208_v23 }
  0xdc   :  { %302 = vtanh.f32 %v212_v24 }
  0xe2   :  { %v289_v25 = vpop.eup %288 }
  0xe3   :  { %v291_v26 = vpop.eup %290  ;;  %225 = vst [vmem:[%s382_s3 + $0x10] sm:$0xff] %v289_v25 }
  0xe4   :  { %v293_v27 = vpop.eup %292  ;;  %229 = vst [vmem:[%s382_s3 + $0x30] sm:$0xff] %v291_v26 }
  0xe5   :  { %v295_v28 = vpop.eup %294  ;;  %223 = vst [vmem:[%s382_s3] sm:$0xff] %v293_v27 }
  0xe6   :  { %v297_v29 = vpop.eup %296  ;;  %227 = vst [vmem:[%s382_s3 + $0x20] sm:$0xff] %v295_v28 }
  0xe7   :  { %v299_v30 = vpop.eup %298  ;;  %226 = vst [vmem:[%s382_s3 + $0x18] sm:$0xff] %v297_v29 }
  0xe8   :  { %v301_v31 = vpop.eup %300  ;;  %230 = vst [vmem:[%s382_s3 + $0x38] sm:$0xff] %v299_v30 }
  0xe9   :  { %v303_v32 = vpop.eup %302  ;;  %224 = vst [vmem:[%s382_s3 + $0x8] sm:$0xff] %v301_v31 }
  0xea   :  { %228 = vst [vmem:[%s382_s3 + $0x28] sm:$0xff] %v303_v32 }

// kernel: gen_forward.13
= control target key start
LH: loop header
LB: loop body
LE: loop exit
PB: predicated region body
PF: predicated region fallthrough
CT: control target
= control target key end

     0   :  { %s1146_s12 = smov 0   ;;  %s1148_s13 = smov 0   ;;  %s1400_s0 = inlined_call_operand.vmem [shape: bf16[1024,2], index: 0, kind: input, shape index: {}]   ;;  %s1401_s1 = inlined_call_operand.vmem [shape: bf16[2,32], index: 1, kind: input, shape index: {}]   ;;  %s1402_s2 = inlined_call_operand.vmem [shape: f32[1,32], index: 2, kind: input, shape index: {}]   ;;  %s1403_s3 = inlined_call_operand.vmem [shape: f32[1024,32], index: 3, kind: output, shape index: {}]  }
   0x1   :  { %s1150_s14 = smov 0  }
   0x2 LB: > { %s32_s15 = sadd.s32 1, %s1119_s13  ;;  %p965_p0 = scmp.ge.s32.totalorder %s1123_s14, 1  ;;  %s1123_s14 = sphi %s1150_s14, %s13_s14   ;;  %s1119_s13 = sphi %s1148_s13, %s1406_s13   ;;  %s1115_s12 = sphi %s1146_s12, %s1405_s12  }
   0x3   : > { %p34_p1 = scmp.ge.s32.totalorder %s32_s15, 4  ;;  %p185_p2 = scmp.lt.s32.totalorder %s1123_s14, 5 }
   0x5   : > { %s1408_s15 = smov (%p34_p1, %s32_s15), 0  ;;  %p186_p3 = pnand %p965_p0, %p185_p2 }
   0x6   : > { %s966_s18 = sshll.u32 (!%p186_p3), %s1115_s12, 5 }
   0x7   : > { %189 = sbr.rel (%p186_p3) target bundleno = 256 (0x100), region = 32  ;;  %p1172_p4 = scmp.lt.s32.totalorder (!%p186_p3), %s966_s18, 127 }
   0xc   : > { %v353_v0 = vld [vmem:[%s1401_s1] sm:$0x1]  ;;  %vm483_vm0 = vcmask 1040384   ;;  %vm256_vm1 = vcmask 261120   ;;  %v1125_v2 = vmov 0.0   ;;  %s1410_s18 = smov (!%p1172_p4, %s966_s18), 127 }
   0xd   : > { %1058 = vmatprep.subr.msk.bf16.mxu0 %vm483_vm0, %v353_v0  ;;  %1059 = vmatprep.subr.msk.bf16.mxu1 %vm483_vm0, %v353_v0  ;;  %v485_v1 = vsel %vm483_vm0, %v353_v0, 0  ;;  %259 = vst.msk [vmem:[#allocation2 + $0x10] sm:$0xff] %vm256_vm1, %v1125_v2  ;;  %257 = vst.msk [vmem:[#allocation2] sm:$0xff] %vm256_vm1, %v1125_v2  ;;  %s967_s20 = sshll.u32 %s1410_s18, 2  ;;  %vm434_vm2 = vcmask 15360   ;;  %s969_s26 = sshll.u32 %s1410_s18, 3 }
   0xe   : > { %1023 = vmatpush3.bf16.msra.mxu0 %v485_v1  ;;  %1057 = vmatpush3.bf16.msra.mxu1 %v485_v1  ;;  %258 = vst.msk [vmem:[#allocation2 + $0x8] sm:$0xff] %vm256_vm1, %v1125_v2  ;;  %260 = vst.msk [vmem:[#allocation2 + $0x18] sm:$0xff] %vm256_vm1, %v1125_v2  ;;  %s1218_s23 = scalar_lea.vmem %s1400_s0, %s967_s20  ;;  %v1260_v44 = vld [vmem:[%s1402_s2] ss:$0 sm:$0xff]  ;;  %s1271_s29 = scalar_lea.vmem %s1403_s3, %s969_s26 }
   0xf   : > { %261 = vst.msk [vmem:[#allocation2 + $0x20] sm:$0xff] %vm256_vm1, %v1125_v2  ;;  %262 = vst.msk [vmem:[#allocation2 + $0x28] sm:$0xff] %vm256_vm1, %v1125_v2  ;;  %v1085_v3 = vld [vmem:[%s1218_s23] sm:$0xff]   ;;  %v1087_v5 = vld [vmem:[%s1218_s23 + $0x8] sm:$0xff]  }
  0x10   : > { %263 = vst.msk [vmem:[#allocation2 + $0x30] sm:$0xff] %vm256_vm1, %v1125_v2  ;;  %264 = vst.msk [vmem:[#allocation2 + $0x38] sm:$0xff] %vm256_vm1, %v1125_v2  ;;  %v1086_v4 = vld [vmem:[%s1218_s23 + $0x40] sm:$0xff]   ;;  %1024 = vmatprep.mubr.msk.bf16.mxu0 %vm434_vm2, %v1085_v3  ;;  %v1088_v6 = vld [vmem:[%s1218_s23 + $0x48] sm:$0xff]  }
  0x11   : > { %265 = vst.msk [vmem:[#allocation2 + $0x40] sm:$0xff] %vm256_vm1, %v1125_v2  ;;  %266 = vst.msk [vmem:[#allocation2 + $0x48] sm:$0xff] %vm256_vm1, %v1125_v2  ;;  %1040 = vmatprep.mubr.msk.bf16.mxu1 %vm434_vm2, %v1086_v4  ;;  %1025 = vmatmul.mubr.msk.bf16.vlgmr.msra.gmra.mxu0 %vm434_vm2, %v1087_v5  ;;  %v1089_v7 = vld [vmem:[%s1218_s23 + $0x10] sm:$0xff]   ;;  %v1091_v9 = vld [vmem:[%s1218_s23 + $0x18] sm:$0xff]  }
  0x12   : > { %267 = vst.msk [vmem:[#allocation2 + $0x50] sm:$0xff] %vm256_vm1, %v1125_v2  ;;  %268 = vst.msk [vmem:[#allocation2 + $0x58] sm:$0xff] %vm256_vm1, %v1125_v2  ;;  %1041 = vmatmul.mubr.msk.bf16.vlgmr.msra.gmra.mxu1 %vm434_vm2, %v1088_v6  ;;  %v1090_v8 = vld [vmem:[%s1218_s23 + $0x50] sm:$0xff]   ;;  %1028 = vmatprep.mubr.msk.bf16.mxu0 %vm434_vm2, %v1089_v7  ;;  %v1092_v10 = vld [vmem:[%s1218_s23 + $0x58] sm:$0xff]  }
  0x13   : > { %269 = vst.msk [vmem:[#allocation2 + $0x60] sm:$0xff] %vm256_vm1, %v1125_v2  ;;  %270 = vst.msk [vmem:[#allocation2 + $0x68] sm:$0xff] %vm256_vm1, %v1125_v2  ;;  %1044 = vmatprep.mubr.msk.bf16.mxu1 %vm434_vm2, %v1090_v8  ;;  %v1093_v11 = vld [vmem:[%s1218_s23 + $0x20] sm:$0xff]   ;;  %v1095_v13 = vld [vmem:[%s1218_s23 + $0x28] sm:$0xff]  }
  0x14   : > { %271 = vst.msk [vmem:[#allocation2 + $0x70] sm:$0xff] %vm256_vm1, %v1125_v2  ;;  %272 = vst.msk [vmem:[#allocation2 + $0x78] sm:$0xff] %vm256_vm1, %v1125_v2  ;;  %v1094_v12 = vld [vmem:[%s1218_s23 + $0x60] sm:$0xff]   ;;  %v1096_v14 = vld [vmem:[%s1218_s23 + $0x68] sm:$0xff]  }
  0x15   : > { %273 = vst.msk [vmem:[#allocation2 + $0x80] sm:$0xff] %vm256_vm1, %v1125_v2  ;;  %274 = vst.msk [vmem:[#allocation2 + $0x88] sm:$0xff] %vm256_vm1, %v1125_v2  ;;  %v1097_v15 = vld [vmem:[%s1218_s23 + $0x30] sm:$0xff]   ;;  %v1099_v17 = vld [vmem:[%s1218_s23 + $0x38] sm:$0xff]  }
  0x16   : > { %275 = vst.msk [vmem:[#allocation2 + $0x90] sm:$0xff] %vm256_vm1, %v1125_v2  ;;  %276 = vst.msk [vmem:[#allocation2 + $0x98] sm:$0xff] %vm256_vm1, %v1125_v2  ;;  %v1098_v16 = vld [vmem:[%s1218_s23 + $0x70] sm:$0xff]   ;;  %v1100_v18 = vld [vmem:[%s1218_s23 + $0x78] sm:$0xff]  }
  0x17   : > { %277 = vst.msk [vmem:[#allocation2 + $0xa0] sm:$0xff] %vm256_vm1, %v1125_v2  ;;  %278 = vst.msk [vmem:[#allocation2 + $0xa8] sm:$0xff] %vm256_vm1, %v1125_v2  ;;  %v291_v19 = vld [vmem:[#allocation2 + $0x10] sm:$0xff]  ;;  %v289_v22 = vld [vmem:[#allocation2] sm:$0xff] }
  0x18   : > { %279 = vst.msk [vmem:[#allocation2 + $0xb0] sm:$0xff] %vm256_vm1, %v1125_v2  ;;  %280 = vst.msk [vmem:[#allocation2 + $0xb8] sm:$0xff] %vm256_vm1, %v1125_v2  ;;  %v292_v28 = vld [vmem:[#allocation2 + $0x18] sm:$0xff]  ;;  %v290_v34 = vld [vmem:[#allocation2 + $0x8] sm:$0xff] }
  0x19   : > { %281 = vst.msk [vmem:[#allocation2 + $0xc0] sm:$0xff] %vm256_vm1, %v1125_v2  ;;  %282 = vst.msk [vmem:[#allocation2 + $0xc8] sm:$0xff] %vm256_vm1, %v1125_v2  ;;  %1029 = vmatmul.mubr.msk.bf16.gmra.mxu0 %vm434_vm2, %v1091_v9  ;;  %v295_v40 = vld [vmem:[#allocation2 + $0x30] sm:$0xff]  ;;  %v293_v47 = vld [vmem:[#allocation2 + $0x20] sm:$0xff] }
  0x1a   : > { %283 = vst.msk [vmem:[#allocation2 + $0xd0] sm:$0xff] %vm256_vm1, %v1125_v2  ;;  %284 = vst.msk [vmem:[#allocation2 + $0xd8] sm:$0xff] %vm256_vm1, %v1125_v2  ;;  %1045 = vmatmul.mubr.msk.bf16.gmra.mxu1 %vm434_vm2, %v1092_v10  ;;  %1032 = vmatprep.mubr.msk.bf16.mxu0 %vm434_vm2, %v1093_v11  ;;  %v296_v54 = vld [vmem:[#allocation2 + $0x38] sm:$0xff]  ;;  %v294_v0 = vld [vmem:[#allocation2 + $0x28] sm:$0xff] }
  0x1b   : > { %285 = vst.msk [vmem:[#allocation2 + $0xe0] sm:$0xff] %vm256_vm1, %v1125_v2  ;;  %286 = vst.msk [vmem:[#allocation2 + $0xe8] sm:$0xff] %vm256_vm1, %v1125_v2  ;;  %1048 = vmatprep.mubr.msk.bf16.mxu1 %vm434_vm2, %v1094_v12  ;;  %v299_v12 = vld [vmem:[#allocation2 + $0x50] sm:$0xff] }
  0x1c   : > { %287 = vst.msk [vmem:[#allocation2 + $0xf0] sm:$0xff] %vm256_vm1, %v1125_v2  ;;  %288 = vst.msk [vmem:[#allocation2 + $0xf8] sm:$0xff] %vm256_vm1, %v1125_v2  ;;  %v305_v25 = vld [vmem:[#allocation2 + $0x80] sm:$0xff]  ;;  %v306_v37 = vld [vmem:[#allocation2 + $0x88] sm:$0xff] }
  0x1d   : > { %v307_v20 = vld [vmem:[#allocation2 + $0x90] sm:$0xff]  ;;  %v308_v31 = vld [vmem:[#allocation2 + $0x98] sm:$0xff] }
  0x1e   : > { %v309_v50 = vld [vmem:[#allocation2 + $0xa0] sm:$0xff]  ;;  %v310_v6 = vld [vmem:[#allocation2 + $0xa8] sm:$0xff] }
  0x1f   : > { %v311_v43 = vld [vmem:[#allocation2 + $0xb0] sm:$0xff]  ;;  %v312_v59 = vld [vmem:[#allocation2 + $0xb8] sm:$0xff] }
  0x21   : > { %1033 = vmatmul.mubr.msk.bf16.gmra.mxu0 %vm434_vm2, %v1095_v13 }
  0x22   : > { %1049 = vmatmul.mubr.msk.bf16.gmra.mxu1 %vm434_vm2, %v1096_v14  ;;  %1036 = vmatprep.mubr.msk.bf16.mxu0 %vm434_vm2, %v1097_v15 }
  0x23   : > { %1052 = vmatprep.mubr.msk.bf16.mxu1 %vm434_vm2, %v1098_v16 }
  0x29   : > { %1037 = vmatmul.mubr.msk.bf16.gmra.mxu0 %vm434_vm2, %v1099_v17 }
  0x2a   : > { %1053 = vmatmul.mubr.msk.bf16.gmra.mxu1 %vm434_vm2, %v1100_v18  ;;  %v315_v18 = vld [vmem:[#allocation2 + $0xd0] sm:$0xff] }
  0xd1   : > { %v1026_v21 = vpop.f32.mrf.mxu0 }
  0xd2   : > { %v650_v23 = vadd.f32 %v1026_v21, %v291_v19  ;;  %v1042_v24 = vpop.f32.mrf.mxu1 }
  0xd3   : > { %v666_v26 = vadd.f32 %v1042_v24, %v307_v20  ;;  %v521_v27 = vpop.f32.mrf.mxu0  ;;  %v297_v24 = vld [vmem:[#allocation2 + $0x40] sm:$0xff] }
  0xd4   : > { %683 = vst.msk [vmem:[#allocation2 + $0x10] sm:$0xff] %vm256_vm1, %v650_v23  ;;  %v648_v29 = vadd.f32 %v521_v27, %v289_v22  ;;  %v585_v30 = vpop.f32.mrf.mxu1 }
  0xd5   : > { %699 = vst.msk [vmem:[#allocation2 + $0x90] sm:$0xff] %vm256_vm1, %v666_v26  ;;  %v664_v32 = vadd.f32 %v585_v30, %v305_v25  ;;  %v1027_v33 = vpop.f32.mrf.mxu0  ;;  %v313_v30 = vld [vmem:[#allocation2 + $0xc0] sm:$0xff] }
  0xd6   : > { %681 = vst.msk [vmem:[#allocation2] sm:$0xff] %vm256_vm1, %v648_v29  ;;  %v651_v35 = vadd.f32 %v1027_v33, %v292_v28  ;;  %v1043_v36 = vpop.f32.mrf.mxu1 }
  0xd7   : > { %697 = vst.msk [vmem:[#allocation2 + $0x80] sm:$0xff] %vm256_vm1, %v664_v32  ;;  %v667_v38 = vadd.f32 %v1043_v36, %v308_v31  ;;  %v524_v39 = vpop.f32.mrf.mxu0  ;;  %v300_v36 = vld [vmem:[#allocation2 + $0x58] sm:$0xff] }
  0xd8   : > { %684 = vst.msk [vmem:[#allocation2 + $0x18] sm:$0xff] %vm256_vm1, %v651_v35  ;;  %v649_v41 = vadd.f32 %v524_v39, %v290_v34  ;;  %v588_v42 = vpop.f32.mrf.mxu1 }
  0xd9   : > { %700 = vst.msk [vmem:[#allocation2 + $0x98] sm:$0xff] %vm256_vm1, %v667_v38  ;;  %v665_v45 = vadd.f32 %v588_v42, %v306_v37  ;;  %v1030_v46 = vpop.f32.mrf.mxu0  ;;  %v316_v42 = vld [vmem:[#allocation2 + $0xd8] sm:$0xff] }
  0xda   : > { %682 = vst.msk [vmem:[#allocation2 + $0x8] sm:$0xff] %vm256_vm1, %v649_v41  ;;  %v654_v48 = vadd.f32 %v1030_v46, %v295_v40  ;;  %v1046_v49 = vpop.f32.mrf.mxu1 }
  0xdb   : > { %v718_v51 = vld [vmem:[#allocation2 + $0x10] sm:$0xff]  ;;  %698 = vst.msk [vmem:[#allocation2 + $0x88] sm:$0xff] %vm256_vm1, %v665_v45  ;;  %v670_v52 = vadd.f32 %v1046_v49, %v311_v43  ;;  %v537_v53 = vpop.f32.mrf.mxu0  ;;  %v298_v49 = vld [vmem:[#allocation2 + $0x48] sm:$0xff] }
  0xdc   : > { %v757_v55 = vadd.f32 %v1260_v44, %v718_v51  ;;  %v734_v56 = vld [vmem:[#allocation2 + $0x90] sm:$0xff]  ;;  %687 = vst.msk [vmem:[#allocation2 + $0x30] sm:$0xff] %vm256_vm1, %v654_v48  ;;  %v652_v57 = vadd.f32 %v537_v53, %v293_v47  ;;  %v601_v58 = vpop.f32.mrf.mxu1 }
  0xdd   : > { %v773_v60 = vadd.f32 %v1260_v44, %v734_v56  ;;  %v716_v61 = vld [vmem:[#allocation2] sm:$0xff]  ;;  %703 = vst.msk [vmem:[#allocation2 + $0xb0] sm:$0xff] %vm256_vm1, %v670_v52  ;;  %v668_v62 = vadd.f32 %v601_v58, %v309_v50  ;;  %v1031_v63 = vpop.f32.mrf.mxu0 }
  0xde   : > { %v789_v1 = vmax.f32 %v757_v55, 0.0  ;;  %v755_v2 = vadd.f32 %v1260_v44, %v716_v61  ;;  %v732_v3 = vld [vmem:[#allocation2 + $0x80] sm:$0xff]  ;;  %685 = vst.msk [vmem:[#allocation2 + $0x20] sm:$0xff] %vm256_vm1, %v652_v57  ;;  %v655_v4 = vadd.f32 %v1031_v63, %v296_v54  ;;  %v1047_v5 = vpop.f32.mrf.mxu1  ;;  %v314_v55 = vld [vmem:[#allocation2 + $0xc8] sm:$0xff]  ;;  %v303_v61 = vld [vmem:[#allocation2 + $0x70] sm:$0xff] }
  0xdf   : > { %v805_v7 = vmax.f32 %v773_v60, 0.0  ;;  %v771_v8 = vadd.f32 %v1260_v44, %v732_v3  ;;  %v719_v9 = vld [vmem:[#allocation2 + $0x18] sm:$0xff]  ;;  %701 = vst.msk [vmem:[#allocation2 + $0xa0] sm:$0xff] %vm256_vm1, %v668_v62  ;;  %v671_v10 = vadd.f32 %v1047_v5, %v312_v59  ;;  %v540_v11 = vpop.f32.mrf.mxu0  ;;  %v319_v3 = vld [vmem:[#allocation2 + $0xf0] sm:$0xff] }
  0xe0   : > { %821 = vst.msk [vmem:[%s1271_s29 + $0x10] sm:$0xff] %vm256_vm1, %v789_v1  ;;  %v787_v13 = vmax.f32 %v755_v2, 0.0  ;;  %v758_v14 = vadd.f32 %v1260_v44, %v719_v9  ;;  %v735_v15 = vld [vmem:[#allocation2 + $0x98] sm:$0xff]  ;;  %688 = vst.msk [vmem:[#allocation2 + $0x38] sm:$0xff] %vm256_vm1, %v655_v4  ;;  %v653_v16 = vadd.f32 %v540_v11, %v294_v0  ;;  %v604_v17 = vpop.f32.mrf.mxu1  ;;  %v301_v9 = vld [vmem:[#allocation2 + $0x60] sm:$0xff] }
  0xe1   : > { %837 = vst.msk [vmem:[%s1271_s29 + $0x90] sm:$0xff] %vm256_vm1, %v805_v7  ;;  %v803_v19 = vmax.f32 %v771_v8, 0.0  ;;  %v774_v20 = vadd.f32 %v1260_v44, %v735_v15  ;;  %v717_v21 = vld [vmem:[#allocation2 + $0x8] sm:$0xff]  ;;  %704 = vst.msk [vmem:[#allocation2 + $0xb8] sm:$0xff] %vm256_vm1, %v671_v10  ;;  %v669_v22 = vadd.f32 %v604_v17, %v310_v6  ;;  %v1034_v23 = vpop.f32.mrf.mxu0  ;;  %v317_v15 = vld [vmem:[#allocation2 + $0xe0] sm:$0xff] }
  0xe2   : > { %819 = vst.msk [vmem:[%s1271_s29] sm:$0xff] %vm256_vm1, %v787_v13  ;;  %v790_v25 = vmax.f32 %v758_v14, 0.0  ;;  %v756_v26 = vadd.f32 %v1260_v44, %v717_v21  ;;  %v733_v27 = vld [vmem:[#allocation2 + $0x88] sm:$0xff]  ;;  %686 = vst.msk [vmem:[#allocation2 + $0x28] sm:$0xff] %vm256_vm1, %v653_v16  ;;  %v658_v28 = vadd.f32 %v1034_v23, %v299_v12  ;;  %v1050_v29 = vpop.f32.mrf.mxu1  ;;  %v304_v21 = vld [vmem:[#allocation2 + $0x78] sm:$0xff] }
  0xe3   : > { %835 = vst.msk [vmem:[%s1271_s29 + $0x80] sm:$0xff] %vm256_vm1, %v803_v19  ;;  %v806_v31 = vmax.f32 %v774_v20, 0.0  ;;  %v772_v32 = vadd.f32 %v1260_v44, %v733_v27  ;;  %v722_v33 = vld [vmem:[#allocation2 + $0x30] sm:$0xff]  ;;  %702 = vst.msk [vmem:[#allocation2 + $0xa8] sm:$0xff] %vm256_vm1, %v669_v22  ;;  %v674_v34 = vadd.f32 %v1050_v29, %v315_v18  ;;  %v553_v35 = vpop.f32.mrf.mxu0  ;;  %v320_v27 = vld [vmem:[#allocation2 + $0xf8] sm:$0xff] }
  0xe4   : > { %822 = vst.msk [vmem:[%s1271_s29 + $0x18] sm:$0xff] %vm256_vm1, %v790_v25  ;;  %v788_v37 = vmax.f32 %v756_v26, 0.0  ;;  %v761_v38 = vadd.f32 %v1260_v44, %v722_v33  ;;  %v738_v39 = vld [vmem:[#allocation2 + $0xb0] sm:$0xff]  ;;  %691 = vst.msk [vmem:[#allocation2 + $0x50] sm:$0xff] %vm256_vm1, %v658_v28  ;;  %v656_v40 = vadd.f32 %v553_v35, %v297_v24  ;;  %v617_v41 = vpop.f32.mrf.mxu1  ;;  %v302_v33 = vld [vmem:[#allocation2 + $0x68] sm:$0xff] }
  0xe5   : > { %838 = vst.msk [vmem:[%s1271_s29 + $0x98] sm:$0xff] %vm256_vm1, %v806_v31  ;;  %v804_v43 = vmax.f32 %v772_v32, 0.0  ;;  %v777_v45 = vadd.f32 %v1260_v44, %v738_v39  ;;  %v720_v46 = vld [vmem:[#allocation2 + $0x20] sm:$0xff]  ;;  %707 = vst.msk [vmem:[#allocation2 + $0xd0] sm:$0xff] %vm256_vm1, %v674_v34  ;;  %v672_v47 = vadd.f32 %v617_v41, %v313_v30  ;;  %v1035_v48 = vpop.f32.mrf.mxu0  ;;  %v318_v39 = vld [vmem:[#allocation2 + $0xe8] sm:$0xff] }
  0xe6   : > { %820 = vst.msk [vmem:[%s1271_s29 + $0x8] sm:$0xff] %vm256_vm1, %v788_v37  ;;  %v793_v50 = vmax.f32 %v761_v38, 0.0  ;;  %v759_v51 = vadd.f32 %v1260_v44, %v720_v46  ;;  %v736_v52 = vld [vmem:[#allocation2 + $0xa0] sm:$0xff]  ;;  %689 = vst.msk [vmem:[#allocation2 + $0x40] sm:$0xff] %vm256_vm1, %v656_v40  ;;  %v659_v53 = vadd.f32 %v1035_v48, %v300_v36  ;;  %v1051_v54 = vpop.f32.mrf.mxu1 }
  0xe7   : > { %836 = vst.msk [vmem:[%s1271_s29 + $0x88] sm:$0xff] %vm256_vm1, %v804_v43  ;;  %v809_v56 = vmax.f32 %v777_v45, 0.0  ;;  %v775_v57 = vadd.f32 %v1260_v44, %v736_v52  ;;  %v723_v58 = vld [vmem:[#allocation2 + $0x38] sm:$0xff]  ;;  %705 = vst.msk [vmem:[#allocation2 + $0xc0] sm:$0xff] %vm256_vm1, %v672_v47  ;;  %v675_v59 = vadd.f32 %v1051_v54, %v316_v42  ;;  %v556_v60 = vpop.f32.mrf.mxu0 }
  0xe8   : > { %825 = vst.msk [vmem:[%s1271_s29 + $0x30] sm:$0xff] %vm256_vm1, %v793_v50  ;;  %v791_v62 = vmax.f32 %v759_v51, 0.0  ;;  %v762_v63 = vadd.f32 %v1260_v44, %v723_v58  ;;  %v739_v0 = vld [vmem:[#allocation2 + $0xb8] sm:$0xff]  ;;  %692 = vst.msk [vmem:[#allocation2 + $0x58] sm:$0xff] %vm256_vm1, %v659_v53  ;;  %v657_v1 = vadd.f32 %v556_v60, %v298_v49  ;;  %v620_v2 = vpop.f32.mrf.mxu1 }
  0xe9   : > { %841 = vst.msk [vmem:[%s1271_s29 + $0xb0] sm:$0xff] %vm256_vm1, %v809_v56  ;;  %v807_v4 = vmax.f32 %v775_v57, 0.0  ;;  %v778_v5 = vadd.f32 %v1260_v44, %v739_v0  ;;  %v721_v6 = vld [vmem:[#allocation2 + $0x28] sm:$0xff]  ;;  %708 = vst.msk [vmem:[#allocation2 + $0xd8] sm:$0xff] %vm256_vm1, %v675_v59  ;;  %v673_v7 = vadd.f32 %v620_v2, %v314_v55  ;;  %v1038_v8 = vpop.f32.mrf.mxu0 }
  0xea   : > { %823 = vst.msk [vmem:[%s1271_s29 + $0x20] sm:$0xff] %vm256_vm1, %v791_v62  ;;  %v794_v10 = vmax.f32 %v762_v63, 0.0  ;;  %v760_v11 = vadd.f32 %v1260_v44, %v721_v6  ;;  %v737_v12 = vld [vmem:[#allocation2 + $0xa8] sm:$0xff]  ;;  %690 = vst.msk [vmem:[#allocation2 + $0x48] sm:$0xff] %vm256_vm1, %v657_v1  ;;  %v662_v13 = vadd.f32 %v1038_v8, %v303_v61  ;;  %v1054_v14 = vpop.f32.mrf.mxu1 }
  0xeb   : > { %839 = vst.msk [vmem:[%s1271_s29 + $0xa0] sm:$0xff] %vm256_vm1, %v807_v4  ;;  %v810_v16 = vmax.f32 %v778_v5, 0.0  ;;  %v776_v17 = vadd.f32 %v1260_v44, %v737_v12  ;;  %v726_v18 = vld [vmem:[#allocation2 + $0x50] sm:$0xff]  ;;  %706 = vst.msk [vmem:[#allocation2 + $0xc8] sm:$0xff] %vm256_vm1, %v673_v7  ;;  %v678_v19 = vadd.f32 %v1054_v14, %v319_v3  ;;  %v569_v20 = vpop.f32.mrf.mxu0 }
  0xec   : > { %826 = vst.msk [vmem:[%s1271_s29 + $0x38] sm:$0xff] %vm256_vm1, %v794_v10  ;;  %v792_v22 = vmax.f32 %v760_v11, 0.0  ;;  %v765_v23 = vadd.f32 %v1260_v44, %v726_v18  ;;  %v742_v24 = vld [vmem:[#allocation2 + $0xd0] sm:$0xff]  ;;  %695 = vst.msk [vmem:[#allocation2 + $0x70] sm:$0xff] %vm256_vm1, %v662_v13  ;;  %v660_v25 = vadd.f32 %v569_v20, %v301_v9  ;;  %v633_v26 = vpop.f32.mrf.mxu1 }
  0xed   : > { %842 = vst.msk [vmem:[%s1271_s29 + $0xb8] sm:$0xff] %vm256_vm1, %v810_v16  ;;  %v808_v28 = vmax.f32 %v776_v17, 0.0  ;;  %v781_v29 = vadd.f32 %v1260_v44, %v742_v24  ;;  %v724_v30 = vld [vmem:[#allocation2 + $0x40] sm:$0xff]  ;;  %711 = vst.msk [vmem:[#allocation2 + $0xf0] sm:$0xff] %vm256_vm1, %v678_v19  ;;  %v676_v31 = vadd.f32 %v633_v26, %v317_v15  ;;  %v1039_v32 = vpop.f32.mrf.mxu0 }
  0xee   : > { %824 = vst.msk [vmem:[%s1271_s29 + $0x28] sm:$0xff] %vm256_vm1, %v792_v22  ;;  %v797_v34 = vmax.f32 %v765_v23, 0.0  ;;  %v763_v35 = vadd.f32 %v1260_v44, %v724_v30  ;;  %v740_v36 = vld [vmem:[#allocation2 + $0xc0] sm:$0xff]  ;;  %693 = vst.msk [vmem:[#allocation2 + $0x60] sm:$0xff] %vm256_vm1, %v660_v25  ;;  %v663_v37 = vadd.f32 %v1039_v32, %v304_v21  ;;  %v1055_v38 = vpop.f32.mrf.mxu1 }
  0xef   : > { %840 = vst.msk [vmem:[%s1271_s29 + $0xa8] sm:$0xff] %vm256_vm1, %v808_v28  ;;  %v813_v40 = vmax.f32 %v781_v29, 0.0  ;;  %v779_v41 = vadd.f32 %v1260_v44, %v740_v36  ;;  %v727_v42 = vld [vmem:[#allocation2 + $0x58] sm:$0xff]  ;;  %709 = vst.msk [vmem:[#allocation2 + $0xe0] sm:$0xff] %vm256_vm1, %v676_v31  ;;  %v679_v43 = vadd.f32 %v1055_v38, %v320_v27  ;;  %v572_v45 = vpop.f32.mrf.mxu0 }
  0xf0   : > { %829 = vst.msk [vmem:[%s1271_s29 + $0x50] sm:$0xff] %vm256_vm1, %v797_v34  ;;  %v795_v46 = vmax.f32 %v763_v35, 0.0  ;;  %v766_v47 = vadd.f32 %v1260_v44, %v727_v42  ;;  %v743_v48 = vld [vmem:[#allocation2 + $0xd8] sm:$0xff]  ;;  %696 = vst.msk [vmem:[#allocation2 + $0x78] sm:$0xff] %vm256_vm1, %v663_v37  ;;  %v661_v49 = vadd.f32 %v572_v45, %v302_v33  ;;  %v636_v50 = vpop.f32.mrf.mxu1 }
  0xf1   : > { %845 = vst.msk [vmem:[%s1271_s29 + $0xd0] sm:$0xff] %vm256_vm1, %v813_v40  ;;  %v811_v51 = vmax.f32 %v779_v41, 0.0  ;;  %v782_v52 = vadd.f32 %v1260_v44, %v743_v48  ;;  %v725_v53 = vld [vmem:[#allocation2 + $0x48] sm:$0xff]  ;;  %712 = vst.msk [vmem:[#allocation2 + $0xf8] sm:$0xff] %vm256_vm1, %v679_v43  ;;  %v677_v54 = vadd.f32 %v636_v50, %v318_v39 }
  0xf2   : > { %827 = vst.msk [vmem:[%s1271_s29 + $0x40] sm:$0xff] %vm256_vm1, %v795_v46  ;;  %v798_v55 = vmax.f32 %v766_v47, 0.0  ;;  %v764_v56 = vadd.f32 %v1260_v44, %v725_v53  ;;  %v741_v57 = vld [vmem:[#allocation2 + $0xc8] sm:$0xff]  ;;  %694 = vst.msk [vmem:[#allocation2 + $0x68] sm:$0xff] %vm256_vm1, %v661_v49 }
  0xf3   : > { %843 = vst.msk [vmem:[%s1271_s29 + $0xc0] sm:$0xff] %vm256_vm1, %v811_v51  ;;  %v814_v58 = vmax.f32 %v782_v52, 0.0  ;;  %v780_v59 = vadd.f32 %v1260_v44, %v741_v57  ;;  %v730_v60 = vld [vmem:[#allocation2 + $0x70] sm:$0xff]  ;;  %710 = vst.msk [vmem:[#allocation2 + $0xe8] sm:$0xff] %vm256_vm1, %v677_v54 }
  0xf4   : > { %830 = vst.msk [vmem:[%s1271_s29 + $0x58] sm:$0xff] %vm256_vm1, %v798_v55  ;;  %v796_v61 = vmax.f32 %v764_v56, 0.0  ;;  %v769_v62 = vadd.f32 %v1260_v44, %v730_v60  ;;  %v746_v63 = vld [vmem:[#allocation2 + $0xf0] sm:$0xff] }
  0xf5   : > { %846 = vst.msk [vmem:[%s1271_s29 + $0xd8] sm:$0xff] %vm256_vm1, %v814_v58  ;;  %v812_v0 = vmax.f32 %v780_v59, 0.0  ;;  %v785_v1 = vadd.f32 %v1260_v44, %v746_v63  ;;  %v728_v2 = vld [vmem:[#allocation2 + $0x60] sm:$0xff] }
  0xf6   : > { %828 = vst.msk [vmem:[%s1271_s29 + $0x48] sm:$0xff] %vm256_vm1, %v796_v61  ;;  %v801_v3 = vmax.f32 %v769_v62, 0.0  ;;  %v767_v4 = vadd.f32 %v1260_v44, %v728_v2  ;;  %v744_v5 = vld [vmem:[#allocation2 + $0xe0] sm:$0xff] }
  0xf7   : > { %844 = vst.msk [vmem:[%s1271_s29 + $0xc8] sm:$0xff] %vm256_vm1, %v812_v0  ;;  %v817_v6 = vmax.f32 %v785_v1, 0.0  ;;  %v783_v7 = vadd.f32 %v1260_v44, %v744_v5  ;;  %v731_v8 = vld [vmem:[#allocation2 + $0x78] sm:$0xff] }
  0xf8   : > { %833 = vst.msk [vmem:[%s1271_s29 + $0x70] sm:$0xff] %vm256_vm1, %v801_v3  ;;  %v799_v9 = vmax.f32 %v767_v4, 0.0  ;;  %v770_v10 = vadd.f32 %v1260_v44, %v731_v8  ;;  %v747_v11 = vld [vmem:[#allocation2 + $0xf8] sm:$0xff] }
  0xf9   : > { %849 = vst.msk [vmem:[%s1271_s29 + $0xf0] sm:$0xff] %vm256_vm1, %v817_v6  ;;  %v815_v12 = vmax.f32 %v783_v7, 0.0  ;;  %v786_v13 = vadd.f32 %v1260_v44, %v747_v11  ;;  %v729_v14 = vld [vmem:[#allocation2 + $0x68] sm:$0xff] }
  0xfa   : > { %831 = vst.msk [vmem:[%s1271_s29 + $0x60] sm:$0xff] %vm256_vm1, %v799_v9  ;;  %v802_v15 = vmax.f32 %v770_v10, 0.0  ;;  %v768_v16 = vadd.f32 %v1260_v44, %v729_v14  ;;  %v745_v17 = vld [vmem:[#allocation2 + $0xe8] sm:$0xff] }
  0xfb   : > { %847 = vst.msk [vmem:[%s1271_s29 + $0xe0] sm:$0xff] %vm256_vm1, %v815_v12  ;;  %v818_v18 = vmax.f32 %v786_v13, 0.0  ;;  %v784_v19 = vadd.f32 %v1260_v44, %v745_v17 }
  0xfc   : > { %834 = vst.msk [vmem:[%s1271_s29 + $0x78] sm:$0xff] %vm256_vm1, %v802_v15  ;;  %v800_v20 = vmax.f32 %v768_v16, 0.0 }
  0xfd   : > { %850 = vst.msk [vmem:[%s1271_s29 + $0xf8] sm:$0xff] %vm256_vm1, %v818_v18  ;;  %v816_v21 = vmax.f32 %v784_v19, 0.0 }
  0xfe   : > { %832 = vst.msk [vmem:[%s1271_s29 + $0x68] sm:$0xff] %vm256_vm1, %v800_v20 }
  0xff   : > { %848 = vst.msk [vmem:[%s1271_s29 + $0xe8] sm:$0xff] %vm256_vm1, %v816_v21 }
 0x100 PF: > { %s13_s14 = sadd.s32 1, %s1123_s14   ;;  %s1405_s12 = smov %s1119_s13 }
 0x101   : > { %p10_p5 = scmp.ge.s32.totalorder %s13_s14, 6   ;;  %s1406_s13 = smov %s1408_s15 }
 0x103   :  { %12 = sbr.rel (!%p10_p5) target bundleno = 2 (0x2), region = 76 }

// kernel: gen_forward.14
= control target key start
LH: loop header
LB: loop body
LE: loop exit
PB: predicated region body
PF: predicated region fallthrough
CT: control target
= control target key end

     0   :  { %s1799_s12 = smov 0   ;;  %s1801_s13 = smov 0   ;;  %s2179_s0 = inlined_call_operand.vmem [shape: bf16[64,512], index: 0, kind: input, shape index: {}]   ;;  %s2180_s1 = inlined_call_operand.vmem [shape: bf16[512,512], index: 1, kind: input, shape index: {}]   ;;  %s2181_s2 = inlined_call_operand.vmem [shape: f32[1,512], index: 2, kind: input, shape index: {}]   ;;  %s2182_s3 = inlined_call_operand.vmem [shape: f32[64,512], index: 3, kind: output, shape index: {}]  }
   0x1   :  { %s1803_s14 = smov 0   ;;  %s1805_s15 = smov 0  }
   0x2   :  { %s1807_s16 = smov 0  }
   0x3 LB: > { %s28_s17 = sadd.s32 1, %s1773_s15  ;;  %s1480_s18 = sadd.s32 4294967295, %s1777_s16   ;;  %s1777_s16 = sphi %s1807_s16, %s13_s16   ;;  %s1773_s15 = sphi %s1805_s15, %s2187_s15   ;;  %s1769_s14 = sphi %s1803_s14, %s2186_s14   ;;  %s1765_s13 = sphi %s1801_s13, %s2185_s13   ;;  %s1761_s12 = sphi %s1799_s12, %s2184_s12  }
   0x4   : > { %p30_p0 = scmp.ge.s32.totalorder %s28_s17, 2  ;;  %p76_p1 = scmp.ne.s32.totalorder %s1765_s13, %s1761_s12 }
   0x5   : > { %p77_p2 = scmp.eq.s32.totalorder %s1777_s16, 0  ;;  %p134_p4 = scmp.eq.s32.totalorder %s1480_s18, 1 }
   0x6   : > { %s2189_s17 = smov (%p30_p0, %s28_s17), 0  ;;  %s69_s20 = sadd.s32 1, %s1765_s13 }
   0x7   : > { %p78_p3 = por %p77_p2, %p76_p1  ;;  %s65_s19 = ssub.s32 %s1773_s15, %s2189_s17 }
   0x8   : > { %p67_p5 = scmp.eq.s32.totalorder %s65_s19, 0  ;;  %p1834_p6 = por %p134_p4, %p76_p1 }
   0x9   : > { %p1484_p7 = scmp.ge.s32.totalorder %s1777_s16, 2 }
   0xa   : > { %s1839_s22 = scalar_select %p67_p5, %s1765_s13, %s69_s20  }
   0xb   : > { %171 = sbr.rel (%p1484_p7) target bundleno = 52 (0x34), region = 20 }
  0x10   : > { %174 = sbr.rel (!%p78_p3) target bundleno = 52 (0x34), region = 24  ;;  %s176_s23 = sand.u32 (%p78_p3), 1, %s1765_s13  }
  0x11   : > { %s1577_s24 = sshll.u32 (%p78_p3), %s1773_s15, 3  ;;  %s1485_s25 = sshll.u32 (%p78_p3), %s176_s23, 9 }
  0x12   : > { %s1847_s28 = scalar_lea.vmem (%p78_p3), %s2180_s1, %s1577_s24  ;;  %s1852_s29 = scalar_lea.vmem (%p78_p3), [#allocation3], %s1485_s25 }
  0x13   : > { %v339_v0 = vld [vmem:[%s1847_s28] sm:$0xff] (%p78_p3)  ;;  %v341_v1 = vld [vmem:[%s1847_s28 + $0x10] sm:$0xff] (%p78_p3) }
  0x14   : > { %v343_v2 = vld [vmem:[%s1847_s28 + $0x20] sm:$0xff] (%p78_p3)  ;;  %340 = vst [vmem:[%s1852_s29] sm:$0xff] (%p78_p3), %v339_v0  ;;  %342 = vst [vmem:[%s1852_s29 + $0x8] sm:$0xff] (%p78_p3), %v341_v1  ;;  %v345_v3 = vld [vmem:[%s1847_s28 + $0x30] sm:$0xff] (%p78_p3) }
  0x15   : > { %344 = vst [vmem:[%s1852_s29 + $0x10] sm:$0xff] %v343_v2  ;;  %v347_v4 = vld [vmem:[%s1847_s28 + $0x40] sm:$0xff]  ;;  %v349_v5 = vld [vmem:[%s1847_s28 + $0x50] sm:$0xff]  ;;  %346 = vst [vmem:[%s1852_s29 + $0x18] sm:$0xff] %v345_v3 }
  0x16   : > { %348 = vst [vmem:[%s1852_s29 + $0x20] sm:$0xff] %v347_v4  ;;  %350 = vst [vmem:[%s1852_s29 + $0x28] sm:$0xff] %v349_v5  ;;  %v351_v6 = vld [vmem:[%s1847_s28 + $0x60] sm:$0xff]  ;;  %v353_v7 = vld [vmem:[%s1847_s28 + $0x70] sm:$0xff] }
  0x17   : > { %v355_v8 = vld [vmem:[%s1847_s28 + $0x80] sm:$0xff]  ;;  %352 = vst [vmem:[%s1852_s29 + $0x30] sm:$0xff] %v351_v6  ;;  %354 = vst [vmem:[%s1852_s29 + $0x38] sm:$0xff] %v353_v7  ;;  %v357_v9 = vld [vmem:[%s1847_s28 + $0x90] sm:$0xff] }
  0x18   : > { %356 = vst [vmem:[%s1852_s29 + $0x40] sm:$0xff] %v355_v8  ;;  %v359_v10 = vld [vmem:[%s1847_s28 + $0xa0] sm:$0xff]  ;;  %v361_v11 = vld [vmem:[%s1847_s28 + $0xb0] sm:$0xff]  ;;  %358 = vst [vmem:[%s1852_s29 + $0x48] sm:$0xff] %v357_v9 }
  0x19   : > { %360 = vst [vmem:[%s1852_s29 + $0x50] sm:$0xff] %v359_v10  ;;  %362 = vst [vmem:[%s1852_s29 + $0x58] sm:$0xff] %v361_v11  ;;  %v363_v12 = vld [vmem:[%s1847_s28 + $0xc0] sm:$0xff]  ;;  %v365_v13 = vld [vmem:[%s1847_s28 + $0xd0] sm:$0xff] }
  0x1a   : > { %v367_v14 = vld [vmem:[%s1847_s28 + $0xe0] sm:$0xff]  ;;  %364 = vst [vmem:[%s1852_s29 + $0x60] sm:$0xff] %v363_v12  ;;  %366 = vst [vmem:[%s1852_s29 + $0x68] sm:$0xff] %v365_v13  ;;  %v369_v15 = vld [vmem:[%s1847_s28 + $0xf0] sm:$0xff] }
  0x1b   : > { %368 = vst [vmem:[%s1852_s29 + $0x70] sm:$0xff] %v367_v14  ;;  %v371_v16 = vld [vmem:[%s1847_s28 + $0x100] sm:$0xff]  ;;  %v373_v17 = vld [vmem:[%s1847_s28 + $0x110] sm:$0xff]  ;;  %370 = vst [vmem:[%s1852_s29 + $0x78] sm:$0xff] %v369_v15 }
  0x1c   : > { %372 = vst [vmem:[%s1852_s29 + $0x80] sm:$0xff] %v371_v16  ;;  %374 = vst [vmem:[%s1852_s29 + $0x88] sm:$0xff] %v373_v17  ;;  %v375_v18 = vld [vmem:[%s1847_s28 + $0x120] sm:$0xff]  ;;  %v377_v19 = vld [vmem:[%s1847_s28 + $0x130] sm:$0xff] }
  0x1d   : > { %v379_v20 = vld [vmem:[%s1847_s28 + $0x140] sm:$0xff]  ;;  %376 = vst [vmem:[%s1852_s29 + $0x90] sm:$0xff] %v375_v18  ;;  %378 = vst [vmem:[%s1852_s29 + $0x98] sm:$0xff] %v377_v19  ;;  %v381_v21 = vld [vmem:[%s1847_s28 + $0x150] sm:$0xff] }
  0x1e   : > { %380 = vst [vmem:[%s1852_s29 + $0xa0] sm:$0xff] %v379_v20  ;;  %v383_v22 = vld [vmem:[%s1847_s28 + $0x160] sm:$0xff]  ;;  %v385_v23 = vld [vmem:[%s1847_s28 + $0x170] sm:$0xff]  ;;  %382 = vst [vmem:[%s1852_s29 + $0xa8] sm:$0xff] %v381_v21 }
  0x1f   : > { %384 = vst [vmem:[%s1852_s29 + $0xb0] sm:$0xff] %v383_v22  ;;  %386 = vst [vmem:[%s1852_s29 + $0xb8] sm:$0xff] %v385_v23  ;;  %v387_v24 = vld [vmem:[%s1847_s28 + $0x180] sm:$0xff]  ;;  %v389_v25 = vld [vmem:[%s1847_s28 + $0x190] sm:$0xff] }
  0x20   : > { %v391_v26 = vld [vmem:[%s1847_s28 + $0x1a0] sm:$0xff]  ;;  %388 = vst [vmem:[%s1852_s29 + $0xc0] sm:$0xff] %v387_v24  ;;  %390 = vst [vmem:[%s1852_s29 + $0xc8] sm:$0xff] %v389_v25  ;;  %v393_v27 = vld [vmem:[%s1847_s28 + $0x1b0] sm:$0xff] }
  0x21   : > { %392 = vst [vmem:[%s1852_s29 + $0xd0] sm:$0xff] %v391_v26  ;;  %v395_v28 = vld [vmem:[%s1847_s28 + $0x1c0] sm:$0xff]  ;;  %v397_v29 = vld [vmem:[%s1847_s28 + $0x1d0] sm:$0xff]  ;;  %394 = vst [vmem:[%s1852_s29 + $0xd8] sm:$0xff] %v393_v27 }
  0x22   : > { %396 = vst [vmem:[%s1852_s29 + $0xe0] sm:$0xff] %v395_v28  ;;  %398 = vst [vmem:[%s1852_s29 + $0xe8] sm:$0xff] %v397_v29  ;;  %v399_v30 = vld [vmem:[%s1847_s28 + $0x1e0] sm:$0xff]  ;;  %v401_v31 = vld [vmem:[%s1847_s28 + $0x1f0] sm:$0xff] }
  0x23   : > { %v403_v32 = vld [vmem:[%s1847_s28 + $0x200] sm:$0xff]  ;;  %400 = vst [vmem:[%s1852_s29 + $0xf0] sm:$0xff] %v399_v30  ;;  %402 = vst [vmem:[%s1852_s29 + $0xf8] sm:$0xff] %v401_v31  ;;  %v405_v33 = vld [vmem:[%s1847_s28 + $0x210] sm:$0xff] }
  0x24   : > { %404 = vst [vmem:[%s1852_s29 + $0x100] sm:$0xff] %v403_v32  ;;  %v407_v34 = vld [vmem:[%s1847_s28 + $0x220] sm:$0xff]  ;;  %v409_v35 = vld [vmem:[%s1847_s28 + $0x230] sm:$0xff]  ;;  %406 = vst [vmem:[%s1852_s29 + $0x108] sm:$0xff] %v405_v33 }
  0x25   : > { %408 = vst [vmem:[%s1852_s29 + $0x110] sm:$0xff] %v407_v34  ;;  %410 = vst [vmem:[%s1852_s29 + $0x118] sm:$0xff] %v409_v35  ;;  %v411_v36 = vld [vmem:[%s1847_s28 + $0x240] sm:$0xff]  ;;  %v413_v37 = vld [vmem:[%s1847_s28 + $0x250] sm:$0xff] }
  0x26   : > { %v415_v38 = vld [vmem:[%s1847_s28 + $0x260] sm:$0xff]  ;;  %412 = vst [vmem:[%s1852_s29 + $0x120] sm:$0xff] %v411_v36  ;;  %414 = vst [vmem:[%s1852_s29 + $0x128] sm:$0xff] %v413_v37  ;;  %v417_v39 = vld [vmem:[%s1847_s28 + $0x270] sm:$0xff] }
  0x27   : > { %416 = vst [vmem:[%s1852_s29 + $0x130] sm:$0xff] %v415_v38  ;;  %v419_v40 = vld [vmem:[%s1847_s28 + $0x280] sm:$0xff]  ;;  %v421_v41 = vld [vmem:[%s1847_s28 + $0x290] sm:$0xff]  ;;  %418 = vst [vmem:[%s1852_s29 + $0x138] sm:$0xff] %v417_v39 }
  0x28   : > { %420 = vst [vmem:[%s1852_s29 + $0x140] sm:$0xff] %v419_v40  ;;  %422 = vst [vmem:[%s1852_s29 + $0x148] sm:$0xff] %v421_v41  ;;  %v423_v42 = vld [vmem:[%s1847_s28 + $0x2a0] sm:$0xff]  ;;  %v425_v43 = vld [vmem:[%s1847_s28 + $0x2b0] sm:$0xff] }
  0x29   : > { %v427_v44 = vld [vmem:[%s1847_s28 + $0x2c0] sm:$0xff]  ;;  %424 = vst [vmem:[%s1852_s29 + $0x150] sm:$0xff] %v423_v42  ;;  %426 = vst [vmem:[%s1852_s29 + $0x158] sm:$0xff] %v425_v43  ;;  %v429_v45 = vld [vmem:[%s1847_s28 + $0x2d0] sm:$0xff] }
  0x2a   : > { %428 = vst [vmem:[%s1852_s29 + $0x160] sm:$0xff] %v427_v44  ;;  %v431_v46 = vld [vmem:[%s1847_s28 + $0x2e0] sm:$0xff]  ;;  %v433_v47 = vld [vmem:[%s1847_s28 + $0x2f0] sm:$0xff]  ;;  %430 = vst [vmem:[%s1852_s29 + $0x168] sm:$0xff] %v429_v45 }
  0x2b   : > { %432 = vst [vmem:[%s1852_s29 + $0x170] sm:$0xff] %v431_v46  ;;  %434 = vst [vmem:[%s1852_s29 + $0x178] sm:$0xff] %v433_v47  ;;  %v435_v48 = vld [vmem:[%s1847_s28 + $0x300] sm:$0xff]  ;;  %v437_v49 = vld [vmem:[%s1847_s28 + $0x310] sm:$0xff] }
  0x2c   : > { %v439_v50 = vld [vmem:[%s1847_s28 + $0x320] sm:$0xff]  ;;  %436 = vst [vmem:[%s1852_s29 + $0x180] sm:$0xff] %v435_v48  ;;  %438 = vst [vmem:[%s1852_s29 + $0x188] sm:$0xff] %v437_v49  ;;  %v441_v51 = vld [vmem:[%s1847_s28 + $0x330] sm:$0xff] }
  0x2d   : > { %440 = vst [vmem:[%s1852_s29 + $0x190] sm:$0xff] %v439_v50  ;;  %v443_v52 = vld [vmem:[%s1847_s28 + $0x340] sm:$0xff]  ;;  %v445_v53 = vld [vmem:[%s1847_s28 + $0x350] sm:$0xff]  ;;  %442 = vst [vmem:[%s1852_s29 + $0x198] sm:$0xff] %v441_v51 }
  0x2e   : > { %444 = vst [vmem:[%s1852_s29 + $0x1a0] sm:$0xff] %v443_v52  ;;  %446 = vst [vmem:[%s1852_s29 + $0x1a8] sm:$0xff] %v445_v53  ;;  %v447_v54 = vld [vmem:[%s1847_s28 + $0x360] sm:$0xff]  ;;  %v449_v55 = vld [vmem:[%s1847_s28 + $0x370] sm:$0xff] }
  0x2f   : > { %v451_v56 = vld [vmem:[%s1847_s28 + $0x380] sm:$0xff]  ;;  %448 = vst [vmem:[%s1852_s29 + $0x1b0] sm:$0xff] %v447_v54  ;;  %450 = vst [vmem:[%s1852_s29 + $0x1b8] sm:$0xff] %v449_v55  ;;  %v453_v57 = vld [vmem:[%s1847_s28 + $0x390] sm:$0xff] }
  0x30   : > { %452 = vst [vmem:[%s1852_s29 + $0x1c0] sm:$0xff] %v451_v56  ;;  %v455_v58 = vld [vmem:[%s1847_s28 + $0x3a0] sm:$0xff]  ;;  %v457_v59 = vld [vmem:[%s1847_s28 + $0x3b0] sm:$0xff]  ;;  %454 = vst [vmem:[%s1852_s29 + $0x1c8] sm:$0xff] %v453_v57 }
  0x31   : > { %456 = vst [vmem:[%s1852_s29 + $0x1d0] sm:$0xff] %v455_v58  ;;  %458 = vst [vmem:[%s1852_s29 + $0x1d8] sm:$0xff] %v457_v59  ;;  %v459_v60 = vld [vmem:[%s1847_s28 + $0x3c0] sm:$0xff]  ;;  %v461_v61 = vld [vmem:[%s1847_s28 + $0x3d0] sm:$0xff] }
  0x32   : > { %v463_v62 = vld [vmem:[%s1847_s28 + $0x3e0] sm:$0xff]  ;;  %460 = vst [vmem:[%s1852_s29 + $0x1e0] sm:$0xff] %v459_v60  ;;  %462 = vst [vmem:[%s1852_s29 + $0x1e8] sm:$0xff] %v461_v61  ;;  %v465_v63 = vld [vmem:[%s1847_s28 + $0x3f0] sm:$0xff] }
  0x33   : > { %464 = vst [vmem:[%s1852_s29 + $0x1f0] sm:$0xff] %v463_v62  ;;  %466 = vst [vmem:[%s1852_s29 + $0x1f8] sm:$0xff] %v465_v63 }
  0x34 PF: > { %p1488_p8 = scmp.ge.s32.totalorder %s1777_s16, 1  ;;  %p479_p9 = scmp.lt.s32.totalorder %s1777_s16, 3 }
  0x36   : > { %p480_p10 = pnand %p1488_p8, %p479_p9 }
  0x37   : > { %s486_s30 = sand.u32 (!%p480_p10), 1, %s1761_s12   ;;  %s1491_s28 = sshll.u32 (!%p480_p10), %s1769_s14, 1 }
  0x38   : > { %483 = sbr.rel (%p480_p10) target bundleno = 366 (0x16e), region = 66  ;;  %s1489_s4 = sshll.u32 (!%p480_p10), %s486_s30, 9 }
  0x39   : > { %s1990_s9 = scalar_lea.vmem (!%p480_p10), [#allocation3], %s1489_s4  ;;  %p537_p11 = scmp.lt.s32.totalorder (!%p480_p10), %s1491_s28, 3 }
  0x3a   : > { %s1490_s6 = sshll.u32 (!%p480_p10), %s486_s30, 7 }
  0x3b   : > { %s2110_s7 = scalar_lea.vmem (!%p480_p10), [#allocation4], %s1490_s6 }
  0x3d   : > { %v1717_v0 = vld [vmem:[%s2179_s0 + $0x4] ss:$16 sps:$4 sm:$0xff]   ;;  %v1720_v1 = vld [vmem:[%s2179_s0 + $0xc] ss:$16 sps:$4 sm:$0xff]   ;;  %v1623_v4 = vld [vmem:[%s1990_s9 + $0x70] ss:$8 sps:$4 sm:$0xff]  }
  0x3e   : > { %v1619_v2 = vld [vmem:[%s1990_s9 + $0x74] ss:$8 sps:$4 sm:$0xff]   ;;  %1091 = vmatprep.mubr.bf16.mxu0 %v1717_v0  ;;  %1164 = vmatprep.mubr.bf16.mxu1 %v1720_v1  ;;  %v1624_v5 = vld [vmem:[%s1990_s9 + $0x170] ss:$8 sps:$4 sm:$0xff]   ;;  %v1625_v6 = vld [vmem:[%s1990_s9 + $0x64] ss:$8 sps:$4 sm:$0xff]  }
  0x3f   : > { %v1621_v3 = vld [vmem:[%s1990_s9 + $0x174] ss:$8 sps:$4 sm:$0xff]   ;;  %1059 = vmatprep.subr.bf16.mxu0 %v1619_v2  ;;  %v1627_v7 = vld [vmem:[%s1990_s9 + $0x164] ss:$8 sps:$4 sm:$0xff]   ;;  %v1629_v8 = vld [vmem:[%s1990_s9 + $0x60] ss:$8 sps:$4 sm:$0xff]  }
  0x40   : > { %1132 = vmatprep.subr.bf16.mxu1 %v1621_v3  ;;  %1060 = vmatpush1.bf16.msra.mxu0 %v1623_v4  ;;  %v1630_v9 = vld [vmem:[%s1990_s9 + $0x160] ss:$8 sps:$4 sm:$0xff]   ;;  %v1631_v10 = vld [vmem:[%s1990_s9 + $0x54] ss:$8 sps:$4 sm:$0xff]   ;;  %v1635_v12 = vld [vmem:[%s1990_s9 + $0x50] ss:$8 sps:$4 sm:$0xff]  }
  0x41   : > { %1133 = vmatpush1.bf16.msra.mxu1 %v1624_v5  ;;  %1061 = vmatprep.subr.bf16.mxu0 %v1625_v6  ;;  %v1633_v11 = vld [vmem:[%s1990_s9 + $0x154] ss:$8 sps:$4 sm:$0xff]   ;;  %v1636_v13 = vld [vmem:[%s1990_s9 + $0x150] ss:$8 sps:$4 sm:$0xff]   ;;  %v1637_v14 = vld [vmem:[%s1990_s9 + $0x44] ss:$8 sps:$4 sm:$0xff]  }
  0x42   : > { %1134 = vmatprep.subr.bf16.mxu1 %v1627_v7  ;;  %v1639_v15 = vld [vmem:[%s1990_s9 + $0x144] ss:$8 sps:$4 sm:$0xff]   ;;  %v1641_v16 = vld [vmem:[%s1990_s9 + $0x40] ss:$8 sps:$4 sm:$0xff]   ;;  %v1643_v18 = vld [vmem:[%s1990_s9 + $0x34] ss:$8 sps:$4 sm:$0xff]  }
  0x43   : > { %v1642_v17 = vld [vmem:[%s1990_s9 + $0x140] ss:$8 sps:$4 sm:$0xff]   ;;  %v1645_v19 = vld [vmem:[%s1990_s9 + $0x134] ss:$8 sps:$4 sm:$0xff]   ;;  %v1647_v20 = vld [vmem:[%s1990_s9 + $0x30] ss:$8 sps:$4 sm:$0xff]  }
  0x44   : > { %1062 = vmatpush1.bf16.msra.mxu0 %v1629_v8  ;;  %v1648_v21 = vld [vmem:[%s1990_s9 + $0x130] ss:$8 sps:$4 sm:$0xff]   ;;  %v1649_v22 = vld [vmem:[%s1990_s9 + $0x24] ss:$8 sps:$4 sm:$0xff]   ;;  %v1653_v24 = vld [vmem:[%s1990_s9 + $0x20] ss:$8 sps:$4 sm:$0xff]  }
  0x45   : > { %1135 = vmatpush1.bf16.msra.mxu1 %v1630_v9  ;;  %1063 = vmatprep.subr.bf16.mxu0 %v1631_v10  ;;  %v1651_v23 = vld [vmem:[%s1990_s9 + $0x124] ss:$8 sps:$4 sm:$0xff]   ;;  %v1654_v25 = vld [vmem:[%s1990_s9 + $0x120] ss:$8 sps:$4 sm:$0xff]   ;;  %v1655_v26 = vld [vmem:[%s1990_s9 + $0x14] ss:$8 sps:$4 sm:$0xff]  }
  0x46   : > { %1136 = vmatprep.subr.bf16.mxu1 %v1633_v11  ;;  %v1657_v27 = vld [vmem:[%s1990_s9 + $0x114] ss:$8 sps:$4 sm:$0xff]   ;;  %v1659_v28 = vld [vmem:[%s1990_s9 + $0x10] ss:$8 sps:$4 sm:$0xff]   ;;  %v1661_v30 = vld [vmem:[%s1990_s9 + $0x4] ss:$8 sps:$4 sm:$0xff]  }
  0x47   : > { %v1660_v29 = vld [vmem:[%s1990_s9 + $0x110] ss:$8 sps:$4 sm:$0xff]   ;;  %v1663_v31 = vld [vmem:[%s1990_s9 + $0x104] ss:$8 sps:$4 sm:$0xff]   ;;  %v1665_v32 = vld [vmem:[%s1990_s9] ss:$8 sps:$4 sm:$0xff]  }
  0x48   : > { %1064 = vmatpush1.bf16.msra.mxu0 %v1635_v12  ;;  %v1666_v33 = vld [vmem:[%s1990_s9 + $0x100] ss:$8 sps:$4 sm:$0xff]   ;;  %v1667_v34 = vld [vmem:[%s1990_s9 + $0xf4] ss:$8 sps:$4 sm:$0xff]   ;;  %v1671_v36 = vld [vmem:[%s1990_s9 + $0xf0] ss:$8 sps:$4 sm:$0xff]  }
  0x49   : > { %1137 = vmatpush1.bf16.msra.mxu1 %v1636_v13  ;;  %1065 = vmatprep.subr.bf16.mxu0 %v1637_v14  ;;  %v1669_v35 = vld [vmem:[%s1990_s9 + $0x1f4] ss:$8 sps:$4 sm:$0xff]   ;;  %v1672_v37 = vld [vmem:[%s1990_s9 + $0x1f0] ss:$8 sps:$4 sm:$0xff]   ;;  %v1673_v38 = vld [vmem:[%s1990_s9 + $0xe4] ss:$8 sps:$4 sm:$0xff]  }
  0x4a   : > { %1138 = vmatprep.subr.bf16.mxu1 %v1639_v15  ;;  %v1675_v39 = vld [vmem:[%s1990_s9 + $0x1e4] ss:$8 sps:$4 sm:$0xff]   ;;  %v1677_v40 = vld [vmem:[%s1990_s9 + $0xe0] ss:$8 sps:$4 sm:$0xff]   ;;  %v1679_v42 = vld [vmem:[%s1990_s9 + $0xd4] ss:$8 sps:$4 sm:$0xff]  }
  0x4b   : > { %v1678_v41 = vld [vmem:[%s1990_s9 + $0x1e0] ss:$8 sps:$4 sm:$0xff]   ;;  %v1681_v43 = vld [vmem:[%s1990_s9 + $0x1d4] ss:$8 sps:$4 sm:$0xff]   ;;  %v1683_v44 = vld [vmem:[%s1990_s9 + $0xd0] ss:$8 sps:$4 sm:$0xff]  }
  0x4c   : > { %1066 = vmatpush1.bf16.msra.mxu0 %v1641_v16  ;;  %v1684_v45 = vld [vmem:[%s1990_s9 + $0x1d0] ss:$8 sps:$4 sm:$0xff]   ;;  %v1685_v46 = vld [vmem:[%s1990_s9 + $0xc4] ss:$8 sps:$4 sm:$0xff]   ;;  %v1689_v48 = vld [vmem:[%s1990_s9 + $0xc0] ss:$8 sps:$4 sm:$0xff]   ;;  %v1258_v16 = vlaneseq }
  0x4d   : > { %1139 = vmatpush1.bf16.msra.mxu1 %v1642_v17  ;;  %1067 = vmatprep.subr.bf16.mxu0 %v1643_v18  ;;  %v1687_v47 = vld [vmem:[%s1990_s9 + $0x1c4] ss:$8 sps:$4 sm:$0xff]   ;;  %v1690_v49 = vld [vmem:[%s1990_s9 + $0x1c0] ss:$8 sps:$4 sm:$0xff]   ;;  %v1691_v50 = vld [vmem:[%s1990_s9 + $0xb4] ss:$8 sps:$4 sm:$0xff]  }
  0x4e   : > { %1140 = vmatprep.subr.bf16.mxu1 %v1645_v19  ;;  %v1693_v51 = vld [vmem:[%s1990_s9 + $0x1b4] ss:$8 sps:$4 sm:$0xff]   ;;  %v1695_v52 = vld [vmem:[%s1990_s9 + $0xb0] ss:$8 sps:$4 sm:$0xff]   ;;  %v1697_v54 = vld [vmem:[%s1990_s9 + $0xa4] ss:$8 sps:$4 sm:$0xff]  }
  0x4f   : > { %v1696_v53 = vld [vmem:[%s1990_s9 + $0x1b0] ss:$8 sps:$4 sm:$0xff]   ;;  %v1699_v55 = vld [vmem:[%s1990_s9 + $0x1a4] ss:$8 sps:$4 sm:$0xff]   ;;  %v1701_v56 = vld [vmem:[%s1990_s9 + $0xa0] ss:$8 sps:$4 sm:$0xff]  }
  0x50   : > { %1068 = vmatpush1.bf16.msra.mxu0 %v1647_v20  ;;  %v1702_v57 = vld [vmem:[%s1990_s9 + $0x1a0] ss:$8 sps:$4 sm:$0xff]   ;;  %v1703_v58 = vld [vmem:[%s1990_s9 + $0x94] ss:$8 sps:$4 sm:$0xff]   ;;  %v1707_v60 = vld [vmem:[%s1990_s9 + $0x90] ss:$8 sps:$4 sm:$0xff]  }
  0x51   : > { %1141 = vmatpush1.bf16.msra.mxu1 %v1648_v21  ;;  %1069 = vmatprep.subr.bf16.mxu0 %v1649_v22  ;;  %v1705_v59 = vld [vmem:[%s1990_s9 + $0x194] ss:$8 sps:$4 sm:$0xff]   ;;  %v1708_v61 = vld [vmem:[%s1990_s9 + $0x190] ss:$8 sps:$4 sm:$0xff]   ;;  %v1709_v62 = vld [vmem:[%s1990_s9 + $0x84] ss:$8 sps:$4 sm:$0xff]  }
  0x52   : > { %1142 = vmatprep.subr.bf16.mxu1 %v1651_v23  ;;  %v1711_v63 = vld [vmem:[%s1990_s9 + $0x184] ss:$8 sps:$4 sm:$0xff]   ;;  %v1713_v0 = vld [vmem:[%s1990_s9 + $0x80] ss:$8 sps:$4 sm:$0xff]   ;;  %s2191_s28 = smov (!%p537_p11, %s1491_s28), 3  ;;  %v1259_v17 = vshrl.u32 %v1258_v16, 7 }
  0x53   : > { %v1714_v1 = vld [vmem:[%s1990_s9 + $0x180] ss:$8 sps:$4 sm:$0xff]   ;;  %v1721_v4 = vld [vmem:[%s2179_s0 + $0x24] ss:$16 sps:$4 sm:$0xff]   ;;  %v1723_v5 = vld [vmem:[%s2179_s0 + $0x2c] ss:$16 sps:$4 sm:$0xff]   ;;  %s539_s5 = scalar_lea.vmem %s2181_s2, %s2191_s28 }
  0x54   : > { %1070 = vmatpush1.bf16.msra.mxu0 %v1653_v24  ;;  %v1715_v2 = vld [vmem:[%s2179_s0] ss:$16 sps:$4 sm:$0xff]   ;;  %v1718_v3 = vld [vmem:[%s2179_s0 + $0x8] ss:$16 sps:$4 sm:$0xff]   ;;  %v1727_v8 = vld [vmem:[%s2179_s0 + $0x44] ss:$16 sps:$4 sm:$0xff]  }
  0x55   : > { %1143 = vmatpush1.bf16.msra.mxu1 %v1654_v25  ;;  %1071 = vmatprep.subr.bf16.mxu0 %v1655_v26  ;;  %v1725_v6 = vld [vmem:[%s2179_s0 + $0x20] ss:$16 sps:$4 sm:$0xff]   ;;  %v1726_v7 = vld [vmem:[%s2179_s0 + $0x28] ss:$16 sps:$4 sm:$0xff]   ;;  %v1729_v9 = vld [vmem:[%s2179_s0 + $0x4c] ss:$16 sps:$4 sm:$0xff]  }
  0x56   : > { %1144 = vmatprep.subr.bf16.mxu1 %v1657_v27  ;;  %v1731_v10 = vld [vmem:[%s2179_s0 + $0x40] ss:$16 sps:$4 sm:$0xff]   ;;  %v1732_v11 = vld [vmem:[%s2179_s0 + $0x48] ss:$16 sps:$4 sm:$0xff]   ;;  %v1733_v12 = vld [vmem:[%s2179_s0 + $0x64] ss:$16 sps:$4 sm:$0xff]  }
  0x57   : > { %v1735_v13 = vld [vmem:[%s2179_s0 + $0x6c] ss:$16 sps:$4 sm:$0xff]   ;;  %v1737_v14 = vld [vmem:[%s2179_s0 + $0x60] ss:$16 sps:$4 sm:$0xff]   ;;  %v1738_v15 = vld [vmem:[%s2179_s0 + $0x68] ss:$16 sps:$4 sm:$0xff]  }
  0x58   : > { %1072 = vmatpush1.bf16.msra.mxu0 %v1659_v28  ;;  %v1260_v18 = vsub.s32 0, %v1259_v17  ;;  %v1256_v19 = vld [vmem:[%s539_s5] sm:$0x3]  ;;  %v1264_v20 = vsub.s32 1, %v1259_v17  ;;  %s1578_s12 = sshll.u32 (%p1834_p6), %s1769_s14, 4 }
  0x59   : > { %1145 = vmatpush1.bf16.msra.mxu1 %v1660_v29  ;;  %1073 = vmatprep.subr.bf16.mxu0 %v1661_v30  ;;  %s1328_s9 = scalar_lea.vmem (%p1834_p6), %s2182_s3, %s1578_s12 }
  0x5a   : > { %1146 = vmatprep.subr.bf16.mxu1 %v1663_v31  ;;  %v2102_v21 = vrot.slane %v1256_v19, %v1260_v18  ;;  %v2106_v25 = vrot.slane %v1256_v19, %v1264_v20 }
  0x5c   : > { %1074 = vmatpush1.bf16.msra.mxu0 %v1665_v32 }
  0x5d   : > { %1147 = vmatpush1.bf16.msra.mxu1 %v1666_v33  ;;  %1075 = vmatprep.subr.bf16.mxu0 %v1667_v34 }
  0x5e   : > { %1148 = vmatprep.subr.bf16.mxu1 %v1669_v35 }
  0x60   : > { %1076 = vmatpush2.bf16.msra.mxu0 %v1671_v36 }
  0x61   : > { %1149 = vmatpush2.bf16.msra.mxu1 %v1672_v37  ;;  %1077 = vmatprep.subr.bf16.mxu0 %v1673_v38 }
  0x62   : > { %1150 = vmatprep.subr.bf16.mxu1 %v1675_v39 }
  0x64   : > { %1078 = vmatpush2.bf16.msra.mxu0 %v1677_v40 }
  0x65   : > { %1151 = vmatpush2.bf16.msra.mxu1 %v1678_v41  ;;  %1079 = vmatprep.subr.bf16.mxu0 %v1679_v42 }
  0x66   : > { %1152 = vmatprep.subr.bf16.mxu1 %v1681_v43 }
  0x68   : > { %1080 = vmatpush2.bf16.msra.mxu0 %v1683_v44 }
  0x69   : > { %1153 = vmatpush2.bf16.msra.mxu1 %v1684_v45  ;;  %1081 = vmatprep.subr.bf16.mxu0 %v1685_v46 }
  0x6a   : > { %1154 = vmatprep.subr.bf16.mxu1 %v1687_v47 }
  0x6c   : > { %1082 = vmatpush2.bf16.msra.mxu0 %v1689_v48 }
  0x6d   : > { %1155 = vmatpush2.bf16.msra.mxu1 %v1690_v49  ;;  %1083 = vmatprep.subr.bf16.mxu0 %v1691_v50 }
  0x6e   : > { %1156 = vmatprep.subr.bf16.mxu1 %v1693_v51 }
  0x70   : > { %1084 = vmatpush2.bf16.msra.mxu0 %v1695_v52 }
  0x71   : > { %1157 = vmatpush2.bf16.msra.mxu1 %v1696_v53  ;;  %1085 = vmatprep.subr.bf16.mxu0 %v1697_v54 }
  0x72   : > { %1158 = vmatprep.subr.bf16.mxu1 %v1699_v55 }
  0x74   : > { %1086 = vmatpush2.bf16.msra.mxu0 %v1701_v56 }
  0x75   : > { %1159 = vmatpush2.bf16.msra.mxu1 %v1702_v57  ;;  %1087 = vmatprep.subr.bf16.mxu0 %v1703_v58 }
  0x76   : > { %1160 = vmatprep.subr.bf16.mxu1 %v1705_v59 }
  0x78   : > { %1088 = vmatpush2.bf16.msra.mxu0 %v1707_v60 }
  0x79   : > { %1161 = vmatpush2.bf16.msra.mxu1 %v1708_v61  ;;  %1089 = vmatprep.subr.bf16.mxu0 %v1709_v62 }
  0x7a   : > { %1162 = vmatprep.subr.bf16.mxu1 %v1711_v63 }
  0x7c   : > { %1090 = vmatpush2.bf16.msra.mxu0 %v1713_v0 }
  0x7d   : > { %1163 = vmatpush2.bf16.msra.mxu1 %v1714_v1 }
  0x7f   : > { %1092 = vmatmul.mubr.bf16.vlgmr.msra.gmra.mxu0 %v1715_v2 }
  0x80   : > { %1165 = vmatmul.mubr.bf16.vlgmr.msra.gmra.mxu1 %v1718_v3  ;;  %1101 = vmatprep.mubr.bf16.mxu0 %v1721_v4 }
  0x81   : > { %1174 = vmatprep.mubr.bf16.mxu1 %v1723_v5 }
  0x87   : > { %1102 = vmatmul.mubr.bf16.gmra.mxu0 %v1725_v6 }
  0x88   : > { %1175 = vmatmul.mubr.bf16.gmra.mxu1 %v1726_v7  ;;  %1111 = vmatprep.mubr.bf16.mxu0 %v1727_v8 }
  0x89   : > { %1184 = vmatprep.mubr.bf16.mxu1 %v1729_v9 }
  0x8f   : > { %1112 = vmatmul.mubr.bf16.gmra.mxu0 %v1731_v10 }
  0x90   : > { %1185 = vmatmul.mubr.bf16.gmra.mxu1 %v1732_v11  ;;  %1121 = vmatprep.mubr.bf16.mxu0 %v1733_v12 }
  0x91   : > { %1194 = vmatprep.mubr.bf16.mxu1 %v1735_v13 }
  0x97   : > { %1122 = vmatmul.mubr.bf16.gmra.mxu0 %v1737_v14 }
  0x98   : > { %1195 = vmatmul.mubr.bf16.gmra.mxu1 %v1738_v15 }
 0x13f   : > { %v1093_v22 = vpop.f32.mrf.mxu0 }
 0x140   : > { %v1166_v23 = vpop.f32.mrf.mxu1 }
 0x141   : > { %v1167_v24 = vadd.f32 %v1166_v23, %v1093_v22  ;;  %v1095_v26 = vpop.f32.mrf.mxu0 }
 0x142   : > { %v1168_v27 = vpop.f32.mrf.mxu1 }
 0x143   : > { %v1268_v28 = vadd.f32 %v2102_v21, %v1167_v24  ;;  %v1169_v29 = vadd.f32 %v1168_v27, %v1095_v26  ;;  %v1097_v30 = vpop.f32.mrf.mxu0 }
 0x144   : > { %v1170_v31 = vpop.f32.mrf.mxu1 }
 0x145   : > { %v1284_v32 = vmax.f32 %v1268_v28, 0.0  ;;  %v1269_v33 = vadd.f32 %v2106_v25, %v1169_v29  ;;  %v1171_v34 = vadd.f32 %v1170_v31, %v1097_v30  ;;  %v1099_v35 = vpop.f32.mrf.mxu0 }
 0x146   : > { %v1172_v36 = vpop.f32.mrf.mxu1 }
 0x147   : > { %1300 = vst [vmem:[%s2110_s7] sm:$0xff] %v1284_v32  ;;  %v1285_v37 = vmax.f32 %v1269_v33, 0.0  ;;  %v1270_v38 = vadd.f32 %v2102_v21, %v1171_v34  ;;  %v1173_v39 = vadd.f32 %v1172_v36, %v1099_v35  ;;  %v1103_v40 = vpop.f32.mrf.mxu0 }
 0x148   : > { %v1176_v41 = vpop.f32.mrf.mxu1 }
 0x149   : > { %1301 = vst [vmem:[%s2110_s7 + $0x8] sm:$0xff] %v1285_v37  ;;  %v1286_v42 = vmax.f32 %v1270_v38, 0.0  ;;  %v1271_v43 = vadd.f32 %v2106_v25, %v1173_v39  ;;  %v1177_v44 = vadd.f32 %v1176_v41, %v1103_v40  ;;  %v1105_v45 = vpop.f32.mrf.mxu0 }
 0x14a   : > { %v1178_v46 = vpop.f32.mrf.mxu1 }
 0x14b   : > { %1302 = vst [vmem:[%s2110_s7 + $0x10] sm:$0xff] %v1286_v42  ;;  %v1287_v47 = vmax.f32 %v1271_v43, 0.0  ;;  %v1272_v48 = vadd.f32 %v2102_v21, %v1177_v44  ;;  %v1179_v49 = vadd.f32 %v1178_v46, %v1105_v45  ;;  %v1107_v50 = vpop.f32.mrf.mxu0 }
 0x14c   : > { %v1180_v51 = vpop.f32.mrf.mxu1 }
 0x14d   : > { %1303 = vst [vmem:[%s2110_s7 + $0x18] sm:$0xff] %v1287_v47  ;;  %v1288_v52 = vmax.f32 %v1272_v48, 0.0  ;;  %v1273_v53 = vadd.f32 %v2106_v25, %v1179_v49  ;;  %v1181_v54 = vadd.f32 %v1180_v51, %v1107_v50  ;;  %v1109_v55 = vpop.f32.mrf.mxu0 }
 0x14e   : > { %v1182_v56 = vpop.f32.mrf.mxu1 }
 0x14f   : > { %1304 = vst [vmem:[%s2110_s7 + $0x20] sm:$0xff] %v1288_v52  ;;  %v1289_v57 = vmax.f32 %v1273_v53, 0.0  ;;  %v1274_v58 = vadd.f32 %v2102_v21, %v1181_v54  ;;  %v1183_v59 = vadd.f32 %v1182_v56, %v1109_v55  ;;  %v1113_v60 = vpop.f32.mrf.mxu0 }
 0x150   : > { %v1186_v61 = vpop.f32.mrf.mxu1  ;;  %v1343_v41 = vld [vmem:[%s2110_s7 + $0x8] sm:$0xff] (%p1834_p6) }
 0x151   : > { %1305 = vst [vmem:[%s2110_s7 + $0x28] sm:$0xff] %v1289_v57  ;;  %v1290_v62 = vmax.f32 %v1274_v58, 0.0  ;;  %v1275_v63 = vadd.f32 %v2106_v25, %v1183_v59  ;;  %v1187_v0 = vadd.f32 %v1186_v61, %v1113_v60  ;;  %v1115_v1 = vpop.f32.mrf.mxu0  ;;  %1344 = vst [vmem:[%s1328_s9 + $0x8] sm:$0xff] (%p1834_p6), %v1343_v41 }
 0x152   : > { %v1188_v2 = vpop.f32.mrf.mxu1 }
 0x153   : > { %1306 = vst [vmem:[%s2110_s7 + $0x30] sm:$0xff] %v1290_v62  ;;  %v1291_v3 = vmax.f32 %v1275_v63, 0.0  ;;  %v1276_v4 = vadd.f32 %v2102_v21, %v1187_v0  ;;  %v1189_v5 = vadd.f32 %v1188_v2, %v1115_v1  ;;  %v1117_v6 = vpop.f32.mrf.mxu0 }
 0x154   : > { %v1190_v7 = vpop.f32.mrf.mxu1  ;;  %v1347_v42 = vld [vmem:[%s2110_s7 + $0x18] sm:$0xff] (%p1834_p6) }
 0x155   : > { %1307 = vst [vmem:[%s2110_s7 + $0x38] sm:$0xff] %v1291_v3  ;;  %v1292_v8 = vmax.f32 %v1276_v4, 0.0  ;;  %v1277_v9 = vadd.f32 %v2106_v25, %v1189_v5  ;;  %v1191_v10 = vadd.f32 %v1190_v7, %v1117_v6  ;;  %v1119_v11 = vpop.f32.mrf.mxu0  ;;  %1348 = vst [vmem:[%s1328_s9 + $0x28] sm:$0xff] (%p1834_p6), %v1347_v42 }
 0x156   : > { %v1192_v12 = vpop.f32.mrf.mxu1  ;;  %v1349_v43 = vld [vmem:[%s2110_s7 + $0x20] sm:$0xff] (%p1834_p6) }
 0x157   : > { %1308 = vst [vmem:[%s2110_s7 + $0x40] sm:$0xff] %v1292_v8  ;;  %v1293_v13 = vmax.f32 %v1277_v9, 0.0  ;;  %v1278_v14 = vadd.f32 %v2102_v21, %v1191_v10  ;;  %v1193_v15 = vadd.f32 %v1192_v12, %v1119_v11  ;;  %v1123_v16 = vpop.f32.mrf.mxu0  ;;  %1350 = vst [vmem:[%s1328_s9 + $0x40] sm:$0xff] (%p1834_p6), %v1349_v43 }
 0x158   : > { %v1196_v17 = vpop.f32.mrf.mxu1  ;;  %v1351_v44 = vld [vmem:[%s2110_s7 + $0x28] sm:$0xff] (%p1834_p6) }
 0x159   : > { %1309 = vst [vmem:[%s2110_s7 + $0x48] sm:$0xff] %v1293_v13  ;;  %v1294_v18 = vmax.f32 %v1278_v14, 0.0  ;;  %v1279_v19 = vadd.f32 %v2106_v25, %v1193_v15  ;;  %v1197_v20 = vadd.f32 %v1196_v17, %v1123_v16  ;;  %v1125_v22 = vpop.f32.mrf.mxu0  ;;  %1352 = vst [vmem:[%s1328_s9 + $0x48] sm:$0xff] (%p1834_p6), %v1351_v44 }
 0x15a   : > { %v1198_v23 = vpop.f32.mrf.mxu1  ;;  %v1353_v45 = vld [vmem:[%s2110_s7 + $0x30] sm:$0xff] (%p1834_p6) }
 0x15b   : > { %1310 = vst [vmem:[%s2110_s7 + $0x50] sm:$0xff] %v1294_v18  ;;  %v1295_v24 = vmax.f32 %v1279_v19, 0.0  ;;  %v1280_v26 = vadd.f32 %v2102_v21, %v1197_v20  ;;  %v1199_v27 = vadd.f32 %v1198_v23, %v1125_v22  ;;  %v1127_v28 = vpop.f32.mrf.mxu0  ;;  %1354 = vst [vmem:[%s1328_s9 + $0x60] sm:$0xff] (%p1834_p6), %v1353_v45 }
 0x15c   : > { %v1200_v29 = vpop.f32.mrf.mxu1  ;;  %v1355_v46 = vld [vmem:[%s2110_s7 + $0x38] sm:$0xff] (%p1834_p6) }
 0x15d   : > { %1311 = vst [vmem:[%s2110_s7 + $0x58] sm:$0xff] %v1295_v24  ;;  %v1296_v30 = vmax.f32 %v1280_v26, 0.0  ;;  %v1281_v31 = vadd.f32 %v2106_v25, %v1199_v27  ;;  %v1201_v32 = vadd.f32 %v1200_v29, %v1127_v28  ;;  %v1129_v33 = vpop.f32.mrf.mxu0  ;;  %1356 = vst [vmem:[%s1328_s9 + $0x68] sm:$0xff] (%p1834_p6), %v1355_v46 }
 0x15e   : > { %v1202_v34 = vpop.f32.mrf.mxu1  ;;  %v1357_v47 = vld [vmem:[%s2110_s7 + $0x40] sm:$0xff] (%p1834_p6) }
 0x15f   : > { %1312 = vst [vmem:[%s2110_s7 + $0x60] sm:$0xff] %v1296_v30  ;;  %v1297_v35 = vmax.f32 %v1281_v31, 0.0  ;;  %v1282_v36 = vadd.f32 %v2102_v21, %v1201_v32  ;;  %v1203_v37 = vadd.f32 %v1202_v34, %v1129_v33  ;;  %v1341_v21 = vld [vmem:[%s2110_s7] sm:$0xff] (%p1834_p6)  ;;  %1358 = vst [vmem:[%s1328_s9 + $0x80] sm:$0xff] (%p1834_p6), %v1357_v47 }
 0x160   : > { %1342 = vst [vmem:[%s1328_s9] sm:$0xff] (%p1834_p6), %v1341_v21  ;;  %v1359_v48 = vld [vmem:[%s2110_s7 + $0x48] sm:$0xff] (%p1834_p6) }
 0x161   : > { %1313 = vst [vmem:[%s2110_s7 + $0x68] sm:$0xff] %v1297_v35  ;;  %v1298_v38 = vmax.f32 %v1282_v36, 0.0  ;;  %v1283_v39 = vadd.f32 %v2106_v25, %v1203_v37  ;;  %1322 = sbr.rel (!%p1834_p6) target bundleno = 366 (0x16e), region = 82  ;;  %v1345_v25 = vld [vmem:[%s2110_s7 + $0x10] sm:$0xff] (%p1834_p6)  ;;  %1360 = vst [vmem:[%s1328_s9 + $0x88] sm:$0xff] (%p1834_p6), %v1359_v48 }
 0x162   : > { %1346 = vst [vmem:[%s1328_s9 + $0x20] sm:$0xff] (%p1834_p6), %v1345_v25  ;;  %v1361_v49 = vld [vmem:[%s2110_s7 + $0x50] sm:$0xff] (%p1834_p6) }
 0x163   : > { %1314 = vst [vmem:[%s2110_s7 + $0x70] sm:$0xff] %v1298_v38  ;;  %v1299_v40 = vmax.f32 %v1283_v39, 0.0  ;;  %1362 = vst [vmem:[%s1328_s9 + $0xa0] sm:$0xff] (%p1834_p6), %v1361_v49 }
 0x164   : > { %v1363_v50 = vld [vmem:[%s2110_s7 + $0x58] sm:$0xff] (%p1834_p6) }
 0x165   : > { %1315 = vst [vmem:[%s2110_s7 + $0x78] sm:$0xff] %v1299_v40  ;;  %1364 = vst [vmem:[%s1328_s9 + $0xa8] sm:$0xff] (%p1834_p6), %v1363_v50 }
 0x166   : > { %v1365_v51 = vld [vmem:[%s2110_s7 + $0x60] sm:$0xff] }
 0x167   : > { %1366 = vst [vmem:[%s1328_s9 + $0xc0] sm:$0xff] %v1365_v51 }
 0x168   : > { %v1367_v52 = vld [vmem:[%s2110_s7 + $0x68] sm:$0xff] }
 0x169   : > { %1368 = vst [vmem:[%s1328_s9 + $0xc8] sm:$0xff] %v1367_v52 }
 0x16a   : > { %v1369_v53 = vld [vmem:[%s2110_s7 + $0x70] sm:$0xff] }
 0x16b   : > { %1370 = vst [vmem:[%s1328_s9 + $0xe0] sm:$0xff] %v1369_v53 }
 0x16c   : > { %v1371_v54 = vld [vmem:[%s2110_s7 + $0x78] sm:$0xff] }
 0x16d   : > { %1372 = vst [vmem:[%s1328_s9 + $0xe8] sm:$0xff] %v1371_v54 }
 0x16e PF: > { %s13_s16 = sadd.s32 1, %s1777_s16   ;;  %s2184_s12 = smov %s1765_s13 }
 0x16f   : > { %p10_p12 = scmp.ge.s32.totalorder %s13_s16, 4   ;;  %s2185_s13 = smov %s1839_s22 }
 0x170   : > { %s2186_s14 = smov %s1773_s15  ;;  %s2187_s15 = smov %s2189_s17 }
 0x171   :  { %12 = sbr.rel (!%p10_p12) target bundleno = 3 (0x3), region = 142 }

// kernel: gen_forward.15
= control target key start
LH: loop header
LB: loop body
LE: loop exit
PB: predicated region body
PF: predicated region fallthrough
CT: control target
= control target key end

     0   :  { %s1826_s15 = smov 0   ;;  %s1828_s16 = smov 0   ;;  %s2396_s0 = inlined_call_operand.vmem [shape: bf16[64,512], index: 0, kind: input, shape index: {}]   ;;  %s2397_s1 = inlined_call_operand.vmem [shape: bf16[512,3712], index: 1, kind: input, shape index: {}]   ;;  %s2398_s2 = inlined_call_operand.vmem [shape: f32[1,3712], index: 2, kind: input, shape index: {}]   ;;  %s2399_s3 = inlined_call_operand.vmem [shape: f32[64,3712], index: 3, kind: input, shape index: {}]   ;;  %s2400_s4 = inlined_call_operand.vmem [shape: s32[64,1], index: 4, kind: output, shape index: {}]  }
   0x1   :  { %s1830_s17 = smov 0   ;;  %s1832_s18 = smov 0  }
   0x2   :  { %s1834_s19 = smov 0  }
   0x3 LB: > { %s23_s20 = sadd.s32 1, %s1793_s18  ;;  %p66_p1 = scmp.ne.s32.totalorder %s1785_s16, %s1781_s15  ;;  %s1797_s19 = sphi %s1834_s19, %s14_s19   ;;  %s1793_s18 = sphi %s1832_s18, %s2405_s18   ;;  %s1789_s17 = sphi %s1830_s17, %s2404_s17   ;;  %s1785_s16 = sphi %s1828_s16, %s2403_s16   ;;  %s1781_s15 = sphi %s1826_s15, %s2402_s15  }
   0x4   : > { %p24_p0 = scmp.ge.s32.totalorder %s23_s20, 29  ;;  %p67_p2 = scmp.eq.s32.totalorder %s1797_s19, 0 }
   0x5   : > { %s59_s23 = sadd.s32 1, %s1785_s16  ;;  %p1517_p5 = scmp.ge.s32.totalorder %s1797_s19, 29 }
   0x6   : > { %s2407_s20 = smov (%p24_p0, %s23_s20), 0  ;;  %p1857_p3 = por %p67_p2, %p66_p1 }
   0x7   : > { %s56_s22 = ssub.s32 %s1793_s18, %s2407_s20  ;;  %182 = sbr.rel (%p1517_p5) target bundleno = 66 (0x42), region = 20 }
   0x8   : > { %p57_p4 = scmp.eq.s32.totalorder %s56_s22, 0 }
   0xa   : > { %s1865_s24 = scalar_select %p57_p4, %s1785_s16, %s59_s23  }
   0xc   : > { %185 = sbr.rel (!%p1857_p3) target bundleno = 58 (0x3a), region = 24  ;;  %s187_s25 = sand.u32 (%p1857_p3), 1, %s1785_s16  }
   0xd   : > { %s1519_s26 = sshll.u32 (%p1857_p3), %s1793_s18, 2  ;;  %s1518_s27 = sshll.u32 (%p1857_p3), %s187_s25, 8 }
   0xe   : > { %s1875_s30 = scalar_lea.vmem (%p1857_p3), %s2397_s1, %s1519_s26  ;;  %s1879_s5 = scalar_lea.vmem (%p1857_p3), [#allocation4], %s1518_s27 }
   0xf   : > { %v208_v0 = vld [vmem:[%s1875_s30] sm:$0xf] (%p1857_p3)  ;;  %v210_v1 = vld [vmem:[%s1875_s30 + $0x74] sm:$0xf] (%p1857_p3)  ;;  %v212_v2 = vld [vmem:[%s1875_s30 + $0xe8] sm:$0xf] (%p1857_p3) }
  0x10   : > { %209 = vst [vmem:[%s1879_s5] sm:$0xf] (%p1857_p3), %v208_v0  ;;  %211 = vst [vmem:[%s1879_s5 + $0x4] sm:$0xf] (%p1857_p3), %v210_v1  ;;  %v214_v3 = vld [vmem:[%s1875_s30 + $0x15c] sm:$0xf] (%p1857_p3) }
  0x11   : > { %v216_v4 = vld [vmem:[%s1875_s30 + $0x1d0] sm:$0xf]  ;;  %213 = vst [vmem:[%s1879_s5 + $0x8] sm:$0xf] %v212_v2  ;;  %215 = vst [vmem:[%s1879_s5 + $0xc] sm:$0xf] %v214_v3 }
  0x12   : > { %217 = vst [vmem:[%s1879_s5 + $0x10] sm:$0xf] %v216_v4  ;;  %v218_v5 = vld [vmem:[%s1875_s30 + $0x244] sm:$0xf]  ;;  %v220_v6 = vld [vmem:[%s1875_s30 + $0x2b8] sm:$0xf] }
  0x13   : > { %v222_v7 = vld [vmem:[%s1875_s30 + $0x32c] sm:$0xf]  ;;  %219 = vst [vmem:[%s1879_s5 + $0x14] sm:$0xf] %v218_v5  ;;  %221 = vst [vmem:[%s1879_s5 + $0x18] sm:$0xf] %v220_v6 }
  0x14   : > { %223 = vst [vmem:[%s1879_s5 + $0x1c] sm:$0xf] %v222_v7  ;;  %v224_v8 = vld [vmem:[%s1875_s30 + $0x3a0] sm:$0xf]  ;;  %v226_v9 = vld [vmem:[%s1875_s30 + $0x414] sm:$0xf] }
  0x15   : > { %v228_v10 = vld [vmem:[%s1875_s30 + $0x488] sm:$0xf]  ;;  %225 = vst [vmem:[%s1879_s5 + $0x20] sm:$0xf] %v224_v8  ;;  %227 = vst [vmem:[%s1879_s5 + $0x24] sm:$0xf] %v226_v9 }
  0x16   : > { %229 = vst [vmem:[%s1879_s5 + $0x28] sm:$0xf] %v228_v10  ;;  %v230_v11 = vld [vmem:[%s1875_s30 + $0x4fc] sm:$0xf]  ;;  %v232_v12 = vld [vmem:[%s1875_s30 + $0x570] sm:$0xf] }
  0x17   : > { %v234_v13 = vld [vmem:[%s1875_s30 + $0x5e4] sm:$0xf]  ;;  %231 = vst [vmem:[%s1879_s5 + $0x2c] sm:$0xf] %v230_v11  ;;  %233 = vst [vmem:[%s1879_s5 + $0x30] sm:$0xf] %v232_v12 }
  0x18   : > { %235 = vst [vmem:[%s1879_s5 + $0x34] sm:$0xf] %v234_v13  ;;  %v236_v14 = vld [vmem:[%s1875_s30 + $0x658] sm:$0xf]  ;;  %v238_v15 = vld [vmem:[%s1875_s30 + $0x6cc] sm:$0xf] }
  0x19   : > { %v240_v16 = vld [vmem:[%s1875_s30 + $0x740] sm:$0xf]  ;;  %237 = vst [vmem:[%s1879_s5 + $0x38] sm:$0xf] %v236_v14  ;;  %239 = vst [vmem:[%s1879_s5 + $0x3c] sm:$0xf] %v238_v15 }
  0x1a   : > { %241 = vst [vmem:[%s1879_s5 + $0x40] sm:$0xf] %v240_v16  ;;  %v242_v17 = vld [vmem:[%s1875_s30 + $0x7b4] sm:$0xf]  ;;  %v244_v18 = vld [vmem:[%s1875_s30 + $0x828] sm:$0xf] }
  0x1b   : > { %v246_v19 = vld [vmem:[%s1875_s30 + $0x89c] sm:$0xf]  ;;  %243 = vst [vmem:[%s1879_s5 + $0x44] sm:$0xf] %v242_v17  ;;  %245 = vst [vmem:[%s1879_s5 + $0x48] sm:$0xf] %v244_v18 }
  0x1c   : > { %247 = vst [vmem:[%s1879_s5 + $0x4c] sm:$0xf] %v246_v19  ;;  %v248_v20 = vld [vmem:[%s1875_s30 + $0x910] sm:$0xf]  ;;  %v250_v21 = vld [vmem:[%s1875_s30 + $0x984] sm:$0xf] }
  0x1d   : > { %v252_v22 = vld [vmem:[%s1875_s30 + $0x9f8] sm:$0xf]  ;;  %249 = vst [vmem:[%s1879_s5 + $0x50] sm:$0xf] %v248_v20  ;;  %251 = vst [vmem:[%s1879_s5 + $0x54] sm:$0xf] %v250_v21 }
  0x1e   : > { %253 = vst [vmem:[%s1879_s5 + $0x58] sm:$0xf] %v252_v22  ;;  %v254_v23 = vld [vmem:[%s1875_s30 + $0xa6c] sm:$0xf]  ;;  %v256_v24 = vld [vmem:[%s1875_s30 + $0xae0] sm:$0xf] }
  0x1f   : > { %v258_v25 = vld [vmem:[%s1875_s30 + $0xb54] sm:$0xf]  ;;  %255 = vst [vmem:[%s1879_s5 + $0x5c] sm:$0xf] %v254_v23  ;;  %257 = vst [vmem:[%s1879_s5 + $0x60] sm:$0xf] %v256_v24 }
  0x20   : > { %259 = vst [vmem:[%s1879_s5 + $0x64] sm:$0xf] %v258_v25  ;;  %v260_v26 = vld [vmem:[%s1875_s30 + $0xbc8] sm:$0xf]  ;;  %v262_v27 = vld [vmem:[%s1875_s30 + $0xc3c] sm:$0xf] }
  0x21   : > { %v264_v28 = vld [vmem:[%s1875_s30 + $0xcb0] sm:$0xf]  ;;  %261 = vst [vmem:[%s1879_s5 + $0x68] sm:$0xf] %v260_v26  ;;  %263 = vst [vmem:[%s1879_s5 + $0x6c] sm:$0xf] %v262_v27 }
  0x22   : > { %265 = vst [vmem:[%s1879_s5 + $0x70] sm:$0xf] %v264_v28  ;;  %v266_v29 = vld [vmem:[%s1875_s30 + $0xd24] sm:$0xf]  ;;  %v268_v30 = vld [vmem:[%s1875_s30 + $0xd98] sm:$0xf] }
  0x23   : > { %v270_v31 = vld [vmem:[%s1875_s30 + $0xe0c] sm:$0xf]  ;;  %267 = vst [vmem:[%s1879_s5 + $0x74] sm:$0xf] %v266_v29  ;;  %269 = vst [vmem:[%s1879_s5 + $0x78] sm:$0xf] %v268_v30 }
  0x24   : > { %271 = vst [vmem:[%s1879_s5 + $0x7c] sm:$0xf] %v270_v31  ;;  %v272_v32 = vld [vmem:[%s1875_s30 + $0xe80] sm:$0xf]  ;;  %v274_v33 = vld [vmem:[%s1875_s30 + $0xef4] sm:$0xf] }
  0x25   : > { %v276_v34 = vld [vmem:[%s1875_s30 + $0xf68] sm:$0xf]  ;;  %273 = vst [vmem:[%s1879_s5 + $0x80] sm:$0xf] %v272_v32  ;;  %275 = vst [vmem:[%s1879_s5 + $0x84] sm:$0xf] %v274_v33 }
  0x26   : > { %277 = vst [vmem:[%s1879_s5 + $0x88] sm:$0xf] %v276_v34  ;;  %v278_v35 = vld [vmem:[%s1875_s30 + $0xfdc] sm:$0xf]  ;;  %v280_v36 = vld [vmem:[%s1875_s30 + $0x1050] sm:$0xf] }
  0x27   : > { %v282_v37 = vld [vmem:[%s1875_s30 + $0x10c4] sm:$0xf]  ;;  %279 = vst [vmem:[%s1879_s5 + $0x8c] sm:$0xf] %v278_v35  ;;  %281 = vst [vmem:[%s1879_s5 + $0x90] sm:$0xf] %v280_v36 }
  0x28   : > { %283 = vst [vmem:[%s1879_s5 + $0x94] sm:$0xf] %v282_v37  ;;  %v284_v38 = vld [vmem:[%s1875_s30 + $0x1138] sm:$0xf]  ;;  %v286_v39 = vld [vmem:[%s1875_s30 + $0x11ac] sm:$0xf] }
  0x29   : > { %v288_v40 = vld [vmem:[%s1875_s30 + $0x1220] sm:$0xf]  ;;  %285 = vst [vmem:[%s1879_s5 + $0x98] sm:$0xf] %v284_v38  ;;  %287 = vst [vmem:[%s1879_s5 + $0x9c] sm:$0xf] %v286_v39 }
  0x2a   : > { %289 = vst [vmem:[%s1879_s5 + $0xa0] sm:$0xf] %v288_v40  ;;  %v290_v41 = vld [vmem:[%s1875_s30 + $0x1294] sm:$0xf]  ;;  %v292_v42 = vld [vmem:[%s1875_s30 + $0x1308] sm:$0xf] }
  0x2b   : > { %v294_v43 = vld [vmem:[%s1875_s30 + $0x137c] sm:$0xf]  ;;  %291 = vst [vmem:[%s1879_s5 + $0xa4] sm:$0xf] %v290_v41  ;;  %293 = vst [vmem:[%s1879_s5 + $0xa8] sm:$0xf] %v292_v42 }
  0x2c   : > { %295 = vst [vmem:[%s1879_s5 + $0xac] sm:$0xf] %v294_v43  ;;  %v296_v44 = vld [vmem:[%s1875_s30 + $0x13f0] sm:$0xf]  ;;  %v298_v45 = vld [vmem:[%s1875_s30 + $0x1464] sm:$0xf] }
  0x2d   : > { %v300_v46 = vld [vmem:[%s1875_s30 + $0x14d8] sm:$0xf]  ;;  %297 = vst [vmem:[%s1879_s5 + $0xb0] sm:$0xf] %v296_v44  ;;  %299 = vst [vmem:[%s1879_s5 + $0xb4] sm:$0xf] %v298_v45 }
  0x2e   : > { %301 = vst [vmem:[%s1879_s5 + $0xb8] sm:$0xf] %v300_v46  ;;  %v302_v47 = vld [vmem:[%s1875_s30 + $0x154c] sm:$0xf]  ;;  %v304_v48 = vld [vmem:[%s1875_s30 + $0x15c0] sm:$0xf] }
  0x2f   : > { %v306_v49 = vld [vmem:[%s1875_s30 + $0x1634] sm:$0xf]  ;;  %303 = vst [vmem:[%s1879_s5 + $0xbc] sm:$0xf] %v302_v47  ;;  %305 = vst [vmem:[%s1879_s5 + $0xc0] sm:$0xf] %v304_v48 }
  0x30   : > { %307 = vst [vmem:[%s1879_s5 + $0xc4] sm:$0xf] %v306_v49  ;;  %v308_v50 = vld [vmem:[%s1875_s30 + $0x16a8] sm:$0xf]  ;;  %v310_v51 = vld [vmem:[%s1875_s30 + $0x171c] sm:$0xf] }
  0x31   : > { %v312_v52 = vld [vmem:[%s1875_s30 + $0x1790] sm:$0xf]  ;;  %309 = vst [vmem:[%s1879_s5 + $0xc8] sm:$0xf] %v308_v50  ;;  %311 = vst [vmem:[%s1879_s5 + $0xcc] sm:$0xf] %v310_v51 }
  0x32   : > { %313 = vst [vmem:[%s1879_s5 + $0xd0] sm:$0xf] %v312_v52  ;;  %v314_v53 = vld [vmem:[%s1875_s30 + $0x1804] sm:$0xf]  ;;  %v316_v54 = vld [vmem:[%s1875_s30 + $0x1878] sm:$0xf] }
  0x33   : > { %v318_v55 = vld [vmem:[%s1875_s30 + $0x18ec] sm:$0xf]  ;;  %315 = vst [vmem:[%s1879_s5 + $0xd4] sm:$0xf] %v314_v53  ;;  %317 = vst [vmem:[%s1879_s5 + $0xd8] sm:$0xf] %v316_v54 }
  0x34   : > { %319 = vst [vmem:[%s1879_s5 + $0xdc] sm:$0xf] %v318_v55  ;;  %v320_v56 = vld [vmem:[%s1875_s30 + $0x1960] sm:$0xf]  ;;  %v322_v57 = vld [vmem:[%s1875_s30 + $0x19d4] sm:$0xf] }
  0x35   : > { %v324_v58 = vld [vmem:[%s1875_s30 + $0x1a48] sm:$0xf]  ;;  %321 = vst [vmem:[%s1879_s5 + $0xe0] sm:$0xf] %v320_v56  ;;  %323 = vst [vmem:[%s1879_s5 + $0xe4] sm:$0xf] %v322_v57 }
  0x36   : > { %325 = vst [vmem:[%s1879_s5 + $0xe8] sm:$0xf] %v324_v58  ;;  %v326_v59 = vld [vmem:[%s1875_s30 + $0x1abc] sm:$0xf]  ;;  %v328_v60 = vld [vmem:[%s1875_s30 + $0x1b30] sm:$0xf] }
  0x37   : > { %v330_v61 = vld [vmem:[%s1875_s30 + $0x1ba4] sm:$0xf]  ;;  %327 = vst [vmem:[%s1879_s5 + $0xec] sm:$0xf] %v326_v59  ;;  %329 = vst [vmem:[%s1879_s5 + $0xf0] sm:$0xf] %v328_v60 }
  0x38   : > { %331 = vst [vmem:[%s1879_s5 + $0xf4] sm:$0xf] %v330_v61  ;;  %v332_v62 = vld [vmem:[%s1875_s30 + $0x1c18] sm:$0xf]  ;;  %v334_v63 = vld [vmem:[%s1875_s30 + $0x1c8c] sm:$0xf] }
  0x39   : > { %333 = vst [vmem:[%s1879_s5 + $0xf8] sm:$0xf] %v332_v62  ;;  %335 = vst [vmem:[%s1879_s5 + $0xfc] sm:$0xf] %v334_v63 }
  0x3a PF: > { %493 = sbr.rel (!%p1857_p3) target bundleno = 66 (0x42), region = 69  ;;  %s495_s6 = sand.u32 (%p1857_p3), 1, %s1785_s16  }
  0x3b   : > { %s1521_s7 = sshll.u32 (%p1857_p3), %s1793_s18, 3  ;;  %s1520_s8 = sshll.u32 (%p1857_p3), %s495_s6, 6 }
  0x3c   : > { %s502_s11 = scalar_lea.vmem (%p1857_p3), %s2399_s3, %s1521_s7  ;;  %s497_s12 = scalar_lea.vmem (%p1857_p3), [#allocation5], %s1520_s8 }
  0x3d   : > { %v545_v0 = vld [vmem:[%s502_s11] sm:$0xff] (%p1857_p3)  ;;  %v547_v1 = vld [vmem:[%s502_s11 + $0xe8] sm:$0xff] (%p1857_p3)  ;;  %v549_v2 = vld [vmem:[%s502_s11 + $0x1d0] sm:$0xff] (%p1857_p3) }
  0x3e   : > { %546 = vst [vmem:[%s497_s12] sm:$0xff] (%p1857_p3), %v545_v0  ;;  %548 = vst [vmem:[%s497_s12 + $0x8] sm:$0xff] (%p1857_p3), %v547_v1  ;;  %v551_v3 = vld [vmem:[%s502_s11 + $0x2b8] sm:$0xff] (%p1857_p3)  ;;  %v553_v4 = vld [vmem:[%s502_s11 + $0x3a0] sm:$0xff] (%p1857_p3) }
  0x3f   : > { %550 = vst [vmem:[%s497_s12 + $0x10] sm:$0xff] %v549_v2  ;;  %v555_v5 = vld [vmem:[%s502_s11 + $0x488] sm:$0xff]  ;;  %552 = vst [vmem:[%s497_s12 + $0x18] sm:$0xff] %v551_v3  ;;  %v557_v6 = vld [vmem:[%s502_s11 + $0x570] sm:$0xff] }
  0x40   : > { %554 = vst [vmem:[%s497_s12 + $0x20] sm:$0xff] %v553_v4  ;;  %556 = vst [vmem:[%s497_s12 + $0x28] sm:$0xff] %v555_v5  ;;  %v559_v7 = vld [vmem:[%s502_s11 + $0x658] sm:$0xff] }
  0x41   : > { %558 = vst [vmem:[%s497_s12 + $0x30] sm:$0xff] %v557_v6  ;;  %560 = vst [vmem:[%s497_s12 + $0x38] sm:$0xff] %v559_v7 }
  0x42 PF: > { %p1522_p6 = scmp.ge.s32.totalorder %s1797_s19, 1  ;;  %p565_p7 = scmp.lt.s32.totalorder %s1797_s19, 30 }
  0x44   : > { %p566_p8 = pnand %p1522_p6, %p565_p7 }
  0x45   : > { %s572_s13 = sand.u32 (!%p566_p8), 1, %s1781_s15   ;;  %p624_p9 = scmp.lt.s32.totalorder (!%p566_p8), %s1789_s17, 28 }
  0x46   : > { %569 = sbr.rel (%p566_p8) target bundleno = 793 (0x319), region = 107  ;;  %s1523_s14 = sshll.u32 (!%p566_p8), %s572_s13, 8 }
  0x47   : > { %s1524_s21 = sshll.u32 (!%p566_p8), %s572_s13, 6  ;;  %s2025_s27 = scalar_lea.vmem (!%p566_p8), [#allocation4], %s1523_s14 }
  0x48   : > { %s2027_s28 = scalar_lea.vmem (!%p566_p8), [#allocation5], %s1524_s21  ;;  %p1525_p10 = scmp.ne.s32.totalorder (!%p566_p8), %s1789_s17, 0 }
  0x4b   : > { %s2019_s22 = scalar_select %p624_p9, %s1789_s17, 28 }
  0x4c   : > { %638 = sbr.rel (%p1525_p10) target bundleno = 90 (0x5a), region = 119 }
  0x4d   : > { %s626_s26 = scalar_lea.vmem %s2398_s2, %s2019_s22 }
  0x51   : > { %vm639_vm0 = vcmask 7168   ;;  %v1799_v8 = vmov -inf   ;;  %v1800_v9 = vmov 0  }
  0x52   : > { %640 = vst.msk [vmem:[#allocation2] sm:$0xff] %vm639_vm0, %v1799_v8  ;;  %641 = vst.msk [vmem:[#allocation2 + $0x8] sm:$0xff] %vm639_vm0, %v1799_v8 }
  0x53   : > { %642 = vst.msk [vmem:[#allocation2 + $0x10] sm:$0xff] %vm639_vm0, %v1799_v8  ;;  %643 = vst.msk [vmem:[#allocation2 + $0x18] sm:$0xff] %vm639_vm0, %v1799_v8 }
  0x54   : > { %644 = vst.msk [vmem:[#allocation2 + $0x20] sm:$0xff] %vm639_vm0, %v1799_v8  ;;  %645 = vst.msk [vmem:[#allocation2 + $0x28] sm:$0xff] %vm639_vm0, %v1799_v8 }
  0x55   : > { %646 = vst.msk [vmem:[#allocation2 + $0x30] sm:$0xff] %vm639_vm0, %v1799_v8  ;;  %647 = vst.msk [vmem:[#allocation2 + $0x38] sm:$0xff] %vm639_vm0, %v1799_v8 }
  0x56   : > { %648 = vst.msk [vmem:[#allocation3] sm:$0xff] %vm639_vm0, %v1800_v9  ;;  %649 = vst.msk [vmem:[#allocation3 + $0x8] sm:$0xff] %vm639_vm0, %v1800_v9 }
  0x57   : > { %650 = vst.msk [vmem:[#allocation3 + $0x10] sm:$0xff] %vm639_vm0, %v1800_v9  ;;  %651 = vst.msk [vmem:[#allocation3 + $0x18] sm:$0xff] %vm639_vm0, %v1800_v9 }
  0x58   : > { %652 = vst.msk [vmem:[#allocation3 + $0x20] sm:$0xff] %vm639_vm0, %v1800_v9  ;;  %653 = vst.msk [vmem:[#allocation3 + $0x28] sm:$0xff] %vm639_vm0, %v1800_v9 }
  0x59   : > { %654 = vst.msk [vmem:[#allocation3 + $0x30] sm:$0xff] %vm639_vm0, %v1800_v9  ;;  %655 = vst.msk [vmem:[#allocation3 + $0x38] sm:$0xff] %vm639_vm0, %v1800_v9 }
  0x5a PF: > { %v1703_v10 = vld [vmem:[%s2025_s27 + $0x78] sm:$0xff]   ;;  %v1707_v14 = vld [vmem:[%s2025_s27 + $0x70] sm:$0xff]   ;;  %v1711_v18 = vld [vmem:[%s2025_s27 + $0x68] sm:$0xff]   ;;  %vm1349_vm1 = vcmask 7168   ;;  %s1575_s22 = sshll.u32 %s1789_s17, 7  ;;  %p1576_p11 = scmp.ne.s32.totalorder %s1789_s17, 28 }
  0x5b   : > { %v1704_v11 = vld [vmem:[%s2025_s27 + $0xf8] sm:$0xff]   ;;  %1581 = vmatprep.subr.bf16.mxu0 %v1703_v10  ;;  %v1708_v15 = vld [vmem:[%s2025_s27 + $0xf0] sm:$0xff]   ;;  %v1712_v19 = vld [vmem:[%s2025_s27 + $0xe8] sm:$0xff]  }
  0x5c   : > { %v1705_v12 = vld [vmem:[%s2025_s27 + $0x38] sm:$0xff]   ;;  %1621 = vmatprep.subr.bf16.mxu1 %v1704_v11  ;;  %v1709_v16 = vld [vmem:[%s2025_s27 + $0x30] sm:$0xff]   ;;  %v1713_v20 = vld [vmem:[%s2025_s27 + $0x28] sm:$0xff]  }
  0x5d   : > { %v1706_v13 = vld [vmem:[%s2025_s27 + $0xb8] sm:$0xff]   ;;  %1582 = vmatpush3.bf16.msra.mxu0 %v1705_v12  ;;  %v1710_v17 = vld [vmem:[%s2025_s27 + $0xb0] sm:$0xff]   ;;  %v1714_v21 = vld [vmem:[%s2025_s27 + $0xa8] sm:$0xff]  }
  0x5e   : > { %1622 = vmatpush3.bf16.msra.mxu1 %v1706_v13  ;;  %1583 = vmatprep.subr.bf16.mxu0 %v1707_v14  ;;  %v1715_v22 = vld [vmem:[%s2025_s27 + $0x60] sm:$0xff]   ;;  %v1719_v26 = vld [vmem:[%s2025_s27 + $0x58] sm:$0xff]   ;;  %v1723_v30 = vld [vmem:[%s2025_s27 + $0x50] sm:$0xff]  }
  0x5f   : > { %1623 = vmatprep.subr.bf16.mxu1 %v1708_v15  ;;  %v1716_v23 = vld [vmem:[%s2025_s27 + $0xe0] sm:$0xff]   ;;  %v1720_v27 = vld [vmem:[%s2025_s27 + $0xd8] sm:$0xff]   ;;  %v1724_v31 = vld [vmem:[%s2025_s27 + $0xd0] sm:$0xff]  }
  0x60   : > { %v1717_v24 = vld [vmem:[%s2025_s27 + $0x20] sm:$0xff]   ;;  %v1721_v28 = vld [vmem:[%s2025_s27 + $0x18] sm:$0xff]   ;;  %v1725_v32 = vld [vmem:[%s2025_s27 + $0x10] sm:$0xff]  }
  0x61   : > { %1584 = vmatpush3.bf16.msra.mxu0 %v1709_v16  ;;  %v1718_v25 = vld [vmem:[%s2025_s27 + $0xa0] sm:$0xff]   ;;  %v1722_v29 = vld [vmem:[%s2025_s27 + $0x98] sm:$0xff]   ;;  %v1726_v33 = vld [vmem:[%s2025_s27 + $0x90] sm:$0xff]  }
  0x62   : > { %1624 = vmatpush3.bf16.msra.mxu1 %v1710_v17  ;;  %1585 = vmatprep.subr.bf16.mxu0 %v1711_v18  ;;  %v1727_v34 = vld [vmem:[%s2025_s27 + $0x48] sm:$0xff]   ;;  %v1731_v38 = vld [vmem:[%s2025_s27 + $0x40] sm:$0xff]  }
  0x63   : > { %1625 = vmatprep.subr.bf16.mxu1 %v1712_v19  ;;  %v1728_v35 = vld [vmem:[%s2025_s27 + $0xc8] sm:$0xff]   ;;  %v1732_v39 = vld [vmem:[%s2025_s27 + $0xc0] sm:$0xff]  }
  0x64   : > { %v1729_v36 = vld [vmem:[%s2025_s27 + $0x8] sm:$0xff]   ;;  %v1733_v40 = vld [vmem:[%s2025_s27] sm:$0xff]  }
  0x65   : > { %1586 = vmatpush3.bf16.msra.mxu0 %v1713_v20  ;;  %v1730_v37 = vld [vmem:[%s2025_s27 + $0x88] sm:$0xff]   ;;  %v1734_v41 = vld [vmem:[%s2025_s27 + $0x80] sm:$0xff]  }
  0x66   : > { %1626 = vmatpush3.bf16.msra.mxu1 %v1714_v21  ;;  %1587 = vmatprep.subr.bf16.mxu0 %v1715_v22  ;;  %v1735_v42 = vld [vmem:[%s2396_s0] ss:$16 sps:$4 sm:$0xff]   ;;  %v1737_v43 = vld [vmem:[%s2396_s0 + $0x4] ss:$16 sps:$4 sm:$0xff]   ;;  %v1738_v44 = vld [vmem:[%s2396_s0 + $0x8] ss:$16 sps:$4 sm:$0xff]  }
  0x67   : > { %1627 = vmatprep.subr.bf16.mxu1 %v1716_v23  ;;  %v1740_v45 = vld [vmem:[%s2396_s0 + $0xc] ss:$16 sps:$4 sm:$0xff]   ;;  %1047 = vmatprep.mubr.bf16.mxu0 %v1737_v43  ;;  %v1741_v46 = vld [vmem:[%s2396_s0 + $0x24] ss:$16 sps:$4 sm:$0xff]   ;;  %v1745_v48 = vld [vmem:[%s2396_s0 + $0x20] ss:$16 sps:$4 sm:$0xff]  }
  0x68   : > { %1112 = vmatprep.mubr.bf16.mxu1 %v1740_v45  ;;  %v1743_v47 = vld [vmem:[%s2396_s0 + $0x2c] ss:$16 sps:$4 sm:$0xff]   ;;  %v1746_v49 = vld [vmem:[%s2396_s0 + $0x28] ss:$16 sps:$4 sm:$0xff]   ;;  %v1747_v50 = vld [vmem:[%s2396_s0 + $0x44] ss:$16 sps:$4 sm:$0xff]  }
  0x69   : > { %1588 = vmatpush3.bf16.msra.mxu0 %v1717_v24  ;;  %v1749_v51 = vld [vmem:[%s2396_s0 + $0x4c] ss:$16 sps:$4 sm:$0xff]   ;;  %v1751_v52 = vld [vmem:[%s2396_s0 + $0x40] ss:$16 sps:$4 sm:$0xff]   ;;  %v1752_v53 = vld [vmem:[%s2396_s0 + $0x48] ss:$16 sps:$4 sm:$0xff]  }
  0x6a   : > { %1628 = vmatpush3.bf16.msra.mxu1 %v1718_v25  ;;  %1589 = vmatprep.subr.bf16.mxu0 %v1719_v26  ;;  %v1753_v54 = vld [vmem:[%s2396_s0 + $0x64] ss:$16 sps:$4 sm:$0xff]   ;;  %v1755_v55 = vld [vmem:[%s2396_s0 + $0x6c] ss:$16 sps:$4 sm:$0xff]   ;;  %v1757_v56 = vld [vmem:[%s2396_s0 + $0x60] ss:$16 sps:$4 sm:$0xff]  }
  0x6b   : > { %1629 = vmatprep.subr.bf16.mxu1 %v1720_v27  ;;  %v1758_v57 = vld [vmem:[%s2396_s0 + $0x68] ss:$16 sps:$4 sm:$0xff]   ;;  %v2131_v60 = vld [vmem:[%s626_s26] ss:$0 sm:$0xff]  ;;  %v1147_v25 = vld [vmem:[%s2027_s28 + $0x10] sm:$0xff] }
  0x6c   : > { %v1145_v5 = vld [vmem:[%s2027_s28] sm:$0xff]  ;;  %v1146_v15 = vld [vmem:[%s2027_s28 + $0x8] sm:$0xff] }
  0x6d   : > { %1590 = vmatpush3.bf16.msra.mxu0 %v1721_v28  ;;  %v1149_v45 = vld [vmem:[%s2027_s28 + $0x20] sm:$0xff] }
  0x6e   : > { %1630 = vmatpush3.bf16.msra.mxu1 %v1722_v29  ;;  %1591 = vmatprep.subr.bf16.mxu0 %v1723_v30 }
  0x6f   : > { %1631 = vmatprep.subr.bf16.mxu1 %v1724_v31 }
  0x71   : > { %1592 = vmatpush3.bf16.msra.mxu0 %v1725_v32 }
  0x72   : > { %1632 = vmatpush3.bf16.msra.mxu1 %v1726_v33  ;;  %1593 = vmatprep.subr.bf16.mxu0 %v1727_v34 }
  0x73   : > { %1633 = vmatprep.subr.bf16.mxu1 %v1728_v35  ;;  %v1148_v35 = vld [vmem:[%s2027_s28 + $0x18] sm:$0xff] }
  0x75   : > { %1594 = vmatpush3.bf16.msra.mxu0 %v1729_v36 }
  0x76   : > { %1634 = vmatpush3.bf16.msra.mxu1 %v1730_v37  ;;  %1595 = vmatprep.subr.bf16.mxu0 %v1731_v38 }
  0x77   : > { %1635 = vmatprep.subr.bf16.mxu1 %v1732_v39 }
  0x79   : > { %1596 = vmatpush3.bf16.msra.mxu0 %v1733_v40 }
  0x7a   : > { %1636 = vmatpush3.bf16.msra.mxu1 %v1734_v41 }
  0x7c   : > { %1048 = vmatmul.mubr.bf16.vlgmr.msra.gmra.mxu0 %v1735_v42 }
  0x7d   : > { %1113 = vmatmul.mubr.bf16.vlgmr.msra.gmra.mxu1 %v1738_v44  ;;  %1055 = vmatprep.mubr.bf16.mxu0 %v1741_v46 }
  0x7e   : > { %1120 = vmatprep.mubr.bf16.mxu1 %v1743_v47 }
  0x84   : > { %1056 = vmatmul.mubr.bf16.gmra.mxu0 %v1745_v48 }
  0x85   : > { %1121 = vmatmul.mubr.bf16.gmra.mxu1 %v1746_v49  ;;  %1063 = vmatprep.mubr.bf16.mxu0 %v1747_v50 }
  0x86   : > { %1128 = vmatprep.mubr.bf16.mxu1 %v1749_v51 }
  0x8c   : > { %1064 = vmatmul.mubr.bf16.gmra.mxu0 %v1751_v52 }
  0x8d   : > { %1129 = vmatmul.mubr.bf16.gmra.mxu1 %v1752_v53  ;;  %1071 = vmatprep.mubr.bf16.mxu0 %v1753_v54 }
  0x8e   : > { %1136 = vmatprep.mubr.bf16.mxu1 %v1755_v55  ;;  %v1150_v55 = vld [vmem:[%s2027_s28 + $0x28] sm:$0xff] }
  0x94   : > { %1072 = vmatmul.mubr.bf16.gmra.mxu0 %v1757_v56 }
  0x95   : > { %1137 = vmatmul.mubr.bf16.gmra.mxu1 %v1758_v57 }
 0x13c   : > { %v1597_v58 = vpop.f32.mrf.mxu0 }
 0x13d   : > { %v1637_v59 = vpop.f32.mrf.mxu1 }
 0x13e   : > { %v1598_v61 = vpop.f32.mrf.mxu0 }
 0x13f   : > { %v1599_v62 = vadd.f32 %v1598_v61, %v1597_v58  ;;  %v1638_v63 = vpop.f32.mrf.mxu1 }
 0x140   : > { %v1600_v0 = vpop.f32.mrf.mxu0  ;;  %v1639_v2 = vadd.f32 %v1638_v63, %v1637_v59 }
 0x141   : > { %v1050_v1 = vadd.f32 %v1599_v62, %v2131_v60  ;;  %v1640_v3 = vpop.f32.mrf.mxu1 }
 0x142   : > { %v1601_v4 = vpop.f32.mrf.mxu0 }
 0x143   : > { %v1115_v6 = vadd.f32 %v1639_v2, %v1050_v1  ;;  %v1602_v7 = vadd.f32 %v1601_v4, %v1600_v0  ;;  %v1641_v8 = vpop.f32.mrf.mxu1  ;;  %v1151_v2 = vld [vmem:[%s2027_s28 + $0x30] sm:$0xff] }
 0x144   : > { %v1603_v9 = vpop.f32.mrf.mxu0  ;;  %v1642_v11 = vadd.f32 %v1641_v8, %v1640_v3 }
 0x145   : > { %v1053_v10 = vadd.f32 %v1602_v7, %v2131_v60  ;;  %v1643_v12 = vpop.f32.mrf.mxu1  ;;  %v2136_v13 = vadd.f32 %v1145_v5, %v1115_v6 }
 0x146   : > { %v1604_v14 = vpop.f32.mrf.mxu0 }
 0x147   : > { %v1118_v16 = vadd.f32 %v1642_v11, %v1053_v10  ;;  %v1605_v17 = vadd.f32 %v1604_v14, %v1603_v9  ;;  %v1644_v18 = vpop.f32.mrf.mxu1  ;;  %1161 = vmax.xlane.f32.xlu0 %v2136_v13  ;;  %v1152_v9 = vld [vmem:[%s2027_s28 + $0x38] sm:$0xff]  ;;  %v2173_v14 = vld [vmem:[#allocation2] sm:$0xff] }
 0x148   : > { %v1606_v19 = vpop.f32.mrf.mxu0  ;;  %v1645_v21 = vadd.f32 %v1644_v18, %v1643_v12  ;;  %v1177_v12 = vlaneseq }
 0x149   : > { %v1058_v20 = vadd.f32 %v1605_v17, %v2131_v60  ;;  %v1646_v22 = vpop.f32.mrf.mxu1  ;;  %v2141_v23 = vadd.f32 %v1146_v15, %v1118_v16  ;;  %v2185_v17 = vld [vmem:[#allocation2 + $0x8] sm:$0xff] }
 0x14a   : > { %v1607_v24 = vpop.f32.mrf.mxu0  ;;  %v2175_v15 = vand.u32 127, %v1177_v12 }
 0x14b   : > { %v1123_v26 = vadd.f32 %v1645_v21, %v1058_v20  ;;  %v1608_v27 = vadd.f32 %v1607_v24, %v1606_v19  ;;  %v1647_v28 = vpop.f32.mrf.mxu1  ;;  %1163 = vmax.xlane.f32.xlu0 %v2141_v23 }
 0x14c   : > { %v1609_v29 = vpop.f32.mrf.mxu0  ;;  %v1648_v31 = vadd.f32 %v1647_v28, %v1646_v22  ;;  %v2202_v22 = vld [vmem:[#allocation2 + $0x10] sm:$0xff]  ;;  %v2220_v28 = vld [vmem:[#allocation2 + $0x18] sm:$0xff] }
 0x14d   : > { %v1061_v30 = vadd.f32 %v1608_v27, %v2131_v60  ;;  %v1649_v32 = vpop.f32.mrf.mxu1  ;;  %v2146_v33 = vadd.f32 %v1147_v25, %v1123_v26 }
 0x14e   : > { %v1610_v34 = vpop.f32.mrf.mxu0 }
 0x14f   : > { %v1126_v36 = vadd.f32 %v1648_v31, %v1061_v30  ;;  %v1611_v37 = vadd.f32 %v1610_v34, %v1609_v29  ;;  %v1650_v38 = vpop.f32.mrf.mxu1  ;;  %1165 = vmax.xlane.f32.xlu1 %v2146_v33  ;;  %v2238_v34 = vld [vmem:[#allocation2 + $0x20] sm:$0xff] }
 0x150   : > { %v1612_v39 = vpop.f32.mrf.mxu0  ;;  %v1651_v41 = vadd.f32 %v1650_v38, %v1649_v32 }
 0x151   : > { %v1066_v40 = vadd.f32 %v1611_v37, %v2131_v60  ;;  %v1652_v42 = vpop.f32.mrf.mxu1  ;;  %v2151_v43 = vadd.f32 %v1148_v35, %v1126_v36 }
 0x152   : > { %v1613_v44 = vpop.f32.mrf.mxu0 }
 0x153   : > { %v1131_v46 = vadd.f32 %v1651_v41, %v1066_v40  ;;  %v1614_v47 = vadd.f32 %v1613_v44, %v1612_v39  ;;  %v1653_v48 = vpop.f32.mrf.mxu1  ;;  %1167 = vmax.xlane.f32.xlu1 %v2151_v43  ;;  %v2254_v40 = vld [vmem:[#allocation2 + $0x28] sm:$0xff] }
 0x154   : > { %v1615_v49 = vpop.f32.mrf.mxu0  ;;  %v1654_v51 = vadd.f32 %v1653_v48, %v1652_v42 }
 0x155   : > { %v1069_v50 = vadd.f32 %v1614_v47, %v2131_v60  ;;  %v1655_v52 = vpop.f32.mrf.mxu1  ;;  %v2156_v53 = vadd.f32 %v1149_v45, %v1131_v46  ;;  %v2266_v46 = vld [vmem:[#allocation2 + $0x30] sm:$0xff] }
 0x156   : > { %v1616_v54 = vpop.f32.mrf.mxu0 }
 0x157   : > { %v1134_v56 = vadd.f32 %v1654_v51, %v1069_v50  ;;  %v1617_v57 = vadd.f32 %v1616_v54, %v1615_v49  ;;  %v1656_v58 = vpop.f32.mrf.mxu1  ;;  %1169 = vmax.xlane.f32.xlu0 %v2156_v53 }
 0x158   : > { %v1618_v59 = vpop.f32.mrf.mxu0  ;;  %v1657_v62 = vadd.f32 %v1656_v58, %v1655_v52  ;;  %v2276_v52 = vld [vmem:[#allocation2 + $0x38] sm:$0xff] }
 0x159   : > { %v1074_v61 = vadd.f32 %v1617_v57, %v2131_v60  ;;  %v1658_v63 = vpop.f32.mrf.mxu1  ;;  %v2161_v0 = vadd.f32 %v1150_v55, %v1134_v56 }
 0x15a   : > { %v1619_v1 = vpop.f32.mrf.mxu0 }
 0x15b   : > { %v1139_v3 = vadd.f32 %v1657_v62, %v1074_v61  ;;  %v1620_v4 = vadd.f32 %v1619_v1, %v1618_v59  ;;  %v1659_v5 = vpop.f32.mrf.mxu1  ;;  %1171 = vmax.xlane.f32.xlu1 %v2161_v0 }
 0x15c   : > { %v1660_v7 = vadd.f32 %v1659_v5, %v1658_v63 }
 0x15d   : > { %v1077_v6 = vadd.f32 %v1620_v4, %v2131_v60  ;;  %v2166_v8 = vadd.f32 %v1151_v2, %v1139_v3 }
 0x15f   : > { %v1142_v10 = vadd.f32 %v1660_v7, %v1077_v6  ;;  %1173 = vmax.xlane.f32.xlu0 %v2166_v8 }
 0x161   : > { %v2170_v11 = vadd.f32 %v1152_v9, %v1142_v10 }
 0x163   : > { %1175 = vmax.xlane.f32.xlu1 %v2170_v11 }
 0x1d0   : > { %v2177_v16 = vpop.xlane.xlu0 %1161 }
 0x1d1   : > { %vm1179_vm2 = vcmp.eq.f32.partialorder %v2136_v13, %v2177_v16  ;;  %vm1325_vm3 = vcmp.gt.f32.partialorder %v2177_v16, %v2173_v14  ;;  %v1366_v60 = vmax.f32 %v2177_v16, %v2173_v14 }
 0x1d2   : > { %v2188_v18 = vsel %vm1179_vm2, %v2175_v15, 128 }
 0x1d3   : > { %1374 = vst.msk [vmem:[#allocation2] sm:$0xff] %vm1349_vm1, %v1366_v60  ;;  %v1196_v19 = vshra.s32 %v2188_v18, 16  ;;  %v1195_v62 = vand.u32 65535, %v2188_v18 }
 0x1d4   : > { %v2192_v20 = vpop.xlane.xlu0 %1163 }
 0x1d5   : > { %vm1180_vm4 = vcmp.eq.f32.partialorder %v2141_v23, %v2192_v20  ;;  %vm1326_vm5 = vcmp.gt.f32.partialorder %v2192_v20, %v2185_v17  ;;  %v1367_v13 = vmax.f32 %v2192_v20, %v2185_v17  ;;  %v2200_v21 = vcvt.s32.f32 %v1196_v19 }
 0x1d6   : > { %v2205_v24 = vsel %vm1180_vm4, %v2175_v15, 128 }
 0x1d7   : > { %1375 = vst.msk [vmem:[#allocation2 + $0x8] sm:$0xff] %vm1349_vm1, %v1367_v13  ;;  %1199 = vmin.xlane.f32.xlu0 %v2200_v21  ;;  %v1210_v25 = vshra.s32 %v2205_v24, 16  ;;  %v1209_v1 = vand.u32 65535, %v2205_v24 }
 0x1d8   : > { %v2210_v23 = vpop.xlane.xlu1 %1165 }
 0x1d9   : > { %vm1181_vm6 = vcmp.eq.f32.partialorder %v2146_v33, %v2210_v23  ;;  %vm1327_vm7 = vcmp.gt.f32.partialorder %v2210_v23, %v2202_v22  ;;  %v1368_v26 = vmax.f32 %v2210_v23, %v2202_v22  ;;  %v2218_v27 = vcvt.s32.f32 %v1210_v25  ;;  %v1337_v22 = vld [vmem:[#allocation3 + $0x20] sm:$0xff] }
 0x1da   : > { %v2223_v29 = vsel %vm1181_vm6, %v2175_v15, 128  ;;  %v1211_v4 = vcvt.s32.f32 %v1209_v1 }
 0x1db   : > { %1376 = vst.msk [vmem:[#allocation2 + $0x10] sm:$0xff] %vm1349_vm1, %v1368_v26  ;;  %1213 = vmin.xlane.f32.xlu1 %v2218_v27  ;;  %v1224_v30 = vshra.s32 %v2223_v29, 16  ;;  %v1223_v5 = vand.u32 65535, %v2223_v29 }
 0x1dc   : > { %v2228_v31 = vpop.xlane.xlu1 %1167 }
 0x1dd   : > { %vm1182_vm8 = vcmp.eq.f32.partialorder %v2151_v43, %v2228_v31  ;;  %vm1328_vm9 = vcmp.gt.f32.partialorder %v2228_v31, %v2220_v28  ;;  %v1369_v32 = vmax.f32 %v2228_v31, %v2220_v28  ;;  %v2236_v33 = vcvt.s32.f32 %v1224_v30  ;;  %v1338_v28 = vld [vmem:[#allocation3 + $0x28] sm:$0xff] }
 0x1de   : > { %v2241_v35 = vsel %vm1182_vm8, %v2175_v15, 128 }
 0x1df   : > { %1377 = vst.msk [vmem:[#allocation2 + $0x18] sm:$0xff] %vm1349_vm1, %v1369_v32  ;;  %1227 = vmin.xlane.f32.xlu0 %v2236_v33  ;;  %v1238_v36 = vshra.s32 %v2241_v35, 16  ;;  %v1237_v9 = vand.u32 65535, %v2241_v35 }
 0x1e0   : > { %v2246_v37 = vpop.xlane.xlu0 %1169 }
 0x1e1   : > { %vm1183_vm10 = vcmp.eq.f32.partialorder %v2156_v53, %v2246_v37  ;;  %vm1329_vm11 = vcmp.gt.f32.partialorder %v2246_v37, %v2238_v34  ;;  %v1370_v38 = vmax.f32 %v2246_v37, %v2238_v34  ;;  %v1240_v39 = vcvt.s32.f32 %v1238_v36  ;;  %v1339_v34 = vld [vmem:[#allocation3 + $0x30] sm:$0xff] }
 0x1e2   : > { %v1191_v41 = vsel %vm1183_vm10, %v2175_v15, 128  ;;  %v1239_v12 = vcvt.s32.f32 %v1237_v9 }
 0x1e3   : > { %1378 = vst.msk [vmem:[#allocation2 + $0x20] sm:$0xff] %vm1349_vm1, %v1370_v38  ;;  %1241 = vmin.xlane.f32.xlu1 %v1240_v39  ;;  %v1252_v42 = vshra.s32 %v1191_v41, 16 }
 0x1e4   : > { %v2258_v43 = vpop.xlane.xlu1 %1171 }
 0x1e5   : > { %vm1184_vm12 = vcmp.eq.f32.partialorder %v2161_v0, %v2258_v43  ;;  %vm1330_vm13 = vcmp.gt.f32.partialorder %v2258_v43, %v2254_v40  ;;  %v1371_v44 = vmax.f32 %v2258_v43, %v2254_v40  ;;  %v1254_v45 = vcvt.s32.f32 %v1252_v42 }
 0x1e6   : > { %v1192_v47 = vsel %vm1184_vm12, %v2175_v15, 128  ;;  %v1197_v0 = vcvt.s32.f32 %v1195_v62 }
 0x1e7   : > { %1379 = vst.msk [vmem:[#allocation2 + $0x28] sm:$0xff] %vm1349_vm1, %v1371_v44  ;;  %1255 = vmin.xlane.f32.xlu0 %v1254_v45  ;;  %v1266_v48 = vshra.s32 %v1192_v47, 16  ;;  %v1265_v13 = vand.u32 65535, %v1192_v47  ;;  %v2305_v47 = vstv %s1575_s22 }
 0x1e8   : > { %v2270_v49 = vpop.xlane.xlu0 %1173 }
 0x1e9   : > { %vm1185_vm14 = vcmp.eq.f32.partialorder %v2166_v8, %v2270_v49  ;;  %v1372_v50 = vmax.f32 %v2270_v49, %v2266_v46  ;;  %v1268_v51 = vcvt.s32.f32 %v1266_v48  ;;  %v1225_v8 = vcvt.s32.f32 %v1223_v5  ;;  %v1335_v5 = vld [vmem:[#allocation3 + $0x10] sm:$0xff] }
 0x1ea   : > { %v1193_v53 = vsel %vm1185_vm14, %v2175_v15, 128  ;;  %v1267_v25 = vcvt.s32.f32 %v1265_v13 }
 0x1eb   : > { %1380 = vst.msk [vmem:[#allocation2 + $0x30] sm:$0xff] %vm1349_vm1, %v1372_v50  ;;  %1269 = vmin.xlane.f32.xlu1 %v1268_v51  ;;  %v1280_v54 = vshra.s32 %v1193_v53, 16  ;;  %v1279_v26 = vand.u32 65535, %v1193_v53  ;;  %v1333_v50 = vld [vmem:[#allocation3] sm:$0xff] }
 0x1ec   : > { %v2280_v55 = vpop.xlane.xlu1 %1175 }
 0x1ed   : > { %vm1186_vm15 = vcmp.eq.f32.partialorder %v2170_v11, %v2280_v55  ;;  %v1373_v56 = vmax.f32 %v2280_v55, %v2276_v52  ;;  %v1282_v57 = vcvt.s32.f32 %v1280_v54  ;;  %v1281_v30 = vcvt.s32.f32 %v1279_v26 }
 0x1ee   : > { %v1194_v58 = vsel %vm1186_vm15, %v2175_v15, 128  ;;  %v1251_v15 = vand.u32 65535, %v1191_v41 }
 0x1ef   : > { %1381 = vst.msk [vmem:[#allocation2 + $0x38] sm:$0xff] %vm1349_vm1, %v1373_v56  ;;  %1283 = vmin.xlane.f32.xlu0 %v1282_v57  ;;  %v1294_v59 = vshra.s32 %v1194_v58, 16  ;;  %v1293_v32 = vand.u32 65535, %v1194_v58 }
 0x1f0   : > { %v1253_v19 = vcvt.s32.f32 %v1251_v15 }
 0x1f1   : > { %v1296_v61 = vcvt.s32.f32 %v1294_v59  ;;  %v1295_v36 = vcvt.s32.f32 %v1293_v32 }
 0x1f3   : > { %1297 = vmin.xlane.f32.xlu1 %v1296_v61 }
 0x260   : > { %v1200_v63 = vpop.xlane.xlu0 %1199 }
 0x261   : > { %vm1201_vm0 = vcmp.eq.f32.partialorder %v2200_v21, %v1200_v63 }
 0x262   : > { %v1202_v2 = vsel %vm1201_vm0, %v1197_v0, inf }
 0x263   : > { %1203 = vmin.xlane.f32.xlu0 %v1202_v2 }
 0x264   : > { %v1214_v3 = vpop.xlane.xlu1 %1213 }
 0x265   : > { %vm1215_vm2 = vcmp.eq.f32.partialorder %v2218_v27, %v1214_v3  ;;  %v1220_v44 = vcvt.f32.s32 %v1214_v3 }
 0x266   : > { %v1216_v6 = vsel %vm1215_vm2, %v1211_v4, inf }
 0x267   : > { %1217 = vmin.xlane.f32.xlu1 %v1216_v6  ;;  %v1221_v53 = vshll.u32 %v1220_v44, 16 }
 0x268   : > { %v1228_v7 = vpop.xlane.xlu0 %1227 }
 0x269   : > { %vm1229_vm4 = vcmp.eq.f32.partialorder %v2236_v33, %v1228_v7  ;;  %v1234_v54 = vcvt.f32.s32 %v1228_v7 }
 0x26a   : > { %v1230_v10 = vsel %vm1229_vm4, %v1225_v8, inf }
 0x26b   : > { %1231 = vmin.xlane.f32.xlu0 %v1230_v10 }
 0x26c   : > { %v1242_v11 = vpop.xlane.xlu1 %1241 }
 0x26d   : > { %vm1243_vm6 = vcmp.eq.f32.partialorder %v1240_v39, %v1242_v11  ;;  %v1206_v39 = vcvt.f32.s32 %v1200_v63  ;;  %v1235_v63 = vshll.u32 %v1234_v54, 16  ;;  %v1248_v0 = vcvt.f32.s32 %v1242_v11  ;;  %v1336_v11 = vld [vmem:[#allocation3 + $0x18] sm:$0xff] }
 0x26e   : > { %v1244_v60 = vsel %vm1243_vm6, %v1239_v12, inf }
 0x26f   : > { %1245 = vmin.xlane.f32.xlu1 %v1244_v60  ;;  %v1207_v42 = vshll.u32 %v1206_v39, 16  ;;  %v1249_v16 = vshll.u32 %v1248_v0, 16 }
 0x270   : > { %v1256_v18 = vpop.xlane.xlu0 %1255 }
 0x271   : > { %vm1257_vm8 = vcmp.eq.f32.partialorder %v1254_v45, %v1256_v18  ;;  %v1262_v6 = vcvt.f32.s32 %v1256_v18 }
 0x272   : > { %v1258_v21 = vsel %vm1257_vm8, %v1253_v19, inf }
 0x273   : > { %1259 = vmin.xlane.f32.xlu0 %v1258_v21  ;;  %v1263_v20 = vshll.u32 %v1262_v6, 16 }
 0x274   : > { %v2295_v24 = vpop.xlane.xlu1 %1269 }
 0x275   : > { %vm1271_vm10 = vcmp.eq.f32.partialorder %v1268_v51, %v2295_v24  ;;  %v1276_v12 = vcvt.f32.s32 %v2295_v24 }
 0x276   : > { %v1272_v27 = vsel %vm1271_vm10, %v1267_v25, inf }
 0x277   : > { %1273 = vmin.xlane.f32.xlu1 %v1272_v27  ;;  %v1277_v13 = vshll.u32 %v1276_v12, 16 }
 0x278   : > { %v2298_v29 = vpop.xlane.xlu0 %1283 }
 0x279   : > { %vm1285_vm12 = vcmp.eq.f32.partialorder %v1282_v57, %v2298_v29  ;;  %v1290_v21 = vcvt.f32.s32 %v2298_v29 }
 0x27a   : > { %v1286_v33 = vsel %vm1285_vm12, %v1281_v30, inf }
 0x27b   : > { %1287 = vmin.xlane.f32.xlu0 %v1286_v33  ;;  %v1291_v30 = vshll.u32 %v1290_v21, 16 }
 0x27c   : > { %v2301_v35 = vpop.xlane.xlu1 %1297 }
 0x27d   : > { %vm1299_vm14 = vcmp.eq.f32.partialorder %v1296_v61, %v2301_v35  ;;  %v1334_v61 = vld [vmem:[#allocation3 + $0x8] sm:$0xff]  ;;  %v1304_v32 = vcvt.f32.s32 %v2301_v35 }
 0x27e   : > { %v1300_v38 = vsel %vm1299_vm14, %v1295_v36, inf }
 0x27f   : > { %1301 = vmin.xlane.f32.xlu1 %v1300_v38  ;;  %v1305_v39 = vshll.u32 %v1304_v32, 16 }
 0x2ec   : > { %v1204_v41 = vpop.xlane.xlu0 %1203 }
 0x2ed   : > { %v1205_v45 = vcvt.f32.s32 %v1204_v41 }
 0x2ef   : > { %v1208_v48 = vadd.s32 %v1207_v42, %v1205_v45  ;;  %v1340_v45 = vld [vmem:[#allocation3 + $0x38] sm:$0xff] }
 0x2f0   : > { %v1218_v51 = vpop.xlane.xlu1 %1217 }
 0x2f1   : > { %v1309_v56 = vadd.s32 %v2305_v47, %v1208_v48  ;;  %v1219_v57 = vcvt.f32.s32 %v1218_v51 }
 0x2f3   : > { %v1341_v58 = vsel %vm1325_vm3, %v1309_v56, %v1333_v50  ;;  %v1222_v59 = vadd.s32 %v1221_v53, %v1219_v57  ;;  %vm1331_vm3 = vcmp.gt.f32.partialorder %v2270_v49, %v2266_v46 }
 0x2f4   : > { %1350 = vst.msk [vmem:[#allocation3] sm:$0xff] %vm1349_vm1, %v1341_v58  ;;  %v1232_v62 = vpop.xlane.xlu0 %1231 }
 0x2f5   : > { %v1310_v1 = vadd.s32 %v2305_v47, %v1222_v59  ;;  %v1233_v2 = vcvt.f32.s32 %v1232_v62 }
 0x2f7   : > { %v1342_v3 = vsel %vm1326_vm5, %v1310_v1, %v1334_v61  ;;  %v1236_v4 = vadd.s32 %v1235_v63, %v1233_v2  ;;  %vm1332_vm5 = vcmp.gt.f32.partialorder %v2280_v55, %v2276_v52 }
 0x2f8   : > { %1351 = vst.msk [vmem:[#allocation3 + $0x8] sm:$0xff] %vm1349_vm1, %v1342_v3  ;;  %v1246_v14 = vpop.xlane.xlu1 %1245 }
 0x2f9   : > { %v1311_v7 = vadd.s32 %v2305_v47, %v1236_v4  ;;  %v1247_v8 = vcvt.f32.s32 %v1246_v14 }
 0x2fb   : > { %v1343_v9 = vsel %vm1327_vm7, %v1311_v7, %v1335_v5  ;;  %v1250_v10 = vadd.s32 %v1249_v16, %v1247_v8 }
 0x2fc   : > { %1352 = vst.msk [vmem:[#allocation3 + $0x10] sm:$0xff] %vm1349_vm1, %v1343_v9  ;;  %v1260_v17 = vpop.xlane.xlu0 %1259 }
 0x2fd   : > { %v1312_v15 = vadd.s32 %v2305_v47, %v1250_v10  ;;  %v1261_v60 = vcvt.f32.s32 %v1260_v17 }
 0x2ff   : > { %v1344_v18 = vsel %vm1328_vm9, %v1312_v15, %v1336_v11  ;;  %v1264_v19 = vadd.s32 %v1263_v20, %v1261_v60 }
 0x300   : > { %1353 = vst.msk [vmem:[#allocation3 + $0x18] sm:$0xff] %vm1349_vm1, %v1344_v18  ;;  %v1274_v23 = vpop.xlane.xlu1 %1273 }
 0x301   : > { %v1313_v25 = vadd.s32 %v2305_v47, %v1264_v19  ;;  %v1275_v26 = vcvt.f32.s32 %v1274_v23 }
 0x303   : > { %v1345_v24 = vsel %vm1329_vm11, %v1313_v25, %v1337_v22  ;;  %v1278_v27 = vadd.s32 %v1277_v13, %v1275_v26 }
 0x304   : > { %1354 = vst.msk [vmem:[#allocation3 + $0x20] sm:$0xff] %vm1349_vm1, %v1345_v24  ;;  %v1288_v31 = vpop.xlane.xlu0 %1287 }
 0x305   : > { %v1314_v33 = vadd.s32 %v2305_v47, %v1278_v27  ;;  %v1289_v36 = vcvt.f32.s32 %v1288_v31 }
 0x307   : > { %v1346_v29 = vsel %vm1330_vm13, %v1314_v33, %v1338_v28  ;;  %v1292_v38 = vadd.s32 %v1291_v30, %v1289_v36 }
 0x308   : > { %1355 = vst.msk [vmem:[#allocation3 + $0x28] sm:$0xff] %vm1349_vm1, %v1346_v29  ;;  %v1302_v37 = vpop.xlane.xlu1 %1301 }
 0x309   : > { %v1315_v41 = vadd.s32 %v2305_v47, %v1292_v38  ;;  %v1303_v42 = vcvt.f32.s32 %v1302_v37 }
 0x30b   : > { %v1347_v35 = vsel %vm1331_vm3, %v1315_v41, %v1339_v34  ;;  %v1306_v44 = vadd.s32 %v1305_v39, %v1303_v42 }
 0x30c   : > { %1356 = vst.msk [vmem:[#allocation3 + $0x30] sm:$0xff] %vm1349_vm1, %v1347_v35  ;;  %1385 = sbr.rel (%p1576_p11) target bundleno = 793 (0x319), region = 123 }
 0x30d   : > { %v1316_v40 = vadd.s32 %v2305_v47, %v1306_v44 }
 0x30f   : > { %v1348_v43 = vsel %vm1332_vm5, %v1316_v40, %v1340_v45 }
 0x310   : > { %1357 = vst.msk [vmem:[#allocation3 + $0x38] sm:$0xff] %vm1349_vm1, %v1348_v43 }
 0x311   : > { %v1386_v48 = vld [vmem:[#allocation3] sm:$0xff]  ;;  %v1387_v50 = vld [vmem:[#allocation3 + $0x8] sm:$0xff]  ;;  %v1388_v51 = vld [vmem:[#allocation3 + $0x10] sm:$0xff] }
 0x312   : > { %1394 = vst.msk [vmem:[%s2400_s4] sm:$0xff] %vm1349_vm1, %v1386_v48  ;;  %1395 = vst.msk [vmem:[%s2400_s4 + $0x8] sm:$0xff] %vm1349_vm1, %v1387_v50  ;;  %v1389_v46 = vld [vmem:[#allocation3 + $0x18] sm:$0xff]  ;;  %v1390_v49 = vld [vmem:[#allocation3 + $0x20] sm:$0xff] }
 0x313   : > { %1396 = vst.msk [vmem:[%s2400_s4 + $0x10] sm:$0xff] %vm1349_vm1, %v1388_v51  ;;  %v1391_v52 = vld [vmem:[#allocation3 + $0x28] sm:$0xff]  ;;  %1397 = vst.msk [vmem:[%s2400_s4 + $0x18] sm:$0xff] %vm1349_vm1, %v1389_v46  ;;  %v1392_v55 = vld [vmem:[#allocation3 + $0x30] sm:$0xff] }
 0x314   : > { %1398 = vst.msk [vmem:[%s2400_s4 + $0x20] sm:$0xff] %vm1349_vm1, %v1390_v49  ;;  %1399 = vst.msk [vmem:[%s2400_s4 + $0x28] sm:$0xff] %vm1349_vm1, %v1391_v52 }
 0x315   : > { %1400 = vst.msk [vmem:[%s2400_s4 + $0x30] sm:$0xff] %vm1349_vm1, %v1392_v55 }
 0x317   : > { %v1393_v47 = vld [vmem:[#allocation3 + $0x38] sm:$0xff] }
 0x318   : > { %1401 = vst.msk [vmem:[%s2400_s4 + $0x38] sm:$0xff] %vm1349_vm1, %v1393_v47 }
 0x319 PF: > { %s14_s19 = sadd.s32 1, %s1797_s19   ;;  %s2402_s15 = smov %s1785_s16 }
 0x31a   : > { %p11_p12 = scmp.ge.s32.totalorder %s14_s19, 31   ;;  %s2403_s16 = smov %s1865_s24 }
 0x31b   : > { %s2404_s17 = smov %s1793_s18  ;;  %s2405_s18 = smov %s2407_s20 }
 0x31c   :  { %13 = sbr.rel (!%p11_p12) target bundleno = 3 (0x3), region = 172 }

// kernel: gen_forward.16
= control target key start
LH: loop header
LB: loop body
LE: loop exit
PB: predicated region body
PF: predicated region fallthrough
CT: control target
= control target key end

     0   :  { %s3006_s6 = smov 0   ;;  %s3008_s7 = smov 0   ;;  %s5311_s0 = inlined_call_operand.vmem [shape: s32[2,1,32], index: 0, kind: input, shape index: {}]   ;;  %s5312_s1 = inlined_call_operand.vmem [shape: f32[2,3606,32], index: 1, kind: output, shape index: {}]  }
   0x1   :  { %s3010_s8 = smov 0  }
   0x2 LB: > { %s23_s9 = sadd.s32 1, %s2989_s7  ;;  %p2486_p0 = scmp.ge.s32.totalorder %s2993_s8, 1  ;;  %s2993_s8 = sphi %s3010_s8, %s11_s8   ;;  %s2989_s7 = sphi %s3008_s7, %s5314_s7   ;;  %s2985_s6 = sphi %s3006_s6, %s5313_s6  }
   0x3   : > { %p25_p1 = scmp.ge.s32.totalorder %s23_s9, 2  ;;  %p104_p2 = scmp.lt.s32.totalorder %s2993_s8, 3 }
   0x5   : > { %s5316_s9 = smov (%p25_p1, %s23_s9), 0  ;;  %p105_p3 = pnand %p2486_p0, %p104_p2 }
   0x6   : > { %p128_p4 = scmp.lt.s32.totalorder (!%p105_p3), %s2985_s6, 1 }
   0x7   : > { %108 = sbr.rel (%p105_p3) target bundleno = 358 (0x166), region = 24 }
   0xc   : > { %v142_v0 = vlaneseq  ;;  %s5318_s6 = smov (!%p128_p4, %s2985_s6), 1  ;;  %vm1952_vm0 = vcmask 261120   ;;  %v2995_v11 = vmov 0.0  }
   0xd   : > { %s3029_s12 = scalar_lea.vmem %s5311_s0, %s5318_s6  ;;  %s2942_s13 = smul.u32 3608, %s5318_s6 }
   0xe   : > { %v3024_v1 = vshrl.u32 %v142_v0, 7  ;;  %v3036_v6 = vld [vmem:[%s3029_s12] ss:$0 sm:$0xff] }
   0xf   : > { %s3045_s16 = scalar_lea.vmem %s5312_s1, %s2942_s13 }
  0x10   : > { %v144_v2 = vadd.s32 8, %v3024_v1  ;;  %v145_v3 = vadd.s32 16, %v3024_v1  ;;  %v146_v4 = vadd.s32 24, %v3024_v1  ;;  %v147_v5 = vadd.s32 32, %v3024_v1 }
  0x11   : > { %v148_v7 = vadd.s32 40, %v3024_v1  ;;  %v149_v8 = vadd.s32 48, %v3024_v1  ;;  %v150_v9 = vadd.s32 56, %v3024_v1  ;;  %v151_v10 = vadd.s32 64, %v3024_v1 }
  0x12   : > { %vm599_vm1 = vcmp.eq.s32.totalorder %v3024_v1, %v3036_v6  ;;  %vm600_vm2 = vcmp.eq.s32.totalorder %v144_v2, %v3036_v6  ;;  %vm601_vm3 = vcmp.eq.s32.totalorder %v145_v3, %v3036_v6  ;;  %vm602_vm4 = vcmp.eq.s32.totalorder %v146_v4, %v3036_v6 }
  0x13   : > { %v2489_v12 = vsel %vm599_vm1, 1.0, %v2995_v11  ;;  %v2490_v13 = vsel %vm600_vm2, 1.0, %v2995_v11  ;;  %v2491_v14 = vsel %vm601_vm3, 1.0, %v2995_v11  ;;  %v2492_v15 = vsel %vm602_vm4, 1.0, %v2995_v11 }
  0x14   : > { %1953 = vst.msk [vmem:[%s3045_s16] sm:$0xff] %vm1952_vm0, %v2489_v12  ;;  %1954 = vst.msk [vmem:[%s3045_s16 + $0x8] sm:$0xff] %vm1952_vm0, %v2490_v13  ;;  %vm603_vm5 = vcmp.eq.s32.totalorder %v147_v5, %v3036_v6  ;;  %vm604_vm6 = vcmp.eq.s32.totalorder %v148_v7, %v3036_v6  ;;  %vm605_vm7 = vcmp.eq.s32.totalorder %v149_v8, %v3036_v6  ;;  %v152_v20 = vadd.s32 72, %v3024_v1 }
  0x15   : > { %1955 = vst.msk [vmem:[%s3045_s16 + $0x10] sm:$0xff] %vm1952_vm0, %v2491_v14  ;;  %1956 = vst.msk [vmem:[%s3045_s16 + $0x18] sm:$0xff] %vm1952_vm0, %v2492_v15  ;;  %vm606_vm8 = vcmp.eq.s32.totalorder %v150_v9, %v3036_v6  ;;  %v2493_v16 = vsel %vm603_vm5, 1.0, %v2995_v11  ;;  %v2494_v17 = vsel %vm604_vm6, 1.0, %v2995_v11  ;;  %v2495_v18 = vsel %vm605_vm7, 1.0, %v2995_v11 }
  0x16   : > { %v2496_v19 = vsel %vm606_vm8, 1.0, %v2995_v11  ;;  %1957 = vst.msk [vmem:[%s3045_s16 + $0x20] sm:$0xff] %vm1952_vm0, %v2493_v16  ;;  %1958 = vst.msk [vmem:[%s3045_s16 + $0x28] sm:$0xff] %vm1952_vm0, %v2494_v17  ;;  %vm607_vm9 = vcmp.eq.s32.totalorder %v151_v10, %v3036_v6  ;;  %v153_v21 = vadd.s32 80, %v3024_v1  ;;  %v154_v22 = vadd.s32 88, %v3024_v1 }
  0x17   : > { %1959 = vst.msk [vmem:[%s3045_s16 + $0x30] sm:$0xff] %vm1952_vm0, %v2495_v18  ;;  %1960 = vst.msk [vmem:[%s3045_s16 + $0x38] sm:$0xff] %vm1952_vm0, %v2496_v19  ;;  %v2497_v23 = vsel %vm607_vm9, 1.0, %v2995_v11  ;;  %v155_v24 = vadd.s32 96, %v3024_v1  ;;  %v156_v25 = vadd.s32 104, %v3024_v1  ;;  %v157_v26 = vadd.s32 112, %v3024_v1 }
  0x18   : > { %1961 = vst.msk [vmem:[%s3045_s16 + $0x40] sm:$0xff] %vm1952_vm0, %v2497_v23  ;;  %vm608_vm10 = vcmp.eq.s32.totalorder %v152_v20, %v3036_v6  ;;  %vm609_vm11 = vcmp.eq.s32.totalorder %v153_v21, %v3036_v6  ;;  %vm610_vm12 = vcmp.eq.s32.totalorder %v154_v22, %v3036_v6  ;;  %v158_v27 = vadd.s32 120, %v3024_v1 }
  0x19   : > { %v2498_v28 = vsel %vm608_vm10, 1.0, %v2995_v11  ;;  %v2499_v29 = vsel %vm609_vm11, 1.0, %v2995_v11  ;;  %v2500_v30 = vsel %vm610_vm12, 1.0, %v2995_v11  ;;  %vm611_vm13 = vcmp.eq.s32.totalorder %v155_v24, %v3036_v6 }
  0x1a   : > { %1962 = vst.msk [vmem:[%s3045_s16 + $0x48] sm:$0xff] %vm1952_vm0, %v2498_v28  ;;  %1963 = vst.msk [vmem:[%s3045_s16 + $0x50] sm:$0xff] %vm1952_vm0, %v2499_v29  ;;  %v2501_v31 = vsel %vm611_vm13, 1.0, %v2995_v11  ;;  %vm612_vm14 = vcmp.eq.s32.totalorder %v156_v25, %v3036_v6  ;;  %vm613_vm15 = vcmp.eq.s32.totalorder %v157_v26, %v3036_v6  ;;  %vm614_vm1 = vcmp.eq.s32.totalorder %v158_v27, %v3036_v6 }
  0x1b   : > { %1964 = vst.msk [vmem:[%s3045_s16 + $0x58] sm:$0xff] %vm1952_vm0, %v2500_v30  ;;  %1965 = vst.msk [vmem:[%s3045_s16 + $0x60] sm:$0xff] %vm1952_vm0, %v2501_v31  ;;  %v2502_v32 = vsel %vm612_vm14, 1.0, %v2995_v11  ;;  %v2503_v33 = vsel %vm613_vm15, 1.0, %v2995_v11  ;;  %v2504_v34 = vsel %vm614_vm1, 1.0, %v2995_v11  ;;  %v159_v35 = vadd.s32 128, %v3024_v1 }
  0x1c   : > { %1966 = vst.msk [vmem:[%s3045_s16 + $0x68] sm:$0xff] %vm1952_vm0, %v2502_v32  ;;  %1967 = vst.msk [vmem:[%s3045_s16 + $0x70] sm:$0xff] %vm1952_vm0, %v2503_v33  ;;  %v160_v36 = vadd.s32 136, %v3024_v1  ;;  %v161_v37 = vadd.s32 144, %v3024_v1  ;;  %v162_v38 = vadd.s32 152, %v3024_v1  ;;  %v163_v39 = vadd.s32 160, %v3024_v1 }
  0x1d   : > { %1968 = vst.msk [vmem:[%s3045_s16 + $0x78] sm:$0xff] %vm1952_vm0, %v2504_v34  ;;  %vm615_vm2 = vcmp.eq.s32.totalorder %v159_v35, %v3036_v6  ;;  %v164_v40 = vadd.s32 168, %v3024_v1  ;;  %v165_v41 = vadd.s32 176, %v3024_v1  ;;  %v166_v42 = vadd.s32 184, %v3024_v1 }
  0x1e   : > { %v2505_v43 = vsel %vm615_vm2, 1.0, %v2995_v11  ;;  %vm616_vm3 = vcmp.eq.s32.totalorder %v160_v36, %v3036_v6  ;;  %vm617_vm4 = vcmp.eq.s32.totalorder %v161_v37, %v3036_v6  ;;  %vm618_vm5 = vcmp.eq.s32.totalorder %v162_v38, %v3036_v6 }
  0x1f   : > { %1969 = vst.msk [vmem:[%s3045_s16 + $0x80] sm:$0xff] %vm1952_vm0, %v2505_v43  ;;  %v2506_v44 = vsel %vm616_vm3, 1.0, %v2995_v11  ;;  %v2507_v45 = vsel %vm617_vm4, 1.0, %v2995_v11  ;;  %v2508_v46 = vsel %vm618_vm5, 1.0, %v2995_v11  ;;  %vm619_vm6 = vcmp.eq.s32.totalorder %v163_v39, %v3036_v6 }
  0x20   : > { %1970 = vst.msk [vmem:[%s3045_s16 + $0x88] sm:$0xff] %vm1952_vm0, %v2506_v44  ;;  %1971 = vst.msk [vmem:[%s3045_s16 + $0x90] sm:$0xff] %vm1952_vm0, %v2507_v45  ;;  %v2509_v47 = vsel %vm619_vm6, 1.0, %v2995_v11  ;;  %vm620_vm7 = vcmp.eq.s32.totalorder %v164_v40, %v3036_v6  ;;  %vm621_vm8 = vcmp.eq.s32.totalorder %v165_v41, %v3036_v6  ;;  %vm622_vm9 = vcmp.eq.s32.totalorder %v166_v42, %v3036_v6 }
  0x21   : > { %1972 = vst.msk [vmem:[%s3045_s16 + $0x98] sm:$0xff] %vm1952_vm0, %v2508_v46  ;;  %1973 = vst.msk [vmem:[%s3045_s16 + $0xa0] sm:$0xff] %vm1952_vm0, %v2509_v47  ;;  %v2510_v48 = vsel %vm620_vm7, 1.0, %v2995_v11  ;;  %v2511_v49 = vsel %vm621_vm8, 1.0, %v2995_v11  ;;  %v2512_v50 = vsel %vm622_vm9, 1.0, %v2995_v11  ;;  %v167_v51 = vadd.s32 192, %v3024_v1 }
  0x22   : > { %1974 = vst.msk [vmem:[%s3045_s16 + $0xa8] sm:$0xff] %vm1952_vm0, %v2510_v48  ;;  %1975 = vst.msk [vmem:[%s3045_s16 + $0xb0] sm:$0xff] %vm1952_vm0, %v2511_v49  ;;  %v168_v52 = vadd.s32 200, %v3024_v1  ;;  %v169_v53 = vadd.s32 208, %v3024_v1  ;;  %v170_v54 = vadd.s32 216, %v3024_v1  ;;  %v171_v55 = vadd.s32 224, %v3024_v1 }
  0x23   : > { %1976 = vst.msk [vmem:[%s3045_s16 + $0xb8] sm:$0xff] %vm1952_vm0, %v2512_v50  ;;  %vm623_vm10 = vcmp.eq.s32.totalorder %v167_v51, %v3036_v6  ;;  %v172_v56 = vadd.s32 232, %v3024_v1  ;;  %v173_v57 = vadd.s32 240, %v3024_v1  ;;  %v174_v58 = vadd.s32 248, %v3024_v1 }
  0x24   : > { %v2513_v59 = vsel %vm623_vm10, 1.0, %v2995_v11  ;;  %vm624_vm11 = vcmp.eq.s32.totalorder %v168_v52, %v3036_v6  ;;  %vm625_vm12 = vcmp.eq.s32.totalorder %v169_v53, %v3036_v6  ;;  %vm626_vm13 = vcmp.eq.s32.totalorder %v170_v54, %v3036_v6 }
  0x25   : > { %1977 = vst.msk [vmem:[%s3045_s16 + $0xc0] sm:$0xff] %vm1952_vm0, %v2513_v59  ;;  %v2514_v60 = vsel %vm624_vm11, 1.0, %v2995_v11  ;;  %v2515_v61 = vsel %vm625_vm12, 1.0, %v2995_v11  ;;  %v2516_v62 = vsel %vm626_vm13, 1.0, %v2995_v11  ;;  %vm627_vm14 = vcmp.eq.s32.totalorder %v171_v55, %v3036_v6 }
  0x26   : > { %1978 = vst.msk [vmem:[%s3045_s16 + $0xc8] sm:$0xff] %vm1952_vm0, %v2514_v60  ;;  %1979 = vst.msk [vmem:[%s3045_s16 + $0xd0] sm:$0xff] %vm1952_vm0, %v2515_v61  ;;  %v2517_v63 = vsel %vm627_vm14, 1.0, %v2995_v11  ;;  %vm628_vm15 = vcmp.eq.s32.totalorder %v172_v56, %v3036_v6  ;;  %vm629_vm1 = vcmp.eq.s32.totalorder %v173_v57, %v3036_v6  ;;  %vm630_vm2 = vcmp.eq.s32.totalorder %v174_v58, %v3036_v6 }
  0x27   : > { %1980 = vst.msk [vmem:[%s3045_s16 + $0xd8] sm:$0xff] %vm1952_vm0, %v2516_v62  ;;  %1981 = vst.msk [vmem:[%s3045_s16 + $0xe0] sm:$0xff] %vm1952_vm0, %v2517_v63  ;;  %v2518_v0 = vsel %vm628_vm15, 1.0, %v2995_v11  ;;  %v2519_v2 = vsel %vm629_vm1, 1.0, %v2995_v11  ;;  %v2520_v3 = vsel %vm630_vm2, 1.0, %v2995_v11  ;;  %v175_v4 = vadd.s32 256, %v3024_v1 }
  0x28   : > { %1982 = vst.msk [vmem:[%s3045_s16 + $0xe8] sm:$0xff] %vm1952_vm0, %v2518_v0  ;;  %1983 = vst.msk [vmem:[%s3045_s16 + $0xf0] sm:$0xff] %vm1952_vm0, %v2519_v2  ;;  %v176_v5 = vadd.s32 264, %v3024_v1  ;;  %v177_v7 = vadd.s32 272, %v3024_v1  ;;  %v178_v8 = vadd.s32 280, %v3024_v1  ;;  %v179_v9 = vadd.s32 288, %v3024_v1 }
  0x29   : > { %1984 = vst.msk [vmem:[%s3045_s16 + $0xf8] sm:$0xff] %vm1952_vm0, %v2520_v3  ;;  %vm631_vm3 = vcmp.eq.s32.totalorder %v175_v4, %v3036_v6  ;;  %v180_v10 = vadd.s32 296, %v3024_v1  ;;  %v181_v12 = vadd.s32 304, %v3024_v1  ;;  %v182_v13 = vadd.s32 312, %v3024_v1 }
  0x2a   : > { %v2521_v14 = vsel %vm631_vm3, 1.0, %v2995_v11  ;;  %vm632_vm4 = vcmp.eq.s32.totalorder %v176_v5, %v3036_v6  ;;  %vm633_vm5 = vcmp.eq.s32.totalorder %v177_v7, %v3036_v6  ;;  %vm634_vm6 = vcmp.eq.s32.totalorder %v178_v8, %v3036_v6 }
  0x2b   : > { %1985 = vst.msk [vmem:[%s3045_s16 + $0x100] sm:$0xff] %vm1952_vm0, %v2521_v14  ;;  %v2522_v15 = vsel %vm632_vm4, 1.0, %v2995_v11  ;;  %v2523_v16 = vsel %vm633_vm5, 1.0, %v2995_v11  ;;  %v2524_v17 = vsel %vm634_vm6, 1.0, %v2995_v11  ;;  %vm635_vm7 = vcmp.eq.s32.totalorder %v179_v9, %v3036_v6 }
  0x2c   : > { %1986 = vst.msk [vmem:[%s3045_s16 + $0x108] sm:$0xff] %vm1952_vm0, %v2522_v15  ;;  %1987 = vst.msk [vmem:[%s3045_s16 + $0x110] sm:$0xff] %vm1952_vm0, %v2523_v16  ;;  %v2525_v18 = vsel %vm635_vm7, 1.0, %v2995_v11  ;;  %vm636_vm8 = vcmp.eq.s32.totalorder %v180_v10, %v3036_v6  ;;  %vm637_vm9 = vcmp.eq.s32.totalorder %v181_v12, %v3036_v6  ;;  %vm638_vm10 = vcmp.eq.s32.totalorder %v182_v13, %v3036_v6 }
  0x2d   : > { %1988 = vst.msk [vmem:[%s3045_s16 + $0x118] sm:$0xff] %vm1952_vm0, %v2524_v17  ;;  %1989 = vst.msk [vmem:[%s3045_s16 + $0x120] sm:$0xff] %vm1952_vm0, %v2525_v18  ;;  %v2526_v19 = vsel %vm636_vm8, 1.0, %v2995_v11  ;;  %v2527_v20 = vsel %vm637_vm9, 1.0, %v2995_v11  ;;  %v2528_v21 = vsel %vm638_vm10, 1.0, %v2995_v11  ;;  %v183_v22 = vadd.s32 320, %v3024_v1 }
  0x2e   : > { %1990 = vst.msk [vmem:[%s3045_s16 + $0x128] sm:$0xff] %vm1952_vm0, %v2526_v19  ;;  %1991 = vst.msk [vmem:[%s3045_s16 + $0x130] sm:$0xff] %vm1952_vm0, %v2527_v20  ;;  %v184_v23 = vadd.s32 328, %v3024_v1  ;;  %v185_v24 = vadd.s32 336, %v3024_v1  ;;  %v186_v25 = vadd.s32 344, %v3024_v1  ;;  %v187_v26 = vadd.s32 352, %v3024_v1 }
  0x2f   : > { %1992 = vst.msk [vmem:[%s3045_s16 + $0x138] sm:$0xff] %vm1952_vm0, %v2528_v21  ;;  %vm639_vm11 = vcmp.eq.s32.totalorder %v183_v22, %v3036_v6  ;;  %v188_v27 = vadd.s32 360, %v3024_v1  ;;  %v189_v28 = vadd.s32 368, %v3024_v1  ;;  %v190_v29 = vadd.s32 376, %v3024_v1 }
  0x30   : > { %v2529_v30 = vsel %vm639_vm11, 1.0, %v2995_v11  ;;  %vm640_vm12 = vcmp.eq.s32.totalorder %v184_v23, %v3036_v6  ;;  %vm641_vm13 = vcmp.eq.s32.totalorder %v185_v24, %v3036_v6  ;;  %vm642_vm14 = vcmp.eq.s32.totalorder %v186_v25, %v3036_v6 }
  0x31   : > { %1993 = vst.msk [vmem:[%s3045_s16 + $0x140] sm:$0xff] %vm1952_vm0, %v2529_v30  ;;  %v2530_v31 = vsel %vm640_vm12, 1.0, %v2995_v11  ;;  %v2531_v32 = vsel %vm641_vm13, 1.0, %v2995_v11  ;;  %v2532_v33 = vsel %vm642_vm14, 1.0, %v2995_v11  ;;  %vm643_vm15 = vcmp.eq.s32.totalorder %v187_v26, %v3036_v6 }
  0x32   : > { %1994 = vst.msk [vmem:[%s3045_s16 + $0x148] sm:$0xff] %vm1952_vm0, %v2530_v31  ;;  %1995 = vst.msk [vmem:[%s3045_s16 + $0x150] sm:$0xff] %vm1952_vm0, %v2531_v32  ;;  %v2533_v34 = vsel %vm643_vm15, 1.0, %v2995_v11  ;;  %vm644_vm1 = vcmp.eq.s32.totalorder %v188_v27, %v3036_v6  ;;  %vm645_vm2 = vcmp.eq.s32.totalorder %v189_v28, %v3036_v6  ;;  %vm646_vm3 = vcmp.eq.s32.totalorder %v190_v29, %v3036_v6 }
  0x33   : > { %1996 = vst.msk [vmem:[%s3045_s16 + $0x158] sm:$0xff] %vm1952_vm0, %v2532_v33  ;;  %1997 = vst.msk [vmem:[%s3045_s16 + $0x160] sm:$0xff] %vm1952_vm0, %v2533_v34  ;;  %v2534_v35 = vsel %vm644_vm1, 1.0, %v2995_v11  ;;  %v2535_v36 = vsel %vm645_vm2, 1.0, %v2995_v11  ;;  %v2536_v37 = vsel %vm646_vm3, 1.0, %v2995_v11  ;;  %v191_v38 = vadd.s32 384, %v3024_v1 }
  0x34   : > { %1998 = vst.msk [vmem:[%s3045_s16 + $0x168] sm:$0xff] %vm1952_vm0, %v2534_v35  ;;  %1999 = vst.msk [vmem:[%s3045_s16 + $0x170] sm:$0xff] %vm1952_vm0, %v2535_v36  ;;  %v192_v39 = vadd.s32 392, %v3024_v1  ;;  %v193_v40 = vadd.s32 400, %v3024_v1  ;;  %v194_v41 = vadd.s32 408, %v3024_v1  ;;  %v195_v42 = vadd.s32 416, %v3024_v1 }
  0x35   : > { %2000 = vst.msk [vmem:[%s3045_s16 + $0x178] sm:$0xff] %vm1952_vm0, %v2536_v37  ;;  %vm647_vm4 = vcmp.eq.s32.totalorder %v191_v38, %v3036_v6  ;;  %v196_v43 = vadd.s32 424, %v3024_v1  ;;  %v197_v44 = vadd.s32 432, %v3024_v1  ;;  %v198_v45 = vadd.s32 440, %v3024_v1 }
  0x36   : > { %v2537_v46 = vsel %vm647_vm4, 1.0, %v2995_v11  ;;  %vm648_vm5 = vcmp.eq.s32.totalorder %v192_v39, %v3036_v6  ;;  %vm649_vm6 = vcmp.eq.s32.totalorder %v193_v40, %v3036_v6  ;;  %vm650_vm7 = vcmp.eq.s32.totalorder %v194_v41, %v3036_v6 }
  0x37   : > { %2001 = vst.msk [vmem:[%s3045_s16 + $0x180] sm:$0xff] %vm1952_vm0, %v2537_v46  ;;  %v2538_v47 = vsel %vm648_vm5, 1.0, %v2995_v11  ;;  %v2539_v48 = vsel %vm649_vm6, 1.0, %v2995_v11  ;;  %v2540_v49 = vsel %vm650_vm7, 1.0, %v2995_v11  ;;  %vm651_vm8 = vcmp.eq.s32.totalorder %v195_v42, %v3036_v6 }
  0x38   : > { %2002 = vst.msk [vmem:[%s3045_s16 + $0x188] sm:$0xff] %vm1952_vm0, %v2538_v47  ;;  %2003 = vst.msk [vmem:[%s3045_s16 + $0x190] sm:$0xff] %vm1952_vm0, %v2539_v48  ;;  %v2541_v50 = vsel %vm651_vm8, 1.0, %v2995_v11  ;;  %vm652_vm9 = vcmp.eq.s32.totalorder %v196_v43, %v3036_v6  ;;  %vm653_vm10 = vcmp.eq.s32.totalorder %v197_v44, %v3036_v6  ;;  %vm654_vm11 = vcmp.eq.s32.totalorder %v198_v45, %v3036_v6 }
  0x39   : > { %2004 = vst.msk [vmem:[%s3045_s16 + $0x198] sm:$0xff] %vm1952_vm0, %v2540_v49  ;;  %2005 = vst.msk [vmem:[%s3045_s16 + $0x1a0] sm:$0xff] %vm1952_vm0, %v2541_v50  ;;  %v2542_v51 = vsel %vm652_vm9, 1.0, %v2995_v11  ;;  %v2543_v52 = vsel %vm653_vm10, 1.0, %v2995_v11  ;;  %v2544_v53 = vsel %vm654_vm11, 1.0, %v2995_v11  ;;  %v199_v54 = vadd.s32 448, %v3024_v1 }
  0x3a   : > { %2006 = vst.msk [vmem:[%s3045_s16 + $0x1a8] sm:$0xff] %vm1952_vm0, %v2542_v51  ;;  %2007 = vst.msk [vmem:[%s3045_s16 + $0x1b0] sm:$0xff] %vm1952_vm0, %v2543_v52  ;;  %v200_v55 = vadd.s32 456, %v3024_v1  ;;  %v201_v56 = vadd.s32 464, %v3024_v1  ;;  %v202_v57 = vadd.s32 472, %v3024_v1  ;;  %v203_v58 = vadd.s32 480, %v3024_v1 }
  0x3b   : > { %2008 = vst.msk [vmem:[%s3045_s16 + $0x1b8] sm:$0xff] %vm1952_vm0, %v2544_v53  ;;  %vm655_vm12 = vcmp.eq.s32.totalorder %v199_v54, %v3036_v6  ;;  %v204_v59 = vadd.s32 488, %v3024_v1  ;;  %v205_v60 = vadd.s32 496, %v3024_v1  ;;  %v206_v61 = vadd.s32 504, %v3024_v1 }
  0x3c   : > { %v2545_v62 = vsel %vm655_vm12, 1.0, %v2995_v11  ;;  %vm656_vm13 = vcmp.eq.s32.totalorder %v200_v55, %v3036_v6  ;;  %vm657_vm14 = vcmp.eq.s32.totalorder %v201_v56, %v3036_v6  ;;  %vm658_vm15 = vcmp.eq.s32.totalorder %v202_v57, %v3036_v6 }
  0x3d   : > { %2009 = vst.msk [vmem:[%s3045_s16 + $0x1c0] sm:$0xff] %vm1952_vm0, %v2545_v62  ;;  %v2546_v63 = vsel %vm656_vm13, 1.0, %v2995_v11  ;;  %v2547_v0 = vsel %vm657_vm14, 1.0, %v2995_v11  ;;  %v2548_v2 = vsel %vm658_vm15, 1.0, %v2995_v11  ;;  %vm659_vm1 = vcmp.eq.s32.totalorder %v203_v58, %v3036_v6 }
  0x3e   : > { %2010 = vst.msk [vmem:[%s3045_s16 + $0x1c8] sm:$0xff] %vm1952_vm0, %v2546_v63  ;;  %2011 = vst.msk [vmem:[%s3045_s16 + $0x1d0] sm:$0xff] %vm1952_vm0, %v2547_v0  ;;  %v2549_v3 = vsel %vm659_vm1, 1.0, %v2995_v11  ;;  %vm660_vm2 = vcmp.eq.s32.totalorder %v204_v59, %v3036_v6  ;;  %vm661_vm3 = vcmp.eq.s32.totalorder %v205_v60, %v3036_v6  ;;  %vm662_vm4 = vcmp.eq.s32.totalorder %v206_v61, %v3036_v6 }
  0x3f   : > { %2012 = vst.msk [vmem:[%s3045_s16 + $0x1d8] sm:$0xff] %vm1952_vm0, %v2548_v2  ;;  %2013 = vst.msk [vmem:[%s3045_s16 + $0x1e0] sm:$0xff] %vm1952_vm0, %v2549_v3  ;;  %v2550_v4 = vsel %vm660_vm2, 1.0, %v2995_v11  ;;  %v2551_v5 = vsel %vm661_vm3, 1.0, %v2995_v11  ;;  %v2552_v7 = vsel %vm662_vm4, 1.0, %v2995_v11  ;;  %v207_v8 = vadd.s32 512, %v3024_v1 }
  0x40   : > { %2014 = vst.msk [vmem:[%s3045_s16 + $0x1e8] sm:$0xff] %vm1952_vm0, %v2550_v4  ;;  %2015 = vst.msk [vmem:[%s3045_s16 + $0x1f0] sm:$0xff] %vm1952_vm0, %v2551_v5  ;;  %v208_v9 = vadd.s32 520, %v3024_v1  ;;  %v209_v10 = vadd.s32 528, %v3024_v1  ;;  %v210_v12 = vadd.s32 536, %v3024_v1  ;;  %v211_v13 = vadd.s32 544, %v3024_v1 }
  0x41   : > { %2016 = vst.msk [vmem:[%s3045_s16 + $0x1f8] sm:$0xff] %vm1952_vm0, %v2552_v7  ;;  %vm663_vm5 = vcmp.eq.s32.totalorder %v207_v8, %v3036_v6  ;;  %v212_v14 = vadd.s32 552, %v3024_v1  ;;  %v213_v15 = vadd.s32 560, %v3024_v1  ;;  %v214_v16 = vadd.s32 568, %v3024_v1 }
  0x42   : > { %v2553_v17 = vsel %vm663_vm5, 1.0, %v2995_v11  ;;  %vm664_vm6 = vcmp.eq.s32.totalorder %v208_v9, %v3036_v6  ;;  %vm665_vm7 = vcmp.eq.s32.totalorder %v209_v10, %v3036_v6  ;;  %vm666_vm8 = vcmp.eq.s32.totalorder %v210_v12, %v3036_v6 }
  0x43   : > { %2017 = vst.msk [vmem:[%s3045_s16 + $0x200] sm:$0xff] %vm1952_vm0, %v2553_v17  ;;  %v2554_v18 = vsel %vm664_vm6, 1.0, %v2995_v11  ;;  %v2555_v19 = vsel %vm665_vm7, 1.0, %v2995_v11  ;;  %v2556_v20 = vsel %vm666_vm8, 1.0, %v2995_v11  ;;  %vm667_vm9 = vcmp.eq.s32.totalorder %v211_v13, %v3036_v6 }
  0x44   : > { %2018 = vst.msk [vmem:[%s3045_s16 + $0x208] sm:$0xff] %vm1952_vm0, %v2554_v18  ;;  %2019 = vst.msk [vmem:[%s3045_s16 + $0x210] sm:$0xff] %vm1952_vm0, %v2555_v19  ;;  %v2557_v21 = vsel %vm667_vm9, 1.0, %v2995_v11  ;;  %vm668_vm10 = vcmp.eq.s32.totalorder %v212_v14, %v3036_v6  ;;  %vm669_vm11 = vcmp.eq.s32.totalorder %v213_v15, %v3036_v6  ;;  %vm670_vm12 = vcmp.eq.s32.totalorder %v214_v16, %v3036_v6 }
  0x45   : > { %2020 = vst.msk [vmem:[%s3045_s16 + $0x218] sm:$0xff] %vm1952_vm0, %v2556_v20  ;;  %2021 = vst.msk [vmem:[%s3045_s16 + $0x220] sm:$0xff] %vm1952_vm0, %v2557_v21  ;;  %v2558_v22 = vsel %vm668_vm10, 1.0, %v2995_v11  ;;  %v2559_v23 = vsel %vm669_vm11, 1.0, %v2995_v11  ;;  %v2560_v24 = vsel %vm670_vm12, 1.0, %v2995_v11  ;;  %v215_v25 = vadd.s32 576, %v3024_v1 }
  0x46   : > { %2022 = vst.msk [vmem:[%s3045_s16 + $0x228] sm:$0xff] %vm1952_vm0, %v2558_v22  ;;  %2023 = vst.msk [vmem:[%s3045_s16 + $0x230] sm:$0xff] %vm1952_vm0, %v2559_v23  ;;  %v216_v26 = vadd.s32 584, %v3024_v1  ;;  %v217_v27 = vadd.s32 592, %v3024_v1  ;;  %v218_v28 = vadd.s32 600, %v3024_v1  ;;  %v219_v29 = vadd.s32 608, %v3024_v1 }
  0x47   : > { %2024 = vst.msk [vmem:[%s3045_s16 + $0x238] sm:$0xff] %vm1952_vm0, %v2560_v24  ;;  %vm671_vm13 = vcmp.eq.s32.totalorder %v215_v25, %v3036_v6  ;;  %v220_v30 = vadd.s32 616, %v3024_v1  ;;  %v221_v31 = vadd.s32 624, %v3024_v1  ;;  %v222_v32 = vadd.s32 632, %v3024_v1 }
  0x48   : > { %v2561_v33 = vsel %vm671_vm13, 1.0, %v2995_v11  ;;  %vm672_vm14 = vcmp.eq.s32.totalorder %v216_v26, %v3036_v6  ;;  %vm673_vm15 = vcmp.eq.s32.totalorder %v217_v27, %v3036_v6  ;;  %vm674_vm1 = vcmp.eq.s32.totalorder %v218_v28, %v3036_v6 }
  0x49   : > { %2025 = vst.msk [vmem:[%s3045_s16 + $0x240] sm:$0xff] %vm1952_vm0, %v2561_v33  ;;  %v2562_v34 = vsel %vm672_vm14, 1.0, %v2995_v11  ;;  %v2563_v35 = vsel %vm673_vm15, 1.0, %v2995_v11  ;;  %v2564_v36 = vsel %vm674_vm1, 1.0, %v2995_v11  ;;  %vm675_vm2 = vcmp.eq.s32.totalorder %v219_v29, %v3036_v6 }
  0x4a   : > { %2026 = vst.msk [vmem:[%s3045_s16 + $0x248] sm:$0xff] %vm1952_vm0, %v2562_v34  ;;  %2027 = vst.msk [vmem:[%s3045_s16 + $0x250] sm:$0xff] %vm1952_vm0, %v2563_v35  ;;  %v2565_v37 = vsel %vm675_vm2, 1.0, %v2995_v11  ;;  %vm676_vm3 = vcmp.eq.s32.totalorder %v220_v30, %v3036_v6  ;;  %vm677_vm4 = vcmp.eq.s32.totalorder %v221_v31, %v3036_v6  ;;  %vm678_vm5 = vcmp.eq.s32.totalorder %v222_v32, %v3036_v6 }
  0x4b   : > { %2028 = vst.msk [vmem:[%s3045_s16 + $0x258] sm:$0xff] %vm1952_vm0, %v2564_v36  ;;  %2029 = vst.msk [vmem:[%s3045_s16 + $0x260] sm:$0xff] %vm1952_vm0, %v2565_v37  ;;  %v2566_v38 = vsel %vm676_vm3, 1.0, %v2995_v11  ;;  %v2567_v39 = vsel %vm677_vm4, 1.0, %v2995_v11  ;;  %v2568_v40 = vsel %vm678_vm5, 1.0, %v2995_v11  ;;  %v223_v41 = vadd.s32 640, %v3024_v1 }
  0x4c   : > { %2030 = vst.msk [vmem:[%s3045_s16 + $0x268] sm:$0xff] %vm1952_vm0, %v2566_v38  ;;  %2031 = vst.msk [vmem:[%s3045_s16 + $0x270] sm:$0xff] %vm1952_vm0, %v2567_v39  ;;  %v224_v42 = vadd.s32 648, %v3024_v1  ;;  %v225_v43 = vadd.s32 656, %v3024_v1  ;;  %v226_v44 = vadd.s32 664, %v3024_v1  ;;  %v227_v45 = vadd.s32 672, %v3024_v1 }
  0x4d   : > { %2032 = vst.msk [vmem:[%s3045_s16 + $0x278] sm:$0xff] %vm1952_vm0, %v2568_v40  ;;  %vm679_vm6 = vcmp.eq.s32.totalorder %v223_v41, %v3036_v6  ;;  %v228_v46 = vadd.s32 680, %v3024_v1  ;;  %v229_v47 = vadd.s32 688, %v3024_v1  ;;  %v230_v48 = vadd.s32 696, %v3024_v1 }
  0x4e   : > { %v2569_v49 = vsel %vm679_vm6, 1.0, %v2995_v11  ;;  %vm680_vm7 = vcmp.eq.s32.totalorder %v224_v42, %v3036_v6  ;;  %vm681_vm8 = vcmp.eq.s32.totalorder %v225_v43, %v3036_v6  ;;  %vm682_vm9 = vcmp.eq.s32.totalorder %v226_v44, %v3036_v6 }
  0x4f   : > { %2033 = vst.msk [vmem:[%s3045_s16 + $0x280] sm:$0xff] %vm1952_vm0, %v2569_v49  ;;  %v2570_v50 = vsel %vm680_vm7, 1.0, %v2995_v11  ;;  %v2571_v51 = vsel %vm681_vm8, 1.0, %v2995_v11  ;;  %v2572_v52 = vsel %vm682_vm9, 1.0, %v2995_v11  ;;  %vm683_vm10 = vcmp.eq.s32.totalorder %v227_v45, %v3036_v6 }
  0x50   : > { %2034 = vst.msk [vmem:[%s3045_s16 + $0x288] sm:$0xff] %vm1952_vm0, %v2570_v50  ;;  %2035 = vst.msk [vmem:[%s3045_s16 + $0x290] sm:$0xff] %vm1952_vm0, %v2571_v51  ;;  %v2573_v53 = vsel %vm683_vm10, 1.0, %v2995_v11  ;;  %vm684_vm11 = vcmp.eq.s32.totalorder %v228_v46, %v3036_v6  ;;  %vm685_vm12 = vcmp.eq.s32.totalorder %v229_v47, %v3036_v6  ;;  %vm686_vm13 = vcmp.eq.s32.totalorder %v230_v48, %v3036_v6 }
  0x51   : > { %2036 = vst.msk [vmem:[%s3045_s16 + $0x298] sm:$0xff] %vm1952_vm0, %v2572_v52  ;;  %2037 = vst.msk [vmem:[%s3045_s16 + $0x2a0] sm:$0xff] %vm1952_vm0, %v2573_v53  ;;  %v2574_v54 = vsel %vm684_vm11, 1.0, %v2995_v11  ;;  %v2575_v55 = vsel %vm685_vm12, 1.0, %v2995_v11  ;;  %v2576_v56 = vsel %vm686_vm13, 1.0, %v2995_v11  ;;  %v231_v57 = vadd.s32 704, %v3024_v1 }
  0x52   : > { %2038 = vst.msk [vmem:[%s3045_s16 + $0x2a8] sm:$0xff] %vm1952_vm0, %v2574_v54  ;;  %2039 = vst.msk [vmem:[%s3045_s16 + $0x2b0] sm:$0xff] %vm1952_vm0, %v2575_v55  ;;  %v232_v58 = vadd.s32 712, %v3024_v1  ;;  %v233_v59 = vadd.s32 720, %v3024_v1  ;;  %v234_v60 = vadd.s32 728, %v3024_v1  ;;  %v235_v61 = vadd.s32 736, %v3024_v1 }
  0x53   : > { %2040 = vst.msk [vmem:[%s3045_s16 + $0x2b8] sm:$0xff] %vm1952_vm0, %v2576_v56  ;;  %vm687_vm14 = vcmp.eq.s32.totalorder %v231_v57, %v3036_v6  ;;  %v236_v62 = vadd.s32 744, %v3024_v1  ;;  %v237_v63 = vadd.s32 752, %v3024_v1  ;;  %v238_v0 = vadd.s32 760, %v3024_v1 }
  0x54   : > { %v2577_v2 = vsel %vm687_vm14, 1.0, %v2995_v11  ;;  %vm688_vm15 = vcmp.eq.s32.totalorder %v232_v58, %v3036_v6  ;;  %vm689_vm1 = vcmp.eq.s32.totalorder %v233_v59, %v3036_v6  ;;  %vm690_vm2 = vcmp.eq.s32.totalorder %v234_v60, %v3036_v6 }
  0x55   : > { %2041 = vst.msk [vmem:[%s3045_s16 + $0x2c0] sm:$0xff] %vm1952_vm0, %v2577_v2  ;;  %v2578_v3 = vsel %vm688_vm15, 1.0, %v2995_v11  ;;  %v2579_v4 = vsel %vm689_vm1, 1.0, %v2995_v11  ;;  %v2580_v5 = vsel %vm690_vm2, 1.0, %v2995_v11  ;;  %vm691_vm3 = vcmp.eq.s32.totalorder %v235_v61, %v3036_v6 }
  0x56   : > { %2042 = vst.msk [vmem:[%s3045_s16 + $0x2c8] sm:$0xff] %vm1952_vm0, %v2578_v3  ;;  %2043 = vst.msk [vmem:[%s3045_s16 + $0x2d0] sm:$0xff] %vm1952_vm0, %v2579_v4  ;;  %v2581_v7 = vsel %vm691_vm3, 1.0, %v2995_v11  ;;  %vm692_vm4 = vcmp.eq.s32.totalorder %v236_v62, %v3036_v6  ;;  %vm693_vm5 = vcmp.eq.s32.totalorder %v237_v63, %v3036_v6  ;;  %vm694_vm6 = vcmp.eq.s32.totalorder %v238_v0, %v3036_v6 }
  0x57   : > { %2044 = vst.msk [vmem:[%s3045_s16 + $0x2d8] sm:$0xff] %vm1952_vm0, %v2580_v5  ;;  %2045 = vst.msk [vmem:[%s3045_s16 + $0x2e0] sm:$0xff] %vm1952_vm0, %v2581_v7  ;;  %v2582_v8 = vsel %vm692_vm4, 1.0, %v2995_v11  ;;  %v2583_v9 = vsel %vm693_vm5, 1.0, %v2995_v11  ;;  %v2584_v10 = vsel %vm694_vm6, 1.0, %v2995_v11  ;;  %v239_v12 = vadd.s32 768, %v3024_v1 }
  0x58   : > { %2046 = vst.msk [vmem:[%s3045_s16 + $0x2e8] sm:$0xff] %vm1952_vm0, %v2582_v8  ;;  %2047 = vst.msk [vmem:[%s3045_s16 + $0x2f0] sm:$0xff] %vm1952_vm0, %v2583_v9  ;;  %v240_v13 = vadd.s32 776, %v3024_v1  ;;  %v241_v14 = vadd.s32 784, %v3024_v1  ;;  %v242_v15 = vadd.s32 792, %v3024_v1  ;;  %v243_v16 = vadd.s32 800, %v3024_v1 }
  0x59   : > { %2048 = vst.msk [vmem:[%s3045_s16 + $0x2f8] sm:$0xff] %vm1952_vm0, %v2584_v10  ;;  %vm695_vm7 = vcmp.eq.s32.totalorder %v239_v12, %v3036_v6  ;;  %v244_v17 = vadd.s32 808, %v3024_v1  ;;  %v245_v18 = vadd.s32 816, %v3024_v1  ;;  %v246_v19 = vadd.s32 824, %v3024_v1 }
  0x5a   : > { %v2585_v20 = vsel %vm695_vm7, 1.0, %v2995_v11  ;;  %vm696_vm8 = vcmp.eq.s32.totalorder %v240_v13, %v3036_v6  ;;  %vm697_vm9 = vcmp.eq.s32.totalorder %v241_v14, %v3036_v6  ;;  %vm698_vm10 = vcmp.eq.s32.totalorder %v242_v15, %v3036_v6 }
  0x5b   : > { %2049 = vst.msk [vmem:[%s3045_s16 + $0x300] sm:$0xff] %vm1952_vm0, %v2585_v20  ;;  %v2586_v21 = vsel %vm696_vm8, 1.0, %v2995_v11  ;;  %v2587_v22 = vsel %vm697_vm9, 1.0, %v2995_v11  ;;  %v2588_v23 = vsel %vm698_vm10, 1.0, %v2995_v11  ;;  %vm699_vm11 = vcmp.eq.s32.totalorder %v243_v16, %v3036_v6 }
  0x5c   : > { %2050 = vst.msk [vmem:[%s3045_s16 + $0x308] sm:$0xff] %vm1952_vm0, %v2586_v21  ;;  %2051 = vst.msk [vmem:[%s3045_s16 + $0x310] sm:$0xff] %vm1952_vm0, %v2587_v22  ;;  %v2589_v24 = vsel %vm699_vm11, 1.0, %v2995_v11  ;;  %vm700_vm12 = vcmp.eq.s32.totalorder %v244_v17, %v3036_v6  ;;  %vm701_vm13 = vcmp.eq.s32.totalorder %v245_v18, %v3036_v6  ;;  %vm702_vm14 = vcmp.eq.s32.totalorder %v246_v19, %v3036_v6  ;;  %v3685_v19 = vld [vmem:[%s3029_s12] ss:$0 sm:$0xff] }
  0x5d   : > { %2052 = vst.msk [vmem:[%s3045_s16 + $0x318] sm:$0xff] %vm1952_vm0, %v2588_v23  ;;  %2053 = vst.msk [vmem:[%s3045_s16 + $0x320] sm:$0xff] %vm1952_vm0, %v2589_v24  ;;  %v2590_v25 = vsel %vm700_vm12, 1.0, %v2995_v11  ;;  %v2591_v26 = vsel %vm701_vm13, 1.0, %v2995_v11  ;;  %v2592_v27 = vsel %vm702_vm14, 1.0, %v2995_v11  ;;  %v247_v28 = vadd.s32 832, %v3024_v1 }
  0x5e   : > { %2054 = vst.msk [vmem:[%s3045_s16 + $0x328] sm:$0xff] %vm1952_vm0, %v2590_v25  ;;  %2055 = vst.msk [vmem:[%s3045_s16 + $0x330] sm:$0xff] %vm1952_vm0, %v2591_v26  ;;  %v248_v29 = vadd.s32 840, %v3024_v1  ;;  %v249_v30 = vadd.s32 848, %v3024_v1  ;;  %v250_v31 = vadd.s32 856, %v3024_v1  ;;  %v251_v32 = vadd.s32 864, %v3024_v1 }
  0x5f   : > { %2056 = vst.msk [vmem:[%s3045_s16 + $0x338] sm:$0xff] %vm1952_vm0, %v2592_v27  ;;  %vm703_vm15 = vcmp.eq.s32.totalorder %v247_v28, %v3036_v6  ;;  %v252_v33 = vadd.s32 872, %v3024_v1  ;;  %v253_v34 = vadd.s32 880, %v3024_v1  ;;  %v254_v35 = vadd.s32 888, %v3024_v1 }
  0x60   : > { %v2593_v36 = vsel %vm703_vm15, 1.0, %v2995_v11  ;;  %vm704_vm1 = vcmp.eq.s32.totalorder %v248_v29, %v3036_v6  ;;  %vm705_vm2 = vcmp.eq.s32.totalorder %v249_v30, %v3036_v6  ;;  %vm706_vm3 = vcmp.eq.s32.totalorder %v250_v31, %v3036_v6 }
  0x61   : > { %2057 = vst.msk [vmem:[%s3045_s16 + $0x340] sm:$0xff] %vm1952_vm0, %v2593_v36  ;;  %v2594_v37 = vsel %vm704_vm1, 1.0, %v2995_v11  ;;  %v2595_v38 = vsel %vm705_vm2, 1.0, %v2995_v11  ;;  %v2596_v39 = vsel %vm706_vm3, 1.0, %v2995_v11  ;;  %vm707_vm4 = vcmp.eq.s32.totalorder %v251_v32, %v3036_v6 }
  0x62   : > { %2058 = vst.msk [vmem:[%s3045_s16 + $0x348] sm:$0xff] %vm1952_vm0, %v2594_v37  ;;  %2059 = vst.msk [vmem:[%s3045_s16 + $0x350] sm:$0xff] %vm1952_vm0, %v2595_v38  ;;  %v2597_v40 = vsel %vm707_vm4, 1.0, %v2995_v11  ;;  %vm708_vm5 = vcmp.eq.s32.totalorder %v252_v33, %v3036_v6  ;;  %vm709_vm6 = vcmp.eq.s32.totalorder %v253_v34, %v3036_v6  ;;  %vm710_vm7 = vcmp.eq.s32.totalorder %v254_v35, %v3036_v6 }
  0x63   : > { %2060 = vst.msk [vmem:[%s3045_s16 + $0x358] sm:$0xff] %vm1952_vm0, %v2596_v39  ;;  %2061 = vst.msk [vmem:[%s3045_s16 + $0x360] sm:$0xff] %vm1952_vm0, %v2597_v40  ;;  %v2598_v41 = vsel %vm708_vm5, 1.0, %v2995_v11  ;;  %v2599_v42 = vsel %vm709_vm6, 1.0, %v2995_v11  ;;  %v2600_v43 = vsel %vm710_vm7, 1.0, %v2995_v11  ;;  %v255_v44 = vadd.s32 896, %v3024_v1 }
  0x64   : > { %2062 = vst.msk [vmem:[%s3045_s16 + $0x368] sm:$0xff] %vm1952_vm0, %v2598_v41  ;;  %2063 = vst.msk [vmem:[%s3045_s16 + $0x370] sm:$0xff] %vm1952_vm0, %v2599_v42  ;;  %v256_v45 = vadd.s32 904, %v3024_v1  ;;  %v257_v46 = vadd.s32 912, %v3024_v1  ;;  %v258_v47 = vadd.s32 920, %v3024_v1  ;;  %v259_v48 = vadd.s32 928, %v3024_v1 }
  0x65   : > { %2064 = vst.msk [vmem:[%s3045_s16 + $0x378] sm:$0xff] %vm1952_vm0, %v2600_v43  ;;  %vm711_vm8 = vcmp.eq.s32.totalorder %v255_v44, %v3036_v6  ;;  %v260_v49 = vadd.s32 936, %v3024_v1  ;;  %v261_v50 = vadd.s32 944, %v3024_v1  ;;  %v262_v51 = vadd.s32 952, %v3024_v1 }
  0x66   : > { %v2601_v52 = vsel %vm711_vm8, 1.0, %v2995_v11  ;;  %vm712_vm9 = vcmp.eq.s32.totalorder %v256_v45, %v3036_v6  ;;  %vm713_vm10 = vcmp.eq.s32.totalorder %v257_v46, %v3036_v6  ;;  %vm714_vm11 = vcmp.eq.s32.totalorder %v258_v47, %v3036_v6 }
  0x67   : > { %2065 = vst.msk [vmem:[%s3045_s16 + $0x380] sm:$0xff] %vm1952_vm0, %v2601_v52  ;;  %v2602_v53 = vsel %vm712_vm9, 1.0, %v2995_v11  ;;  %v2603_v54 = vsel %vm713_vm10, 1.0, %v2995_v11  ;;  %v2604_v55 = vsel %vm714_vm11, 1.0, %v2995_v11  ;;  %vm715_vm12 = vcmp.eq.s32.totalorder %v259_v48, %v3036_v6 }
  0x68   : > { %2066 = vst.msk [vmem:[%s3045_s16 + $0x388] sm:$0xff] %vm1952_vm0, %v2602_v53  ;;  %2067 = vst.msk [vmem:[%s3045_s16 + $0x390] sm:$0xff] %vm1952_vm0, %v2603_v54  ;;  %v2605_v56 = vsel %vm715_vm12, 1.0, %v2995_v11  ;;  %vm716_vm13 = vcmp.eq.s32.totalorder %v260_v49, %v3036_v6  ;;  %vm717_vm14 = vcmp.eq.s32.totalorder %v261_v50, %v3036_v6  ;;  %vm718_vm15 = vcmp.eq.s32.totalorder %v262_v51, %v3036_v6 }
  0x69   : > { %2068 = vst.msk [vmem:[%s3045_s16 + $0x398] sm:$0xff] %vm1952_vm0, %v2604_v55  ;;  %2069 = vst.msk [vmem:[%s3045_s16 + $0x3a0] sm:$0xff] %vm1952_vm0, %v2605_v56  ;;  %v2606_v57 = vsel %vm716_vm13, 1.0, %v2995_v11  ;;  %v2607_v58 = vsel %vm717_vm14, 1.0, %v2995_v11  ;;  %v2608_v59 = vsel %vm718_vm15, 1.0, %v2995_v11  ;;  %v263_v60 = vadd.s32 960, %v3024_v1 }
  0x6a   : > { %2070 = vst.msk [vmem:[%s3045_s16 + $0x3a8] sm:$0xff] %vm1952_vm0, %v2606_v57  ;;  %2071 = vst.msk [vmem:[%s3045_s16 + $0x3b0] sm:$0xff] %vm1952_vm0, %v2607_v58  ;;  %v264_v61 = vadd.s32 968, %v3024_v1  ;;  %v265_v62 = vadd.s32 976, %v3024_v1  ;;  %v266_v63 = vadd.s32 984, %v3024_v1  ;;  %v267_v0 = vadd.s32 992, %v3024_v1 }
  0x6b   : > { %2072 = vst.msk [vmem:[%s3045_s16 + $0x3b8] sm:$0xff] %vm1952_vm0, %v2608_v59  ;;  %vm719_vm1 = vcmp.eq.s32.totalorder %v263_v60, %v3036_v6  ;;  %v268_v2 = vadd.s32 1000, %v3024_v1  ;;  %v269_v3 = vadd.s32 1008, %v3024_v1  ;;  %v270_v4 = vadd.s32 1016, %v3024_v1 }
  0x6c   : > { %v2609_v5 = vsel %vm719_vm1, 1.0, %v2995_v11  ;;  %vm720_vm2 = vcmp.eq.s32.totalorder %v264_v61, %v3036_v6  ;;  %vm721_vm3 = vcmp.eq.s32.totalorder %v265_v62, %v3036_v6  ;;  %vm722_vm4 = vcmp.eq.s32.totalorder %v266_v63, %v3036_v6 }
  0x6d   : > { %2073 = vst.msk [vmem:[%s3045_s16 + $0x3c0] sm:$0xff] %vm1952_vm0, %v2609_v5  ;;  %v2610_v7 = vsel %vm720_vm2, 1.0, %v2995_v11  ;;  %v2611_v8 = vsel %vm721_vm3, 1.0, %v2995_v11  ;;  %v2612_v9 = vsel %vm722_vm4, 1.0, %v2995_v11  ;;  %vm723_vm5 = vcmp.eq.s32.totalorder %v267_v0, %v3036_v6 }
  0x6e   : > { %2074 = vst.msk [vmem:[%s3045_s16 + $0x3c8] sm:$0xff] %vm1952_vm0, %v2610_v7  ;;  %2075 = vst.msk [vmem:[%s3045_s16 + $0x3d0] sm:$0xff] %vm1952_vm0, %v2611_v8  ;;  %v2613_v10 = vsel %vm723_vm5, 1.0, %v2995_v11  ;;  %vm724_vm6 = vcmp.eq.s32.totalorder %v268_v2, %v3036_v6  ;;  %vm725_vm7 = vcmp.eq.s32.totalorder %v269_v3, %v3036_v6  ;;  %vm726_vm8 = vcmp.eq.s32.totalorder %v270_v4, %v3036_v6 }
  0x6f   : > { %2076 = vst.msk [vmem:[%s3045_s16 + $0x3d8] sm:$0xff] %vm1952_vm0, %v2612_v9  ;;  %2077 = vst.msk [vmem:[%s3045_s16 + $0x3e0] sm:$0xff] %vm1952_vm0, %v2613_v10  ;;  %v2614_v12 = vsel %vm724_vm6, 1.0, %v2995_v11  ;;  %v2615_v13 = vsel %vm725_vm7, 1.0, %v2995_v11  ;;  %v2616_v14 = vsel %vm726_vm8, 1.0, %v2995_v11  ;;  %v271_v15 = vadd.s32 1024, %v3024_v1 }
  0x70   : > { %2078 = vst.msk [vmem:[%s3045_s16 + $0x3e8] sm:$0xff] %vm1952_vm0, %v2614_v12  ;;  %2079 = vst.msk [vmem:[%s3045_s16 + $0x3f0] sm:$0xff] %vm1952_vm0, %v2615_v13  ;;  %v272_v16 = vadd.s32 1032, %v3024_v1  ;;  %v273_v6 = vadd.s32 1040, %v3024_v1  ;;  %v274_v17 = vadd.s32 1048, %v3024_v1  ;;  %v275_v18 = vadd.s32 1056, %v3024_v1 }
  0x71   : > { %2080 = vst.msk [vmem:[%s3045_s16 + $0x3f8] sm:$0xff] %vm1952_vm0, %v2616_v14  ;;  %vm727_vm9 = vcmp.eq.s32.totalorder %v271_v15, %v3685_v19  ;;  %v276_v20 = vadd.s32 1064, %v3024_v1  ;;  %v277_v21 = vadd.s32 1072, %v3024_v1  ;;  %v278_v22 = vadd.s32 1080, %v3024_v1 }
  0x72   : > { %v2617_v23 = vsel %vm727_vm9, 1.0, %v2995_v11  ;;  %vm728_vm10 = vcmp.eq.s32.totalorder %v272_v16, %v3685_v19  ;;  %vm729_vm11 = vcmp.eq.s32.totalorder %v273_v6, %v3685_v19  ;;  %vm730_vm12 = vcmp.eq.s32.totalorder %v274_v17, %v3685_v19 }
  0x73   : > { %2081 = vst.msk [vmem:[%s3045_s16 + $0x400] sm:$0xff] %vm1952_vm0, %v2617_v23  ;;  %v2618_v24 = vsel %vm728_vm10, 1.0, %v2995_v11  ;;  %v2619_v25 = vsel %vm729_vm11, 1.0, %v2995_v11  ;;  %v2620_v26 = vsel %vm730_vm12, 1.0, %v2995_v11  ;;  %vm731_vm13 = vcmp.eq.s32.totalorder %v275_v18, %v3685_v19 }
  0x74   : > { %2082 = vst.msk [vmem:[%s3045_s16 + $0x408] sm:$0xff] %vm1952_vm0, %v2618_v24  ;;  %2083 = vst.msk [vmem:[%s3045_s16 + $0x410] sm:$0xff] %vm1952_vm0, %v2619_v25  ;;  %v2621_v27 = vsel %vm731_vm13, 1.0, %v2995_v11  ;;  %vm732_vm14 = vcmp.eq.s32.totalorder %v276_v20, %v3685_v19  ;;  %vm733_vm15 = vcmp.eq.s32.totalorder %v277_v21, %v3685_v19  ;;  %vm734_vm1 = vcmp.eq.s32.totalorder %v278_v22, %v3685_v19 }
  0x75   : > { %2084 = vst.msk [vmem:[%s3045_s16 + $0x418] sm:$0xff] %vm1952_vm0, %v2620_v26  ;;  %2085 = vst.msk [vmem:[%s3045_s16 + $0x420] sm:$0xff] %vm1952_vm0, %v2621_v27  ;;  %v2622_v28 = vsel %vm732_vm14, 1.0, %v2995_v11  ;;  %v2623_v29 = vsel %vm733_vm15, 1.0, %v2995_v11  ;;  %v2624_v30 = vsel %vm734_vm1, 1.0, %v2995_v11  ;;  %v279_v31 = vadd.s32 1088, %v3024_v1 }
  0x76   : > { %2086 = vst.msk [vmem:[%s3045_s16 + $0x428] sm:$0xff] %vm1952_vm0, %v2622_v28  ;;  %2087 = vst.msk [vmem:[%s3045_s16 + $0x430] sm:$0xff] %vm1952_vm0, %v2623_v29  ;;  %v280_v32 = vadd.s32 1096, %v3024_v1  ;;  %v281_v33 = vadd.s32 1104, %v3024_v1  ;;  %v282_v34 = vadd.s32 1112, %v3024_v1  ;;  %v283_v35 = vadd.s32 1120, %v3024_v1 }
  0x77   : > { %2088 = vst.msk [vmem:[%s3045_s16 + $0x438] sm:$0xff] %vm1952_vm0, %v2624_v30  ;;  %vm735_vm2 = vcmp.eq.s32.totalorder %v279_v31, %v3685_v19  ;;  %v284_v36 = vadd.s32 1128, %v3024_v1  ;;  %v285_v37 = vadd.s32 1136, %v3024_v1  ;;  %v286_v38 = vadd.s32 1144, %v3024_v1 }
  0x78   : > { %v2625_v39 = vsel %vm735_vm2, 1.0, %v2995_v11  ;;  %vm736_vm3 = vcmp.eq.s32.totalorder %v280_v32, %v3685_v19  ;;  %vm737_vm4 = vcmp.eq.s32.totalorder %v281_v33, %v3685_v19  ;;  %vm738_vm5 = vcmp.eq.s32.totalorder %v282_v34, %v3685_v19 }
  0x79   : > { %2089 = vst.msk [vmem:[%s3045_s16 + $0x440] sm:$0xff] %vm1952_vm0, %v2625_v39  ;;  %v2626_v40 = vsel %vm736_vm3, 1.0, %v2995_v11  ;;  %v2627_v41 = vsel %vm737_vm4, 1.0, %v2995_v11  ;;  %v2628_v42 = vsel %vm738_vm5, 1.0, %v2995_v11  ;;  %vm739_vm6 = vcmp.eq.s32.totalorder %v283_v35, %v3685_v19 }
  0x7a   : > { %2090 = vst.msk [vmem:[%s3045_s16 + $0x448] sm:$0xff] %vm1952_vm0, %v2626_v40  ;;  %2091 = vst.msk [vmem:[%s3045_s16 + $0x450] sm:$0xff] %vm1952_vm0, %v2627_v41  ;;  %v2629_v43 = vsel %vm739_vm6, 1.0, %v2995_v11  ;;  %vm740_vm7 = vcmp.eq.s32.totalorder %v284_v36, %v3685_v19  ;;  %vm741_vm8 = vcmp.eq.s32.totalorder %v285_v37, %v3685_v19  ;;  %vm742_vm9 = vcmp.eq.s32.totalorder %v286_v38, %v3685_v19 }
  0x7b   : > { %2092 = vst.msk [vmem:[%s3045_s16 + $0x458] sm:$0xff] %vm1952_vm0, %v2628_v42  ;;  %2093 = vst.msk [vmem:[%s3045_s16 + $0x460] sm:$0xff] %vm1952_vm0, %v2629_v43  ;;  %v2630_v44 = vsel %vm740_vm7, 1.0, %v2995_v11  ;;  %v2631_v45 = vsel %vm741_vm8, 1.0, %v2995_v11  ;;  %v2632_v46 = vsel %vm742_vm9, 1.0, %v2995_v11  ;;  %v287_v47 = vadd.s32 1152, %v3024_v1 }
  0x7c   : > { %2094 = vst.msk [vmem:[%s3045_s16 + $0x468] sm:$0xff] %vm1952_vm0, %v2630_v44  ;;  %2095 = vst.msk [vmem:[%s3045_s16 + $0x470] sm:$0xff] %vm1952_vm0, %v2631_v45  ;;  %v288_v48 = vadd.s32 1160, %v3024_v1  ;;  %v289_v49 = vadd.s32 1168, %v3024_v1  ;;  %v290_v50 = vadd.s32 1176, %v3024_v1  ;;  %v291_v51 = vadd.s32 1184, %v3024_v1 }
  0x7d   : > { %2096 = vst.msk [vmem:[%s3045_s16 + $0x478] sm:$0xff] %vm1952_vm0, %v2632_v46  ;;  %vm743_vm10 = vcmp.eq.s32.totalorder %v287_v47, %v3685_v19  ;;  %v292_v52 = vadd.s32 1192, %v3024_v1  ;;  %v293_v53 = vadd.s32 1200, %v3024_v1  ;;  %v294_v54 = vadd.s32 1208, %v3024_v1 }
  0x7e   : > { %v2633_v55 = vsel %vm743_vm10, 1.0, %v2995_v11  ;;  %vm744_vm11 = vcmp.eq.s32.totalorder %v288_v48, %v3685_v19  ;;  %vm745_vm12 = vcmp.eq.s32.totalorder %v289_v49, %v3685_v19  ;;  %vm746_vm13 = vcmp.eq.s32.totalorder %v290_v50, %v3685_v19 }
  0x7f   : > { %2097 = vst.msk [vmem:[%s3045_s16 + $0x480] sm:$0xff] %vm1952_vm0, %v2633_v55  ;;  %v2634_v56 = vsel %vm744_vm11, 1.0, %v2995_v11  ;;  %v2635_v57 = vsel %vm745_vm12, 1.0, %v2995_v11  ;;  %v2636_v58 = vsel %vm746_vm13, 1.0, %v2995_v11  ;;  %vm747_vm14 = vcmp.eq.s32.totalorder %v291_v51, %v3685_v19 }
  0x80   : > { %2098 = vst.msk [vmem:[%s3045_s16 + $0x488] sm:$0xff] %vm1952_vm0, %v2634_v56  ;;  %2099 = vst.msk [vmem:[%s3045_s16 + $0x490] sm:$0xff] %vm1952_vm0, %v2635_v57  ;;  %v2637_v59 = vsel %vm747_vm14, 1.0, %v2995_v11  ;;  %vm748_vm15 = vcmp.eq.s32.totalorder %v292_v52, %v3685_v19  ;;  %vm749_vm1 = vcmp.eq.s32.totalorder %v293_v53, %v3685_v19  ;;  %vm750_vm2 = vcmp.eq.s32.totalorder %v294_v54, %v3685_v19 }
  0x81   : > { %2100 = vst.msk [vmem:[%s3045_s16 + $0x498] sm:$0xff] %vm1952_vm0, %v2636_v58  ;;  %2101 = vst.msk [vmem:[%s3045_s16 + $0x4a0] sm:$0xff] %vm1952_vm0, %v2637_v59  ;;  %v2638_v60 = vsel %vm748_vm15, 1.0, %v2995_v11  ;;  %v2639_v61 = vsel %vm749_vm1, 1.0, %v2995_v11  ;;  %v2640_v62 = vsel %vm750_vm2, 1.0, %v2995_v11  ;;  %v295_v63 = vadd.s32 1216, %v3024_v1 }
  0x82   : > { %2102 = vst.msk [vmem:[%s3045_s16 + $0x4a8] sm:$0xff] %vm1952_vm0, %v2638_v60  ;;  %2103 = vst.msk [vmem:[%s3045_s16 + $0x4b0] sm:$0xff] %vm1952_vm0, %v2639_v61  ;;  %v296_v0 = vadd.s32 1224, %v3024_v1  ;;  %v297_v2 = vadd.s32 1232, %v3024_v1  ;;  %v298_v3 = vadd.s32 1240, %v3024_v1  ;;  %v299_v4 = vadd.s32 1248, %v3024_v1 }
  0x83   : > { %2104 = vst.msk [vmem:[%s3045_s16 + $0x4b8] sm:$0xff] %vm1952_vm0, %v2640_v62  ;;  %vm751_vm3 = vcmp.eq.s32.totalorder %v295_v63, %v3685_v19  ;;  %v300_v5 = vadd.s32 1256, %v3024_v1  ;;  %v301_v7 = vadd.s32 1264, %v3024_v1  ;;  %v302_v8 = vadd.s32 1272, %v3024_v1 }
  0x84   : > { %v2641_v9 = vsel %vm751_vm3, 1.0, %v2995_v11  ;;  %vm752_vm4 = vcmp.eq.s32.totalorder %v296_v0, %v3685_v19  ;;  %vm753_vm5 = vcmp.eq.s32.totalorder %v297_v2, %v3685_v19  ;;  %vm754_vm6 = vcmp.eq.s32.totalorder %v298_v3, %v3685_v19 }
  0x85   : > { %2105 = vst.msk [vmem:[%s3045_s16 + $0x4c0] sm:$0xff] %vm1952_vm0, %v2641_v9  ;;  %v2642_v10 = vsel %vm752_vm4, 1.0, %v2995_v11  ;;  %v2643_v12 = vsel %vm753_vm5, 1.0, %v2995_v11  ;;  %v2644_v13 = vsel %vm754_vm6, 1.0, %v2995_v11  ;;  %vm755_vm7 = vcmp.eq.s32.totalorder %v299_v4, %v3685_v19 }
  0x86   : > { %2106 = vst.msk [vmem:[%s3045_s16 + $0x4c8] sm:$0xff] %vm1952_vm0, %v2642_v10  ;;  %2107 = vst.msk [vmem:[%s3045_s16 + $0x4d0] sm:$0xff] %vm1952_vm0, %v2643_v12  ;;  %v2645_v14 = vsel %vm755_vm7, 1.0, %v2995_v11  ;;  %vm756_vm8 = vcmp.eq.s32.totalorder %v300_v5, %v3685_v19  ;;  %vm757_vm9 = vcmp.eq.s32.totalorder %v301_v7, %v3685_v19  ;;  %vm758_vm10 = vcmp.eq.s32.totalorder %v302_v8, %v3685_v19 }
  0x87   : > { %2108 = vst.msk [vmem:[%s3045_s16 + $0x4d8] sm:$0xff] %vm1952_vm0, %v2644_v13  ;;  %2109 = vst.msk [vmem:[%s3045_s16 + $0x4e0] sm:$0xff] %vm1952_vm0, %v2645_v14  ;;  %v2646_v15 = vsel %vm756_vm8, 1.0, %v2995_v11  ;;  %v2647_v16 = vsel %vm757_vm9, 1.0, %v2995_v11  ;;  %v2648_v6 = vsel %vm758_vm10, 1.0, %v2995_v11  ;;  %v303_v17 = vadd.s32 1280, %v3024_v1 }
  0x88   : > { %2110 = vst.msk [vmem:[%s3045_s16 + $0x4e8] sm:$0xff] %vm1952_vm0, %v2646_v15  ;;  %2111 = vst.msk [vmem:[%s3045_s16 + $0x4f0] sm:$0xff] %vm1952_vm0, %v2647_v16  ;;  %v304_v18 = vadd.s32 1288, %v3024_v1  ;;  %v305_v20 = vadd.s32 1296, %v3024_v1  ;;  %v306_v21 = vadd.s32 1304, %v3024_v1  ;;  %v307_v22 = vadd.s32 1312, %v3024_v1 }
  0x89   : > { %2112 = vst.msk [vmem:[%s3045_s16 + $0x4f8] sm:$0xff] %vm1952_vm0, %v2648_v6  ;;  %vm759_vm11 = vcmp.eq.s32.totalorder %v303_v17, %v3685_v19  ;;  %v308_v23 = vadd.s32 1320, %v3024_v1  ;;  %v309_v24 = vadd.s32 1328, %v3024_v1  ;;  %v310_v25 = vadd.s32 1336, %v3024_v1 }
  0x8a   : > { %v2649_v26 = vsel %vm759_vm11, 1.0, %v2995_v11  ;;  %vm760_vm12 = vcmp.eq.s32.totalorder %v304_v18, %v3685_v19  ;;  %vm761_vm13 = vcmp.eq.s32.totalorder %v305_v20, %v3685_v19  ;;  %vm762_vm14 = vcmp.eq.s32.totalorder %v306_v21, %v3685_v19 }
  0x8b   : > { %2113 = vst.msk [vmem:[%s3045_s16 + $0x500] sm:$0xff] %vm1952_vm0, %v2649_v26  ;;  %v2650_v27 = vsel %vm760_vm12, 1.0, %v2995_v11  ;;  %v2651_v28 = vsel %vm761_vm13, 1.0, %v2995_v11  ;;  %v2652_v29 = vsel %vm762_vm14, 1.0, %v2995_v11  ;;  %vm763_vm15 = vcmp.eq.s32.totalorder %v307_v22, %v3685_v19 }
  0x8c   : > { %2114 = vst.msk [vmem:[%s3045_s16 + $0x508] sm:$0xff] %vm1952_vm0, %v2650_v27  ;;  %2115 = vst.msk [vmem:[%s3045_s16 + $0x510] sm:$0xff] %vm1952_vm0, %v2651_v28  ;;  %v2653_v30 = vsel %vm763_vm15, 1.0, %v2995_v11  ;;  %vm764_vm1 = vcmp.eq.s32.totalorder %v308_v23, %v3685_v19  ;;  %vm765_vm2 = vcmp.eq.s32.totalorder %v309_v24, %v3685_v19  ;;  %vm766_vm3 = vcmp.eq.s32.totalorder %v310_v25, %v3685_v19 }
  0x8d   : > { %2116 = vst.msk [vmem:[%s3045_s16 + $0x518] sm:$0xff] %vm1952_vm0, %v2652_v29  ;;  %2117 = vst.msk [vmem:[%s3045_s16 + $0x520] sm:$0xff] %vm1952_vm0, %v2653_v30  ;;  %v2654_v31 = vsel %vm764_vm1, 1.0, %v2995_v11  ;;  %v2655_v32 = vsel %vm765_vm2, 1.0, %v2995_v11  ;;  %v2656_v33 = vsel %vm766_vm3, 1.0, %v2995_v11  ;;  %v311_v34 = vadd.s32 1344, %v3024_v1 }
  0x8e   : > { %2118 = vst.msk [vmem:[%s3045_s16 + $0x528] sm:$0xff] %vm1952_vm0, %v2654_v31  ;;  %2119 = vst.msk [vmem:[%s3045_s16 + $0x530] sm:$0xff] %vm1952_vm0, %v2655_v32  ;;  %v312_v35 = vadd.s32 1352, %v3024_v1  ;;  %v313_v36 = vadd.s32 1360, %v3024_v1  ;;  %v314_v37 = vadd.s32 1368, %v3024_v1  ;;  %v315_v38 = vadd.s32 1376, %v3024_v1 }
  0x8f   : > { %2120 = vst.msk [vmem:[%s3045_s16 + $0x538] sm:$0xff] %vm1952_vm0, %v2656_v33  ;;  %vm767_vm4 = vcmp.eq.s32.totalorder %v311_v34, %v3685_v19  ;;  %v316_v39 = vadd.s32 1384, %v3024_v1  ;;  %v317_v40 = vadd.s32 1392, %v3024_v1  ;;  %v318_v41 = vadd.s32 1400, %v3024_v1 }
  0x90   : > { %v2657_v42 = vsel %vm767_vm4, 1.0, %v2995_v11  ;;  %vm768_vm5 = vcmp.eq.s32.totalorder %v312_v35, %v3685_v19  ;;  %vm769_vm6 = vcmp.eq.s32.totalorder %v313_v36, %v3685_v19  ;;  %vm770_vm7 = vcmp.eq.s32.totalorder %v314_v37, %v3685_v19 }
  0x91   : > { %2121 = vst.msk [vmem:[%s3045_s16 + $0x540] sm:$0xff] %vm1952_vm0, %v2657_v42  ;;  %v2658_v43 = vsel %vm768_vm5, 1.0, %v2995_v11  ;;  %v2659_v44 = vsel %vm769_vm6, 1.0, %v2995_v11  ;;  %v2660_v45 = vsel %vm770_vm7, 1.0, %v2995_v11  ;;  %vm771_vm8 = vcmp.eq.s32.totalorder %v315_v38, %v3685_v19 }
  0x92   : > { %2122 = vst.msk [vmem:[%s3045_s16 + $0x548] sm:$0xff] %vm1952_vm0, %v2658_v43  ;;  %2123 = vst.msk [vmem:[%s3045_s16 + $0x550] sm:$0xff] %vm1952_vm0, %v2659_v44  ;;  %v2661_v46 = vsel %vm771_vm8, 1.0, %v2995_v11  ;;  %vm772_vm9 = vcmp.eq.s32.totalorder %v316_v39, %v3685_v19  ;;  %vm773_vm10 = vcmp.eq.s32.totalorder %v317_v40, %v3685_v19  ;;  %vm774_vm11 = vcmp.eq.s32.totalorder %v318_v41, %v3685_v19 }
  0x93   : > { %2124 = vst.msk [vmem:[%s3045_s16 + $0x558] sm:$0xff] %vm1952_vm0, %v2660_v45  ;;  %2125 = vst.msk [vmem:[%s3045_s16 + $0x560] sm:$0xff] %vm1952_vm0, %v2661_v46  ;;  %v2662_v47 = vsel %vm772_vm9, 1.0, %v2995_v11  ;;  %v2663_v48 = vsel %vm773_vm10, 1.0, %v2995_v11  ;;  %v2664_v49 = vsel %vm774_vm11, 1.0, %v2995_v11  ;;  %v319_v50 = vadd.s32 1408, %v3024_v1 }
  0x94   : > { %2126 = vst.msk [vmem:[%s3045_s16 + $0x568] sm:$0xff] %vm1952_vm0, %v2662_v47  ;;  %2127 = vst.msk [vmem:[%s3045_s16 + $0x570] sm:$0xff] %vm1952_vm0, %v2663_v48  ;;  %v320_v51 = vadd.s32 1416, %v3024_v1  ;;  %v321_v52 = vadd.s32 1424, %v3024_v1  ;;  %v322_v53 = vadd.s32 1432, %v3024_v1  ;;  %v323_v54 = vadd.s32 1440, %v3024_v1 }
  0x95   : > { %2128 = vst.msk [vmem:[%s3045_s16 + $0x578] sm:$0xff] %vm1952_vm0, %v2664_v49  ;;  %vm775_vm12 = vcmp.eq.s32.totalorder %v319_v50, %v3685_v19  ;;  %v324_v55 = vadd.s32 1448, %v3024_v1  ;;  %v325_v56 = vadd.s32 1456, %v3024_v1  ;;  %v326_v57 = vadd.s32 1464, %v3024_v1 }
  0x96   : > { %v2665_v58 = vsel %vm775_vm12, 1.0, %v2995_v11  ;;  %vm776_vm13 = vcmp.eq.s32.totalorder %v320_v51, %v3685_v19  ;;  %vm777_vm14 = vcmp.eq.s32.totalorder %v321_v52, %v3685_v19  ;;  %vm778_vm15 = vcmp.eq.s32.totalorder %v322_v53, %v3685_v19 }
  0x97   : > { %2129 = vst.msk [vmem:[%s3045_s16 + $0x580] sm:$0xff] %vm1952_vm0, %v2665_v58  ;;  %v2666_v59 = vsel %vm776_vm13, 1.0, %v2995_v11  ;;  %v2667_v60 = vsel %vm777_vm14, 1.0, %v2995_v11  ;;  %v2668_v61 = vsel %vm778_vm15, 1.0, %v2995_v11  ;;  %vm779_vm1 = vcmp.eq.s32.totalorder %v323_v54, %v3685_v19 }
  0x98   : > { %2130 = vst.msk [vmem:[%s3045_s16 + $0x588] sm:$0xff] %vm1952_vm0, %v2666_v59  ;;  %2131 = vst.msk [vmem:[%s3045_s16 + $0x590] sm:$0xff] %vm1952_vm0, %v2667_v60  ;;  %v2669_v62 = vsel %vm779_vm1, 1.0, %v2995_v11  ;;  %vm780_vm2 = vcmp.eq.s32.totalorder %v324_v55, %v3685_v19  ;;  %vm781_vm3 = vcmp.eq.s32.totalorder %v325_v56, %v3685_v19  ;;  %vm782_vm4 = vcmp.eq.s32.totalorder %v326_v57, %v3685_v19 }
  0x99   : > { %2132 = vst.msk [vmem:[%s3045_s16 + $0x598] sm:$0xff] %vm1952_vm0, %v2668_v61  ;;  %2133 = vst.msk [vmem:[%s3045_s16 + $0x5a0] sm:$0xff] %vm1952_vm0, %v2669_v62  ;;  %v2670_v63 = vsel %vm780_vm2, 1.0, %v2995_v11  ;;  %v2671_v0 = vsel %vm781_vm3, 1.0, %v2995_v11  ;;  %v2672_v2 = vsel %vm782_vm4, 1.0, %v2995_v11  ;;  %v327_v3 = vadd.s32 1472, %v3024_v1 }
  0x9a   : > { %2134 = vst.msk [vmem:[%s3045_s16 + $0x5a8] sm:$0xff] %vm1952_vm0, %v2670_v63  ;;  %2135 = vst.msk [vmem:[%s3045_s16 + $0x5b0] sm:$0xff] %vm1952_vm0, %v2671_v0  ;;  %v328_v4 = vadd.s32 1480, %v3024_v1  ;;  %v329_v5 = vadd.s32 1488, %v3024_v1  ;;  %v330_v7 = vadd.s32 1496, %v3024_v1  ;;  %v331_v8 = vadd.s32 1504, %v3024_v1 }
  0x9b   : > { %2136 = vst.msk [vmem:[%s3045_s16 + $0x5b8] sm:$0xff] %vm1952_vm0, %v2672_v2  ;;  %vm783_vm5 = vcmp.eq.s32.totalorder %v327_v3, %v3685_v19  ;;  %v332_v9 = vadd.s32 1512, %v3024_v1  ;;  %v333_v10 = vadd.s32 1520, %v3024_v1  ;;  %v334_v12 = vadd.s32 1528, %v3024_v1 }
  0x9c   : > { %v2673_v13 = vsel %vm783_vm5, 1.0, %v2995_v11  ;;  %vm784_vm6 = vcmp.eq.s32.totalorder %v328_v4, %v3685_v19  ;;  %vm785_vm7 = vcmp.eq.s32.totalorder %v329_v5, %v3685_v19  ;;  %vm786_vm8 = vcmp.eq.s32.totalorder %v330_v7, %v3685_v19 }
  0x9d   : > { %2137 = vst.msk [vmem:[%s3045_s16 + $0x5c0] sm:$0xff] %vm1952_vm0, %v2673_v13  ;;  %v2674_v14 = vsel %vm784_vm6, 1.0, %v2995_v11  ;;  %v2675_v15 = vsel %vm785_vm7, 1.0, %v2995_v11  ;;  %v2676_v16 = vsel %vm786_vm8, 1.0, %v2995_v11  ;;  %vm787_vm9 = vcmp.eq.s32.totalorder %v331_v8, %v3685_v19 }
  0x9e   : > { %2138 = vst.msk [vmem:[%s3045_s16 + $0x5c8] sm:$0xff] %vm1952_vm0, %v2674_v14  ;;  %2139 = vst.msk [vmem:[%s3045_s16 + $0x5d0] sm:$0xff] %vm1952_vm0, %v2675_v15  ;;  %v2677_v6 = vsel %vm787_vm9, 1.0, %v2995_v11  ;;  %vm788_vm10 = vcmp.eq.s32.totalorder %v332_v9, %v3685_v19  ;;  %vm789_vm11 = vcmp.eq.s32.totalorder %v333_v10, %v3685_v19  ;;  %vm790_vm12 = vcmp.eq.s32.totalorder %v334_v12, %v3685_v19 }
  0x9f   : > { %2140 = vst.msk [vmem:[%s3045_s16 + $0x5d8] sm:$0xff] %vm1952_vm0, %v2676_v16  ;;  %2141 = vst.msk [vmem:[%s3045_s16 + $0x5e0] sm:$0xff] %vm1952_vm0, %v2677_v6  ;;  %v2678_v17 = vsel %vm788_vm10, 1.0, %v2995_v11  ;;  %v2679_v18 = vsel %vm789_vm11, 1.0, %v2995_v11  ;;  %v2680_v20 = vsel %vm790_vm12, 1.0, %v2995_v11  ;;  %v335_v21 = vadd.s32 1536, %v3024_v1 }
  0xa0   : > { %2142 = vst.msk [vmem:[%s3045_s16 + $0x5e8] sm:$0xff] %vm1952_vm0, %v2678_v17  ;;  %2143 = vst.msk [vmem:[%s3045_s16 + $0x5f0] sm:$0xff] %vm1952_vm0, %v2679_v18  ;;  %v336_v22 = vadd.s32 1544, %v3024_v1  ;;  %v337_v23 = vadd.s32 1552, %v3024_v1  ;;  %v338_v24 = vadd.s32 1560, %v3024_v1  ;;  %v339_v25 = vadd.s32 1568, %v3024_v1 }
  0xa1   : > { %2144 = vst.msk [vmem:[%s3045_s16 + $0x5f8] sm:$0xff] %vm1952_vm0, %v2680_v20  ;;  %vm791_vm13 = vcmp.eq.s32.totalorder %v335_v21, %v3685_v19  ;;  %v340_v26 = vadd.s32 1576, %v3024_v1  ;;  %v341_v27 = vadd.s32 1584, %v3024_v1  ;;  %v342_v28 = vadd.s32 1592, %v3024_v1 }
  0xa2   : > { %v2681_v29 = vsel %vm791_vm13, 1.0, %v2995_v11  ;;  %vm792_vm14 = vcmp.eq.s32.totalorder %v336_v22, %v3685_v19  ;;  %vm793_vm15 = vcmp.eq.s32.totalorder %v337_v23, %v3685_v19  ;;  %vm794_vm1 = vcmp.eq.s32.totalorder %v338_v24, %v3685_v19 }
  0xa3   : > { %2145 = vst.msk [vmem:[%s3045_s16 + $0x600] sm:$0xff] %vm1952_vm0, %v2681_v29  ;;  %v2682_v30 = vsel %vm792_vm14, 1.0, %v2995_v11  ;;  %v2683_v31 = vsel %vm793_vm15, 1.0, %v2995_v11  ;;  %v2684_v32 = vsel %vm794_vm1, 1.0, %v2995_v11  ;;  %vm795_vm2 = vcmp.eq.s32.totalorder %v339_v25, %v3685_v19 }
  0xa4   : > { %2146 = vst.msk [vmem:[%s3045_s16 + $0x608] sm:$0xff] %vm1952_vm0, %v2682_v30  ;;  %2147 = vst.msk [vmem:[%s3045_s16 + $0x610] sm:$0xff] %vm1952_vm0, %v2683_v31  ;;  %v2685_v33 = vsel %vm795_vm2, 1.0, %v2995_v11  ;;  %vm796_vm3 = vcmp.eq.s32.totalorder %v340_v26, %v3685_v19  ;;  %vm797_vm4 = vcmp.eq.s32.totalorder %v341_v27, %v3685_v19  ;;  %vm798_vm5 = vcmp.eq.s32.totalorder %v342_v28, %v3685_v19 }
  0xa5   : > { %2148 = vst.msk [vmem:[%s3045_s16 + $0x618] sm:$0xff] %vm1952_vm0, %v2684_v32  ;;  %2149 = vst.msk [vmem:[%s3045_s16 + $0x620] sm:$0xff] %vm1952_vm0, %v2685_v33  ;;  %v2686_v34 = vsel %vm796_vm3, 1.0, %v2995_v11  ;;  %v2687_v35 = vsel %vm797_vm4, 1.0, %v2995_v11  ;;  %v2688_v36 = vsel %vm798_vm5, 1.0, %v2995_v11  ;;  %v343_v37 = vadd.s32 1600, %v3024_v1 }
  0xa6   : > { %2150 = vst.msk [vmem:[%s3045_s16 + $0x628] sm:$0xff] %vm1952_vm0, %v2686_v34  ;;  %2151 = vst.msk [vmem:[%s3045_s16 + $0x630] sm:$0xff] %vm1952_vm0, %v2687_v35  ;;  %v344_v38 = vadd.s32 1608, %v3024_v1  ;;  %v345_v39 = vadd.s32 1616, %v3024_v1  ;;  %v346_v40 = vadd.s32 1624, %v3024_v1  ;;  %v347_v41 = vadd.s32 1632, %v3024_v1 }
  0xa7   : > { %2152 = vst.msk [vmem:[%s3045_s16 + $0x638] sm:$0xff] %vm1952_vm0, %v2688_v36  ;;  %vm799_vm6 = vcmp.eq.s32.totalorder %v343_v37, %v3685_v19  ;;  %v348_v42 = vadd.s32 1640, %v3024_v1  ;;  %v349_v43 = vadd.s32 1648, %v3024_v1  ;;  %v350_v44 = vadd.s32 1656, %v3024_v1 }
  0xa8   : > { %v2689_v45 = vsel %vm799_vm6, 1.0, %v2995_v11  ;;  %vm800_vm7 = vcmp.eq.s32.totalorder %v344_v38, %v3685_v19  ;;  %vm801_vm8 = vcmp.eq.s32.totalorder %v345_v39, %v3685_v19  ;;  %vm802_vm9 = vcmp.eq.s32.totalorder %v346_v40, %v3685_v19 }
  0xa9   : > { %2153 = vst.msk [vmem:[%s3045_s16 + $0x640] sm:$0xff] %vm1952_vm0, %v2689_v45  ;;  %v2690_v46 = vsel %vm800_vm7, 1.0, %v2995_v11  ;;  %v2691_v47 = vsel %vm801_vm8, 1.0, %v2995_v11  ;;  %v2692_v48 = vsel %vm802_vm9, 1.0, %v2995_v11  ;;  %vm803_vm10 = vcmp.eq.s32.totalorder %v347_v41, %v3685_v19 }
  0xaa   : > { %2154 = vst.msk [vmem:[%s3045_s16 + $0x648] sm:$0xff] %vm1952_vm0, %v2690_v46  ;;  %2155 = vst.msk [vmem:[%s3045_s16 + $0x650] sm:$0xff] %vm1952_vm0, %v2691_v47  ;;  %v2693_v49 = vsel %vm803_vm10, 1.0, %v2995_v11  ;;  %vm804_vm11 = vcmp.eq.s32.totalorder %v348_v42, %v3685_v19  ;;  %vm805_vm12 = vcmp.eq.s32.totalorder %v349_v43, %v3685_v19  ;;  %vm806_vm13 = vcmp.eq.s32.totalorder %v350_v44, %v3685_v19 }
  0xab   : > { %2156 = vst.msk [vmem:[%s3045_s16 + $0x658] sm:$0xff] %vm1952_vm0, %v2692_v48  ;;  %2157 = vst.msk [vmem:[%s3045_s16 + $0x660] sm:$0xff] %vm1952_vm0, %v2693_v49  ;;  %v2694_v50 = vsel %vm804_vm11, 1.0, %v2995_v11  ;;  %v2695_v51 = vsel %vm805_vm12, 1.0, %v2995_v11  ;;  %v2696_v52 = vsel %vm806_vm13, 1.0, %v2995_v11  ;;  %v351_v53 = vadd.s32 1664, %v3024_v1 }
  0xac   : > { %2158 = vst.msk [vmem:[%s3045_s16 + $0x668] sm:$0xff] %vm1952_vm0, %v2694_v50  ;;  %2159 = vst.msk [vmem:[%s3045_s16 + $0x670] sm:$0xff] %vm1952_vm0, %v2695_v51  ;;  %v352_v54 = vadd.s32 1672, %v3024_v1  ;;  %v353_v55 = vadd.s32 1680, %v3024_v1  ;;  %v354_v56 = vadd.s32 1688, %v3024_v1  ;;  %v355_v57 = vadd.s32 1696, %v3024_v1 }
  0xad   : > { %2160 = vst.msk [vmem:[%s3045_s16 + $0x678] sm:$0xff] %vm1952_vm0, %v2696_v52  ;;  %vm807_vm14 = vcmp.eq.s32.totalorder %v351_v53, %v3685_v19  ;;  %v356_v58 = vadd.s32 1704, %v3024_v1  ;;  %v357_v59 = vadd.s32 1712, %v3024_v1  ;;  %v358_v60 = vadd.s32 1720, %v3024_v1 }
  0xae   : > { %v2697_v61 = vsel %vm807_vm14, 1.0, %v2995_v11  ;;  %vm808_vm15 = vcmp.eq.s32.totalorder %v352_v54, %v3685_v19  ;;  %vm809_vm1 = vcmp.eq.s32.totalorder %v353_v55, %v3685_v19  ;;  %vm810_vm2 = vcmp.eq.s32.totalorder %v354_v56, %v3685_v19 }
  0xaf   : > { %2161 = vst.msk [vmem:[%s3045_s16 + $0x680] sm:$0xff] %vm1952_vm0, %v2697_v61  ;;  %v2698_v62 = vsel %vm808_vm15, 1.0, %v2995_v11  ;;  %v2699_v63 = vsel %vm809_vm1, 1.0, %v2995_v11  ;;  %v2700_v0 = vsel %vm810_vm2, 1.0, %v2995_v11  ;;  %vm811_vm3 = vcmp.eq.s32.totalorder %v355_v57, %v3685_v19 }
  0xb0   : > { %2162 = vst.msk [vmem:[%s3045_s16 + $0x688] sm:$0xff] %vm1952_vm0, %v2698_v62  ;;  %2163 = vst.msk [vmem:[%s3045_s16 + $0x690] sm:$0xff] %vm1952_vm0, %v2699_v63  ;;  %v2701_v2 = vsel %vm811_vm3, 1.0, %v2995_v11  ;;  %vm812_vm4 = vcmp.eq.s32.totalorder %v356_v58, %v3685_v19  ;;  %vm813_vm5 = vcmp.eq.s32.totalorder %v357_v59, %v3685_v19  ;;  %vm814_vm6 = vcmp.eq.s32.totalorder %v358_v60, %v3685_v19 }
  0xb1   : > { %2164 = vst.msk [vmem:[%s3045_s16 + $0x698] sm:$0xff] %vm1952_vm0, %v2700_v0  ;;  %2165 = vst.msk [vmem:[%s3045_s16 + $0x6a0] sm:$0xff] %vm1952_vm0, %v2701_v2  ;;  %v2702_v3 = vsel %vm812_vm4, 1.0, %v2995_v11  ;;  %v2703_v4 = vsel %vm813_vm5, 1.0, %v2995_v11  ;;  %v2704_v5 = vsel %vm814_vm6, 1.0, %v2995_v11  ;;  %v359_v7 = vadd.s32 1728, %v3024_v1 }
  0xb2   : > { %2166 = vst.msk [vmem:[%s3045_s16 + $0x6a8] sm:$0xff] %vm1952_vm0, %v2702_v3  ;;  %2167 = vst.msk [vmem:[%s3045_s16 + $0x6b0] sm:$0xff] %vm1952_vm0, %v2703_v4  ;;  %v360_v8 = vadd.s32 1736, %v3024_v1  ;;  %v361_v9 = vadd.s32 1744, %v3024_v1  ;;  %v362_v10 = vadd.s32 1752, %v3024_v1  ;;  %v363_v12 = vadd.s32 1760, %v3024_v1 }
  0xb3   : > { %2168 = vst.msk [vmem:[%s3045_s16 + $0x6b8] sm:$0xff] %vm1952_vm0, %v2704_v5  ;;  %vm815_vm7 = vcmp.eq.s32.totalorder %v359_v7, %v3685_v19  ;;  %v364_v13 = vadd.s32 1768, %v3024_v1  ;;  %v365_v14 = vadd.s32 1776, %v3024_v1  ;;  %v366_v15 = vadd.s32 1784, %v3024_v1 }
  0xb4   : > { %v2705_v16 = vsel %vm815_vm7, 1.0, %v2995_v11  ;;  %vm816_vm8 = vcmp.eq.s32.totalorder %v360_v8, %v3685_v19  ;;  %vm817_vm9 = vcmp.eq.s32.totalorder %v361_v9, %v3685_v19  ;;  %vm818_vm10 = vcmp.eq.s32.totalorder %v362_v10, %v3685_v19 }
  0xb5   : > { %2169 = vst.msk [vmem:[%s3045_s16 + $0x6c0] sm:$0xff] %vm1952_vm0, %v2705_v16  ;;  %v2706_v6 = vsel %vm816_vm8, 1.0, %v2995_v11  ;;  %v2707_v17 = vsel %vm817_vm9, 1.0, %v2995_v11  ;;  %v2708_v18 = vsel %vm818_vm10, 1.0, %v2995_v11  ;;  %vm819_vm11 = vcmp.eq.s32.totalorder %v363_v12, %v3685_v19 }
  0xb6   : > { %2170 = vst.msk [vmem:[%s3045_s16 + $0x6c8] sm:$0xff] %vm1952_vm0, %v2706_v6  ;;  %2171 = vst.msk [vmem:[%s3045_s16 + $0x6d0] sm:$0xff] %vm1952_vm0, %v2707_v17  ;;  %v2709_v20 = vsel %vm819_vm11, 1.0, %v2995_v11  ;;  %vm820_vm12 = vcmp.eq.s32.totalorder %v364_v13, %v3685_v19  ;;  %vm821_vm13 = vcmp.eq.s32.totalorder %v365_v14, %v3685_v19  ;;  %vm822_vm14 = vcmp.eq.s32.totalorder %v366_v15, %v3685_v19 }
  0xb7   : > { %2172 = vst.msk [vmem:[%s3045_s16 + $0x6d8] sm:$0xff] %vm1952_vm0, %v2708_v18  ;;  %2173 = vst.msk [vmem:[%s3045_s16 + $0x6e0] sm:$0xff] %vm1952_vm0, %v2709_v20  ;;  %v2710_v21 = vsel %vm820_vm12, 1.0, %v2995_v11  ;;  %v2711_v22 = vsel %vm821_vm13, 1.0, %v2995_v11  ;;  %v2712_v23 = vsel %vm822_vm14, 1.0, %v2995_v11  ;;  %v367_v24 = vadd.s32 1792, %v3024_v1 }
  0xb8   : > { %2174 = vst.msk [vmem:[%s3045_s16 + $0x6e8] sm:$0xff] %vm1952_vm0, %v2710_v21  ;;  %2175 = vst.msk [vmem:[%s3045_s16 + $0x6f0] sm:$0xff] %vm1952_vm0, %v2711_v22  ;;  %v368_v25 = vadd.s32 1800, %v3024_v1  ;;  %v369_v26 = vadd.s32 1808, %v3024_v1  ;;  %v370_v27 = vadd.s32 1816, %v3024_v1  ;;  %v371_v28 = vadd.s32 1824, %v3024_v1 }
  0xb9   : > { %2176 = vst.msk [vmem:[%s3045_s16 + $0x6f8] sm:$0xff] %vm1952_vm0, %v2712_v23  ;;  %vm823_vm15 = vcmp.eq.s32.totalorder %v367_v24, %v3685_v19  ;;  %v372_v29 = vadd.s32 1832, %v3024_v1  ;;  %v373_v30 = vadd.s32 1840, %v3024_v1  ;;  %v374_v31 = vadd.s32 1848, %v3024_v1 }
  0xba   : > { %v2713_v32 = vsel %vm823_vm15, 1.0, %v2995_v11  ;;  %vm824_vm1 = vcmp.eq.s32.totalorder %v368_v25, %v3685_v19  ;;  %vm825_vm2 = vcmp.eq.s32.totalorder %v369_v26, %v3685_v19  ;;  %vm826_vm3 = vcmp.eq.s32.totalorder %v370_v27, %v3685_v19 }
  0xbb   : > { %2177 = vst.msk [vmem:[%s3045_s16 + $0x700] sm:$0xff] %vm1952_vm0, %v2713_v32  ;;  %v2714_v33 = vsel %vm824_vm1, 1.0, %v2995_v11  ;;  %v2715_v34 = vsel %vm825_vm2, 1.0, %v2995_v11  ;;  %v2716_v35 = vsel %vm826_vm3, 1.0, %v2995_v11  ;;  %vm827_vm4 = vcmp.eq.s32.totalorder %v371_v28, %v3685_v19 }
  0xbc   : > { %2178 = vst.msk [vmem:[%s3045_s16 + $0x708] sm:$0xff] %vm1952_vm0, %v2714_v33  ;;  %2179 = vst.msk [vmem:[%s3045_s16 + $0x710] sm:$0xff] %vm1952_vm0, %v2715_v34  ;;  %v2717_v36 = vsel %vm827_vm4, 1.0, %v2995_v11  ;;  %vm828_vm5 = vcmp.eq.s32.totalorder %v372_v29, %v3685_v19  ;;  %vm829_vm6 = vcmp.eq.s32.totalorder %v373_v30, %v3685_v19  ;;  %vm830_vm7 = vcmp.eq.s32.totalorder %v374_v31, %v3685_v19  ;;  %v4328_v31 = vld [vmem:[%s3029_s12] ss:$0 sm:$0xff] }
  0xbd   : > { %2180 = vst.msk [vmem:[%s3045_s16 + $0x718] sm:$0xff] %vm1952_vm0, %v2716_v35  ;;  %2181 = vst.msk [vmem:[%s3045_s16 + $0x720] sm:$0xff] %vm1952_vm0, %v2717_v36  ;;  %v2718_v37 = vsel %vm828_vm5, 1.0, %v2995_v11  ;;  %v2719_v38 = vsel %vm829_vm6, 1.0, %v2995_v11  ;;  %v2720_v39 = vsel %vm830_vm7, 1.0, %v2995_v11  ;;  %v375_v40 = vadd.s32 1856, %v3024_v1 }
  0xbe   : > { %2182 = vst.msk [vmem:[%s3045_s16 + $0x728] sm:$0xff] %vm1952_vm0, %v2718_v37  ;;  %2183 = vst.msk [vmem:[%s3045_s16 + $0x730] sm:$0xff] %vm1952_vm0, %v2719_v38  ;;  %v376_v41 = vadd.s32 1864, %v3024_v1  ;;  %v377_v42 = vadd.s32 1872, %v3024_v1  ;;  %v378_v43 = vadd.s32 1880, %v3024_v1  ;;  %v379_v44 = vadd.s32 1888, %v3024_v1 }
  0xbf   : > { %2184 = vst.msk [vmem:[%s3045_s16 + $0x738] sm:$0xff] %vm1952_vm0, %v2720_v39  ;;  %vm831_vm8 = vcmp.eq.s32.totalorder %v375_v40, %v3685_v19  ;;  %v380_v45 = vadd.s32 1896, %v3024_v1  ;;  %v381_v46 = vadd.s32 1904, %v3024_v1  ;;  %v382_v47 = vadd.s32 1912, %v3024_v1 }
  0xc0   : > { %v2721_v48 = vsel %vm831_vm8, 1.0, %v2995_v11  ;;  %vm832_vm9 = vcmp.eq.s32.totalorder %v376_v41, %v3685_v19  ;;  %vm833_vm10 = vcmp.eq.s32.totalorder %v377_v42, %v3685_v19  ;;  %vm834_vm11 = vcmp.eq.s32.totalorder %v378_v43, %v3685_v19 }
  0xc1   : > { %2185 = vst.msk [vmem:[%s3045_s16 + $0x740] sm:$0xff] %vm1952_vm0, %v2721_v48  ;;  %v2722_v49 = vsel %vm832_vm9, 1.0, %v2995_v11  ;;  %v2723_v50 = vsel %vm833_vm10, 1.0, %v2995_v11  ;;  %v2724_v51 = vsel %vm834_vm11, 1.0, %v2995_v11  ;;  %vm835_vm12 = vcmp.eq.s32.totalorder %v379_v44, %v3685_v19 }
  0xc2   : > { %2186 = vst.msk [vmem:[%s3045_s16 + $0x748] sm:$0xff] %vm1952_vm0, %v2722_v49  ;;  %2187 = vst.msk [vmem:[%s3045_s16 + $0x750] sm:$0xff] %vm1952_vm0, %v2723_v50  ;;  %v2725_v52 = vsel %vm835_vm12, 1.0, %v2995_v11  ;;  %vm836_vm13 = vcmp.eq.s32.totalorder %v380_v45, %v3685_v19  ;;  %vm837_vm14 = vcmp.eq.s32.totalorder %v381_v46, %v3685_v19  ;;  %vm838_vm15 = vcmp.eq.s32.totalorder %v382_v47, %v3685_v19 }
  0xc3   : > { %2188 = vst.msk [vmem:[%s3045_s16 + $0x758] sm:$0xff] %vm1952_vm0, %v2724_v51  ;;  %2189 = vst.msk [vmem:[%s3045_s16 + $0x760] sm:$0xff] %vm1952_vm0, %v2725_v52  ;;  %v2726_v53 = vsel %vm836_vm13, 1.0, %v2995_v11  ;;  %v2727_v54 = vsel %vm837_vm14, 1.0, %v2995_v11  ;;  %v2728_v55 = vsel %vm838_vm15, 1.0, %v2995_v11  ;;  %v383_v56 = vadd.s32 1920, %v3024_v1 }
  0xc4   : > { %2190 = vst.msk [vmem:[%s3045_s16 + $0x768] sm:$0xff] %vm1952_vm0, %v2726_v53  ;;  %2191 = vst.msk [vmem:[%s3045_s16 + $0x770] sm:$0xff] %vm1952_vm0, %v2727_v54  ;;  %v384_v57 = vadd.s32 1928, %v3024_v1  ;;  %v385_v58 = vadd.s32 1936, %v3024_v1  ;;  %v386_v59 = vadd.s32 1944, %v3024_v1  ;;  %v387_v60 = vadd.s32 1952, %v3024_v1 }
  0xc5   : > { %2192 = vst.msk [vmem:[%s3045_s16 + $0x778] sm:$0xff] %vm1952_vm0, %v2728_v55  ;;  %vm839_vm1 = vcmp.eq.s32.totalorder %v383_v56, %v3685_v19  ;;  %v388_v61 = vadd.s32 1960, %v3024_v1  ;;  %v389_v62 = vadd.s32 1968, %v3024_v1  ;;  %v390_v63 = vadd.s32 1976, %v3024_v1 }
  0xc6   : > { %v2729_v0 = vsel %vm839_vm1, 1.0, %v2995_v11  ;;  %vm840_vm2 = vcmp.eq.s32.totalorder %v384_v57, %v3685_v19  ;;  %vm841_vm3 = vcmp.eq.s32.totalorder %v385_v58, %v3685_v19  ;;  %vm842_vm4 = vcmp.eq.s32.totalorder %v386_v59, %v3685_v19 }
  0xc7   : > { %2193 = vst.msk [vmem:[%s3045_s16 + $0x780] sm:$0xff] %vm1952_vm0, %v2729_v0  ;;  %v2730_v2 = vsel %vm840_vm2, 1.0, %v2995_v11  ;;  %v2731_v3 = vsel %vm841_vm3, 1.0, %v2995_v11  ;;  %v2732_v4 = vsel %vm842_vm4, 1.0, %v2995_v11  ;;  %vm843_vm5 = vcmp.eq.s32.totalorder %v387_v60, %v3685_v19 }
  0xc8   : > { %2194 = vst.msk [vmem:[%s3045_s16 + $0x788] sm:$0xff] %vm1952_vm0, %v2730_v2  ;;  %2195 = vst.msk [vmem:[%s3045_s16 + $0x790] sm:$0xff] %vm1952_vm0, %v2731_v3  ;;  %v2733_v5 = vsel %vm843_vm5, 1.0, %v2995_v11  ;;  %vm844_vm6 = vcmp.eq.s32.totalorder %v388_v61, %v3685_v19  ;;  %vm845_vm7 = vcmp.eq.s32.totalorder %v389_v62, %v3685_v19  ;;  %vm846_vm8 = vcmp.eq.s32.totalorder %v390_v63, %v3685_v19 }
  0xc9   : > { %2196 = vst.msk [vmem:[%s3045_s16 + $0x798] sm:$0xff] %vm1952_vm0, %v2732_v4  ;;  %2197 = vst.msk [vmem:[%s3045_s16 + $0x7a0] sm:$0xff] %vm1952_vm0, %v2733_v5  ;;  %v2734_v7 = vsel %vm844_vm6, 1.0, %v2995_v11  ;;  %v2735_v8 = vsel %vm845_vm7, 1.0, %v2995_v11  ;;  %v2736_v9 = vsel %vm846_vm8, 1.0, %v2995_v11  ;;  %v391_v10 = vadd.s32 1984, %v3024_v1 }
  0xca   : > { %2198 = vst.msk [vmem:[%s3045_s16 + $0x7a8] sm:$0xff] %vm1952_vm0, %v2734_v7  ;;  %2199 = vst.msk [vmem:[%s3045_s16 + $0x7b0] sm:$0xff] %vm1952_vm0, %v2735_v8  ;;  %v392_v12 = vadd.s32 1992, %v3024_v1  ;;  %v393_v13 = vadd.s32 2000, %v3024_v1  ;;  %v394_v14 = vadd.s32 2008, %v3024_v1  ;;  %v395_v15 = vadd.s32 2016, %v3024_v1 }
  0xcb   : > { %2200 = vst.msk [vmem:[%s3045_s16 + $0x7b8] sm:$0xff] %vm1952_vm0, %v2736_v9  ;;  %vm847_vm9 = vcmp.eq.s32.totalorder %v391_v10, %v3685_v19  ;;  %v396_v16 = vadd.s32 2024, %v3024_v1  ;;  %v397_v6 = vadd.s32 2032, %v3024_v1  ;;  %v398_v17 = vadd.s32 2040, %v3024_v1 }
  0xcc   : > { %v2737_v18 = vsel %vm847_vm9, 1.0, %v2995_v11  ;;  %vm848_vm10 = vcmp.eq.s32.totalorder %v392_v12, %v3685_v19  ;;  %vm849_vm11 = vcmp.eq.s32.totalorder %v393_v13, %v3685_v19  ;;  %vm850_vm12 = vcmp.eq.s32.totalorder %v394_v14, %v3685_v19 }
  0xcd   : > { %2201 = vst.msk [vmem:[%s3045_s16 + $0x7c0] sm:$0xff] %vm1952_vm0, %v2737_v18  ;;  %v2738_v20 = vsel %vm848_vm10, 1.0, %v2995_v11  ;;  %v2739_v21 = vsel %vm849_vm11, 1.0, %v2995_v11  ;;  %v2740_v22 = vsel %vm850_vm12, 1.0, %v2995_v11  ;;  %vm851_vm13 = vcmp.eq.s32.totalorder %v395_v15, %v3685_v19 }
  0xce   : > { %2202 = vst.msk [vmem:[%s3045_s16 + $0x7c8] sm:$0xff] %vm1952_vm0, %v2738_v20  ;;  %2203 = vst.msk [vmem:[%s3045_s16 + $0x7d0] sm:$0xff] %vm1952_vm0, %v2739_v21  ;;  %v2741_v23 = vsel %vm851_vm13, 1.0, %v2995_v11  ;;  %vm852_vm14 = vcmp.eq.s32.totalorder %v396_v16, %v3685_v19  ;;  %vm853_vm15 = vcmp.eq.s32.totalorder %v397_v6, %v3685_v19  ;;  %vm854_vm1 = vcmp.eq.s32.totalorder %v398_v17, %v3685_v19 }
  0xcf   : > { %2204 = vst.msk [vmem:[%s3045_s16 + $0x7d8] sm:$0xff] %vm1952_vm0, %v2740_v22  ;;  %2205 = vst.msk [vmem:[%s3045_s16 + $0x7e0] sm:$0xff] %vm1952_vm0, %v2741_v23  ;;  %v2742_v24 = vsel %vm852_vm14, 1.0, %v2995_v11  ;;  %v2743_v25 = vsel %vm853_vm15, 1.0, %v2995_v11  ;;  %v2744_v26 = vsel %vm854_vm1, 1.0, %v2995_v11  ;;  %v399_v27 = vadd.s32 2048, %v3024_v1 }
  0xd0   : > { %2206 = vst.msk [vmem:[%s3045_s16 + $0x7e8] sm:$0xff] %vm1952_vm0, %v2742_v24  ;;  %2207 = vst.msk [vmem:[%s3045_s16 + $0x7f0] sm:$0xff] %vm1952_vm0, %v2743_v25  ;;  %v400_v28 = vadd.s32 2056, %v3024_v1  ;;  %v401_v19 = vadd.s32 2064, %v3024_v1  ;;  %v402_v29 = vadd.s32 2072, %v3024_v1  ;;  %v403_v30 = vadd.s32 2080, %v3024_v1 }
  0xd1   : > { %2208 = vst.msk [vmem:[%s3045_s16 + $0x7f8] sm:$0xff] %vm1952_vm0, %v2744_v26  ;;  %vm855_vm2 = vcmp.eq.s32.totalorder %v399_v27, %v4328_v31  ;;  %v404_v32 = vadd.s32 2088, %v3024_v1  ;;  %v405_v33 = vadd.s32 2096, %v3024_v1  ;;  %v406_v34 = vadd.s32 2104, %v3024_v1 }
  0xd2   : > { %v2745_v35 = vsel %vm855_vm2, 1.0, %v2995_v11  ;;  %vm856_vm3 = vcmp.eq.s32.totalorder %v400_v28, %v4328_v31  ;;  %vm857_vm4 = vcmp.eq.s32.totalorder %v401_v19, %v4328_v31  ;;  %vm858_vm5 = vcmp.eq.s32.totalorder %v402_v29, %v4328_v31 }
  0xd3   : > { %2209 = vst.msk [vmem:[%s3045_s16 + $0x800] sm:$0xff] %vm1952_vm0, %v2745_v35  ;;  %v2746_v36 = vsel %vm856_vm3, 1.0, %v2995_v11  ;;  %v2747_v37 = vsel %vm857_vm4, 1.0, %v2995_v11  ;;  %v2748_v38 = vsel %vm858_vm5, 1.0, %v2995_v11  ;;  %vm859_vm6 = vcmp.eq.s32.totalorder %v403_v30, %v4328_v31 }
  0xd4   : > { %2210 = vst.msk [vmem:[%s3045_s16 + $0x808] sm:$0xff] %vm1952_vm0, %v2746_v36  ;;  %2211 = vst.msk [vmem:[%s3045_s16 + $0x810] sm:$0xff] %vm1952_vm0, %v2747_v37  ;;  %v2749_v39 = vsel %vm859_vm6, 1.0, %v2995_v11  ;;  %vm860_vm7 = vcmp.eq.s32.totalorder %v404_v32, %v4328_v31  ;;  %vm861_vm8 = vcmp.eq.s32.totalorder %v405_v33, %v4328_v31  ;;  %vm862_vm9 = vcmp.eq.s32.totalorder %v406_v34, %v4328_v31 }
  0xd5   : > { %2212 = vst.msk [vmem:[%s3045_s16 + $0x818] sm:$0xff] %vm1952_vm0, %v2748_v38  ;;  %2213 = vst.msk [vmem:[%s3045_s16 + $0x820] sm:$0xff] %vm1952_vm0, %v2749_v39  ;;  %v2750_v40 = vsel %vm860_vm7, 1.0, %v2995_v11  ;;  %v2751_v41 = vsel %vm861_vm8, 1.0, %v2995_v11  ;;  %v2752_v42 = vsel %vm862_vm9, 1.0, %v2995_v11  ;;  %v407_v43 = vadd.s32 2112, %v3024_v1 }
  0xd6   : > { %2214 = vst.msk [vmem:[%s3045_s16 + $0x828] sm:$0xff] %vm1952_vm0, %v2750_v40  ;;  %2215 = vst.msk [vmem:[%s3045_s16 + $0x830] sm:$0xff] %vm1952_vm0, %v2751_v41  ;;  %v408_v44 = vadd.s32 2120, %v3024_v1  ;;  %v409_v45 = vadd.s32 2128, %v3024_v1  ;;  %v410_v46 = vadd.s32 2136, %v3024_v1  ;;  %v411_v47 = vadd.s32 2144, %v3024_v1 }
  0xd7   : > { %2216 = vst.msk [vmem:[%s3045_s16 + $0x838] sm:$0xff] %vm1952_vm0, %v2752_v42  ;;  %vm863_vm10 = vcmp.eq.s32.totalorder %v407_v43, %v4328_v31  ;;  %v412_v48 = vadd.s32 2152, %v3024_v1  ;;  %v413_v49 = vadd.s32 2160, %v3024_v1  ;;  %v414_v50 = vadd.s32 2168, %v3024_v1 }
  0xd8   : > { %v2753_v51 = vsel %vm863_vm10, 1.0, %v2995_v11  ;;  %vm864_vm11 = vcmp.eq.s32.totalorder %v408_v44, %v4328_v31  ;;  %vm865_vm12 = vcmp.eq.s32.totalorder %v409_v45, %v4328_v31  ;;  %vm866_vm13 = vcmp.eq.s32.totalorder %v410_v46, %v4328_v31 }
  0xd9   : > { %2217 = vst.msk [vmem:[%s3045_s16 + $0x840] sm:$0xff] %vm1952_vm0, %v2753_v51  ;;  %v2754_v52 = vsel %vm864_vm11, 1.0, %v2995_v11  ;;  %v2755_v53 = vsel %vm865_vm12, 1.0, %v2995_v11  ;;  %v2756_v54 = vsel %vm866_vm13, 1.0, %v2995_v11  ;;  %vm867_vm14 = vcmp.eq.s32.totalorder %v411_v47, %v4328_v31 }
  0xda   : > { %2218 = vst.msk [vmem:[%s3045_s16 + $0x848] sm:$0xff] %vm1952_vm0, %v2754_v52  ;;  %2219 = vst.msk [vmem:[%s3045_s16 + $0x850] sm:$0xff] %vm1952_vm0, %v2755_v53  ;;  %v2757_v55 = vsel %vm867_vm14, 1.0, %v2995_v11  ;;  %vm868_vm15 = vcmp.eq.s32.totalorder %v412_v48, %v4328_v31  ;;  %vm869_vm1 = vcmp.eq.s32.totalorder %v413_v49, %v4328_v31  ;;  %vm870_vm2 = vcmp.eq.s32.totalorder %v414_v50, %v4328_v31 }
  0xdb   : > { %2220 = vst.msk [vmem:[%s3045_s16 + $0x858] sm:$0xff] %vm1952_vm0, %v2756_v54  ;;  %2221 = vst.msk [vmem:[%s3045_s16 + $0x860] sm:$0xff] %vm1952_vm0, %v2757_v55  ;;  %v2758_v56 = vsel %vm868_vm15, 1.0, %v2995_v11  ;;  %v2759_v57 = vsel %vm869_vm1, 1.0, %v2995_v11  ;;  %v2760_v58 = vsel %vm870_vm2, 1.0, %v2995_v11  ;;  %v415_v59 = vadd.s32 2176, %v3024_v1 }
  0xdc   : > { %2222 = vst.msk [vmem:[%s3045_s16 + $0x868] sm:$0xff] %vm1952_vm0, %v2758_v56  ;;  %2223 = vst.msk [vmem:[%s3045_s16 + $0x870] sm:$0xff] %vm1952_vm0, %v2759_v57  ;;  %v416_v60 = vadd.s32 2184, %v3024_v1  ;;  %v417_v61 = vadd.s32 2192, %v3024_v1  ;;  %v418_v62 = vadd.s32 2200, %v3024_v1  ;;  %v419_v63 = vadd.s32 2208, %v3024_v1 }
  0xdd   : > { %2224 = vst.msk [vmem:[%s3045_s16 + $0x878] sm:$0xff] %vm1952_vm0, %v2760_v58  ;;  %vm871_vm3 = vcmp.eq.s32.totalorder %v415_v59, %v4328_v31  ;;  %v420_v0 = vadd.s32 2216, %v3024_v1  ;;  %v421_v2 = vadd.s32 2224, %v3024_v1  ;;  %v422_v3 = vadd.s32 2232, %v3024_v1 }
  0xde   : > { %v2761_v4 = vsel %vm871_vm3, 1.0, %v2995_v11  ;;  %vm872_vm4 = vcmp.eq.s32.totalorder %v416_v60, %v4328_v31  ;;  %vm873_vm5 = vcmp.eq.s32.totalorder %v417_v61, %v4328_v31  ;;  %vm874_vm6 = vcmp.eq.s32.totalorder %v418_v62, %v4328_v31 }
  0xdf   : > { %2225 = vst.msk [vmem:[%s3045_s16 + $0x880] sm:$0xff] %vm1952_vm0, %v2761_v4  ;;  %v2762_v5 = vsel %vm872_vm4, 1.0, %v2995_v11  ;;  %v2763_v7 = vsel %vm873_vm5, 1.0, %v2995_v11  ;;  %v2764_v8 = vsel %vm874_vm6, 1.0, %v2995_v11  ;;  %vm875_vm7 = vcmp.eq.s32.totalorder %v419_v63, %v4328_v31 }
  0xe0   : > { %2226 = vst.msk [vmem:[%s3045_s16 + $0x888] sm:$0xff] %vm1952_vm0, %v2762_v5  ;;  %2227 = vst.msk [vmem:[%s3045_s16 + $0x890] sm:$0xff] %vm1952_vm0, %v2763_v7  ;;  %v2765_v9 = vsel %vm875_vm7, 1.0, %v2995_v11  ;;  %vm876_vm8 = vcmp.eq.s32.totalorder %v420_v0, %v4328_v31  ;;  %vm877_vm9 = vcmp.eq.s32.totalorder %v421_v2, %v4328_v31  ;;  %vm878_vm10 = vcmp.eq.s32.totalorder %v422_v3, %v4328_v31 }
  0xe1   : > { %2228 = vst.msk [vmem:[%s3045_s16 + $0x898] sm:$0xff] %vm1952_vm0, %v2764_v8  ;;  %2229 = vst.msk [vmem:[%s3045_s16 + $0x8a0] sm:$0xff] %vm1952_vm0, %v2765_v9  ;;  %v2766_v10 = vsel %vm876_vm8, 1.0, %v2995_v11  ;;  %v2767_v12 = vsel %vm877_vm9, 1.0, %v2995_v11  ;;  %v2768_v13 = vsel %vm878_vm10, 1.0, %v2995_v11  ;;  %v423_v14 = vadd.s32 2240, %v3024_v1 }
  0xe2   : > { %2230 = vst.msk [vmem:[%s3045_s16 + $0x8a8] sm:$0xff] %vm1952_vm0, %v2766_v10  ;;  %2231 = vst.msk [vmem:[%s3045_s16 + $0x8b0] sm:$0xff] %vm1952_vm0, %v2767_v12  ;;  %v424_v15 = vadd.s32 2248, %v3024_v1  ;;  %v425_v16 = vadd.s32 2256, %v3024_v1  ;;  %v426_v6 = vadd.s32 2264, %v3024_v1  ;;  %v427_v17 = vadd.s32 2272, %v3024_v1 }
  0xe3   : > { %2232 = vst.msk [vmem:[%s3045_s16 + $0x8b8] sm:$0xff] %vm1952_vm0, %v2768_v13  ;;  %vm879_vm11 = vcmp.eq.s32.totalorder %v423_v14, %v4328_v31  ;;  %v428_v18 = vadd.s32 2280, %v3024_v1  ;;  %v429_v20 = vadd.s32 2288, %v3024_v1  ;;  %v430_v21 = vadd.s32 2296, %v3024_v1 }
  0xe4   : > { %v2769_v22 = vsel %vm879_vm11, 1.0, %v2995_v11  ;;  %vm880_vm12 = vcmp.eq.s32.totalorder %v424_v15, %v4328_v31  ;;  %vm881_vm13 = vcmp.eq.s32.totalorder %v425_v16, %v4328_v31  ;;  %vm882_vm14 = vcmp.eq.s32.totalorder %v426_v6, %v4328_v31 }
  0xe5   : > { %2233 = vst.msk [vmem:[%s3045_s16 + $0x8c0] sm:$0xff] %vm1952_vm0, %v2769_v22  ;;  %v2770_v23 = vsel %vm880_vm12, 1.0, %v2995_v11  ;;  %v2771_v24 = vsel %vm881_vm13, 1.0, %v2995_v11  ;;  %v2772_v25 = vsel %vm882_vm14, 1.0, %v2995_v11  ;;  %vm883_vm15 = vcmp.eq.s32.totalorder %v427_v17, %v4328_v31 }
  0xe6   : > { %2234 = vst.msk [vmem:[%s3045_s16 + $0x8c8] sm:$0xff] %vm1952_vm0, %v2770_v23  ;;  %2235 = vst.msk [vmem:[%s3045_s16 + $0x8d0] sm:$0xff] %vm1952_vm0, %v2771_v24  ;;  %v2773_v26 = vsel %vm883_vm15, 1.0, %v2995_v11  ;;  %vm884_vm1 = vcmp.eq.s32.totalorder %v428_v18, %v4328_v31  ;;  %vm885_vm2 = vcmp.eq.s32.totalorder %v429_v20, %v4328_v31  ;;  %vm886_vm3 = vcmp.eq.s32.totalorder %v430_v21, %v4328_v31 }
  0xe7   : > { %2236 = vst.msk [vmem:[%s3045_s16 + $0x8d8] sm:$0xff] %vm1952_vm0, %v2772_v25  ;;  %2237 = vst.msk [vmem:[%s3045_s16 + $0x8e0] sm:$0xff] %vm1952_vm0, %v2773_v26  ;;  %v2774_v27 = vsel %vm884_vm1, 1.0, %v2995_v11  ;;  %v2775_v28 = vsel %vm885_vm2, 1.0, %v2995_v11  ;;  %v2776_v19 = vsel %vm886_vm3, 1.0, %v2995_v11  ;;  %v431_v29 = vadd.s32 2304, %v3024_v1 }
  0xe8   : > { %2238 = vst.msk [vmem:[%s3045_s16 + $0x8e8] sm:$0xff] %vm1952_vm0, %v2774_v27  ;;  %2239 = vst.msk [vmem:[%s3045_s16 + $0x8f0] sm:$0xff] %vm1952_vm0, %v2775_v28  ;;  %v432_v30 = vadd.s32 2312, %v3024_v1  ;;  %v433_v32 = vadd.s32 2320, %v3024_v1  ;;  %v434_v33 = vadd.s32 2328, %v3024_v1  ;;  %v435_v34 = vadd.s32 2336, %v3024_v1 }
  0xe9   : > { %2240 = vst.msk [vmem:[%s3045_s16 + $0x8f8] sm:$0xff] %vm1952_vm0, %v2776_v19  ;;  %vm887_vm4 = vcmp.eq.s32.totalorder %v431_v29, %v4328_v31  ;;  %v436_v35 = vadd.s32 2344, %v3024_v1  ;;  %v437_v36 = vadd.s32 2352, %v3024_v1  ;;  %v438_v37 = vadd.s32 2360, %v3024_v1 }
  0xea   : > { %v2777_v38 = vsel %vm887_vm4, 1.0, %v2995_v11  ;;  %vm888_vm5 = vcmp.eq.s32.totalorder %v432_v30, %v4328_v31  ;;  %vm889_vm6 = vcmp.eq.s32.totalorder %v433_v32, %v4328_v31  ;;  %vm890_vm7 = vcmp.eq.s32.totalorder %v434_v33, %v4328_v31 }
  0xeb   : > { %2241 = vst.msk [vmem:[%s3045_s16 + $0x900] sm:$0xff] %vm1952_vm0, %v2777_v38  ;;  %v2778_v39 = vsel %vm888_vm5, 1.0, %v2995_v11  ;;  %v2779_v40 = vsel %vm889_vm6, 1.0, %v2995_v11  ;;  %v2780_v41 = vsel %vm890_vm7, 1.0, %v2995_v11  ;;  %vm891_vm8 = vcmp.eq.s32.totalorder %v435_v34, %v4328_v31 }
  0xec   : > { %2242 = vst.msk [vmem:[%s3045_s16 + $0x908] sm:$0xff] %vm1952_vm0, %v2778_v39  ;;  %2243 = vst.msk [vmem:[%s3045_s16 + $0x910] sm:$0xff] %vm1952_vm0, %v2779_v40  ;;  %v2781_v42 = vsel %vm891_vm8, 1.0, %v2995_v11  ;;  %vm892_vm9 = vcmp.eq.s32.totalorder %v436_v35, %v4328_v31  ;;  %vm893_vm10 = vcmp.eq.s32.totalorder %v437_v36, %v4328_v31  ;;  %vm894_vm11 = vcmp.eq.s32.totalorder %v438_v37, %v4328_v31 }
  0xed   : > { %2244 = vst.msk [vmem:[%s3045_s16 + $0x918] sm:$0xff] %vm1952_vm0, %v2780_v41  ;;  %2245 = vst.msk [vmem:[%s3045_s16 + $0x920] sm:$0xff] %vm1952_vm0, %v2781_v42  ;;  %v2782_v43 = vsel %vm892_vm9, 1.0, %v2995_v11  ;;  %v2783_v44 = vsel %vm893_vm10, 1.0, %v2995_v11  ;;  %v2784_v45 = vsel %vm894_vm11, 1.0, %v2995_v11  ;;  %v439_v46 = vadd.s32 2368, %v3024_v1 }
  0xee   : > { %2246 = vst.msk [vmem:[%s3045_s16 + $0x928] sm:$0xff] %vm1952_vm0, %v2782_v43  ;;  %2247 = vst.msk [vmem:[%s3045_s16 + $0x930] sm:$0xff] %vm1952_vm0, %v2783_v44  ;;  %v440_v47 = vadd.s32 2376, %v3024_v1  ;;  %v441_v48 = vadd.s32 2384, %v3024_v1  ;;  %v442_v49 = vadd.s32 2392, %v3024_v1  ;;  %v443_v50 = vadd.s32 2400, %v3024_v1 }
  0xef   : > { %2248 = vst.msk [vmem:[%s3045_s16 + $0x938] sm:$0xff] %vm1952_vm0, %v2784_v45  ;;  %vm895_vm12 = vcmp.eq.s32.totalorder %v439_v46, %v4328_v31  ;;  %v444_v51 = vadd.s32 2408, %v3024_v1  ;;  %v445_v52 = vadd.s32 2416, %v3024_v1  ;;  %v446_v53 = vadd.s32 2424, %v3024_v1 }
  0xf0   : > { %v2785_v54 = vsel %vm895_vm12, 1.0, %v2995_v11  ;;  %vm896_vm13 = vcmp.eq.s32.totalorder %v440_v47, %v4328_v31  ;;  %vm897_vm14 = vcmp.eq.s32.totalorder %v441_v48, %v4328_v31  ;;  %vm898_vm15 = vcmp.eq.s32.totalorder %v442_v49, %v4328_v31 }
  0xf1   : > { %2249 = vst.msk [vmem:[%s3045_s16 + $0x940] sm:$0xff] %vm1952_vm0, %v2785_v54  ;;  %v2786_v55 = vsel %vm896_vm13, 1.0, %v2995_v11  ;;  %v2787_v56 = vsel %vm897_vm14, 1.0, %v2995_v11  ;;  %v2788_v57 = vsel %vm898_vm15, 1.0, %v2995_v11  ;;  %vm899_vm1 = vcmp.eq.s32.totalorder %v443_v50, %v4328_v31 }
  0xf2   : > { %2250 = vst.msk [vmem:[%s3045_s16 + $0x948] sm:$0xff] %vm1952_vm0, %v2786_v55  ;;  %2251 = vst.msk [vmem:[%s3045_s16 + $0x950] sm:$0xff] %vm1952_vm0, %v2787_v56  ;;  %v2789_v58 = vsel %vm899_vm1, 1.0, %v2995_v11  ;;  %vm900_vm2 = vcmp.eq.s32.totalorder %v444_v51, %v4328_v31  ;;  %vm901_vm3 = vcmp.eq.s32.totalorder %v445_v52, %v4328_v31  ;;  %vm902_vm4 = vcmp.eq.s32.totalorder %v446_v53, %v4328_v31 }
  0xf3   : > { %2252 = vst.msk [vmem:[%s3045_s16 + $0x958] sm:$0xff] %vm1952_vm0, %v2788_v57  ;;  %2253 = vst.msk [vmem:[%s3045_s16 + $0x960] sm:$0xff] %vm1952_vm0, %v2789_v58  ;;  %v2790_v59 = vsel %vm900_vm2, 1.0, %v2995_v11  ;;  %v2791_v60 = vsel %vm901_vm3, 1.0, %v2995_v11  ;;  %v2792_v61 = vsel %vm902_vm4, 1.0, %v2995_v11  ;;  %v447_v62 = vadd.s32 2432, %v3024_v1 }
  0xf4   : > { %2254 = vst.msk [vmem:[%s3045_s16 + $0x968] sm:$0xff] %vm1952_vm0, %v2790_v59  ;;  %2255 = vst.msk [vmem:[%s3045_s16 + $0x970] sm:$0xff] %vm1952_vm0, %v2791_v60  ;;  %v448_v63 = vadd.s32 2440, %v3024_v1  ;;  %v449_v0 = vadd.s32 2448, %v3024_v1  ;;  %v450_v2 = vadd.s32 2456, %v3024_v1  ;;  %v451_v3 = vadd.s32 2464, %v3024_v1 }
  0xf5   : > { %2256 = vst.msk [vmem:[%s3045_s16 + $0x978] sm:$0xff] %vm1952_vm0, %v2792_v61  ;;  %vm903_vm5 = vcmp.eq.s32.totalorder %v447_v62, %v4328_v31  ;;  %v452_v4 = vadd.s32 2472, %v3024_v1  ;;  %v453_v5 = vadd.s32 2480, %v3024_v1  ;;  %v454_v7 = vadd.s32 2488, %v3024_v1 }
  0xf6   : > { %v2793_v8 = vsel %vm903_vm5, 1.0, %v2995_v11  ;;  %vm904_vm6 = vcmp.eq.s32.totalorder %v448_v63, %v4328_v31  ;;  %vm905_vm7 = vcmp.eq.s32.totalorder %v449_v0, %v4328_v31  ;;  %vm906_vm8 = vcmp.eq.s32.totalorder %v450_v2, %v4328_v31 }
  0xf7   : > { %2257 = vst.msk [vmem:[%s3045_s16 + $0x980] sm:$0xff] %vm1952_vm0, %v2793_v8  ;;  %v2794_v9 = vsel %vm904_vm6, 1.0, %v2995_v11  ;;  %v2795_v10 = vsel %vm905_vm7, 1.0, %v2995_v11  ;;  %v2796_v12 = vsel %vm906_vm8, 1.0, %v2995_v11  ;;  %vm907_vm9 = vcmp.eq.s32.totalorder %v451_v3, %v4328_v31 }
  0xf8   : > { %2258 = vst.msk [vmem:[%s3045_s16 + $0x988] sm:$0xff] %vm1952_vm0, %v2794_v9  ;;  %2259 = vst.msk [vmem:[%s3045_s16 + $0x990] sm:$0xff] %vm1952_vm0, %v2795_v10  ;;  %v2797_v13 = vsel %vm907_vm9, 1.0, %v2995_v11  ;;  %vm908_vm10 = vcmp.eq.s32.totalorder %v452_v4, %v4328_v31  ;;  %vm909_vm11 = vcmp.eq.s32.totalorder %v453_v5, %v4328_v31  ;;  %vm910_vm12 = vcmp.eq.s32.totalorder %v454_v7, %v4328_v31 }
  0xf9   : > { %2260 = vst.msk [vmem:[%s3045_s16 + $0x998] sm:$0xff] %vm1952_vm0, %v2796_v12  ;;  %2261 = vst.msk [vmem:[%s3045_s16 + $0x9a0] sm:$0xff] %vm1952_vm0, %v2797_v13  ;;  %v2798_v14 = vsel %vm908_vm10, 1.0, %v2995_v11  ;;  %v2799_v15 = vsel %vm909_vm11, 1.0, %v2995_v11  ;;  %v2800_v16 = vsel %vm910_vm12, 1.0, %v2995_v11  ;;  %v455_v6 = vadd.s32 2496, %v3024_v1 }
  0xfa   : > { %2262 = vst.msk [vmem:[%s3045_s16 + $0x9a8] sm:$0xff] %vm1952_vm0, %v2798_v14  ;;  %2263 = vst.msk [vmem:[%s3045_s16 + $0x9b0] sm:$0xff] %vm1952_vm0, %v2799_v15  ;;  %v456_v17 = vadd.s32 2504, %v3024_v1  ;;  %v457_v18 = vadd.s32 2512, %v3024_v1  ;;  %v458_v20 = vadd.s32 2520, %v3024_v1  ;;  %v459_v21 = vadd.s32 2528, %v3024_v1 }
  0xfb   : > { %2264 = vst.msk [vmem:[%s3045_s16 + $0x9b8] sm:$0xff] %vm1952_vm0, %v2800_v16  ;;  %vm911_vm13 = vcmp.eq.s32.totalorder %v455_v6, %v4328_v31  ;;  %v460_v22 = vadd.s32 2536, %v3024_v1  ;;  %v461_v23 = vadd.s32 2544, %v3024_v1  ;;  %v462_v24 = vadd.s32 2552, %v3024_v1 }
  0xfc   : > { %v2801_v25 = vsel %vm911_vm13, 1.0, %v2995_v11  ;;  %vm912_vm14 = vcmp.eq.s32.totalorder %v456_v17, %v4328_v31  ;;  %vm913_vm15 = vcmp.eq.s32.totalorder %v457_v18, %v4328_v31  ;;  %vm914_vm1 = vcmp.eq.s32.totalorder %v458_v20, %v4328_v31 }
  0xfd   : > { %2265 = vst.msk [vmem:[%s3045_s16 + $0x9c0] sm:$0xff] %vm1952_vm0, %v2801_v25  ;;  %v2802_v26 = vsel %vm912_vm14, 1.0, %v2995_v11  ;;  %v2803_v27 = vsel %vm913_vm15, 1.0, %v2995_v11  ;;  %v2804_v28 = vsel %vm914_vm1, 1.0, %v2995_v11  ;;  %vm915_vm2 = vcmp.eq.s32.totalorder %v459_v21, %v4328_v31 }
  0xfe   : > { %2266 = vst.msk [vmem:[%s3045_s16 + $0x9c8] sm:$0xff] %vm1952_vm0, %v2802_v26  ;;  %2267 = vst.msk [vmem:[%s3045_s16 + $0x9d0] sm:$0xff] %vm1952_vm0, %v2803_v27  ;;  %v2805_v19 = vsel %vm915_vm2, 1.0, %v2995_v11  ;;  %vm916_vm3 = vcmp.eq.s32.totalorder %v460_v22, %v4328_v31  ;;  %vm917_vm4 = vcmp.eq.s32.totalorder %v461_v23, %v4328_v31  ;;  %vm918_vm5 = vcmp.eq.s32.totalorder %v462_v24, %v4328_v31 }
  0xff   : > { %2268 = vst.msk [vmem:[%s3045_s16 + $0x9d8] sm:$0xff] %vm1952_vm0, %v2804_v28  ;;  %2269 = vst.msk [vmem:[%s3045_s16 + $0x9e0] sm:$0xff] %vm1952_vm0, %v2805_v19  ;;  %v2806_v29 = vsel %vm916_vm3, 1.0, %v2995_v11  ;;  %v2807_v30 = vsel %vm917_vm4, 1.0, %v2995_v11  ;;  %v2808_v32 = vsel %vm918_vm5, 1.0, %v2995_v11  ;;  %v463_v33 = vadd.s32 2560, %v3024_v1 }
 0x100   : > { %2270 = vst.msk [vmem:[%s3045_s16 + $0x9e8] sm:$0xff] %vm1952_vm0, %v2806_v29  ;;  %2271 = vst.msk [vmem:[%s3045_s16 + $0x9f0] sm:$0xff] %vm1952_vm0, %v2807_v30  ;;  %v464_v34 = vadd.s32 2568, %v3024_v1  ;;  %v465_v35 = vadd.s32 2576, %v3024_v1  ;;  %v466_v36 = vadd.s32 2584, %v3024_v1  ;;  %v467_v37 = vadd.s32 2592, %v3024_v1 }
 0x101   : > { %2272 = vst.msk [vmem:[%s3045_s16 + $0x9f8] sm:$0xff] %vm1952_vm0, %v2808_v32  ;;  %vm919_vm6 = vcmp.eq.s32.totalorder %v463_v33, %v4328_v31  ;;  %v468_v38 = vadd.s32 2600, %v3024_v1  ;;  %v469_v39 = vadd.s32 2608, %v3024_v1  ;;  %v470_v40 = vadd.s32 2616, %v3024_v1 }
 0x102   : > { %v2809_v41 = vsel %vm919_vm6, 1.0, %v2995_v11  ;;  %vm920_vm7 = vcmp.eq.s32.totalorder %v464_v34, %v4328_v31  ;;  %vm921_vm8 = vcmp.eq.s32.totalorder %v465_v35, %v4328_v31  ;;  %vm922_vm9 = vcmp.eq.s32.totalorder %v466_v36, %v4328_v31 }
 0x103   : > { %2273 = vst.msk [vmem:[%s3045_s16 + $0xa00] sm:$0xff] %vm1952_vm0, %v2809_v41  ;;  %v2810_v42 = vsel %vm920_vm7, 1.0, %v2995_v11  ;;  %v2811_v43 = vsel %vm921_vm8, 1.0, %v2995_v11  ;;  %v2812_v44 = vsel %vm922_vm9, 1.0, %v2995_v11  ;;  %vm923_vm10 = vcmp.eq.s32.totalorder %v467_v37, %v4328_v31 }
 0x104   : > { %2274 = vst.msk [vmem:[%s3045_s16 + $0xa08] sm:$0xff] %vm1952_vm0, %v2810_v42  ;;  %2275 = vst.msk [vmem:[%s3045_s16 + $0xa10] sm:$0xff] %vm1952_vm0, %v2811_v43  ;;  %v2813_v45 = vsel %vm923_vm10, 1.0, %v2995_v11  ;;  %vm924_vm11 = vcmp.eq.s32.totalorder %v468_v38, %v4328_v31  ;;  %vm925_vm12 = vcmp.eq.s32.totalorder %v469_v39, %v4328_v31  ;;  %vm926_vm13 = vcmp.eq.s32.totalorder %v470_v40, %v4328_v31 }
 0x105   : > { %2276 = vst.msk [vmem:[%s3045_s16 + $0xa18] sm:$0xff] %vm1952_vm0, %v2812_v44  ;;  %2277 = vst.msk [vmem:[%s3045_s16 + $0xa20] sm:$0xff] %vm1952_vm0, %v2813_v45  ;;  %v2814_v46 = vsel %vm924_vm11, 1.0, %v2995_v11  ;;  %v2815_v47 = vsel %vm925_vm12, 1.0, %v2995_v11  ;;  %v2816_v48 = vsel %vm926_vm13, 1.0, %v2995_v11  ;;  %v471_v49 = vadd.s32 2624, %v3024_v1 }
 0x106   : > { %2278 = vst.msk [vmem:[%s3045_s16 + $0xa28] sm:$0xff] %vm1952_vm0, %v2814_v46  ;;  %2279 = vst.msk [vmem:[%s3045_s16 + $0xa30] sm:$0xff] %vm1952_vm0, %v2815_v47  ;;  %v472_v50 = vadd.s32 2632, %v3024_v1  ;;  %v473_v51 = vadd.s32 2640, %v3024_v1  ;;  %v474_v52 = vadd.s32 2648, %v3024_v1  ;;  %v475_v53 = vadd.s32 2656, %v3024_v1 }
 0x107   : > { %2280 = vst.msk [vmem:[%s3045_s16 + $0xa38] sm:$0xff] %vm1952_vm0, %v2816_v48  ;;  %vm927_vm14 = vcmp.eq.s32.totalorder %v471_v49, %v4328_v31  ;;  %v476_v54 = vadd.s32 2664, %v3024_v1  ;;  %v477_v55 = vadd.s32 2672, %v3024_v1  ;;  %v478_v56 = vadd.s32 2680, %v3024_v1 }
 0x108   : > { %v2817_v57 = vsel %vm927_vm14, 1.0, %v2995_v11  ;;  %vm928_vm15 = vcmp.eq.s32.totalorder %v472_v50, %v4328_v31  ;;  %vm929_vm1 = vcmp.eq.s32.totalorder %v473_v51, %v4328_v31  ;;  %vm930_vm2 = vcmp.eq.s32.totalorder %v474_v52, %v4328_v31 }
 0x109   : > { %2281 = vst.msk [vmem:[%s3045_s16 + $0xa40] sm:$0xff] %vm1952_vm0, %v2817_v57  ;;  %v2818_v58 = vsel %vm928_vm15, 1.0, %v2995_v11  ;;  %v2819_v59 = vsel %vm929_vm1, 1.0, %v2995_v11  ;;  %v2820_v60 = vsel %vm930_vm2, 1.0, %v2995_v11  ;;  %vm931_vm3 = vcmp.eq.s32.totalorder %v475_v53, %v4328_v31 }
 0x10a   : > { %2282 = vst.msk [vmem:[%s3045_s16 + $0xa48] sm:$0xff] %vm1952_vm0, %v2818_v58  ;;  %2283 = vst.msk [vmem:[%s3045_s16 + $0xa50] sm:$0xff] %vm1952_vm0, %v2819_v59  ;;  %v2821_v61 = vsel %vm931_vm3, 1.0, %v2995_v11  ;;  %vm932_vm4 = vcmp.eq.s32.totalorder %v476_v54, %v4328_v31  ;;  %vm933_vm5 = vcmp.eq.s32.totalorder %v477_v55, %v4328_v31  ;;  %vm934_vm6 = vcmp.eq.s32.totalorder %v478_v56, %v4328_v31 }
 0x10b   : > { %2284 = vst.msk [vmem:[%s3045_s16 + $0xa58] sm:$0xff] %vm1952_vm0, %v2820_v60  ;;  %2285 = vst.msk [vmem:[%s3045_s16 + $0xa60] sm:$0xff] %vm1952_vm0, %v2821_v61  ;;  %v2822_v62 = vsel %vm932_vm4, 1.0, %v2995_v11  ;;  %v2823_v63 = vsel %vm933_vm5, 1.0, %v2995_v11  ;;  %v2824_v0 = vsel %vm934_vm6, 1.0, %v2995_v11  ;;  %v479_v2 = vadd.s32 2688, %v3024_v1 }
 0x10c   : > { %2286 = vst.msk [vmem:[%s3045_s16 + $0xa68] sm:$0xff] %vm1952_vm0, %v2822_v62  ;;  %2287 = vst.msk [vmem:[%s3045_s16 + $0xa70] sm:$0xff] %vm1952_vm0, %v2823_v63  ;;  %v480_v3 = vadd.s32 2696, %v3024_v1  ;;  %v481_v4 = vadd.s32 2704, %v3024_v1  ;;  %v482_v5 = vadd.s32 2712, %v3024_v1  ;;  %v483_v7 = vadd.s32 2720, %v3024_v1 }
 0x10d   : > { %2288 = vst.msk [vmem:[%s3045_s16 + $0xa78] sm:$0xff] %vm1952_vm0, %v2824_v0  ;;  %vm935_vm7 = vcmp.eq.s32.totalorder %v479_v2, %v4328_v31  ;;  %v484_v8 = vadd.s32 2728, %v3024_v1  ;;  %v485_v9 = vadd.s32 2736, %v3024_v1  ;;  %v486_v10 = vadd.s32 2744, %v3024_v1 }
 0x10e   : > { %v2825_v12 = vsel %vm935_vm7, 1.0, %v2995_v11  ;;  %vm936_vm8 = vcmp.eq.s32.totalorder %v480_v3, %v4328_v31  ;;  %vm937_vm9 = vcmp.eq.s32.totalorder %v481_v4, %v4328_v31  ;;  %vm938_vm10 = vcmp.eq.s32.totalorder %v482_v5, %v4328_v31 }
 0x10f   : > { %2289 = vst.msk [vmem:[%s3045_s16 + $0xa80] sm:$0xff] %vm1952_vm0, %v2825_v12  ;;  %v2826_v13 = vsel %vm936_vm8, 1.0, %v2995_v11  ;;  %v2827_v14 = vsel %vm937_vm9, 1.0, %v2995_v11  ;;  %v2828_v15 = vsel %vm938_vm10, 1.0, %v2995_v11  ;;  %vm939_vm11 = vcmp.eq.s32.totalorder %v483_v7, %v4328_v31 }
 0x110   : > { %2290 = vst.msk [vmem:[%s3045_s16 + $0xa88] sm:$0xff] %vm1952_vm0, %v2826_v13  ;;  %2291 = vst.msk [vmem:[%s3045_s16 + $0xa90] sm:$0xff] %vm1952_vm0, %v2827_v14  ;;  %v2829_v16 = vsel %vm939_vm11, 1.0, %v2995_v11  ;;  %vm940_vm12 = vcmp.eq.s32.totalorder %v484_v8, %v4328_v31  ;;  %vm941_vm13 = vcmp.eq.s32.totalorder %v485_v9, %v4328_v31  ;;  %vm942_vm14 = vcmp.eq.s32.totalorder %v486_v10, %v4328_v31 }
 0x111   : > { %2292 = vst.msk [vmem:[%s3045_s16 + $0xa98] sm:$0xff] %vm1952_vm0, %v2828_v15  ;;  %2293 = vst.msk [vmem:[%s3045_s16 + $0xaa0] sm:$0xff] %vm1952_vm0, %v2829_v16  ;;  %v2830_v6 = vsel %vm940_vm12, 1.0, %v2995_v11  ;;  %v2831_v17 = vsel %vm941_vm13, 1.0, %v2995_v11  ;;  %v2832_v18 = vsel %vm942_vm14, 1.0, %v2995_v11  ;;  %v487_v20 = vadd.s32 2752, %v3024_v1 }
 0x112   : > { %2294 = vst.msk [vmem:[%s3045_s16 + $0xaa8] sm:$0xff] %vm1952_vm0, %v2830_v6  ;;  %2295 = vst.msk [vmem:[%s3045_s16 + $0xab0] sm:$0xff] %vm1952_vm0, %v2831_v17  ;;  %v488_v21 = vadd.s32 2760, %v3024_v1  ;;  %v489_v22 = vadd.s32 2768, %v3024_v1  ;;  %v490_v23 = vadd.s32 2776, %v3024_v1  ;;  %v491_v24 = vadd.s32 2784, %v3024_v1 }
 0x113   : > { %2296 = vst.msk [vmem:[%s3045_s16 + $0xab8] sm:$0xff] %vm1952_vm0, %v2832_v18  ;;  %vm943_vm15 = vcmp.eq.s32.totalorder %v487_v20, %v4328_v31  ;;  %v492_v25 = vadd.s32 2792, %v3024_v1  ;;  %v493_v26 = vadd.s32 2800, %v3024_v1  ;;  %v494_v27 = vadd.s32 2808, %v3024_v1 }
 0x114   : > { %v2833_v28 = vsel %vm943_vm15, 1.0, %v2995_v11  ;;  %vm944_vm1 = vcmp.eq.s32.totalorder %v488_v21, %v4328_v31  ;;  %vm945_vm2 = vcmp.eq.s32.totalorder %v489_v22, %v4328_v31  ;;  %vm946_vm3 = vcmp.eq.s32.totalorder %v490_v23, %v4328_v31 }
 0x115   : > { %2297 = vst.msk [vmem:[%s3045_s16 + $0xac0] sm:$0xff] %vm1952_vm0, %v2833_v28  ;;  %v2834_v19 = vsel %vm944_vm1, 1.0, %v2995_v11  ;;  %v2835_v29 = vsel %vm945_vm2, 1.0, %v2995_v11  ;;  %v2836_v30 = vsel %vm946_vm3, 1.0, %v2995_v11  ;;  %vm947_vm4 = vcmp.eq.s32.totalorder %v491_v24, %v4328_v31 }
 0x116   : > { %2298 = vst.msk [vmem:[%s3045_s16 + $0xac8] sm:$0xff] %vm1952_vm0, %v2834_v19  ;;  %2299 = vst.msk [vmem:[%s3045_s16 + $0xad0] sm:$0xff] %vm1952_vm0, %v2835_v29  ;;  %v2837_v32 = vsel %vm947_vm4, 1.0, %v2995_v11  ;;  %vm948_vm5 = vcmp.eq.s32.totalorder %v492_v25, %v4328_v31  ;;  %vm949_vm6 = vcmp.eq.s32.totalorder %v493_v26, %v4328_v31  ;;  %vm950_vm7 = vcmp.eq.s32.totalorder %v494_v27, %v4328_v31 }
 0x117   : > { %2300 = vst.msk [vmem:[%s3045_s16 + $0xad8] sm:$0xff] %vm1952_vm0, %v2836_v30  ;;  %2301 = vst.msk [vmem:[%s3045_s16 + $0xae0] sm:$0xff] %vm1952_vm0, %v2837_v32  ;;  %v2838_v33 = vsel %vm948_vm5, 1.0, %v2995_v11  ;;  %v2839_v34 = vsel %vm949_vm6, 1.0, %v2995_v11  ;;  %v2840_v35 = vsel %vm950_vm7, 1.0, %v2995_v11  ;;  %v495_v36 = vadd.s32 2816, %v3024_v1 }
 0x118   : > { %2302 = vst.msk [vmem:[%s3045_s16 + $0xae8] sm:$0xff] %vm1952_vm0, %v2838_v33  ;;  %2303 = vst.msk [vmem:[%s3045_s16 + $0xaf0] sm:$0xff] %vm1952_vm0, %v2839_v34  ;;  %v496_v37 = vadd.s32 2824, %v3024_v1  ;;  %v497_v38 = vadd.s32 2832, %v3024_v1  ;;  %v498_v39 = vadd.s32 2840, %v3024_v1  ;;  %v499_v40 = vadd.s32 2848, %v3024_v1 }
 0x119   : > { %2304 = vst.msk [vmem:[%s3045_s16 + $0xaf8] sm:$0xff] %vm1952_vm0, %v2840_v35  ;;  %vm951_vm8 = vcmp.eq.s32.totalorder %v495_v36, %v4328_v31  ;;  %v500_v41 = vadd.s32 2856, %v3024_v1  ;;  %v501_v42 = vadd.s32 2864, %v3024_v1  ;;  %v502_v43 = vadd.s32 2872, %v3024_v1 }
 0x11a   : > { %v2841_v44 = vsel %vm951_vm8, 1.0, %v2995_v11  ;;  %vm952_vm9 = vcmp.eq.s32.totalorder %v496_v37, %v4328_v31  ;;  %vm953_vm10 = vcmp.eq.s32.totalorder %v497_v38, %v4328_v31  ;;  %vm954_vm11 = vcmp.eq.s32.totalorder %v498_v39, %v4328_v31 }
 0x11b   : > { %2305 = vst.msk [vmem:[%s3045_s16 + $0xb00] sm:$0xff] %vm1952_vm0, %v2841_v44  ;;  %v2842_v45 = vsel %vm952_vm9, 1.0, %v2995_v11  ;;  %v2843_v46 = vsel %vm953_vm10, 1.0, %v2995_v11  ;;  %v2844_v47 = vsel %vm954_vm11, 1.0, %v2995_v11  ;;  %vm955_vm12 = vcmp.eq.s32.totalorder %v499_v40, %v4328_v31 }
 0x11c   : > { %2306 = vst.msk [vmem:[%s3045_s16 + $0xb08] sm:$0xff] %vm1952_vm0, %v2842_v45  ;;  %2307 = vst.msk [vmem:[%s3045_s16 + $0xb10] sm:$0xff] %vm1952_vm0, %v2843_v46  ;;  %v2845_v48 = vsel %vm955_vm12, 1.0, %v2995_v11  ;;  %vm956_vm13 = vcmp.eq.s32.totalorder %v500_v41, %v4328_v31  ;;  %vm957_vm14 = vcmp.eq.s32.totalorder %v501_v42, %v4328_v31  ;;  %vm958_vm15 = vcmp.eq.s32.totalorder %v502_v43, %v4328_v31  ;;  %v4971_v43 = vld [vmem:[%s3029_s12] ss:$0 sm:$0xff] }
 0x11d   : > { %2308 = vst.msk [vmem:[%s3045_s16 + $0xb18] sm:$0xff] %vm1952_vm0, %v2844_v47  ;;  %2309 = vst.msk [vmem:[%s3045_s16 + $0xb20] sm:$0xff] %vm1952_vm0, %v2845_v48  ;;  %v2846_v49 = vsel %vm956_vm13, 1.0, %v2995_v11  ;;  %v2847_v50 = vsel %vm957_vm14, 1.0, %v2995_v11  ;;  %v2848_v51 = vsel %vm958_vm15, 1.0, %v2995_v11  ;;  %v503_v52 = vadd.s32 2880, %v3024_v1 }
 0x11e   : > { %2310 = vst.msk [vmem:[%s3045_s16 + $0xb28] sm:$0xff] %vm1952_vm0, %v2846_v49  ;;  %2311 = vst.msk [vmem:[%s3045_s16 + $0xb30] sm:$0xff] %vm1952_vm0, %v2847_v50  ;;  %v504_v53 = vadd.s32 2888, %v3024_v1  ;;  %v505_v54 = vadd.s32 2896, %v3024_v1  ;;  %v506_v55 = vadd.s32 2904, %v3024_v1  ;;  %v507_v56 = vadd.s32 2912, %v3024_v1 }
 0x11f   : > { %2312 = vst.msk [vmem:[%s3045_s16 + $0xb38] sm:$0xff] %vm1952_vm0, %v2848_v51  ;;  %vm959_vm1 = vcmp.eq.s32.totalorder %v503_v52, %v4328_v31  ;;  %v508_v57 = vadd.s32 2920, %v3024_v1  ;;  %v509_v58 = vadd.s32 2928, %v3024_v1  ;;  %v510_v59 = vadd.s32 2936, %v3024_v1 }
 0x120   : > { %v2849_v60 = vsel %vm959_vm1, 1.0, %v2995_v11  ;;  %vm960_vm2 = vcmp.eq.s32.totalorder %v504_v53, %v4328_v31  ;;  %vm961_vm3 = vcmp.eq.s32.totalorder %v505_v54, %v4328_v31  ;;  %vm962_vm4 = vcmp.eq.s32.totalorder %v506_v55, %v4328_v31 }
 0x121   : > { %2313 = vst.msk [vmem:[%s3045_s16 + $0xb40] sm:$0xff] %vm1952_vm0, %v2849_v60  ;;  %v2850_v61 = vsel %vm960_vm2, 1.0, %v2995_v11  ;;  %v2851_v62 = vsel %vm961_vm3, 1.0, %v2995_v11  ;;  %v2852_v63 = vsel %vm962_vm4, 1.0, %v2995_v11  ;;  %vm963_vm5 = vcmp.eq.s32.totalorder %v507_v56, %v4328_v31 }
 0x122   : > { %2314 = vst.msk [vmem:[%s3045_s16 + $0xb48] sm:$0xff] %vm1952_vm0, %v2850_v61  ;;  %2315 = vst.msk [vmem:[%s3045_s16 + $0xb50] sm:$0xff] %vm1952_vm0, %v2851_v62  ;;  %v2853_v0 = vsel %vm963_vm5, 1.0, %v2995_v11  ;;  %vm964_vm6 = vcmp.eq.s32.totalorder %v508_v57, %v4328_v31  ;;  %vm965_vm7 = vcmp.eq.s32.totalorder %v509_v58, %v4328_v31  ;;  %vm966_vm8 = vcmp.eq.s32.totalorder %v510_v59, %v4328_v31 }
 0x123   : > { %2316 = vst.msk [vmem:[%s3045_s16 + $0xb58] sm:$0xff] %vm1952_vm0, %v2852_v63  ;;  %2317 = vst.msk [vmem:[%s3045_s16 + $0xb60] sm:$0xff] %vm1952_vm0, %v2853_v0  ;;  %v2854_v2 = vsel %vm964_vm6, 1.0, %v2995_v11  ;;  %v2855_v3 = vsel %vm965_vm7, 1.0, %v2995_v11  ;;  %v2856_v4 = vsel %vm966_vm8, 1.0, %v2995_v11  ;;  %v511_v5 = vadd.s32 2944, %v3024_v1 }
 0x124   : > { %2318 = vst.msk [vmem:[%s3045_s16 + $0xb68] sm:$0xff] %vm1952_vm0, %v2854_v2  ;;  %2319 = vst.msk [vmem:[%s3045_s16 + $0xb70] sm:$0xff] %vm1952_vm0, %v2855_v3  ;;  %v512_v7 = vadd.s32 2952, %v3024_v1  ;;  %v513_v8 = vadd.s32 2960, %v3024_v1  ;;  %v514_v9 = vadd.s32 2968, %v3024_v1  ;;  %v515_v10 = vadd.s32 2976, %v3024_v1 }
 0x125   : > { %2320 = vst.msk [vmem:[%s3045_s16 + $0xb78] sm:$0xff] %vm1952_vm0, %v2856_v4  ;;  %vm967_vm9 = vcmp.eq.s32.totalorder %v511_v5, %v4328_v31  ;;  %v516_v12 = vadd.s32 2984, %v3024_v1  ;;  %v517_v13 = vadd.s32 2992, %v3024_v1  ;;  %v518_v14 = vadd.s32 3000, %v3024_v1 }
 0x126   : > { %v2857_v15 = vsel %vm967_vm9, 1.0, %v2995_v11  ;;  %vm968_vm10 = vcmp.eq.s32.totalorder %v512_v7, %v4328_v31  ;;  %vm969_vm11 = vcmp.eq.s32.totalorder %v513_v8, %v4328_v31  ;;  %vm970_vm12 = vcmp.eq.s32.totalorder %v514_v9, %v4328_v31 }
 0x127   : > { %2321 = vst.msk [vmem:[%s3045_s16 + $0xb80] sm:$0xff] %vm1952_vm0, %v2857_v15  ;;  %v2858_v16 = vsel %vm968_vm10, 1.0, %v2995_v11  ;;  %v2859_v6 = vsel %vm969_vm11, 1.0, %v2995_v11  ;;  %v2860_v17 = vsel %vm970_vm12, 1.0, %v2995_v11  ;;  %vm971_vm13 = vcmp.eq.s32.totalorder %v515_v10, %v4328_v31 }
 0x128   : > { %2322 = vst.msk [vmem:[%s3045_s16 + $0xb88] sm:$0xff] %vm1952_vm0, %v2858_v16  ;;  %2323 = vst.msk [vmem:[%s3045_s16 + $0xb90] sm:$0xff] %vm1952_vm0, %v2859_v6  ;;  %v2861_v18 = vsel %vm971_vm13, 1.0, %v2995_v11  ;;  %vm972_vm14 = vcmp.eq.s32.totalorder %v516_v12, %v4328_v31  ;;  %vm973_vm15 = vcmp.eq.s32.totalorder %v517_v13, %v4328_v31  ;;  %vm974_vm1 = vcmp.eq.s32.totalorder %v518_v14, %v4328_v31 }
 0x129   : > { %2324 = vst.msk [vmem:[%s3045_s16 + $0xb98] sm:$0xff] %vm1952_vm0, %v2860_v17  ;;  %2325 = vst.msk [vmem:[%s3045_s16 + $0xba0] sm:$0xff] %vm1952_vm0, %v2861_v18  ;;  %v2862_v20 = vsel %vm972_vm14, 1.0, %v2995_v11  ;;  %v2863_v21 = vsel %vm973_vm15, 1.0, %v2995_v11  ;;  %v2864_v22 = vsel %vm974_vm1, 1.0, %v2995_v11  ;;  %v519_v23 = vadd.s32 3008, %v3024_v1 }
 0x12a   : > { %2326 = vst.msk [vmem:[%s3045_s16 + $0xba8] sm:$0xff] %vm1952_vm0, %v2862_v20  ;;  %2327 = vst.msk [vmem:[%s3045_s16 + $0xbb0] sm:$0xff] %vm1952_vm0, %v2863_v21  ;;  %v520_v24 = vadd.s32 3016, %v3024_v1  ;;  %v521_v25 = vadd.s32 3024, %v3024_v1  ;;  %v522_v26 = vadd.s32 3032, %v3024_v1  ;;  %v523_v27 = vadd.s32 3040, %v3024_v1 }
 0x12b   : > { %2328 = vst.msk [vmem:[%s3045_s16 + $0xbb8] sm:$0xff] %vm1952_vm0, %v2864_v22  ;;  %vm975_vm2 = vcmp.eq.s32.totalorder %v519_v23, %v4328_v31  ;;  %v524_v28 = vadd.s32 3048, %v3024_v1  ;;  %v525_v19 = vadd.s32 3056, %v3024_v1  ;;  %v526_v29 = vadd.s32 3064, %v3024_v1 }
 0x12c   : > { %v2865_v30 = vsel %vm975_vm2, 1.0, %v2995_v11  ;;  %vm976_vm3 = vcmp.eq.s32.totalorder %v520_v24, %v4328_v31  ;;  %vm977_vm4 = vcmp.eq.s32.totalorder %v521_v25, %v4328_v31  ;;  %vm978_vm5 = vcmp.eq.s32.totalorder %v522_v26, %v4328_v31 }
 0x12d   : > { %2329 = vst.msk [vmem:[%s3045_s16 + $0xbc0] sm:$0xff] %vm1952_vm0, %v2865_v30  ;;  %v2866_v32 = vsel %vm976_vm3, 1.0, %v2995_v11  ;;  %v2867_v33 = vsel %vm977_vm4, 1.0, %v2995_v11  ;;  %v2868_v34 = vsel %vm978_vm5, 1.0, %v2995_v11  ;;  %vm979_vm6 = vcmp.eq.s32.totalorder %v523_v27, %v4328_v31 }
 0x12e   : > { %2330 = vst.msk [vmem:[%s3045_s16 + $0xbc8] sm:$0xff] %vm1952_vm0, %v2866_v32  ;;  %2331 = vst.msk [vmem:[%s3045_s16 + $0xbd0] sm:$0xff] %vm1952_vm0, %v2867_v33  ;;  %v2869_v35 = vsel %vm979_vm6, 1.0, %v2995_v11  ;;  %vm980_vm7 = vcmp.eq.s32.totalorder %v524_v28, %v4328_v31  ;;  %vm981_vm8 = vcmp.eq.s32.totalorder %v525_v19, %v4328_v31  ;;  %vm982_vm9 = vcmp.eq.s32.totalorder %v526_v29, %v4328_v31 }
 0x12f   : > { %2332 = vst.msk [vmem:[%s3045_s16 + $0xbd8] sm:$0xff] %vm1952_vm0, %v2868_v34  ;;  %2333 = vst.msk [vmem:[%s3045_s16 + $0xbe0] sm:$0xff] %vm1952_vm0, %v2869_v35  ;;  %v2870_v36 = vsel %vm980_vm7, 1.0, %v2995_v11  ;;  %v2871_v37 = vsel %vm981_vm8, 1.0, %v2995_v11  ;;  %v2872_v38 = vsel %vm982_vm9, 1.0, %v2995_v11  ;;  %v527_v39 = vadd.s32 3072, %v3024_v1 }
 0x130   : > { %2334 = vst.msk [vmem:[%s3045_s16 + $0xbe8] sm:$0xff] %vm1952_vm0, %v2870_v36  ;;  %2335 = vst.msk [vmem:[%s3045_s16 + $0xbf0] sm:$0xff] %vm1952_vm0, %v2871_v37  ;;  %v528_v40 = vadd.s32 3080, %v3024_v1  ;;  %v529_v31 = vadd.s32 3088, %v3024_v1  ;;  %v530_v41 = vadd.s32 3096, %v3024_v1  ;;  %v531_v42 = vadd.s32 3104, %v3024_v1 }
 0x131   : > { %2336 = vst.msk [vmem:[%s3045_s16 + $0xbf8] sm:$0xff] %vm1952_vm0, %v2872_v38  ;;  %vm983_vm10 = vcmp.eq.s32.totalorder %v527_v39, %v4971_v43  ;;  %v532_v44 = vadd.s32 3112, %v3024_v1  ;;  %v533_v45 = vadd.s32 3120, %v3024_v1  ;;  %v534_v46 = vadd.s32 3128, %v3024_v1 }
 0x132   : > { %v2873_v47 = vsel %vm983_vm10, 1.0, %v2995_v11  ;;  %vm984_vm11 = vcmp.eq.s32.totalorder %v528_v40, %v4971_v43  ;;  %vm985_vm12 = vcmp.eq.s32.totalorder %v529_v31, %v4971_v43  ;;  %vm986_vm13 = vcmp.eq.s32.totalorder %v530_v41, %v4971_v43 }
 0x133   : > { %2337 = vst.msk [vmem:[%s3045_s16 + $0xc00] sm:$0xff] %vm1952_vm0, %v2873_v47  ;;  %v2874_v48 = vsel %vm984_vm11, 1.0, %v2995_v11  ;;  %v2875_v49 = vsel %vm985_vm12, 1.0, %v2995_v11  ;;  %v2876_v50 = vsel %vm986_vm13, 1.0, %v2995_v11  ;;  %vm987_vm14 = vcmp.eq.s32.totalorder %v531_v42, %v4971_v43 }
 0x134   : > { %2338 = vst.msk [vmem:[%s3045_s16 + $0xc08] sm:$0xff] %vm1952_vm0, %v2874_v48  ;;  %2339 = vst.msk [vmem:[%s3045_s16 + $0xc10] sm:$0xff] %vm1952_vm0, %v2875_v49  ;;  %v2877_v51 = vsel %vm987_vm14, 1.0, %v2995_v11  ;;  %vm988_vm15 = vcmp.eq.s32.totalorder %v532_v44, %v4971_v43  ;;  %vm989_vm1 = vcmp.eq.s32.totalorder %v533_v45, %v4971_v43  ;;  %vm990_vm2 = vcmp.eq.s32.totalorder %v534_v46, %v4971_v43 }
 0x135   : > { %2340 = vst.msk [vmem:[%s3045_s16 + $0xc18] sm:$0xff] %vm1952_vm0, %v2876_v50  ;;  %2341 = vst.msk [vmem:[%s3045_s16 + $0xc20] sm:$0xff] %vm1952_vm0, %v2877_v51  ;;  %v2878_v52 = vsel %vm988_vm15, 1.0, %v2995_v11  ;;  %v2879_v53 = vsel %vm989_vm1, 1.0, %v2995_v11  ;;  %v2880_v54 = vsel %vm990_vm2, 1.0, %v2995_v11  ;;  %v535_v55 = vadd.s32 3136, %v3024_v1 }
 0x136   : > { %2342 = vst.msk [vmem:[%s3045_s16 + $0xc28] sm:$0xff] %vm1952_vm0, %v2878_v52  ;;  %2343 = vst.msk [vmem:[%s3045_s16 + $0xc30] sm:$0xff] %vm1952_vm0, %v2879_v53  ;;  %v536_v56 = vadd.s32 3144, %v3024_v1  ;;  %v537_v57 = vadd.s32 3152, %v3024_v1  ;;  %v538_v58 = vadd.s32 3160, %v3024_v1  ;;  %v539_v59 = vadd.s32 3168, %v3024_v1 }
 0x137   : > { %2344 = vst.msk [vmem:[%s3045_s16 + $0xc38] sm:$0xff] %vm1952_vm0, %v2880_v54  ;;  %vm991_vm3 = vcmp.eq.s32.totalorder %v535_v55, %v4971_v43  ;;  %v540_v60 = vadd.s32 3176, %v3024_v1  ;;  %v541_v61 = vadd.s32 3184, %v3024_v1  ;;  %v542_v62 = vadd.s32 3192, %v3024_v1 }
 0x138   : > { %v2881_v63 = vsel %vm991_vm3, 1.0, %v2995_v11  ;;  %vm992_vm4 = vcmp.eq.s32.totalorder %v536_v56, %v4971_v43  ;;  %vm993_vm5 = vcmp.eq.s32.totalorder %v537_v57, %v4971_v43  ;;  %vm994_vm6 = vcmp.eq.s32.totalorder %v538_v58, %v4971_v43 }
 0x139   : > { %2345 = vst.msk [vmem:[%s3045_s16 + $0xc40] sm:$0xff] %vm1952_vm0, %v2881_v63  ;;  %v2882_v0 = vsel %vm992_vm4, 1.0, %v2995_v11  ;;  %v2883_v2 = vsel %vm993_vm5, 1.0, %v2995_v11  ;;  %v2884_v3 = vsel %vm994_vm6, 1.0, %v2995_v11  ;;  %vm995_vm7 = vcmp.eq.s32.totalorder %v539_v59, %v4971_v43 }
 0x13a   : > { %2346 = vst.msk [vmem:[%s3045_s16 + $0xc48] sm:$0xff] %vm1952_vm0, %v2882_v0  ;;  %2347 = vst.msk [vmem:[%s3045_s16 + $0xc50] sm:$0xff] %vm1952_vm0, %v2883_v2  ;;  %v2885_v4 = vsel %vm995_vm7, 1.0, %v2995_v11  ;;  %vm996_vm8 = vcmp.eq.s32.totalorder %v540_v60, %v4971_v43  ;;  %vm997_vm9 = vcmp.eq.s32.totalorder %v541_v61, %v4971_v43  ;;  %vm998_vm10 = vcmp.eq.s32.totalorder %v542_v62, %v4971_v43 }
 0x13b   : > { %2348 = vst.msk [vmem:[%s3045_s16 + $0xc58] sm:$0xff] %vm1952_vm0, %v2884_v3  ;;  %2349 = vst.msk [vmem:[%s3045_s16 + $0xc60] sm:$0xff] %vm1952_vm0, %v2885_v4  ;;  %v2886_v5 = vsel %vm996_vm8, 1.0, %v2995_v11  ;;  %v2887_v7 = vsel %vm997_vm9, 1.0, %v2995_v11  ;;  %v2888_v8 = vsel %vm998_vm10, 1.0, %v2995_v11  ;;  %v543_v9 = vadd.s32 3200, %v3024_v1 }
 0x13c   : > { %2350 = vst.msk [vmem:[%s3045_s16 + $0xc68] sm:$0xff] %vm1952_vm0, %v2886_v5  ;;  %2351 = vst.msk [vmem:[%s3045_s16 + $0xc70] sm:$0xff] %vm1952_vm0, %v2887_v7  ;;  %v544_v10 = vadd.s32 3208, %v3024_v1  ;;  %v545_v12 = vadd.s32 3216, %v3024_v1  ;;  %v546_v13 = vadd.s32 3224, %v3024_v1  ;;  %v547_v14 = vadd.s32 3232, %v3024_v1 }
 0x13d   : > { %2352 = vst.msk [vmem:[%s3045_s16 + $0xc78] sm:$0xff] %vm1952_vm0, %v2888_v8  ;;  %vm999_vm11 = vcmp.eq.s32.totalorder %v543_v9, %v4971_v43  ;;  %v548_v15 = vadd.s32 3240, %v3024_v1  ;;  %v549_v16 = vadd.s32 3248, %v3024_v1  ;;  %v550_v6 = vadd.s32 3256, %v3024_v1 }
 0x13e   : > { %v2889_v17 = vsel %vm999_vm11, 1.0, %v2995_v11  ;;  %vm1000_vm12 = vcmp.eq.s32.totalorder %v544_v10, %v4971_v43  ;;  %vm1001_vm13 = vcmp.eq.s32.totalorder %v545_v12, %v4971_v43  ;;  %vm1002_vm14 = vcmp.eq.s32.totalorder %v546_v13, %v4971_v43 }
 0x13f   : > { %2353 = vst.msk [vmem:[%s3045_s16 + $0xc80] sm:$0xff] %vm1952_vm0, %v2889_v17  ;;  %v2890_v18 = vsel %vm1000_vm12, 1.0, %v2995_v11  ;;  %v2891_v20 = vsel %vm1001_vm13, 1.0, %v2995_v11  ;;  %v2892_v21 = vsel %vm1002_vm14, 1.0, %v2995_v11  ;;  %vm1003_vm15 = vcmp.eq.s32.totalorder %v547_v14, %v4971_v43 }
 0x140   : > { %2354 = vst.msk [vmem:[%s3045_s16 + $0xc88] sm:$0xff] %vm1952_vm0, %v2890_v18  ;;  %2355 = vst.msk [vmem:[%s3045_s16 + $0xc90] sm:$0xff] %vm1952_vm0, %v2891_v20  ;;  %v2893_v22 = vsel %vm1003_vm15, 1.0, %v2995_v11  ;;  %vm1004_vm1 = vcmp.eq.s32.totalorder %v548_v15, %v4971_v43  ;;  %vm1005_vm2 = vcmp.eq.s32.totalorder %v549_v16, %v4971_v43  ;;  %vm1006_vm3 = vcmp.eq.s32.totalorder %v550_v6, %v4971_v43 }
 0x141   : > { %2356 = vst.msk [vmem:[%s3045_s16 + $0xc98] sm:$0xff] %vm1952_vm0, %v2892_v21  ;;  %2357 = vst.msk [vmem:[%s3045_s16 + $0xca0] sm:$0xff] %vm1952_vm0, %v2893_v22  ;;  %v2894_v23 = vsel %vm1004_vm1, 1.0, %v2995_v11  ;;  %v2895_v24 = vsel %vm1005_vm2, 1.0, %v2995_v11  ;;  %v2896_v25 = vsel %vm1006_vm3, 1.0, %v2995_v11  ;;  %v551_v26 = vadd.s32 3264, %v3024_v1 }
 0x142   : > { %2358 = vst.msk [vmem:[%s3045_s16 + $0xca8] sm:$0xff] %vm1952_vm0, %v2894_v23  ;;  %2359 = vst.msk [vmem:[%s3045_s16 + $0xcb0] sm:$0xff] %vm1952_vm0, %v2895_v24  ;;  %v552_v27 = vadd.s32 3272, %v3024_v1  ;;  %v553_v28 = vadd.s32 3280, %v3024_v1  ;;  %v554_v19 = vadd.s32 3288, %v3024_v1  ;;  %v555_v29 = vadd.s32 3296, %v3024_v1 }
 0x143   : > { %2360 = vst.msk [vmem:[%s3045_s16 + $0xcb8] sm:$0xff] %vm1952_vm0, %v2896_v25  ;;  %vm1007_vm4 = vcmp.eq.s32.totalorder %v551_v26, %v4971_v43  ;;  %v556_v30 = vadd.s32 3304, %v3024_v1  ;;  %v557_v32 = vadd.s32 3312, %v3024_v1  ;;  %v558_v33 = vadd.s32 3320, %v3024_v1 }
 0x144   : > { %v2897_v34 = vsel %vm1007_vm4, 1.0, %v2995_v11  ;;  %vm1008_vm5 = vcmp.eq.s32.totalorder %v552_v27, %v4971_v43  ;;  %vm1009_vm6 = vcmp.eq.s32.totalorder %v553_v28, %v4971_v43  ;;  %vm1010_vm7 = vcmp.eq.s32.totalorder %v554_v19, %v4971_v43 }
 0x145   : > { %2361 = vst.msk [vmem:[%s3045_s16 + $0xcc0] sm:$0xff] %vm1952_vm0, %v2897_v34  ;;  %v2898_v35 = vsel %vm1008_vm5, 1.0, %v2995_v11  ;;  %v2899_v36 = vsel %vm1009_vm6, 1.0, %v2995_v11  ;;  %v2900_v37 = vsel %vm1010_vm7, 1.0, %v2995_v11  ;;  %vm1011_vm8 = vcmp.eq.s32.totalorder %v555_v29, %v4971_v43 }
 0x146   : > { %2362 = vst.msk [vmem:[%s3045_s16 + $0xcc8] sm:$0xff] %vm1952_vm0, %v2898_v35  ;;  %2363 = vst.msk [vmem:[%s3045_s16 + $0xcd0] sm:$0xff] %vm1952_vm0, %v2899_v36  ;;  %v2901_v38 = vsel %vm1011_vm8, 1.0, %v2995_v11  ;;  %vm1012_vm9 = vcmp.eq.s32.totalorder %v556_v30, %v4971_v43  ;;  %vm1013_vm10 = vcmp.eq.s32.totalorder %v557_v32, %v4971_v43  ;;  %vm1014_vm11 = vcmp.eq.s32.totalorder %v558_v33, %v4971_v43 }
 0x147   : > { %2364 = vst.msk [vmem:[%s3045_s16 + $0xcd8] sm:$0xff] %vm1952_vm0, %v2900_v37  ;;  %2365 = vst.msk [vmem:[%s3045_s16 + $0xce0] sm:$0xff] %vm1952_vm0, %v2901_v38  ;;  %v2902_v39 = vsel %vm1012_vm9, 1.0, %v2995_v11  ;;  %v2903_v40 = vsel %vm1013_vm10, 1.0, %v2995_v11  ;;  %v2904_v31 = vsel %vm1014_vm11, 1.0, %v2995_v11  ;;  %v559_v41 = vadd.s32 3328, %v3024_v1 }
 0x148   : > { %2366 = vst.msk [vmem:[%s3045_s16 + $0xce8] sm:$0xff] %vm1952_vm0, %v2902_v39  ;;  %2367 = vst.msk [vmem:[%s3045_s16 + $0xcf0] sm:$0xff] %vm1952_vm0, %v2903_v40  ;;  %v560_v42 = vadd.s32 3336, %v3024_v1  ;;  %v561_v44 = vadd.s32 3344, %v3024_v1  ;;  %v562_v45 = vadd.s32 3352, %v3024_v1  ;;  %v563_v46 = vadd.s32 3360, %v3024_v1 }
 0x149   : > { %2368 = vst.msk [vmem:[%s3045_s16 + $0xcf8] sm:$0xff] %vm1952_vm0, %v2904_v31  ;;  %vm1015_vm12 = vcmp.eq.s32.totalorder %v559_v41, %v4971_v43  ;;  %v564_v47 = vadd.s32 3368, %v3024_v1  ;;  %v565_v48 = vadd.s32 3376, %v3024_v1  ;;  %v566_v49 = vadd.s32 3384, %v3024_v1 }
 0x14a   : > { %v2905_v50 = vsel %vm1015_vm12, 1.0, %v2995_v11  ;;  %vm1016_vm13 = vcmp.eq.s32.totalorder %v560_v42, %v4971_v43  ;;  %vm1017_vm14 = vcmp.eq.s32.totalorder %v561_v44, %v4971_v43  ;;  %vm1018_vm15 = vcmp.eq.s32.totalorder %v562_v45, %v4971_v43 }
 0x14b   : > { %2369 = vst.msk [vmem:[%s3045_s16 + $0xd00] sm:$0xff] %vm1952_vm0, %v2905_v50  ;;  %v2906_v51 = vsel %vm1016_vm13, 1.0, %v2995_v11  ;;  %v2907_v52 = vsel %vm1017_vm14, 1.0, %v2995_v11  ;;  %v2908_v53 = vsel %vm1018_vm15, 1.0, %v2995_v11  ;;  %vm1019_vm1 = vcmp.eq.s32.totalorder %v563_v46, %v4971_v43 }
 0x14c   : > { %2370 = vst.msk [vmem:[%s3045_s16 + $0xd08] sm:$0xff] %vm1952_vm0, %v2906_v51  ;;  %2371 = vst.msk [vmem:[%s3045_s16 + $0xd10] sm:$0xff] %vm1952_vm0, %v2907_v52  ;;  %v2909_v54 = vsel %vm1019_vm1, 1.0, %v2995_v11  ;;  %vm1020_vm2 = vcmp.eq.s32.totalorder %v564_v47, %v4971_v43  ;;  %vm1021_vm3 = vcmp.eq.s32.totalorder %v565_v48, %v4971_v43  ;;  %vm1022_vm4 = vcmp.eq.s32.totalorder %v566_v49, %v4971_v43 }
 0x14d   : > { %2372 = vst.msk [vmem:[%s3045_s16 + $0xd18] sm:$0xff] %vm1952_vm0, %v2908_v53  ;;  %2373 = vst.msk [vmem:[%s3045_s16 + $0xd20] sm:$0xff] %vm1952_vm0, %v2909_v54  ;;  %v2910_v55 = vsel %vm1020_vm2, 1.0, %v2995_v11  ;;  %v2911_v56 = vsel %vm1021_vm3, 1.0, %v2995_v11  ;;  %v2912_v57 = vsel %vm1022_vm4, 1.0, %v2995_v11  ;;  %v567_v58 = vadd.s32 3392, %v3024_v1 }
 0x14e   : > { %2374 = vst.msk [vmem:[%s3045_s16 + $0xd28] sm:$0xff] %vm1952_vm0, %v2910_v55  ;;  %2375 = vst.msk [vmem:[%s3045_s16 + $0xd30] sm:$0xff] %vm1952_vm0, %v2911_v56  ;;  %v568_v59 = vadd.s32 3400, %v3024_v1  ;;  %v569_v60 = vadd.s32 3408, %v3024_v1  ;;  %v570_v61 = vadd.s32 3416, %v3024_v1  ;;  %v571_v62 = vadd.s32 3424, %v3024_v1 }
 0x14f   : > { %2376 = vst.msk [vmem:[%s3045_s16 + $0xd38] sm:$0xff] %vm1952_vm0, %v2912_v57  ;;  %vm1023_vm5 = vcmp.eq.s32.totalorder %v567_v58, %v4971_v43  ;;  %v572_v63 = vadd.s32 3432, %v3024_v1  ;;  %v573_v0 = vadd.s32 3440, %v3024_v1  ;;  %v574_v2 = vadd.s32 3448, %v3024_v1 }
 0x150   : > { %v2913_v3 = vsel %vm1023_vm5, 1.0, %v2995_v11  ;;  %vm1024_vm6 = vcmp.eq.s32.totalorder %v568_v59, %v4971_v43  ;;  %vm1025_vm7 = vcmp.eq.s32.totalorder %v569_v60, %v4971_v43  ;;  %vm1026_vm8 = vcmp.eq.s32.totalorder %v570_v61, %v4971_v43 }
 0x151   : > { %2377 = vst.msk [vmem:[%s3045_s16 + $0xd40] sm:$0xff] %vm1952_vm0, %v2913_v3  ;;  %v2914_v4 = vsel %vm1024_vm6, 1.0, %v2995_v11  ;;  %v2915_v5 = vsel %vm1025_vm7, 1.0, %v2995_v11  ;;  %v2916_v7 = vsel %vm1026_vm8, 1.0, %v2995_v11  ;;  %vm1027_vm9 = vcmp.eq.s32.totalorder %v571_v62, %v4971_v43 }
 0x152   : > { %2378 = vst.msk [vmem:[%s3045_s16 + $0xd48] sm:$0xff] %vm1952_vm0, %v2914_v4  ;;  %2379 = vst.msk [vmem:[%s3045_s16 + $0xd50] sm:$0xff] %vm1952_vm0, %v2915_v5  ;;  %v2917_v8 = vsel %vm1027_vm9, 1.0, %v2995_v11  ;;  %vm1028_vm10 = vcmp.eq.s32.totalorder %v572_v63, %v4971_v43  ;;  %vm1029_vm11 = vcmp.eq.s32.totalorder %v573_v0, %v4971_v43  ;;  %vm1030_vm12 = vcmp.eq.s32.totalorder %v574_v2, %v4971_v43 }
 0x153   : > { %2380 = vst.msk [vmem:[%s3045_s16 + $0xd58] sm:$0xff] %vm1952_vm0, %v2916_v7  ;;  %2381 = vst.msk [vmem:[%s3045_s16 + $0xd60] sm:$0xff] %vm1952_vm0, %v2917_v8  ;;  %v2918_v9 = vsel %vm1028_vm10, 1.0, %v2995_v11  ;;  %v2919_v10 = vsel %vm1029_vm11, 1.0, %v2995_v11  ;;  %v2920_v12 = vsel %vm1030_vm12, 1.0, %v2995_v11  ;;  %v575_v13 = vadd.s32 3456, %v3024_v1 }
 0x154   : > { %2382 = vst.msk [vmem:[%s3045_s16 + $0xd68] sm:$0xff] %vm1952_vm0, %v2918_v9  ;;  %2383 = vst.msk [vmem:[%s3045_s16 + $0xd70] sm:$0xff] %vm1952_vm0, %v2919_v10  ;;  %v576_v14 = vadd.s32 3464, %v3024_v1  ;;  %v577_v15 = vadd.s32 3472, %v3024_v1  ;;  %v578_v16 = vadd.s32 3480, %v3024_v1  ;;  %v579_v6 = vadd.s32 3488, %v3024_v1 }
 0x155   : > { %2384 = vst.msk [vmem:[%s3045_s16 + $0xd78] sm:$0xff] %vm1952_vm0, %v2920_v12  ;;  %vm1031_vm13 = vcmp.eq.s32.totalorder %v575_v13, %v4971_v43  ;;  %v580_v17 = vadd.s32 3496, %v3024_v1  ;;  %v581_v18 = vadd.s32 3504, %v3024_v1  ;;  %v582_v20 = vadd.s32 3512, %v3024_v1 }
 0x156   : > { %v2921_v21 = vsel %vm1031_vm13, 1.0, %v2995_v11  ;;  %vm1032_vm14 = vcmp.eq.s32.totalorder %v576_v14, %v4971_v43  ;;  %vm1033_vm15 = vcmp.eq.s32.totalorder %v577_v15, %v4971_v43  ;;  %vm1034_vm1 = vcmp.eq.s32.totalorder %v578_v16, %v4971_v43 }
 0x157   : > { %2385 = vst.msk [vmem:[%s3045_s16 + $0xd80] sm:$0xff] %vm1952_vm0, %v2921_v21  ;;  %v2922_v22 = vsel %vm1032_vm14, 1.0, %v2995_v11  ;;  %v2923_v23 = vsel %vm1033_vm15, 1.0, %v2995_v11  ;;  %v2924_v24 = vsel %vm1034_vm1, 1.0, %v2995_v11  ;;  %vm1035_vm2 = vcmp.eq.s32.totalorder %v579_v6, %v4971_v43 }
 0x158   : > { %2386 = vst.msk [vmem:[%s3045_s16 + $0xd88] sm:$0xff] %vm1952_vm0, %v2922_v22  ;;  %2387 = vst.msk [vmem:[%s3045_s16 + $0xd90] sm:$0xff] %vm1952_vm0, %v2923_v23  ;;  %v2925_v25 = vsel %vm1035_vm2, 1.0, %v2995_v11  ;;  %vm1036_vm3 = vcmp.eq.s32.totalorder %v580_v17, %v4971_v43  ;;  %vm1037_vm4 = vcmp.eq.s32.totalorder %v581_v18, %v4971_v43  ;;  %vm1038_vm5 = vcmp.eq.s32.totalorder %v582_v20, %v4971_v43 }
 0x159   : > { %2388 = vst.msk [vmem:[%s3045_s16 + $0xd98] sm:$0xff] %vm1952_vm0, %v2924_v24  ;;  %2389 = vst.msk [vmem:[%s3045_s16 + $0xda0] sm:$0xff] %vm1952_vm0, %v2925_v25  ;;  %v2926_v26 = vsel %vm1036_vm3, 1.0, %v2995_v11  ;;  %v2927_v27 = vsel %vm1037_vm4, 1.0, %v2995_v11  ;;  %v2928_v28 = vsel %vm1038_vm5, 1.0, %v2995_v11  ;;  %v583_v19 = vadd.s32 3520, %v3024_v1 }
 0x15a   : > { %2390 = vst.msk [vmem:[%s3045_s16 + $0xda8] sm:$0xff] %vm1952_vm0, %v2926_v26  ;;  %2391 = vst.msk [vmem:[%s3045_s16 + $0xdb0] sm:$0xff] %vm1952_vm0, %v2927_v27  ;;  %v584_v29 = vadd.s32 3528, %v3024_v1  ;;  %v585_v30 = vadd.s32 3536, %v3024_v1  ;;  %v586_v32 = vadd.s32 3544, %v3024_v1  ;;  %v587_v33 = vadd.s32 3552, %v3024_v1 }
 0x15b   : > { %2392 = vst.msk [vmem:[%s3045_s16 + $0xdb8] sm:$0xff] %vm1952_vm0, %v2928_v28  ;;  %vm1039_vm6 = vcmp.eq.s32.totalorder %v583_v19, %v4971_v43  ;;  %v588_v34 = vadd.s32 3560, %v3024_v1  ;;  %v589_v35 = vadd.s32 3568, %v3024_v1  ;;  %v590_v36 = vadd.s32 3576, %v3024_v1 }
 0x15c   : > { %v2929_v37 = vsel %vm1039_vm6, 1.0, %v2995_v11  ;;  %vm1040_vm7 = vcmp.eq.s32.totalorder %v584_v29, %v4971_v43  ;;  %vm1041_vm8 = vcmp.eq.s32.totalorder %v585_v30, %v4971_v43  ;;  %vm1042_vm9 = vcmp.eq.s32.totalorder %v586_v32, %v4971_v43 }
 0x15d   : > { %2393 = vst.msk [vmem:[%s3045_s16 + $0xdc0] sm:$0xff] %vm1952_vm0, %v2929_v37  ;;  %v2930_v38 = vsel %vm1040_vm7, 1.0, %v2995_v11  ;;  %v2931_v39 = vsel %vm1041_vm8, 1.0, %v2995_v11  ;;  %v2932_v40 = vsel %vm1042_vm9, 1.0, %v2995_v11  ;;  %vm1043_vm10 = vcmp.eq.s32.totalorder %v587_v33, %v4971_v43 }
 0x15e   : > { %2394 = vst.msk [vmem:[%s3045_s16 + $0xdc8] sm:$0xff] %vm1952_vm0, %v2930_v38  ;;  %2395 = vst.msk [vmem:[%s3045_s16 + $0xdd0] sm:$0xff] %vm1952_vm0, %v2931_v39  ;;  %v2933_v31 = vsel %vm1043_vm10, 1.0, %v2995_v11  ;;  %vm1044_vm11 = vcmp.eq.s32.totalorder %v588_v34, %v4971_v43  ;;  %vm1045_vm12 = vcmp.eq.s32.totalorder %v589_v35, %v4971_v43  ;;  %vm1046_vm13 = vcmp.eq.s32.totalorder %v590_v36, %v4971_v43 }
 0x15f   : > { %2396 = vst.msk [vmem:[%s3045_s16 + $0xdd8] sm:$0xff] %vm1952_vm0, %v2932_v40  ;;  %2397 = vst.msk [vmem:[%s3045_s16 + $0xde0] sm:$0xff] %vm1952_vm0, %v2933_v31  ;;  %v2934_v41 = vsel %vm1044_vm11, 1.0, %v2995_v11  ;;  %v2935_v42 = vsel %vm1045_vm12, 1.0, %v2995_v11  ;;  %v2936_v44 = vsel %vm1046_vm13, 1.0, %v2995_v11  ;;  %v591_v45 = vadd.s32 3584, %v3024_v1 }
 0x160   : > { %2398 = vst.msk [vmem:[%s3045_s16 + $0xde8] sm:$0xff] %vm1952_vm0, %v2934_v41  ;;  %2399 = vst.msk [vmem:[%s3045_s16 + $0xdf0] sm:$0xff] %vm1952_vm0, %v2935_v42  ;;  %v592_v46 = vadd.s32 3592, %v3024_v1  ;;  %v593_v47 = vadd.s32 3600, %v3024_v1  ;;  %vm2403_vm15 = vcmask 259072  }
 0x161   : > { %2400 = vst.msk [vmem:[%s3045_s16 + $0xdf8] sm:$0xff] %vm1952_vm0, %v2936_v44  ;;  %vm1047_vm14 = vcmp.eq.s32.totalorder %v591_v45, %v4971_v43 }
 0x162   : > { %v2937_v48 = vsel %vm1047_vm14, 1.0, %v2995_v11  ;;  %vm1048_vm1 = vcmp.eq.s32.totalorder %v592_v46, %v4971_v43  ;;  %vm1049_vm2 = vcmp.eq.s32.totalorder %v593_v47, %v4971_v43 }
 0x163   : > { %2401 = vst.msk [vmem:[%s3045_s16 + $0xe00] sm:$0xff] %vm1952_vm0, %v2937_v48  ;;  %v2938_v49 = vsel %vm1048_vm1, 1.0, %v2995_v11  ;;  %v2939_v50 = vsel %vm1049_vm2, 1.0, %v2995_v11 }
 0x164   : > { %2402 = vst.msk [vmem:[%s3045_s16 + $0xe08] sm:$0xff] %vm1952_vm0, %v2938_v49 }
 0x165   : > { %2404 = vst.msk [vmem:[%s3045_s16 + $0xe10] sm:$0x3f] %vm2403_vm15, %v2939_v50 }
 0x166 PF: > { %s11_s8 = sadd.s32 1, %s2993_s8   ;;  %s5313_s6 = smov %s2989_s7 }
 0x167   : > { %p8_p5 = scmp.ge.s32.totalorder %s11_s8, 4   ;;  %s5314_s7 = smov %s5316_s9 }
 0x169   :  { %10 = sbr.rel (!%p8_p5) target bundleno = 2 (0x2), region = 54 }

</bundles_post_ra>
